<compile_context>
chip_gen: v5e
topology: v5e:2x2
jax: 0.10.0
libtpu: 0.0.40
codegen_flags: <defaults>
</compile_context>

<pallas_src>
import functools
import itertools

import jax
import jax.numpy as jnp
import numpy as np
from jax.experimental import pallas as pl
from jax.experimental.pallas import tpu as pltpu

BN_EPS = 1e-5


# ----------------------------- Pallas kernel ------------------------------- #

def _conv_tail(v, s_ref, w_ref, b_ref, *, H, W, k):
    """k x k SAME conv (+ folded-BN bias) + ReLU on an (H, W, Cr) value.

    v     : (H, W, Cr)            reduce-branch activation (already ReLU'd)
    s_ref : (H+k-1, W+k-1, Cr)    VMEM scratch used to build the zero halo
    w_ref : (k*k, Cr, Cout)       per-tap BN-folded weight slices (tap-major)
    b_ref : (1, Cout)             folded bias
    returns (H*W, Cout) f32
    """
    p = (k - 1) // 2
    cr = v.shape[-1]
    cout = w_ref.shape[-1]
    # Build the zero-padded halo in VMEM (PyTorch zero 'same' padding).
    s_ref[...] = jnp.zeros_like(s_ref)
    s_ref[p:p + H, p:p + W, :] = v
    s = s_ref[...]
    # k*k shifted matmuls accumulated in f32 (in-kernel im2col).
    acc = jnp.zeros((H * W, cout), jnp.float32)
    for i, (dh, dw) in enumerate(itertools.product(range(k), range(k))):
        acc = acc + jnp.dot(s[dh:dh + H, dw:dw + W, :].reshape(H * W, cr),
                            w_ref[i], preferred_element_type=jnp.float32)
    return jnp.maximum(acc + b_ref[...], 0.0)


def _inception_kernel(x_ref, w1_ref, b1_ref, wp_ref, bp_ref,
                      w3_ref, b3_ref, w5_ref, b5_ref,
                      o_ref, s3_ref, s5_ref, *, H, W, c1a, c2r, c3r):
    """Fully fused InceptionBlock for one batch element.

    x_ref : (1, H+2, W+2, Cin) NHWC, spatial halo padded with -inf (max pool)
    w1_ref: (Cin, c1a+c2r+c3r) hstacked BN-folded 1x1 weights (b1|b2r|b3r)
    b1_ref: (1, c1a+c2r+c3r)
    wp_ref: (Cin, Cp)  BN-folded 1x1 weight of the pool branch; bp_ref (1, Cp)
    w3_ref: (9,  c2r, C3o)  per-tap 3x3 weights; b3_ref (1, C3o)
    w5_ref: (25, c3r, C5o)  per-tap 5x5 weights; b5_ref (1, C5o)
    o_ref : (H*W, C1a+C3o+C5o+Cp)  concatenated branch outputs
    s3_ref/s5_ref : VMEM scratch for the 3x3 / 5x5 zero halos
    """
    x = x_ref[0]                                       # (H+2, W+2, Cin)
    cin = x.shape[-1]

    # --- fused 1x1 convs: branch1 | branch2-reduce | branch3-reduce ---
    xc = x[1:1 + H, 1:1 + W, :].reshape(H * W, cin)
    y1 = jnp.maximum(
        jnp.dot(xc, w1_ref[...], preferred_element_type=jnp.float32) + b1_ref[...],
        0.0)                                           # (H*W, c1a+c2r+c3r)
    b1_out = y1[:, :c1a]
    b2_red = y1[:, c1a:c1a + c2r]
    b3_red = y1[:, c1a + c2r:]

    # --- branch 4: 3x3 / stride-1 max pool (same padding) then 1x1 conv ---
    pooled = x[0:H, 0:W, :]
    for dh in range(3):
        for dw in range(3):
            if dh == 0 and dw == 0:
                continue
            pooled = jnp.maximum(pooled, x[dh:dh + H, dw:dw + W, :])
    b4_out = jnp.maximum(
        jnp.dot(pooled.reshape(H * W, cin), wp_ref[...],
                preferred_element_type=jnp.float32) + bp_ref[...],
        0.0)

    # --- branch 2 / branch 3 tails: 3x3 and 5x5 convs on the reduce outputs ---
    b2_out = _conv_tail(b2_red.reshape(H, W, c2r), s3_ref, w3_ref, b3_ref,
                        H=H, W=W, k=3)
    b3_out = _conv_tail(b3_red.reshape(H, W, c3r), s5_ref, w5_ref, b5_ref,
                        H=H, W=W, k=5)

    # torch.cat along channels == lane-axis concat, then one dense store.
    o_ref[...] = jnp.concatenate([b1_out, b2_out, b3_out, b4_out],
                                 axis=-1).astype(o_ref.dtype)


# ---------------------------- params & BN folding ---------------------------- #

def init_conv_block(key, cin, cout, k):
    ks = jax.random.split(key, 6)
    w = 0.1 * jax.random.normal(ks[0], (cout, cin, k, k), jnp.float32)
    b = 0.1 * jax.random.normal(ks[1], (cout,), jnp.float32)
    gamma = 1.0 + 0.1 * jax.random.normal(ks[2], (cout,), jnp.float32)
    beta = 0.1 * jax.random.normal(ks[3], (cout,), jnp.float32)
    rmean = 0.1 * jax.random.normal(ks[4], (cout,), jnp.float32)
    rvar = 1.0 + 0.1 * jnp.abs(jax.random.normal(ks[5], (cout,), jnp.float32))
    return (w, b, gamma, beta, rmean, rvar)


def init_inception(key, in_ch, out_1x1, red_3x3, out_3x3, red_5x5, out_5x5, out_pool):
    ks = jax.random.split(key, 6)
    return {
        "b1":   init_conv_block(ks[0], in_ch, out_1x1, 1),
        "b2_1": init_conv_block(ks[1], in_ch, red_3x3, 1),
        "b2_2": init_conv_block(ks[2], red_3x3, out_3x3, 3),
        "b3_1": init_conv_block(ks[3], in_ch, red_5x5, 1),
        "b3_2": init_conv_block(ks[4], red_5x5, out_5x5, 5),
        "b4":   init_conv_block(ks[5], in_ch, out_pool, 1),
    }


def _fold_bn(params):
    """Fold inference BatchNorm into conv weight / bias."""
    w, b, gamma, beta, rmean, rvar = params
    scale = gamma / jnp.sqrt(rvar + BN_EPS)              # (Cout,)
    wf = w * scale[:, None, None, None]                  # (Cout, Cin, k, k)
    bf = scale * (b - rmean) + beta                      # (Cout,)
    return wf, bf


def _fold_1x1(params):
    wf, bf = _fold_bn(params)
    return wf[:, :, 0, 0].T, bf                          # (Cin, Cout), (Cout,)


def _fold_kxk(params):
    wf, bf = _fold_bn(params)
    cout, cin, k, _ = wf.shape
    wk = wf.transpose(2, 3, 1, 0).reshape(k * k, cin, cout)   # tap-major (dh*k+dw)
    return wk, bf, k


# ------------------------------ forward pass -------------------------------- #

def inception_forward(params, x_nchw):
    N, _, H, W = x_nchw.shape
    x = jnp.transpose(x_nchw, (0, 2, 3, 1))              # NHWC once

    # BN-folded weights.
    w_b1, bias_b1 = _fold_1x1(params["b1"])
    w_b2r, bias_b2r = _fold_1x1(params["b2_1"])
    w_b3r, bias_b3r = _fold_1x1(params["b3_1"])
    w_b4, bias_b4 = _fold_1x1(params["b4"])
    w3, bias3, k3 = _fold_kxk(params["b2_2"])
    w5, bias5, k5 = _fold_kxk(params["b3_2"])

    cin = x.shape[-1]
    c1a, c2r, c3r = w_b1.shape[1], w_b2r.shape[1], w_b3r.shape[1]
    c3o, c5o, cp = w3.shape[-1], w5.shape[-1], w_b4.shape[1]
    c1tot = c1a + c2r + c3r
    ctot = c1a + c3o + c5o + cp

    # Hstack the three direct 1x1 branches into one matmul weight.
    w1 = jnp.concatenate([w_b1, w_b2r, w_b3r], axis=1)   # (Cin, c1tot)
    b1v = jnp.concatenate([bias_b1, bias_b2r, bias_b3r])

    # -inf halo so the same padded tensor feeds the 3x3 max pool (PyTorch
    # semantics); the 1x1 convs only read the un-padded centre.
    x_pad = jnp.pad(x, ((0, 0), (1, 1), (1, 1), (0, 0)), constant_values=-jnp.inf)

    kern = functools.partial(_inception_kernel, H=H, W=W,
                             c1a=c1a, c2r=c2r, c3r=c3r)
    out = pl.pallas_call(
        kern,
        grid=(N,),
        in_specs=[
            pl.BlockSpec((1, H + 2, W + 2, cin), lambda n: (n, 0, 0, 0)),
            pl.BlockSpec((cin, c1tot), lambda n: (0, 0)),
            pl.BlockSpec((1, c1tot), lambda n: (0, 0)),
            pl.BlockSpec((cin, cp), lambda n: (0, 0)),
            pl.BlockSpec((1, cp), lambda n: (0, 0)),
            pl.BlockSpec((k3 * k3, c2r, c3o), lambda n: (0, 0, 0)),
            pl.BlockSpec((1, c3o), lambda n: (0, 0)),
            pl.BlockSpec((k5 * k5, c3r, c5o), lambda n: (0, 0, 0)),
            pl.BlockSpec((1, c5o), lambda n: (0, 0)),
        ],
        out_specs=pl.BlockSpec((H * W, ctot), lambda n: (n, 0)),
        out_shape=jax.ShapeDtypeStruct((N * H * W, ctot), jnp.float32),
        scratch_shapes=[
            pltpu.VMEM((H + k3 - 1, W + k3 - 1, c2r), jnp.float32),
            pltpu.VMEM((H + k5 - 1, W + k5 - 1, c3r), jnp.float32),
        ],
        compiler_params=pltpu.CompilerParams(dimension_semantics=("parallel",)),
    )(x_pad, w1, b1v.reshape(1, c1tot), w_b4, bias_b4.reshape(1, cp),
      w3, bias3.reshape(1, c3o), w5, bias5.reshape(1, c5o))

    out = out.reshape(N, H, W, ctot)
    return jnp.transpose(out, (0, 3, 1, 2))              # back to NCHW once


# ------------------------------ pure-JAX reference --------------------------- #

def ref_conv_block(params, x):
    w, b, gamma, beta, rmean, rvar = params
    k = w.shape[-1]
    pad = (k - 1) // 2
    y = jax.lax.conv_general_dilated(
        x, w, (1, 1), [(pad, pad), (pad, pad)],
        dimension_numbers=("NCHW", "OIHW", "NCHW"),
        precision=jax.lax.Precision.HIGHEST)
    y = y + b[None, :, None, None]
    y = (gamma[None, :, None, None] * (y - rmean[None, :, None, None])
         / jnp.sqrt(rvar + BN_EPS)[None, :, None, None] + beta[None, :, None, None])
    return jnp.maximum(y, 0.0)


def ref_maxpool(x):
    return jax.lax.reduce_window(x, -jnp.inf, jax.lax.max,
                                 (1, 1, 3, 3), (1, 1, 1, 1),
                                 [(0, 0), (0, 0), (1, 1), (1, 1)])


def ref_forward(params, x):
    b1 = ref_conv_block(params["b1"], x)
    b2 = ref_conv_block(params["b2_2"], ref_conv_block(params["b2_1"], x))
    b3 = ref_conv_block(params["b3_2"], ref_conv_block(params["b3_1"], x))
    b4 = ref_conv_block(params["b4"], ref_maxpool(x))
    return jnp.concatenate([b1, b2, b3, b4], axis=1)


# ----------------------------------- main ----------------------------------- #

if __name__ == "__main__":
    key = jax.random.PRNGKey(0)
    kx, kp = jax.random.split(key)

    # InceptionBlock(in_channels=4, out_1x1=4, red_3x3=4, out_3x3=8,
    #                red_5x5=2, out_5x5=4, out_pool=4)
    params = init_inception(kp, 4, 4, 4, 8, 2, 4, 4)
    x = jax.random.normal(kx, (2, 4, 16, 16), jnp.float32)   # NCHW

    out = jax.jit(inception_forward)(params, x)
    out = jax.block_until_ready(out)
    assert out.shape == (2, 4 + 8 + 4 + 4, 16, 16), out.shape

    ref = jax.block_until_ready(ref_forward(params, x))
    np.testing.assert_allclose(np.asarray(out), np.asarray(ref), atol=1e-3, rtol=1e-3)

    print("KERNEL_OK")
</pallas_src>

<mosaic_0001>
module attributes {stable_mosaic.version = 11 : i64} {
  func.func @_inception_kernel(%arg0: i32, %arg1: memref<1x18x18x4xf32, #tpu.memory_space<vmem>>, %arg2: memref<4x10xf32, #tpu.memory_space<vmem>>, %arg3: memref<1x10xf32, #tpu.memory_space<vmem>>, %arg4: memref<4x4xf32, #tpu.memory_space<vmem>>, %arg5: memref<1x4xf32, #tpu.memory_space<vmem>>, %arg6: memref<9x4x8xf32, #tpu.memory_space<vmem>>, %arg7: memref<1x8xf32, #tpu.memory_space<vmem>>, %arg8: memref<25x2x4xf32, #tpu.memory_space<vmem>>, %arg9: memref<1x4xf32, #tpu.memory_space<vmem>>, %arg10: memref<256x20xf32, #tpu.memory_space<vmem>>, %arg11: memref<18x18x4xf32, #tpu.memory_space<vmem>>, %arg12: memref<20x20x2xf32, #tpu.memory_space<vmem>>) attributes {dimension_semantics = [#tpu.dimension_semantics<parallel>], iteration_bounds = array<i64: 2>, scalar_prefetch = 0 : i64, scratch_operands = 2 : i64, tpu.core_type = #tpu.core_type<tc>, window_params = [{transform_indices = @transform_0, window_bounds = array<i64: 1, 18, 18, 4>}, {pipeline_mode = #tpu.pipeline_mode<synchronous>, transform_indices = @transform_1, window_bounds = array<i64: 4, 10>}, {pipeline_mode = #tpu.pipeline_mode<synchronous>, transform_indices = @transform_2, window_bounds = array<i64: 1, 10>}, {pipeline_mode = #tpu.pipeline_mode<synchronous>, transform_indices = @transform_3, window_bounds = array<i64: 4, 4>}, {pipeline_mode = #tpu.pipeline_mode<synchronous>, transform_indices = @transform_4, window_bounds = array<i64: 1, 4>}, {pipeline_mode = #tpu.pipeline_mode<synchronous>, transform_indices = @transform_5, window_bounds = array<i64: 9, 4, 8>}, {pipeline_mode = #tpu.pipeline_mode<synchronous>, transform_indices = @transform_6, window_bounds = array<i64: 1, 8>}, {pipeline_mode = #tpu.pipeline_mode<synchronous>, transform_indices = @transform_7, window_bounds = array<i64: 25, 2, 4>}, {pipeline_mode = #tpu.pipeline_mode<synchronous>, transform_indices = @transform_8, window_bounds = array<i64: 1, 4>}, {transform_indices = @transform_9, window_bounds = array<i64: 256, 20>}]} {
    %c0 = arith.constant 0 : index
    %c0_0 = arith.constant 0 : index
    %c0_1 = arith.constant 0 : index
    %c0_2 = arith.constant 0 : index
    %0 = vector.load %arg1[%c0, %c0_0, %c0_1, %c0_2] : memref<1x18x18x4xf32, #tpu.memory_space<vmem>>, vector<1x18x18x4xf32>
    %1 = vector.shape_cast %0 : vector<1x18x18x4xf32> to vector<18x18x4xf32>
    %2 = vector.extract_strided_slice %1 {offsets = [1, 1, 0], sizes = [16, 16, 4], strides = [1, 1, 1]} : vector<18x18x4xf32> to vector<16x16x4xf32>
    %3 = vector.shape_cast %2 : vector<16x16x4xf32> to vector<256x4xf32>
    %c0_3 = arith.constant 0 : index
    %c0_4 = arith.constant 0 : index
    %4 = vector.load %arg2[%c0_3, %c0_4] : memref<4x10xf32, #tpu.memory_space<vmem>>, vector<4x10xf32>
    %cst = arith.constant dense<0.000000e+00> : vector<256x10xf32>
    %5 = tpu.matmul %3, %4, %cst {dimension_numbers = #tpu.dot_dimension_numbers<[1], [0], [0], [1], [0, 0, 1, 1], [], []>} : vector<256x4xf32>, vector<4x10xf32>, vector<256x10xf32> -> vector<256x10xf32>
    %c0_5 = arith.constant 0 : index
    %c0_6 = arith.constant 0 : index
    %6 = vector.load %arg3[%c0_5, %c0_6] : memref<1x10xf32, #tpu.memory_space<vmem>>, vector<1x10xf32>
    %7 = vector.broadcast %6 : vector<1x10xf32> to vector<256x10xf32>
    %8 = arith.addf %5, %7 : vector<256x10xf32>
    %cst_7 = arith.constant 0.000000e+00 : f32
    %9 = vector.broadcast %cst_7 : f32 to vector<256x10xf32>
    %10 = arith.maximumf %8, %9 : vector<256x10xf32>
    %11 = vector.extract_strided_slice %10 {offsets = [0, 0], sizes = [256, 4], strides = [1, 1]} : vector<256x10xf32> to vector<256x4xf32>
    %12 = vector.extract_strided_slice %10 {offsets = [0, 4], sizes = [256, 4], strides = [1, 1]} : vector<256x10xf32> to vector<256x4xf32>
    %13 = vector.extract_strided_slice %10 {offsets = [0, 8], sizes = [256, 2], strides = [1, 1]} : vector<256x10xf32> to vector<256x2xf32>
    %14 = vector.extract_strided_slice %1 {offsets = [0, 0, 0], sizes = [16, 16, 4], strides = [1, 1, 1]} : vector<18x18x4xf32> to vector<16x16x4xf32>
    %15 = vector.extract_strided_slice %1 {offsets = [0, 1, 0], sizes = [16, 16, 4], strides = [1, 1, 1]} : vector<18x18x4xf32> to vector<16x16x4xf32>
    %16 = arith.maximumf %14, %15 : vector<16x16x4xf32>
    %17 = vector.extract_strided_slice %1 {offsets = [0, 2, 0], sizes = [16, 16, 4], strides = [1, 1, 1]} : vector<18x18x4xf32> to vector<16x16x4xf32>
    %18 = arith.maximumf %16, %17 : vector<16x16x4xf32>
    %19 = vector.extract_strided_slice %1 {offsets = [1, 0, 0], sizes = [16, 16, 4], strides = [1, 1, 1]} : vector<18x18x4xf32> to vector<16x16x4xf32>
    %20 = arith.maximumf %18, %19 : vector<16x16x4xf32>
    %21 = vector.extract_strided_slice %1 {offsets = [1, 1, 0], sizes = [16, 16, 4], strides = [1, 1, 1]} : vector<18x18x4xf32> to vector<16x16x4xf32>
    %22 = arith.maximumf %20, %21 : vector<16x16x4xf32>
    %23 = vector.extract_strided_slice %1 {offsets = [1, 2, 0], sizes = [16, 16, 4], strides = [1, 1, 1]} : vector<18x18x4xf32> to vector<16x16x4xf32>
    %24 = arith.maximumf %22, %23 : vector<16x16x4xf32>
    %25 = vector.extract_strided_slice %1 {offsets = [2, 0, 0], sizes = [16, 16, 4], strides = [1, 1, 1]} : vector<18x18x4xf32> to vector<16x16x4xf32>
    %26 = arith.maximumf %24, %25 : vector<16x16x4xf32>
    %27 = vector.extract_strided_slice %1 {offsets = [2, 1, 0], sizes = [16, 16, 4], strides = [1, 1, 1]} : vector<18x18x4xf32> to vector<16x16x4xf32>
    %28 = arith.maximumf %26, %27 : vector<16x16x4xf32>
    %29 = vector.extract_strided_slice %1 {offsets = [2, 2, 0], sizes = [16, 16, 4], strides = [1, 1, 1]} : vector<18x18x4xf32> to vector<16x16x4xf32>
    %30 = arith.maximumf %28, %29 : vector<16x16x4xf32>
    %31 = vector.shape_cast %30 : vector<16x16x4xf32> to vector<256x4xf32>
    %c0_8 = arith.constant 0 : index
    %c0_9 = arith.constant 0 : index
    %32 = vector.load %arg4[%c0_8, %c0_9] : memref<4x4xf32, #tpu.memory_space<vmem>>, vector<4x4xf32>
    %cst_10 = arith.constant dense<0.000000e+00> : vector<256x4xf32>
    %33 = tpu.matmul %31, %32, %cst_10 {dimension_numbers = #tpu.dot_dimension_numbers<[1], [0], [0], [1], [0, 0, 1, 1], [], []>} : vector<256x4xf32>, vector<4x4xf32>, vector<256x4xf32> -> vector<256x4xf32>
    %c0_11 = arith.constant 0 : index
    %c0_12 = arith.constant 0 : index
    %34 = vector.load %arg5[%c0_11, %c0_12] : memref<1x4xf32, #tpu.memory_space<vmem>>, vector<1x4xf32>
    %35 = vector.broadcast %34 : vector<1x4xf32> to vector<256x4xf32>
    %36 = arith.addf %33, %35 : vector<256x4xf32>
    %cst_13 = arith.constant 0.000000e+00 : f32
    %37 = vector.broadcast %cst_13 : f32 to vector<256x4xf32>
    %38 = arith.maximumf %36, %37 : vector<256x4xf32>
    %39 = vector.shape_cast %12 : vector<256x4xf32> to vector<16x16x4xf32>
    %cst_14 = arith.constant 0.000000e+00 : f32
    %40 = vector.broadcast %cst_14 : f32 to vector<18x18x4xf32>
    %c0_15 = arith.constant 0 : index
    %c0_16 = arith.constant 0 : index
    %c0_17 = arith.constant 0 : index
    %41 = vector.load %arg11[%c0_15, %c0_16, %c0_17] : memref<18x18x4xf32, #tpu.memory_space<vmem>>, vector<18x18x4xf32>
    tpu.vector_store %arg11[%c0_15, %c0_16, %c0_17], %40 {strides = array<i32>} : memref<18x18x4xf32, #tpu.memory_space<vmem>>, vector<18x18x4xf32>,
    %c1 = arith.constant 1 : index
    %c1_18 = arith.constant 1 : index
    %c0_19 = arith.constant 0 : index
    %42 = vector.load %arg11[%c1, %c1_18, %c0_19] : memref<18x18x4xf32, #tpu.memory_space<vmem>>, vector<16x16x4xf32>
    tpu.vector_store %arg11[%c1, %c1_18, %c0_19], %39 {strides = array<i32>} : memref<18x18x4xf32, #tpu.memory_space<vmem>>, vector<16x16x4xf32>,
    %c0_20 = arith.constant 0 : index
    %c0_21 = arith.constant 0 : index
    %c0_22 = arith.constant 0 : index
    %43 = vector.load %arg11[%c0_20, %c0_21, %c0_22] : memref<18x18x4xf32, #tpu.memory_space<vmem>>, vector<18x18x4xf32>
    %cst_23 = arith.constant 0.000000e+00 : f32
    %44 = vector.broadcast %cst_23 : f32 to vector<256x8xf32>
    %45 = vector.extract_strided_slice %43 {offsets = [0, 0, 0], sizes = [16, 16, 4], strides = [1, 1, 1]} : vector<18x18x4xf32> to vector<16x16x4xf32>
    %46 = vector.shape_cast %45 : vector<16x16x4xf32> to vector<256x4xf32>
    %c0_24 = arith.constant 0 : index
    %c0_25 = arith.constant 0 : index
    %c0_26 = arith.constant 0 : index
    %47 = vector.load %arg6[%c0_24, %c0_25, %c0_26] : memref<9x4x8xf32, #tpu.memory_space<vmem>>, vector<1x4x8xf32>
    %48 = vector.shape_cast %47 : vector<1x4x8xf32> to vector<4x8xf32>
    %cst_27 = arith.constant dense<0.000000e+00> : vector<256x8xf32>
    %49 = tpu.matmul %46, %48, %cst_27 {dimension_numbers = #tpu.dot_dimension_numbers<[1], [0], [0], [1], [0, 0, 1, 1], [], []>} : vector<256x4xf32>, vector<4x8xf32>, vector<256x8xf32> -> vector<256x8xf32>
    %50 = arith.addf %44, %49 : vector<256x8xf32>
    %51 = vector.extract_strided_slice %43 {offsets = [0, 1, 0], sizes = [16, 16, 4], strides = [1, 1, 1]} : vector<18x18x4xf32> to vector<16x16x4xf32>
    %52 = vector.shape_cast %51 : vector<16x16x4xf32> to vector<256x4xf32>
    %c1_28 = arith.constant 1 : index
    %c0_29 = arith.constant 0 : index
    %c0_30 = arith.constant 0 : index
    %53 = vector.load %arg6[%c1_28, %c0_29, %c0_30] : memref<9x4x8xf32, #tpu.memory_space<vmem>>, vector<1x4x8xf32>
    %54 = vector.shape_cast %53 : vector<1x4x8xf32> to vector<4x8xf32>
    %cst_31 = arith.constant dense<0.000000e+00> : vector<256x8xf32>
    %55 = tpu.matmul %52, %54, %cst_31 {dimension_numbers = #tpu.dot_dimension_numbers<[1], [0], [0], [1], [0, 0, 1, 1], [], []>} : vector<256x4xf32>, vector<4x8xf32>, vector<256x8xf32> -> vector<256x8xf32>
    %56 = arith.addf %50, %55 : vector<256x8xf32>
    %57 = vector.extract_strided_slice %43 {offsets = [0, 2, 0], sizes = [16, 16, 4], strides = [1, 1, 1]} : vector<18x18x4xf32> to vector<16x16x4xf32>
    %58 = vector.shape_cast %57 : vector<16x16x4xf32> to vector<256x4xf32>
    %c2 = arith.constant 2 : index
    %c0_32 = arith.constant 0 : index
    %c0_33 = arith.constant 0 : index
    %59 = vector.load %arg6[%c2, %c0_32, %c0_33] : memref<9x4x8xf32, #tpu.memory_space<vmem>>, vector<1x4x8xf32>
    %60 = vector.shape_cast %59 : vector<1x4x8xf32> to vector<4x8xf32>
    %cst_34 = arith.constant dense<0.000000e+00> : vector<256x8xf32>
    %61 = tpu.matmul %58, %60, %cst_34 {dimension_numbers = #tpu.dot_dimension_numbers<[1], [0], [0], [1], [0, 0, 1, 1], [], []>} : vector<256x4xf32>, vector<4x8xf32>, vector<256x8xf32> -> vector<256x8xf32>
    %62 = arith.addf %56, %61 : vector<256x8xf32>
    %63 = vector.extract_strided_slice %43 {offsets = [1, 0, 0], sizes = [16, 16, 4], strides = [1, 1, 1]} : vector<18x18x4xf32> to vector<16x16x4xf32>
    %64 = vector.shape_cast %63 : vector<16x16x4xf32> to vector<256x4xf32>
    %c3 = arith.constant 3 : index
    %c0_35 = arith.constant 0 : index
    %c0_36 = arith.constant 0 : index
    %65 = vector.load %arg6[%c3, %c0_35, %c0_36] : memref<9x4x8xf32, #tpu.memory_space<vmem>>, vector<1x4x8xf32>
    %66 = vector.shape_cast %65 : vector<1x4x8xf32> to vector<4x8xf32>
    %cst_37 = arith.constant dense<0.000000e+00> : vector<256x8xf32>
    %67 = tpu.matmul %64, %66, %cst_37 {dimension_numbers = #tpu.dot_dimension_numbers<[1], [0], [0], [1], [0, 0, 1, 1], [], []>} : vector<256x4xf32>, vector<4x8xf32>, vector<256x8xf32> -> vector<256x8xf32>
    %68 = arith.addf %62, %67 : vector<256x8xf32>
    %69 = vector.extract_strided_slice %43 {offsets = [1, 1, 0], sizes = [16, 16, 4], strides = [1, 1, 1]} : vector<18x18x4xf32> to vector<16x16x4xf32>
    %70 = vector.shape_cast %69 : vector<16x16x4xf32> to vector<256x4xf32>
    %c4 = arith.constant 4 : index
    %c0_38 = arith.constant 0 : index
    %c0_39 = arith.constant 0 : index
    %71 = vector.load %arg6[%c4, %c0_38, %c0_39] : memref<9x4x8xf32, #tpu.memory_space<vmem>>, vector<1x4x8xf32>
    %72 = vector.shape_cast %71 : vector<1x4x8xf32> to vector<4x8xf32>
    %cst_40 = arith.constant dense<0.000000e+00> : vector<256x8xf32>
    %73 = tpu.matmul %70, %72, %cst_40 {dimension_numbers = #tpu.dot_dimension_numbers<[1], [0], [0], [1], [0, 0, 1, 1], [], []>} : vector<256x4xf32>, vector<4x8xf32>, vector<256x8xf32> -> vector<256x8xf32>
    %74 = arith.addf %68, %73 : vector<256x8xf32>
    %75 = vector.extract_strided_slice %43 {offsets = [1, 2, 0], sizes = [16, 16, 4], strides = [1, 1, 1]} : vector<18x18x4xf32> to vector<16x16x4xf32>
    %76 = vector.shape_cast %75 : vector<16x16x4xf32> to vector<256x4xf32>
    %c5 = arith.constant 5 : index
    %c0_41 = arith.constant 0 : index
    %c0_42 = arith.constant 0 : index
    %77 = vector.load %arg6[%c5, %c0_41, %c0_42] : memref<9x4x8xf32, #tpu.memory_space<vmem>>, vector<1x4x8xf32>
    %78 = vector.shape_cast %77 : vector<1x4x8xf32> to vector<4x8xf32>
    %cst_43 = arith.constant dense<0.000000e+00> : vector<256x8xf32>
    %79 = tpu.matmul %76, %78, %cst_43 {dimension_numbers = #tpu.dot_dimension_numbers<[1], [0], [0], [1], [0, 0, 1, 1], [], []>} : vector<256x4xf32>, vector<4x8xf32>, vector<256x8xf32> -> vector<256x8xf32>
    %80 = arith.addf %74, %79 : vector<256x8xf32>
    %81 = vector.extract_strided_slice %43 {offsets = [2, 0, 0], sizes = [16, 16, 4], strides = [1, 1, 1]} : vector<18x18x4xf32> to vector<16x16x4xf32>
    %82 = vector.shape_cast %81 : vector<16x16x4xf32> to vector<256x4xf32>
    %c6 = arith.constant 6 : index
    %c0_44 = arith.constant 0 : index
    %c0_45 = arith.constant 0 : index
    %83 = vector.load %arg6[%c6, %c0_44, %c0_45] : memref<9x4x8xf32, #tpu.memory_space<vmem>>, vector<1x4x8xf32>
    %84 = vector.shape_cast %83 : vector<1x4x8xf32> to vector<4x8xf32>
    %cst_46 = arith.constant dense<0.000000e+00> : vector<256x8xf32>
    %85 = tpu.matmul %82, %84, %cst_46 {dimension_numbers = #tpu.dot_dimension_numbers<[1], [0], [0], [1], [0, 0, 1, 1], [], []>} : vector<256x4xf32>, vector<4x8xf32>, vector<256x8xf32> -> vector<256x8xf32>
    %86 = arith.addf %80, %85 : vector<256x8xf32>
    %87 = vector.extract_strided_slice %43 {offsets = [2, 1, 0], sizes = [16, 16, 4], strides = [1, 1, 1]} : vector<18x18x4xf32> to vector<16x16x4xf32>
    %88 = vector.shape_cast %87 : vector<16x16x4xf32> to vector<256x4xf32>
    %c7 = arith.constant 7 : index
    %c0_47 = arith.constant 0 : index
    %c0_48 = arith.constant 0 : index
    %89 = vector.load %arg6[%c7, %c0_47, %c0_48] : memref<9x4x8xf32, #tpu.memory_space<vmem>>, vector<1x4x8xf32>
    %90 = vector.shape_cast %89 : vector<1x4x8xf32> to vector<4x8xf32>
    %cst_49 = arith.constant dense<0.000000e+00> : vector<256x8xf32>
    %91 = tpu.matmul %88, %90, %cst_49 {dimension_numbers = #tpu.dot_dimension_numbers<[1], [0], [0], [1], [0, 0, 1, 1], [], []>} : vector<256x4xf32>, vector<4x8xf32>, vector<256x8xf32> -> vector<256x8xf32>
    %92 = arith.addf %86, %91 : vector<256x8xf32>
    %93 = vector.extract_strided_slice %43 {offsets = [2, 2, 0], sizes = [16, 16, 4], strides = [1, 1, 1]} : vector<18x18x4xf32> to vector<16x16x4xf32>
    %94 = vector.shape_cast %93 : vector<16x16x4xf32> to vector<256x4xf32>
    %c8 = arith.constant 8 : index
    %c0_50 = arith.constant 0 : index
    %c0_51 = arith.constant 0 : index
    %95 = vector.load %arg6[%c8, %c0_50, %c0_51] : memref<9x4x8xf32, #tpu.memory_space<vmem>>, vector<1x4x8xf32>
    %96 = vector.shape_cast %95 : vector<1x4x8xf32> to vector<4x8xf32>
    %cst_52 = arith.constant dense<0.000000e+00> : vector<256x8xf32>
    %97 = tpu.matmul %94, %96, %cst_52 {dimension_numbers = #tpu.dot_dimension_numbers<[1], [0], [0], [1], [0, 0, 1, 1], [], []>} : vector<256x4xf32>, vector<4x8xf32>, vector<256x8xf32> -> vector<256x8xf32>
    %98 = arith.addf %92, %97 : vector<256x8xf32>
    %c0_53 = arith.constant 0 : index
    %c0_54 = arith.constant 0 : index
    %99 = vector.load %arg7[%c0_53, %c0_54] : memref<1x8xf32, #tpu.memory_space<vmem>>, vector<1x8xf32>
    %100 = vector.broadcast %99 : vector<1x8xf32> to vector<256x8xf32>
    %101 = arith.addf %98, %100 : vector<256x8xf32>
    %cst_55 = arith.constant 0.000000e+00 : f32
    %102 = vector.broadcast %cst_55 : f32 to vector<256x8xf32>
    %103 = arith.maximumf %101, %102 : vector<256x8xf32>
    %104 = vector.shape_cast %13 : vector<256x2xf32> to vector<16x16x2xf32>
    %cst_56 = arith.constant 0.000000e+00 : f32
    %105 = vector.broadcast %cst_56 : f32 to vector<20x20x2xf32>
    %c0_57 = arith.constant 0 : index
    %c0_58 = arith.constant 0 : index
    %c0_59 = arith.constant 0 : index
    %106 = vector.load %arg12[%c0_57, %c0_58, %c0_59] : memref<20x20x2xf32, #tpu.memory_space<vmem>>, vector<20x20x2xf32>
    tpu.vector_store %arg12[%c0_57, %c0_58, %c0_59], %105 {strides = array<i32>} : memref<20x20x2xf32, #tpu.memory_space<vmem>>, vector<20x20x2xf32>,
    %c2_60 = arith.constant 2 : index
    %c2_61 = arith.constant 2 : index
    %c0_62 = arith.constant 0 : index
    %107 = vector.load %arg12[%c2_60, %c2_61, %c0_62] : memref<20x20x2xf32, #tpu.memory_space<vmem>>, vector<16x16x2xf32>
    tpu.vector_store %arg12[%c2_60, %c2_61, %c0_62], %104 {strides = array<i32>} : memref<20x20x2xf32, #tpu.memory_space<vmem>>, vector<16x16x2xf32>,
    %c0_63 = arith.constant 0 : index
    %c0_64 = arith.constant 0 : index
    %c0_65 = arith.constant 0 : index
    %108 = vector.load %arg12[%c0_63, %c0_64, %c0_65] : memref<20x20x2xf32, #tpu.memory_space<vmem>>, vector<20x20x2xf32>
    %cst_66 = arith.constant 0.000000e+00 : f32
    %109 = vector.broadcast %cst_66 : f32 to vector<256x4xf32>
    %110 = vector.extract_strided_slice %108 {offsets = [0, 0, 0], sizes = [16, 16, 2], strides = [1, 1, 1]} : vector<20x20x2xf32> to vector<16x16x2xf32>
    %111 = vector.shape_cast %110 : vector<16x16x2xf32> to vector<256x2xf32>
    %c0_67 = arith.constant 0 : index
    %c0_68 = arith.constant 0 : index
    %c0_69 = arith.constant 0 : index
    %112 = vector.load %arg8[%c0_67, %c0_68, %c0_69] : memref<25x2x4xf32, #tpu.memory_space<vmem>>, vector<1x2x4xf32>
    %113 = vector.shape_cast %112 : vector<1x2x4xf32> to vector<2x4xf32>
    %cst_70 = arith.constant dense<0.000000e+00> : vector<256x4xf32>
    %114 = tpu.matmul %111, %113, %cst_70 {dimension_numbers = #tpu.dot_dimension_numbers<[1], [0], [0], [1], [0, 0, 1, 1], [], []>} : vector<256x2xf32>, vector<2x4xf32>, vector<256x4xf32> -> vector<256x4xf32>
    %115 = arith.addf %109, %114 : vector<256x4xf32>
    %116 = vector.extract_strided_slice %108 {offsets = [0, 1, 0], sizes = [16, 16, 2], strides = [1, 1, 1]} : vector<20x20x2xf32> to vector<16x16x2xf32>
    %117 = vector.shape_cast %116 : vector<16x16x2xf32> to vector<256x2xf32>
    %c1_71 = arith.constant 1 : index
    %c0_72 = arith.constant 0 : index
    %c0_73 = arith.constant 0 : index
    %118 = vector.load %arg8[%c1_71, %c0_72, %c0_73] : memref<25x2x4xf32, #tpu.memory_space<vmem>>, vector<1x2x4xf32>
    %119 = vector.shape_cast %118 : vector<1x2x4xf32> to vector<2x4xf32>
    %cst_74 = arith.constant dense<0.000000e+00> : vector<256x4xf32>
    %120 = tpu.matmul %117, %119, %cst_74 {dimension_numbers = #tpu.dot_dimension_numbers<[1], [0], [0], [1], [0, 0, 1, 1], [], []>} : vector<256x2xf32>, vector<2x4xf32>, vector<256x4xf32> -> vector<256x4xf32>
    %121 = arith.addf %115, %120 : vector<256x4xf32>
    %122 = vector.extract_strided_slice %108 {offsets = [0, 2, 0], sizes = [16, 16, 2], strides = [1, 1, 1]} : vector<20x20x2xf32> to vector<16x16x2xf32>
    %123 = vector.shape_cast %122 : vector<16x16x2xf32> to vector<256x2xf32>
    %c2_75 = arith.constant 2 : index
    %c0_76 = arith.constant 0 : index
    %c0_77 = arith.constant 0 : index
    %124 = vector.load %arg8[%c2_75, %c0_76, %c0_77] : memref<25x2x4xf32, #tpu.memory_space<vmem>>, vector<1x2x4xf32>
    %125 = vector.shape_cast %124 : vector<1x2x4xf32> to vector<2x4xf32>
    %cst_78 = arith.constant dense<0.000000e+00> : vector<256x4xf32>
    %126 = tpu.matmul %123, %125, %cst_78 {dimension_numbers = #tpu.dot_dimension_numbers<[1], [0], [0], [1], [0, 0, 1, 1], [], []>} : vector<256x2xf32>, vector<2x4xf32>, vector<256x4xf32> -> vector<256x4xf32>
    %127 = arith.addf %121, %126 : vector<256x4xf32>
    %128 = vector.extract_strided_slice %108 {offsets = [0, 3, 0], sizes = [16, 16, 2], strides = [1, 1, 1]} : vector<20x20x2xf32> to vector<16x16x2xf32>
    %129 = vector.shape_cast %128 : vector<16x16x2xf32> to vector<256x2xf32>
    %c3_79 = arith.constant 3 : index
    %c0_80 = arith.constant 0 : index
    %c0_81 = arith.constant 0 : index
    %130 = vector.load %arg8[%c3_79, %c0_80, %c0_81] : memref<25x2x4xf32, #tpu.memory_space<vmem>>, vector<1x2x4xf32>
    %131 = vector.shape_cast %130 : vector<1x2x4xf32> to vector<2x4xf32>
    %cst_82 = arith.constant dense<0.000000e+00> : vector<256x4xf32>
    %132 = tpu.matmul %129, %131, %cst_82 {dimension_numbers = #tpu.dot_dimension_numbers<[1], [0], [0], [1], [0, 0, 1, 1], [], []>} : vector<256x2xf32>, vector<2x4xf32>, vector<256x4xf32> -> vector<256x4xf32>
    %133 = arith.addf %127, %132 : vector<256x4xf32>
    %134 = vector.extract_strided_slice %108 {offsets = [0, 4, 0], sizes = [16, 16, 2], strides = [1, 1, 1]} : vector<20x20x2xf32> to vector<16x16x2xf32>
    %135 = vector.shape_cast %134 : vector<16x16x2xf32> to vector<256x2xf32>
    %c4_83 = arith.constant 4 : index
    %c0_84 = arith.constant 0 : index
    %c0_85 = arith.constant 0 : index
    %136 = vector.load %arg8[%c4_83, %c0_84, %c0_85] : memref<25x2x4xf32, #tpu.memory_space<vmem>>, vector<1x2x4xf32>
    %137 = vector.shape_cast %136 : vector<1x2x4xf32> to vector<2x4xf32>
    %cst_86 = arith.constant dense<0.000000e+00> : vector<256x4xf32>
    %138 = tpu.matmul %135, %137, %cst_86 {dimension_numbers = #tpu.dot_dimension_numbers<[1], [0], [0], [1], [0, 0, 1, 1], [], []>} : vector<256x2xf32>, vector<2x4xf32>, vector<256x4xf32> -> vector<256x4xf32>
    %139 = arith.addf %133, %138 : vector<256x4xf32>
    %140 = vector.extract_strided_slice %108 {offsets = [1, 0, 0], sizes = [16, 16, 2], strides = [1, 1, 1]} : vector<20x20x2xf32> to vector<16x16x2xf32>
    %141 = vector.shape_cast %140 : vector<16x16x2xf32> to vector<256x2xf32>
    %c5_87 = arith.constant 5 : index
    %c0_88 = arith.constant 0 : index
    %c0_89 = arith.constant 0 : index
    %142 = vector.load %arg8[%c5_87, %c0_88, %c0_89] : memref<25x2x4xf32, #tpu.memory_space<vmem>>, vector<1x2x4xf32>
    %143 = vector.shape_cast %142 : vector<1x2x4xf32> to vector<2x4xf32>
    %cst_90 = arith.constant dense<0.000000e+00> : vector<256x4xf32>
    %144 = tpu.matmul %141, %143, %cst_90 {dimension_numbers = #tpu.dot_dimension_numbers<[1], [0], [0], [1], [0, 0, 1, 1], [], []>} : vector<256x2xf32>, vector<2x4xf32>, vector<256x4xf32> -> vector<256x4xf32>
    %145 = arith.addf %139, %144 : vector<256x4xf32>
    %146 = vector.extract_strided_slice %108 {offsets = [1, 1, 0], sizes = [16, 16, 2], strides = [1, 1, 1]} : vector<20x20x2xf32> to vector<16x16x2xf32>
    %147 = vector.shape_cast %146 : vector<16x16x2xf32> to vector<256x2xf32>
    %c6_91 = arith.constant 6 : index
    %c0_92 = arith.constant 0 : index
    %c0_93 = arith.constant 0 : index
    %148 = vector.load %arg8[%c6_91, %c0_92, %c0_93] : memref<25x2x4xf32, #tpu.memory_space<vmem>>, vector<1x2x4xf32>
    %149 = vector.shape_cast %148 : vector<1x2x4xf32> to vector<2x4xf32>
    %cst_94 = arith.constant dense<0.000000e+00> : vector<256x4xf32>
    %150 = tpu.matmul %147, %149, %cst_94 {dimension_numbers = #tpu.dot_dimension_numbers<[1], [0], [0], [1], [0, 0, 1, 1], [], []>} : vector<256x2xf32>, vector<2x4xf32>, vector<256x4xf32> -> vector<256x4xf32>
    %151 = arith.addf %145, %150 : vector<256x4xf32>
    %152 = vector.extract_strided_slice %108 {offsets = [1, 2, 0], sizes = [16, 16, 2], strides = [1, 1, 1]} : vector<20x20x2xf32> to vector<16x16x2xf32>
    %153 = vector.shape_cast %152 : vector<16x16x2xf32> to vector<256x2xf32>
    %c7_95 = arith.constant 7 : index
    %c0_96 = arith.constant 0 : index
    %c0_97 = arith.constant 0 : index
    %154 = vector.load %arg8[%c7_95, %c0_96, %c0_97] : memref<25x2x4xf32, #tpu.memory_space<vmem>>, vector<1x2x4xf32>
    %155 = vector.shape_cast %154 : vector<1x2x4xf32> to vector<2x4xf32>
    %cst_98 = arith.constant dense<0.000000e+00> : vector<256x4xf32>
    %156 = tpu.matmul %153, %155, %cst_98 {dimension_numbers = #tpu.dot_dimension_numbers<[1], [0], [0], [1], [0, 0, 1, 1], [], []>} : vector<256x2xf32>, vector<2x4xf32>, vector<256x4xf32> -> vector<256x4xf32>
    %157 = arith.addf %151, %156 : vector<256x4xf32>
    %158 = vector.extract_strided_slice %108 {offsets = [1, 3, 0], sizes = [16, 16, 2], strides = [1, 1, 1]} : vector<20x20x2xf32> to vector<16x16x2xf32>
    %159 = vector.shape_cast %158 : vector<16x16x2xf32> to vector<256x2xf32>
    %c8_99 = arith.constant 8 : index
    %c0_100 = arith.constant 0 : index
    %c0_101 = arith.constant 0 : index
    %160 = vector.load %arg8[%c8_99, %c0_100, %c0_101] : memref<25x2x4xf32, #tpu.memory_space<vmem>>, vector<1x2x4xf32>
    %161 = vector.shape_cast %160 : vector<1x2x4xf32> to vector<2x4xf32>
    %cst_102 = arith.constant dense<0.000000e+00> : vector<256x4xf32>
    %162 = tpu.matmul %159, %161, %cst_102 {dimension_numbers = #tpu.dot_dimension_numbers<[1], [0], [0], [1], [0, 0, 1, 1], [], []>} : vector<256x2xf32>, vector<2x4xf32>, vector<256x4xf32> -> vector<256x4xf32>
    %163 = arith.addf %157, %162 : vector<256x4xf32>
    %164 = vector.extract_strided_slice %108 {offsets = [1, 4, 0], sizes = [16, 16, 2], strides = [1, 1, 1]} : vector<20x20x2xf32> to vector<16x16x2xf32>
    %165 = vector.shape_cast %164 : vector<16x16x2xf32> to vector<256x2xf32>
    %c9 = arith.constant 9 : index
    %c0_103 = arith.constant 0 : index
    %c0_104 = arith.constant 0 : index
    %166 = vector.load %arg8[%c9, %c0_103, %c0_104] : memref<25x2x4xf32, #tpu.memory_space<vmem>>, vector<1x2x4xf32>
    %167 = vector.shape_cast %166 : vector<1x2x4xf32> to vector<2x4xf32>
    %cst_105 = arith.constant dense<0.000000e+00> : vector<256x4xf32>
    %168 = tpu.matmul %165, %167, %cst_105 {dimension_numbers = #tpu.dot_dimension_numbers<[1], [0], [0], [1], [0, 0, 1, 1], [], []>} : vector<256x2xf32>, vector<2x4xf32>, vector<256x4xf32> -> vector<256x4xf32>
    %169 = arith.addf %163, %168 : vector<256x4xf32>
    %170 = vector.extract_strided_slice %108 {offsets = [2, 0, 0], sizes = [16, 16, 2], strides = [1, 1, 1]} : vector<20x20x2xf32> to vector<16x16x2xf32>
    %171 = vector.shape_cast %170 : vector<16x16x2xf32> to vector<256x2xf32>
    %c10 = arith.constant 10 : index
    %c0_106 = arith.constant 0 : index
    %c0_107 = arith.constant 0 : index
    %172 = vector.load %arg8[%c10, %c0_106, %c0_107] : memref<25x2x4xf32, #tpu.memory_space<vmem>>, vector<1x2x4xf32>
    %173 = vector.shape_cast %172 : vector<1x2x4xf32> to vector<2x4xf32>
    %cst_108 = arith.constant dense<0.000000e+00> : vector<256x4xf32>
    %174 = tpu.matmul %171, %173, %cst_108 {dimension_numbers = #tpu.dot_dimension_numbers<[1], [0], [0], [1], [0, 0, 1, 1], [], []>} : vector<256x2xf32>, vector<2x4xf32>, vector<256x4xf32> -> vector<256x4xf32>
    %175 = arith.addf %169, %174 : vector<256x4xf32>
    %176 = vector.extract_strided_slice %108 {offsets = [2, 1, 0], sizes = [16, 16, 2], strides = [1, 1, 1]} : vector<20x20x2xf32> to vector<16x16x2xf32>
    %177 = vector.shape_cast %176 : vector<16x16x2xf32> to vector<256x2xf32>
    %c11 = arith.constant 11 : index
    %c0_109 = arith.constant 0 : index
    %c0_110 = arith.constant 0 : index
    %178 = vector.load %arg8[%c11, %c0_109, %c0_110] : memref<25x2x4xf32, #tpu.memory_space<vmem>>, vector<1x2x4xf32>
    %179 = vector.shape_cast %178 : vector<1x2x4xf32> to vector<2x4xf32>
    %cst_111 = arith.constant dense<0.000000e+00> : vector<256x4xf32>
    %180 = tpu.matmul %177, %179, %cst_111 {dimension_numbers = #tpu.dot_dimension_numbers<[1], [0], [0], [1], [0, 0, 1, 1], [], []>} : vector<256x2xf32>, vector<2x4xf32>, vector<256x4xf32> -> vector<256x4xf32>
    %181 = arith.addf %175, %180 : vector<256x4xf32>
    %182 = vector.extract_strided_slice %108 {offsets = [2, 2, 0], sizes = [16, 16, 2], strides = [1, 1, 1]} : vector<20x20x2xf32> to vector<16x16x2xf32>
    %183 = vector.shape_cast %182 : vector<16x16x2xf32> to vector<256x2xf32>
    %c12 = arith.constant 12 : index
    %c0_112 = arith.constant 0 : index
    %c0_113 = arith.constant 0 : index
    %184 = vector.load %arg8[%c12, %c0_112, %c0_113] : memref<25x2x4xf32, #tpu.memory_space<vmem>>, vector<1x2x4xf32>
    %185 = vector.shape_cast %184 : vector<1x2x4xf32> to vector<2x4xf32>
    %cst_114 = arith.constant dense<0.000000e+00> : vector<256x4xf32>
    %186 = tpu.matmul %183, %185, %cst_114 {dimension_numbers = #tpu.dot_dimension_numbers<[1], [0], [0], [1], [0, 0, 1, 1], [], []>} : vector<256x2xf32>, vector<2x4xf32>, vector<256x4xf32> -> vector<256x4xf32>
    %187 = arith.addf %181, %186 : vector<256x4xf32>
    %188 = vector.extract_strided_slice %108 {offsets = [2, 3, 0], sizes = [16, 16, 2], strides = [1, 1, 1]} : vector<20x20x2xf32> to vector<16x16x2xf32>
    %189 = vector.shape_cast %188 : vector<16x16x2xf32> to vector<256x2xf32>
    %c13 = arith.constant 13 : index
    %c0_115 = arith.constant 0 : index
    %c0_116 = arith.constant 0 : index
    %190 = vector.load %arg8[%c13, %c0_115, %c0_116] : memref<25x2x4xf32, #tpu.memory_space<vmem>>, vector<1x2x4xf32>
    %191 = vector.shape_cast %190 : vector<1x2x4xf32> to vector<2x4xf32>
    %cst_117 = arith.constant dense<0.000000e+00> : vector<256x4xf32>
    %192 = tpu.matmul %189, %191, %cst_117 {dimension_numbers = #tpu.dot_dimension_numbers<[1], [0], [0], [1], [0, 0, 1, 1], [], []>} : vector<256x2xf32>, vector<2x4xf32>, vector<256x4xf32> -> vector<256x4xf32>
    %193 = arith.addf %187, %192 : vector<256x4xf32>
    %194 = vector.extract_strided_slice %108 {offsets = [2, 4, 0], sizes = [16, 16, 2], strides = [1, 1, 1]} : vector<20x20x2xf32> to vector<16x16x2xf32>
    %195 = vector.shape_cast %194 : vector<16x16x2xf32> to vector<256x2xf32>
    %c14 = arith.constant 14 : index
    %c0_118 = arith.constant 0 : index
    %c0_119 = arith.constant 0 : index
    %196 = vector.load %arg8[%c14, %c0_118, %c0_119] : memref<25x2x4xf32, #tpu.memory_space<vmem>>, vector<1x2x4xf32>
    %197 = vector.shape_cast %196 : vector<1x2x4xf32> to vector<2x4xf32>
    %cst_120 = arith.constant dense<0.000000e+00> : vector<256x4xf32>
    %198 = tpu.matmul %195, %197, %cst_120 {dimension_numbers = #tpu.dot_dimension_numbers<[1], [0], [0], [1], [0, 0, 1, 1], [], []>} : vector<256x2xf32>, vector<2x4xf32>, vector<256x4xf32> -> vector<256x4xf32>
    %199 = arith.addf %193, %198 : vector<256x4xf32>
    %200 = vector.extract_strided_slice %108 {offsets = [3, 0, 0], sizes = [16, 16, 2], strides = [1, 1, 1]} : vector<20x20x2xf32> to vector<16x16x2xf32>
    %201 = vector.shape_cast %200 : vector<16x16x2xf32> to vector<256x2xf32>
    %c15 = arith.constant 15 : index
    %c0_121 = arith.constant 0 : index
    %c0_122 = arith.constant 0 : index
    %202 = vector.load %arg8[%c15, %c0_121, %c0_122] : memref<25x2x4xf32, #tpu.memory_space<vmem>>, vector<1x2x4xf32>
    %203 = vector.shape_cast %202 : vector<1x2x4xf32> to vector<2x4xf32>
    %cst_123 = arith.constant dense<0.000000e+00> : vector<256x4xf32>
    %204 = tpu.matmul %201, %203, %cst_123 {dimension_numbers = #tpu.dot_dimension_numbers<[1], [0], [0], [1], [0, 0, 1, 1], [], []>} : vector<256x2xf32>, vector<2x4xf32>, vector<256x4xf32> -> vector<256x4xf32>
    %205 = arith.addf %199, %204 : vector<256x4xf32>
    %206 = vector.extract_strided_slice %108 {offsets = [3, 1, 0], sizes = [16, 16, 2], strides = [1, 1, 1]} : vector<20x20x2xf32> to vector<16x16x2xf32>
    %207 = vector.shape_cast %206 : vector<16x16x2xf32> to vector<256x2xf32>
    %c16 = arith.constant 16 : index
    %c0_124 = arith.constant 0 : index
    %c0_125 = arith.constant 0 : index
    %208 = vector.load %arg8[%c16, %c0_124, %c0_125] : memref<25x2x4xf32, #tpu.memory_space<vmem>>, vector<1x2x4xf32>
    %209 = vector.shape_cast %208 : vector<1x2x4xf32> to vector<2x4xf32>
    %cst_126 = arith.constant dense<0.000000e+00> : vector<256x4xf32>
    %210 = tpu.matmul %207, %209, %cst_126 {dimension_numbers = #tpu.dot_dimension_numbers<[1], [0], [0], [1], [0, 0, 1, 1], [], []>} : vector<256x2xf32>, vector<2x4xf32>, vector<256x4xf32> -> vector<256x4xf32>
    %211 = arith.addf %205, %210 : vector<256x4xf32>
    %212 = vector.extract_strided_slice %108 {offsets = [3, 2, 0], sizes = [16, 16, 2], strides = [1, 1, 1]} : vector<20x20x2xf32> to vector<16x16x2xf32>
    %213 = vector.shape_cast %212 : vector<16x16x2xf32> to vector<256x2xf32>
    %c17 = arith.constant 17 : index
    %c0_127 = arith.constant 0 : index
    %c0_128 = arith.constant 0 : index
    %214 = vector.load %arg8[%c17, %c0_127, %c0_128] : memref<25x2x4xf32, #tpu.memory_space<vmem>>, vector<1x2x4xf32>
    %215 = vector.shape_cast %214 : vector<1x2x4xf32> to vector<2x4xf32>
    %cst_129 = arith.constant dense<0.000000e+00> : vector<256x4xf32>
    %216 = tpu.matmul %213, %215, %cst_129 {dimension_numbers = #tpu.dot_dimension_numbers<[1], [0], [0], [1], [0, 0, 1, 1], [], []>} : vector<256x2xf32>, vector<2x4xf32>, vector<256x4xf32> -> vector<256x4xf32>
    %217 = arith.addf %211, %216 : vector<256x4xf32>
    %218 = vector.extract_strided_slice %108 {offsets = [3, 3, 0], sizes = [16, 16, 2], strides = [1, 1, 1]} : vector<20x20x2xf32> to vector<16x16x2xf32>
    %219 = vector.shape_cast %218 : vector<16x16x2xf32> to vector<256x2xf32>
    %c18 = arith.constant 18 : index
    %c0_130 = arith.constant 0 : index
    %c0_131 = arith.constant 0 : index
    %220 = vector.load %arg8[%c18, %c0_130, %c0_131] : memref<25x2x4xf32, #tpu.memory_space<vmem>>, vector<1x2x4xf32>
    %221 = vector.shape_cast %220 : vector<1x2x4xf32> to vector<2x4xf32>
    %cst_132 = arith.constant dense<0.000000e+00> : vector<256x4xf32>
    %222 = tpu.matmul %219, %221, %cst_132 {dimension_numbers = #tpu.dot_dimension_numbers<[1], [0], [0], [1], [0, 0, 1, 1], [], []>} : vector<256x2xf32>, vector<2x4xf32>, vector<256x4xf32> -> vector<256x4xf32>
    %223 = arith.addf %217, %222 : vector<256x4xf32>
    %224 = vector.extract_strided_slice %108 {offsets = [3, 4, 0], sizes = [16, 16, 2], strides = [1, 1, 1]} : vector<20x20x2xf32> to vector<16x16x2xf32>
    %225 = vector.shape_cast %224 : vector<16x16x2xf32> to vector<256x2xf32>
    %c19 = arith.constant 19 : index
    %c0_133 = arith.constant 0 : index
    %c0_134 = arith.constant 0 : index
    %226 = vector.load %arg8[%c19, %c0_133, %c0_134] : memref<25x2x4xf32, #tpu.memory_space<vmem>>, vector<1x2x4xf32>
    %227 = vector.shape_cast %226 : vector<1x2x4xf32> to vector<2x4xf32>
    %cst_135 = arith.constant dense<0.000000e+00> : vector<256x4xf32>
    %228 = tpu.matmul %225, %227, %cst_135 {dimension_numbers = #tpu.dot_dimension_numbers<[1], [0], [0], [1], [0, 0, 1, 1], [], []>} : vector<256x2xf32>, vector<2x4xf32>, vector<256x4xf32> -> vector<256x4xf32>
    %229 = arith.addf %223, %228 : vector<256x4xf32>
    %230 = vector.extract_strided_slice %108 {offsets = [4, 0, 0], sizes = [16, 16, 2], strides = [1, 1, 1]} : vector<20x20x2xf32> to vector<16x16x2xf32>
    %231 = vector.shape_cast %230 : vector<16x16x2xf32> to vector<256x2xf32>
    %c20 = arith.constant 20 : index
    %c0_136 = arith.constant 0 : index
    %c0_137 = arith.constant 0 : index
    %232 = vector.load %arg8[%c20, %c0_136, %c0_137] : memref<25x2x4xf32, #tpu.memory_space<vmem>>, vector<1x2x4xf32>
    %233 = vector.shape_cast %232 : vector<1x2x4xf32> to vector<2x4xf32>
    %cst_138 = arith.constant dense<0.000000e+00> : vector<256x4xf32>
    %234 = tpu.matmul %231, %233, %cst_138 {dimension_numbers = #tpu.dot_dimension_numbers<[1], [0], [0], [1], [0, 0, 1, 1], [], []>} : vector<256x2xf32>, vector<2x4xf32>, vector<256x4xf32> -> vector<256x4xf32>
    %235 = arith.addf %229, %234 : vector<256x4xf32>
    %236 = vector.extract_strided_slice %108 {offsets = [4, 1, 0], sizes = [16, 16, 2], strides = [1, 1, 1]} : vector<20x20x2xf32> to vector<16x16x2xf32>
    %237 = vector.shape_cast %236 : vector<16x16x2xf32> to vector<256x2xf32>
    %c21 = arith.constant 21 : index
    %c0_139 = arith.constant 0 : index
    %c0_140 = arith.constant 0 : index
    %238 = vector.load %arg8[%c21, %c0_139, %c0_140] : memref<25x2x4xf32, #tpu.memory_space<vmem>>, vector<1x2x4xf32>
    %239 = vector.shape_cast %238 : vector<1x2x4xf32> to vector<2x4xf32>
    %cst_141 = arith.constant dense<0.000000e+00> : vector<256x4xf32>
    %240 = tpu.matmul %237, %239, %cst_141 {dimension_numbers = #tpu.dot_dimension_numbers<[1], [0], [0], [1], [0, 0, 1, 1], [], []>} : vector<256x2xf32>, vector<2x4xf32>, vector<256x4xf32> -> vector<256x4xf32>
    %241 = arith.addf %235, %240 : vector<256x4xf32>
    %242 = vector.extract_strided_slice %108 {offsets = [4, 2, 0], sizes = [16, 16, 2], strides = [1, 1, 1]} : vector<20x20x2xf32> to vector<16x16x2xf32>
    %243 = vector.shape_cast %242 : vector<16x16x2xf32> to vector<256x2xf32>
    %c22 = arith.constant 22 : index
    %c0_142 = arith.constant 0 : index
    %c0_143 = arith.constant 0 : index
    %244 = vector.load %arg8[%c22, %c0_142, %c0_143] : memref<25x2x4xf32, #tpu.memory_space<vmem>>, vector<1x2x4xf32>
    %245 = vector.shape_cast %244 : vector<1x2x4xf32> to vector<2x4xf32>
    %cst_144 = arith.constant dense<0.000000e+00> : vector<256x4xf32>
    %246 = tpu.matmul %243, %245, %cst_144 {dimension_numbers = #tpu.dot_dimension_numbers<[1], [0], [0], [1], [0, 0, 1, 1], [], []>} : vector<256x2xf32>, vector<2x4xf32>, vector<256x4xf32> -> vector<256x4xf32>
    %247 = arith.addf %241, %246 : vector<256x4xf32>
    %248 = vector.extract_strided_slice %108 {offsets = [4, 3, 0], sizes = [16, 16, 2], strides = [1, 1, 1]} : vector<20x20x2xf32> to vector<16x16x2xf32>
    %249 = vector.shape_cast %248 : vector<16x16x2xf32> to vector<256x2xf32>
    %c23 = arith.constant 23 : index
    %c0_145 = arith.constant 0 : index
    %c0_146 = arith.constant 0 : index
    %250 = vector.load %arg8[%c23, %c0_145, %c0_146] : memref<25x2x4xf32, #tpu.memory_space<vmem>>, vector<1x2x4xf32>
    %251 = vector.shape_cast %250 : vector<1x2x4xf32> to vector<2x4xf32>
    %cst_147 = arith.constant dense<0.000000e+00> : vector<256x4xf32>
    %252 = tpu.matmul %249, %251, %cst_147 {dimension_numbers = #tpu.dot_dimension_numbers<[1], [0], [0], [1], [0, 0, 1, 1], [], []>} : vector<256x2xf32>, vector<2x4xf32>, vector<256x4xf32> -> vector<256x4xf32>
    %253 = arith.addf %247, %252 : vector<256x4xf32>
    %254 = vector.extract_strided_slice %108 {offsets = [4, 4, 0], sizes = [16, 16, 2], strides = [1, 1, 1]} : vector<20x20x2xf32> to vector<16x16x2xf32>
    %255 = vector.shape_cast %254 : vector<16x16x2xf32> to vector<256x2xf32>
    %c24 = arith.constant 24 : index
    %c0_148 = arith.constant 0 : index
    %c0_149 = arith.constant 0 : index
    %256 = vector.load %arg8[%c24, %c0_148, %c0_149] : memref<25x2x4xf32, #tpu.memory_space<vmem>>, vector<1x2x4xf32>
    %257 = vector.shape_cast %256 : vector<1x2x4xf32> to vector<2x4xf32>
    %cst_150 = arith.constant dense<0.000000e+00> : vector<256x4xf32>
    %258 = tpu.matmul %255, %257, %cst_150 {dimension_numbers = #tpu.dot_dimension_numbers<[1], [0], [0], [1], [0, 0, 1, 1], [], []>} : vector<256x2xf32>, vector<2x4xf32>, vector<256x4xf32> -> vector<256x4xf32>
    %259 = arith.addf %253, %258 : vector<256x4xf32>
    %c0_151 = arith.constant 0 : index
    %c0_152 = arith.constant 0 : index
    %260 = vector.load %arg9[%c0_151, %c0_152] : memref<1x4xf32, #tpu.memory_space<vmem>>, vector<1x4xf32>
    %261 = vector.broadcast %260 : vector<1x4xf32> to vector<256x4xf32>
    %262 = arith.addf %259, %261 : vector<256x4xf32>
    %cst_153 = arith.constant 0.000000e+00 : f32
    %263 = vector.broadcast %cst_153 : f32 to vector<256x4xf32>
    %264 = arith.maximumf %262, %263 : vector<256x4xf32>
    %265 = tpu.concatenate %11, %103, %264, %38 in 1 : vector<256x4xf32>, vector<256x8xf32>, vector<256x4xf32>, vector<256x4xf32> -> vector<256x20xf32>
    %c0_154 = arith.constant 0 : index
    %c0_155 = arith.constant 0 : index
    %266 = vector.load %arg10[%c0_154, %c0_155] : memref<256x20xf32, #tpu.memory_space<vmem>>, vector<256x20xf32>
    tpu.vector_store %arg10[%c0_154, %c0_155], %265 {strides = array<i32>} : memref<256x20xf32, #tpu.memory_space<vmem>>, vector<256x20xf32>,
    return
  }
  func.func @transform_0(%arg0: i32) -> (i32, i32, i32, i32) {
    %c0_i32 = arith.constant 0 : i32
    %c0_i32_0 = arith.constant 0 : i32
    %c0_i32_1 = arith.constant 0 : i32
    %c0_i32_2 = arith.constant 0 : i32
    return %arg0, %c0_i32, %c0_i32_0, %c0_i32_1 : i32, i32, i32, i32
  }
  func.func @transform_1(%arg0: i32) -> (i32, i32) {
    %c0_i32 = arith.constant 0 : i32
    %c0_i32_0 = arith.constant 0 : i32
    %c0_i32_1 = arith.constant 0 : i32
    return %c0_i32, %c0_i32_0 : i32, i32
  }
  func.func @transform_2(%arg0: i32) -> (i32, i32) {
    %c0_i32 = arith.constant 0 : i32
    %c0_i32_0 = arith.constant 0 : i32
    %c0_i32_1 = arith.constant 0 : i32
    return %c0_i32, %c0_i32_0 : i32, i32
  }
  func.func @transform_3(%arg0: i32) -> (i32, i32) {
    %c0_i32 = arith.constant 0 : i32
    %c0_i32_0 = arith.constant 0 : i32
    %c0_i32_1 = arith.constant 0 : i32
    return %c0_i32, %c0_i32_0 : i32, i32
  }
  func.func @transform_4(%arg0: i32) -> (i32, i32) {
    %c0_i32 = arith.constant 0 : i32
    %c0_i32_0 = arith.constant 0 : i32
    %c0_i32_1 = arith.constant 0 : i32
    return %c0_i32, %c0_i32_0 : i32, i32
  }
  func.func @transform_5(%arg0: i32) -> (i32, i32, i32) {
    %c0_i32 = arith.constant 0 : i32
    %c0_i32_0 = arith.constant 0 : i32
    %c0_i32_1 = arith.constant 0 : i32
    %c0_i32_2 = arith.constant 0 : i32
    return %c0_i32, %c0_i32_0, %c0_i32_1 : i32, i32, i32
  }
  func.func @transform_6(%arg0: i32) -> (i32, i32) {
    %c0_i32 = arith.constant 0 : i32
    %c0_i32_0 = arith.constant 0 : i32
    %c0_i32_1 = arith.constant 0 : i32
    return %c0_i32, %c0_i32_0 : i32, i32
  }
  func.func @transform_7(%arg0: i32) -> (i32, i32, i32) {
    %c0_i32 = arith.constant 0 : i32
    %c0_i32_0 = arith.constant 0 : i32
    %c0_i32_1 = arith.constant 0 : i32
    %c0_i32_2 = arith.constant 0 : i32
    return %c0_i32, %c0_i32_0, %c0_i32_1 : i32, i32, i32
  }
  func.func @transform_8(%arg0: i32) -> (i32, i32) {
    %c0_i32 = arith.constant 0 : i32
    %c0_i32_0 = arith.constant 0 : i32
    %c0_i32_1 = arith.constant 0 : i32
    return %c0_i32, %c0_i32_0 : i32, i32
  }
  func.func @transform_9(%arg0: i32) -> (i32, i32) {
    %c0_i32 = arith.constant 0 : i32
    %c0_i32_0 = arith.constant 0 : i32
    return %arg0, %c0_i32 : i32, i32
  }
}

</mosaic_0001>

<bundles_post_ra>
// kernel: inception_forward.1
= control target key start
LH: loop header
LB: loop body
LE: loop exit
PB: predicated region body
PF: predicated region fallthrough
CT: control target
= control target key end

     0   :  { %14 = vsyncpa [#allocation5], 0  ;;  %s16451_s0 = inlined_call_operand.vmem [shape: f32[2,18,18,4], index: 0, kind: input, shape index: {}]   ;;  %s16452_s1 = inlined_call_operand.vmem [shape: f32[4,10], index: 1, kind: input, shape index: {}]   ;;  %s16453_s2 = inlined_call_operand.vmem [shape: f32[1,10], index: 2, kind: input, shape index: {}]   ;;  %s16454_s3 = inlined_call_operand.vmem [shape: f32[4,4], index: 3, kind: input, shape index: {}]   ;;  %s16455_s4 = inlined_call_operand.vmem [shape: f32[1,4], index: 4, kind: input, shape index: {}]   ;;  %s16456_s5 = inlined_call_operand.vmem [shape: f32[9,4,8], index: 5, kind: input, shape index: {}]   ;;  %s16457_s6 = inlined_call_operand.vmem [shape: f32[1,8], index: 6, kind: input, shape index: {}]   ;;  %s16458_s7 = inlined_call_operand.vmem [shape: f32[25,2,4], index: 7, kind: input, shape index: {}]   ;;  %s16459_s8 = inlined_call_operand.vmem [shape: f32[1,4], index: 8, kind: input, shape index: {}]   ;;  %s16460_s9 = inlined_call_operand.hbm [shape: f32[512,20], index: 9, kind: output, shape index: {}]  }
   0x1   :  { %16 = vsyncpa [#allocation5 + $0x1], 0  ;;  %s10474_s30 = smov 0   ;;  %s10476_s10 = smov 0  }
   0x2   :  { %s10478_s11 = smov 0   ;;  %s10480_s12 = smov 0  }
   0x3 LB: > { %s10495_s13 = sadd.s32 4294967295, %s10414_s12   ;;  %s8950_s14 = sadd.s32 4294967294, %s10414_s12   ;;  %s10414_s12 = sphi %s10480_s12, %s18014_s12   ;;  %s10410_s11 = sphi %s10478_s11, %s18013_s11   ;;  %s10406_s10 = sphi %s10476_s10, %s18012_s10   ;;  %s10402_s30 = sphi %s10474_s30, %s18011_s30  }
   0x4   : > { %s10499_s15 = sadd.s32 1, %s10414_s12   ;;  %s223_s16 = sadd.s32 1, %s10410_s11 }
   0x5   : > { %s220_s17 = ssub.s32 %s10414_s12, %s10499_s15  ;;  %p233_p0 = scmp.ne.s32.totalorder %s10410_s11, %s10406_s10 }
   0x6   : > { %p221_p1 = scmp.eq.s32.totalorder %s220_s17, 0  ;;  %p234_p2 = scmp.eq.s32.totalorder %s10495_s13, 1 }
   0x7   : > { %p239_p3 = scmp.ne.s32.totalorder %s10406_s10, %s10402_s30  ;;  %p240_p4 = scmp.eq.s32.totalorder %s8950_s14, 1 }
   0x8   : > { %s10510_s18 = scalar_select %p221_p1, %s10410_s11, %s223_s16  }
   0x9   : > { %p10512_p5 = por %p234_p2, %p233_p0  ;;  %p10516_p6 = por %p240_p4, %p239_p3 }
   0xa   : > { %p8953_p7 = scmp.ge.s32.totalorder %s10414_s12, 1  ;;  %p290_p8 = scmp.lt.s32.totalorder %s10414_s12, 3 }
   0xc   : > { %p291_p9 = pnand %p8953_p7, %p290_p8 }
   0xe   : > { %294 = sbr.rel (%p291_p9) target bundleno = 2884 (0xb44), region = 56 }
  0x13   : > { %v515_v0 = vld [vmem:[%s16452_s1] sm:$0xf]  ;;  %vm585_vm0 = vcmask 1043456   ;;  %p326_p10 = scmp.lt.s32.totalorder %s10495_s13, 1  ;;  %vm434_vm1 = vcmask 1046528   ;;  %vm806_vm2 = vcmask 1045504  }
  0x14   : > { %8956 = vmatpush.msk.msra.mxu0 %vm585_vm0, %v515_v0  ;;  %v1169_v1 = vld [vmem:[%s16454_s3] sm:$0xf]  ;;  %vm520_vm3 = vcmask 31744   ;;  %s10416_s17 = smov 124   ;;  %vm1420_vm4 = vcmask 25600   ;;  %s10418_s24 = smov 120  }
  0x15   : > { %s327_s25 = scalar_select %p326_p10, %s10495_s13, 1  ;;  %8989 = vmatpush.msk.msra.mxu1 %vm585_vm0, %v1169_v1  ;;  %vm3491_vm5 = vcmask 15360   ;;  %vm3494_vm6 = vcmask 11264   ;;  %vm3937_vm7 = vcmask 1041408   ;;  %vm4528_vm8 = vcmask 1044480  }
  0x16   : > { %s10420_s23 = smov 4   ;;  %vm8773_vm9 = vcmask 97280   ;;  %vm8806_vm10 = vcmask 130048   ;;  %vm8839_vm11 = vcmask 162816  }
  0x17   : > { %s10182_s26 = smul.u32 432, %s327_s25 }
  0x19   : > { %s10535_s29 = scalar_lea.vmem %s16451_s0, %s10182_s26  ;;  %s10419_s26 = smov 16  }
  0x1a   : > { %v332_v2 = vld [vmem:[%s10535_s29] sm:$0xff]  ;;  %v333_v3 = vld [vmem:[%s10535_s29 + $0x8] sm:$0xff]  ;;  %v335_v4 = vld [vmem:[%s10535_s29 + $0x18] sm:$0xff] }
  0x1b   : > { %v336_v5 = vld [vmem:[%s10535_s29 + $0x20] sm:$0xff]  ;;  %v435_v6 = vrot.slane %v335_v4, 1  ;;  %v737_v7 = vrot.slane %v332_v2, 1  ;;  %v738_v8 = vrot.slane %v333_v3, 1  ;;  %v807_v9 = vrot.slane %v332_v2, 2  ;;  %v338_v25 = vld [vmem:[%s10535_s29 + $0x30] sm:$0xff] }
  0x1c   : > { %v436_v10 = vrot.slane %v336_v5, 1  ;;  %v808_v11 = vrot.slane %v333_v3, 2  ;;  %v812_v12 = vrot.slane %v335_v4, 2  ;;  %v334_v13 = vld [vmem:[%s10535_s29 + $0x10] sm:$0x3]  ;;  %v813_v15 = vrot.slane %v336_v5, 2 }
  0x1d   : > { %v739_v14 = vsel %vm434_vm1, %v737_v7, %v738_v8  ;;  %v337_v16 = vld [vmem:[%s10535_s29 + $0x28] sm:$0x3]  ;;  %v740_v17 = vrot.slane %v334_v13, 1  ;;  %v810_v18 = vrot.slane %v334_v13, 2  ;;  %v339_v27 = vld [vmem:[%s10535_s29 + $0x38] sm:$0xff]  ;;  %v440_v35 = vrot.slane %v338_v25, 1 }
  0x1e   : > { %v437_v19 = vsel %vm434_vm1, %v435_v6, %v436_v10  ;;  %v774_v20 = vmax.f32 %v332_v2, %v739_v14  ;;  %v809_v21 = vsel %vm806_vm2, %v807_v9, %v808_v11  ;;  %v438_v28 = vrot.slane %v337_v16, 1  ;;  %v340_v40 = vld [vmem:[%s10535_s29 + $0x40] sm:$0x3]  ;;  %v341_v60 = vld [vmem:[%s10535_s29 + $0x48] sm:$0xff]  ;;  %v342_v61 = vld [vmem:[%s10535_s29 + $0x50] sm:$0xff] }
  0x1f   : > { %8957 = vmatmul.msk.f32.vlgmr.msra.gmra.mxu0 %vm520_vm3, %v437_v19  ;;  %v776_v22 = vmax.f32 %v335_v4, %v437_v19  ;;  %v741_v23 = vsel %vm434_vm1, %v738_v8, %v740_v17  ;;  %v811_v24 = vsel %vm806_vm2, %v808_v11, %v810_v18  ;;  %v814_v30 = vsel %vm806_vm2, %v812_v12, %v813_v15  ;;  %v343_v12 = vld [vmem:[%s10535_s29 + $0x58] sm:$0x3] }
  0x20   : > { %v919_v26 = vmax.f32 %v774_v20, %v809_v21  ;;  %v775_v29 = vmax.f32 %v333_v3, %v741_v23  ;;  %v815_v31 = vrot.slane %v337_v16, 2  ;;  %v441_v36 = vrot.slane %v339_v27, 1 }
  0x21   : > { %v921_v32 = vmax.f32 %v776_v22, %v814_v30  ;;  %v439_v38 = vsel %vm434_vm1, %v436_v10, %v438_v28  ;;  %v817_v42 = vrot.slane %v338_v25, 2  ;;  %v818_v43 = vrot.slane %v339_v27, 2 }
  0x22   : > { %v951_v33 = vmax.f32 %v919_v26, %v335_v4  ;;  %v920_v34 = vmax.f32 %v775_v29, %v811_v24  ;;  %v816_v41 = vsel %vm806_vm2, %v813_v15, %v815_v31  ;;  %v777_v46 = vmax.f32 %v336_v5, %v439_v38  ;;  %v345_v26 = vld [vmem:[%s10535_s29 + $0x68] sm:$0xff] }
  0x23   : > { %v953_v44 = vmax.f32 %v921_v32, %v338_v25  ;;  %v442_v48 = vsel %vm434_vm1, %v440_v35, %v441_v36  ;;  %v443_v49 = vrot.slane %v340_v40, 1  ;;  %v819_v52 = vsel %vm806_vm2, %v817_v42, %v818_v43 }
  0x24   : > { %v985_v37 = vmax.f32 %v951_v33, %v437_v19  ;;  %v952_v39 = vmax.f32 %v920_v34, %v336_v5  ;;  %v922_v53 = vmax.f32 %v777_v46, %v816_v41  ;;  %v820_v58 = vrot.slane %v340_v40, 2 }
  0x25   : > { %v987_v54 = vmax.f32 %v953_v44, %v442_v48  ;;  %v444_v57 = vsel %vm434_vm1, %v441_v36, %v443_v49  ;;  %v778_v63 = vmax.f32 %v338_v25, %v442_v48  ;;  %v445_v3 = vrot.slane %v341_v60, 1 }
  0x26   : > { %v1024_v45 = vmax.f32 %v985_v37, %v814_v30  ;;  %v986_v47 = vmax.f32 %v952_v39, %v439_v38  ;;  %v954_v62 = vmax.f32 %v922_v53, %v339_v27  ;;  %v821_v2 = vsel %vm806_vm2, %v818_v43, %v820_v58 }
  0x27   : > { %8958 = vmatmul.msk.f32.gmra.mxu0 %vm520_vm3, %v439_v38  ;;  %v1026_v0 = vmax.f32 %v987_v54, %v819_v52  ;;  %v446_v4 = vrot.slane %v342_v61, 1  ;;  %v923_v5 = vmax.f32 %v778_v63, %v819_v52  ;;  %v822_v10 = vrot.slane %v341_v60, 2  ;;  %v347_v54 = vld [vmem:[%s10535_s29 + $0x78] sm:$0xff] }
  0x28   : > { %v1025_v50 = vmax.f32 %v986_v47, %v816_v41  ;;  %v1056_v51 = vmax.f32 %v1024_v45, %v338_v25  ;;  %v988_v6 = vmax.f32 %v954_v62, %v444_v57  ;;  %v823_v11 = vrot.slane %v342_v61, 2  ;;  %v344_v25 = vld [vmem:[%s10535_s29 + $0x60] sm:$0xff]  ;;  %v346_v41 = vld [vmem:[%s10535_s29 + $0x70] sm:$0x3] }
  0x29   : > { %v1058_v8 = vmax.f32 %v1026_v0, %v341_v60  ;;  %v447_v9 = vsel %vm434_vm1, %v445_v3, %v446_v4  ;;  %v779_v13 = vmax.f32 %v339_v27, %v444_v57  ;;  %v955_v15 = vmax.f32 %v923_v5, %v341_v60 }
  0x2a   : > { %v1098_v55 = vmax.f32 %v1056_v51, %v442_v48  ;;  %v1057_v56 = vmax.f32 %v1025_v50, %v339_v27  ;;  %v1027_v14 = vmax.f32 %v988_v6, %v821_v2  ;;  %v824_v17 = vsel %vm806_vm2, %v822_v10, %v823_v11  ;;  %v349_v6 = vld [vmem:[%s10535_s29 + $0x88] sm:$0x3] }
  0x2b   : > { %v1100_v16 = vmax.f32 %v1058_v8, %v447_v9  ;;  %v448_v18 = vrot.slane %v343_v12, 1  ;;  %v924_v19 = vmax.f32 %v779_v13, %v821_v2  ;;  %v989_v20 = vmax.f32 %v955_v15, %v447_v9 }
  0x2c   : > { %v1137_v59 = vmax.f32 %v1098_v55, %v819_v52  ;;  %v1099_v1 = vmax.f32 %v1057_v56, %v444_v57  ;;  %v1059_v22 = vmax.f32 %v1027_v14, %v342_v61  ;;  %v825_v24 = vrot.slane %v343_v12, 2  ;;  %v348_v55 = vld [vmem:[%s10535_s29 + $0x80] sm:$0xff] }
  0x2d   : > { %v1139_v21 = vmax.f32 %v1100_v16, %v824_v17  ;;  %v449_v23 = vsel %vm434_vm1, %v446_v4, %v448_v18  ;;  %v780_v27 = vmax.f32 %v341_v60, %v447_v9  ;;  %v1028_v28 = vmax.f32 %v989_v20, %v824_v17  ;;  %v351_v20 = vld [vmem:[%s10535_s29 + $0x98] sm:$0xff] }
  0x2e   : > { %8990 = vmatmul.msk.f32.vlgmr.msra.gmra.mxu1 %vm520_vm3, %v1137_v59  ;;  %v1138_v7 = vmax.f32 %v1099_v1, %v821_v2  ;;  %v956_v29 = vmax.f32 %v924_v19, %v342_v61  ;;  %v1101_v30 = vmax.f32 %v1059_v22, %v449_v23  ;;  %v826_v31 = vsel %vm806_vm2, %v823_v11, %v825_v24  ;;  %v350_v19 = vld [vmem:[%s10535_s29 + $0x90] sm:$0xff] }
  0x2f   : > { %8959 = vmatmul.msk.f32.gmra.mxu0 %vm520_vm3, %v442_v48  ;;  %v450_v32 = vrot.slane %v344_v25, 1  ;;  %v451_v33 = vrot.slane %v345_v26, 1  ;;  %v925_v34 = vmax.f32 %v780_v27, %v824_v17  ;;  %v1060_v37 = vmax.f32 %v1028_v28, %v344_v25 }
  0x30   : > { %v990_v35 = vmax.f32 %v956_v29, %v449_v23  ;;  %v1140_v36 = vmax.f32 %v1101_v30, %v826_v31  ;;  %v827_v39 = vrot.slane %v344_v25, 2  ;;  %v828_v40 = vrot.slane %v345_v26, 2 }
  0x31   : > { %v452_v38 = vsel %vm434_vm1, %v450_v32, %v451_v33  ;;  %v781_v42 = vmax.f32 %v342_v61, %v449_v23  ;;  %v957_v44 = vmax.f32 %v925_v34, %v344_v25  ;;  %v453_v47 = vrot.slane %v346_v41, 1 }
  0x32   : > { %v1029_v43 = vmax.f32 %v990_v35, %v826_v31  ;;  %v1102_v45 = vmax.f32 %v1060_v37, %v452_v38  ;;  %v829_v46 = vsel %vm806_vm2, %v827_v39, %v828_v40  ;;  %v830_v53 = vrot.slane %v346_v41, 2  ;;  %v352_v35 = vld [vmem:[%s10535_s29 + $0xa0] sm:$0x3] }
  0x33   : > { %v926_v48 = vmax.f32 %v781_v42, %v826_v31  ;;  %v991_v49 = vmax.f32 %v957_v44, %v452_v38  ;;  %v454_v52 = vsel %vm434_vm1, %v451_v33, %v453_v47  ;;  %v782_v56 = vmax.f32 %v344_v25, %v452_v38 }
  0x34   : > { %v1141_v50 = vmax.f32 %v1102_v45, %v829_v46  ;;  %v1061_v51 = vmax.f32 %v1029_v43, %v345_v26  ;;  %v831_v60 = vsel %vm806_vm2, %v828_v40, %v830_v53  ;;  %v455_v61 = vrot.slane %v347_v54, 1 }
  0x35   : > { %v958_v58 = vmax.f32 %v926_v48, %v345_v26  ;;  %v456_v62 = vrot.slane %v348_v55, 1  ;;  %v927_v63 = vmax.f32 %v782_v56, %v829_v46  ;;  %v832_v4 = vrot.slane %v347_v54, 2  ;;  %v353_v48 = vld [vmem:[%s10535_s29 + $0xa8] sm:$0xff] }
  0x36   : > { %8991 = vmatmul.msk.f32.gmra.mxu1 %vm520_vm3, %v1138_v7  ;;  %v1103_v59 = vmax.f32 %v1061_v51, %v454_v52  ;;  %v833_v5 = vrot.slane %v348_v55, 2  ;;  %v783_v7 = vmax.f32 %v345_v26, %v454_v52  ;;  %v458_v12 = vrot.slane %v349_v6, 1 }
  0x37   : > { %8960 = vmatmul.msk.f32.gmra.mxu0 %vm520_vm3, %v444_v57  ;;  %v1030_v57 = vmax.f32 %v991_v49, %v829_v46  ;;  %v992_v0 = vmax.f32 %v958_v58, %v454_v52  ;;  %v457_v3 = vsel %vm434_vm1, %v455_v61, %v456_v62  ;;  %v835_v18 = vrot.slane %v349_v6, 2  ;;  %v354_v49 = vld [vmem:[%s10535_s29 + $0xb0] sm:$0xff] }
  0x38   : > { %v1142_v1 = vmax.f32 %v1103_v59, %v831_v60  ;;  %v834_v11 = vsel %vm806_vm2, %v832_v4, %v833_v5  ;;  %v928_v13 = vmax.f32 %v783_v7, %v831_v60  ;;  %v459_v17 = vsel %vm434_vm1, %v456_v62, %v458_v12 }
  0x39   : > { %v1062_v2 = vmax.f32 %v1030_v57, %v347_v54  ;;  %v1031_v8 = vmax.f32 %v992_v0, %v831_v60  ;;  %v836_v25 = vsel %vm806_vm2, %v833_v5, %v835_v18  ;;  %v460_v26 = vrot.slane %v350_v19, 1  ;;  %v355_v0 = vld [vmem:[%s10535_s29 + $0xb8] sm:$0x3] }
  0x3a   : > { %v461_v27 = vrot.slane %v351_v20, 1  ;;  %v837_v33 = vrot.slane %v350_v19, 2  ;;  %v838_v34 = vrot.slane %v351_v20, 2  ;;  %v463_v41 = vrot.slane %v352_v35, 1 }
  0x3b   : > { %v1104_v10 = vmax.f32 %v1062_v2, %v457_v3  ;;  %v1063_v16 = vmax.f32 %v1031_v8, %v348_v55  ;;  %v840_v47 = vrot.slane %v352_v35, 2  ;;  %v466_v56 = vrot.slane %v354_v49, 1 }
  0x3c   : > { %v462_v32 = vsel %vm434_vm1, %v460_v26, %v461_v27  ;;  %v839_v40 = vsel %vm806_vm2, %v837_v33, %v838_v34  ;;  %v464_v46 = vsel %vm434_vm1, %v461_v27, %v463_v41  ;;  %v842_v62 = vrot.slane %v353_v48, 2 }
  0x3d   : > { %v1143_v15 = vmax.f32 %v1104_v10, %v834_v11  ;;  %v1105_v24 = vmax.f32 %v1063_v16, %v459_v17  ;;  %v468_v6 = vrot.slane %v355_v0, 1  ;;  %v845_v12 = vrot.slane %v355_v0, 2 }
  0x3e   : > { %8992 = vmatmul.msk.f32.gmra.mxu1 %vm520_vm3, %v1139_v21  ;;  %v784_v21 = vmax.f32 %v347_v54, %v457_v3 }
  0x3f   : > { %8961 = vmatmul.msk.f32.gmra.mxu0 %vm520_vm3, %v447_v9  ;;  %v959_v9 = vmax.f32 %v927_v63, %v347_v54  ;;  %v1144_v30 = vmax.f32 %v1105_v24, %v836_v25  ;;  %v841_v54 = vsel %vm806_vm2, %v838_v34, %v840_v47  ;;  %v843_v63 = vrot.slane %v354_v49, 2 }
  0x40   : > { %v929_v28 = vmax.f32 %v784_v21, %v834_v11 }
  0x41   : > { %v993_v14 = vmax.f32 %v959_v9, %v457_v3  ;;  %v844_v5 = vsel %vm806_vm2, %v842_v62, %v843_v63 }
  0x43   : > { %v1032_v22 = vmax.f32 %v993_v14, %v834_v11  ;;  %v469_v11 = vsel %vm434_vm1, %v466_v56, %v468_v6  ;;  %v357_v14 = vld [vmem:[%s10535_s29 + $0xc8] sm:$0xff] }
  0x44   : > { %v471_v21 = vrot.slane %v357_v14, 1 }
  0x45   : > { %v1064_v31 = vmax.f32 %v1032_v22, %v350_v19 }
  0x46   : > { %8993 = vmatmul.msk.f32.gmra.mxu1 %vm520_vm3, %v1140_v36  ;;  %v785_v36 = vmax.f32 %v348_v55, %v459_v17 }
  0x47   : > { %8962 = vmatmul.msk.f32.gmra.mxu0 %vm520_vm3, %v449_v23  ;;  %v960_v23 = vmax.f32 %v928_v13, %v348_v55  ;;  %v1106_v39 = vmax.f32 %v1064_v31, %v462_v32  ;;  %v465_v55 = vrot.slane %v353_v48, 1  ;;  %v356_v13 = vld [vmem:[%s10535_s29 + $0xc0] sm:$0xff] }
  0x48   : > { %v930_v42 = vmax.f32 %v785_v36, %v836_v25  ;;  %v847_v27 = vrot.slane %v356_v13, 2 }
  0x49   : > { %v994_v29 = vmax.f32 %v960_v23, %v459_v17  ;;  %v1145_v44 = vmax.f32 %v1106_v39, %v839_v40  ;;  %v467_v61 = vsel %vm434_vm1, %v465_v55, %v466_v56 }
  0x4b   : > { %v1033_v37 = vmax.f32 %v994_v29, %v836_v25  ;;  %v358_v29 = vld [vmem:[%s10535_s29 + $0xd0] sm:$0x3] }
  0x4c   : > { %v473_v35 = vrot.slane %v358_v29, 1  ;;  %v850_v41 = vrot.slane %v358_v29, 2 }
  0x4d   : > { %v1065_v45 = vmax.f32 %v1033_v37, %v351_v20 }
  0x4e   : > { %8994 = vmatmul.msk.f32.gmra.mxu1 %vm520_vm3, %v1141_v50  ;;  %v786_v50 = vmax.f32 %v350_v19, %v462_v32 }
  0x4f   : > { %8963 = vmatmul.msk.f32.gmra.mxu0 %vm520_vm3, %v452_v38  ;;  %v961_v38 = vmax.f32 %v929_v28, %v350_v19  ;;  %v1107_v53 = vmax.f32 %v1065_v45, %v464_v46  ;;  %v846_v19 = vsel %vm806_vm2, %v843_v63, %v845_v12  ;;  %v848_v28 = vrot.slane %v357_v14, 2 }
  0x50   : > { %v931_v57 = vmax.f32 %v786_v50, %v839_v40 }
  0x51   : > { %v995_v43 = vmax.f32 %v961_v38, %v462_v32  ;;  %v1146_v59 = vmax.f32 %v1107_v53, %v841_v54  ;;  %v849_v34 = vsel %vm806_vm2, %v847_v27, %v848_v28 }
  0x53   : > { %v1034_v51 = vmax.f32 %v995_v43, %v839_v40  ;;  %v474_v40 = vsel %vm434_vm1, %v471_v21, %v473_v35  ;;  %v10627_v43 = vld [vmem:[%s10535_s29 + $0xe0] sm:$0xff] }
  0x54   : > { %v476_v50 = vrot.slane %v10627_v43, 1 }
  0x55   : > { %v1066_v60 = vmax.f32 %v1034_v51, %v353_v48 }
  0x56   : > { %8995 = vmatmul.msk.f32.gmra.mxu1 %vm520_vm3, %v1142_v1  ;;  %v787_v1 = vmax.f32 %v351_v20, %v464_v46 }
  0x57   : > { %8964 = vmatmul.msk.f32.gmra.mxu0 %vm520_vm3, %v454_v52  ;;  %v962_v52 = vmax.f32 %v930_v42, %v351_v20  ;;  %v1108_v4 = vmax.f32 %v1066_v60, %v467_v61  ;;  %v470_v20 = vrot.slane %v356_v13, 1  ;;  %v359_v42 = vld [vmem:[%s10535_s29 + $0xd8] sm:$0xff] }
  0x58   : > { %v932_v7 = vmax.f32 %v787_v1, %v841_v54  ;;  %v852_v56 = vrot.slane %v359_v42, 2  ;;  %v10642_v1 = vld [vmem:[%s16453_s2] ss:$0 sm:$0xff] }
  0x59   : > { %v996_v58 = vmax.f32 %v962_v52, %v464_v46  ;;  %v1147_v9 = vmax.f32 %v1108_v4, %v844_v5  ;;  %v472_v26 = vsel %vm434_vm1, %v470_v20, %v471_v21 }
  0x5b   : > { %v1035_v2 = vmax.f32 %v996_v58, %v841_v54  ;;  %v361_v58 = vld [vmem:[%s10535_s29 + $0xe8] sm:$0x3] }
  0x5c   : > { %v478_v0 = vrot.slane %v361_v58, 1 }
  0x5d   : > { %v1067_v10 = vmax.f32 %v1035_v2, %v354_v49 }
  0x5e   : > { %8996 = vmatmul.msk.f32.gmra.mxu1 %vm520_vm3, %v1143_v15  ;;  %v788_v15 = vmax.f32 %v353_v48, %v467_v61  ;;  %v479_v6 = vsel %vm434_vm1, %v476_v50, %v478_v0 }
  0x5f   : > { %8965 = vmatmul.msk.f32.gmra.mxu0 %vm520_vm3, %v457_v3  ;;  %v963_v3 = vmax.f32 %v931_v57, %v353_v48  ;;  %v1109_v18 = vmax.f32 %v1067_v10, %v469_v11  ;;  %v851_v48 = vsel %vm806_vm2, %v848_v28, %v850_v41  ;;  %v853_v57 = vrot.slane %v10627_v43, 2  ;;  %v10648_v10 = vld [vmem:[%s10535_s29 + $0xf8] sm:$0xff]  ;;  %v364_v28 = vld [vmem:[%s10535_s29 + $0x100] sm:$0x3] }
  0x60   : > { %v933_v22 = vmax.f32 %v788_v15, %v844_v5 }
  0x61   : > { %v997_v8 = vmax.f32 %v963_v3, %v467_v61  ;;  %v1148_v24 = vmax.f32 %v1109_v18, %v846_v19  ;;  %v854_v63 = vsel %vm806_vm2, %v852_v56, %v853_v57 }
  0x63   : > { %v1036_v16 = vmax.f32 %v997_v8, %v844_v5 }
  0x65   : > { %v1068_v25 = vmax.f32 %v1036_v16, %v356_v13 }
  0x66   : > { %8997 = vmatmul.msk.f32.gmra.mxu1 %vm520_vm3, %v1144_v30  ;;  %v789_v30 = vmax.f32 %v354_v49, %v469_v11 }
  0x67   : > { %8966 = vmatmul.msk.f32.gmra.mxu0 %vm520_vm3, %v459_v17  ;;  %v964_v17 = vmax.f32 %v932_v7, %v354_v49  ;;  %v1110_v33 = vmax.f32 %v1068_v25, %v472_v26  ;;  %v475_v49 = vrot.slane %v359_v42, 1  ;;  %v855_v7 = vrot.slane %v361_v58, 2 }
  0x68   : > { %v934_v36 = vmax.f32 %v789_v30, %v846_v19  ;;  %v793_v30 = vmax.f32 %v10627_v43, %v479_v6 }
  0x69   : > { %v998_v23 = vmax.f32 %v964_v17, %v469_v11  ;;  %v1149_v38 = vmax.f32 %v1110_v33, %v849_v34  ;;  %v477_v55 = vsel %vm434_vm1, %v475_v49, %v476_v50  ;;  %v856_v17 = vsel %vm806_vm2, %v853_v57, %v855_v7 }
  0x6a   : > { %v792_v12 = vmax.f32 %v359_v42, %v477_v55 }
  0x6b   : > { %v1037_v31 = vmax.f32 %v998_v23, %v846_v19  ;;  %v481_v19 = vrot.slane %v10648_v10, 1 }
  0x6c   : > { %v937_v20 = vmax.f32 %v792_v12, %v854_v63 }
  0x6d   : > { %v1069_v39 = vmax.f32 %v1037_v31, %v357_v14 }
  0x6e   : > { %8998 = vmatmul.msk.f32.gmra.mxu1 %vm520_vm3, %v1145_v44  ;;  %v790_v44 = vmax.f32 %v356_v13, %v472_v26 }
  0x6f   : > { %8967 = vmatmul.msk.f32.gmra.mxu0 %vm520_vm3, %v462_v32  ;;  %v965_v32 = vmax.f32 %v933_v22, %v356_v13  ;;  %v1111_v47 = vmax.f32 %v1069_v39, %v474_v40 }
  0x70   : > { %v935_v51 = vmax.f32 %v790_v44, %v849_v34 }
  0x71   : > { %v999_v37 = vmax.f32 %v965_v32, %v472_v26  ;;  %v1150_v53 = vmax.f32 %v1111_v47, %v851_v48 }
  0x73   : > { %v1038_v45 = vmax.f32 %v999_v37, %v849_v34  ;;  %v938_v37 = vmax.f32 %v793_v30, %v856_v17 }
  0x75   : > { %v1070_v54 = vmax.f32 %v1038_v45, %v359_v42  ;;  %v365_v45 = vld [vmem:[%s10535_s29 + $0x108] sm:$0xff]  ;;  %v970_v50 = vmax.f32 %v938_v37, %v10648_v10 }
  0x76   : > { %8999 = vmatmul.msk.f32.gmra.mxu1 %vm520_vm3, %v1146_v59  ;;  %v791_v59 = vmax.f32 %v357_v14, %v474_v40 }
  0x77   : > { %8968 = vmatmul.msk.f32.gmra.mxu0 %vm520_vm3, %v464_v46  ;;  %v966_v46 = vmax.f32 %v934_v36, %v357_v14  ;;  %v1112_v62 = vmax.f32 %v1070_v54, %v477_v55  ;;  %v483_v36 = vrot.slane %v364_v28, 1  ;;  %v485_v54 = vrot.slane %v365_v45, 1 }
  0x78   : > { %v936_v2 = vmax.f32 %v791_v59, %v851_v48 }
  0x79   : > { %v1000_v52 = vmax.f32 %v966_v46, %v474_v40  ;;  %v1151_v4 = vmax.f32 %v1112_v62, %v854_v63  ;;  %v10678_v46 = vld [vmem:[%s10535_s29 + $0x110] sm:$0xff]  ;;  %v862_v62 = vrot.slane %v365_v45, 2 }
  0x7a   : > { %v968_v14 = vmax.f32 %v936_v2, %v10627_v43  ;;  %v367_v2 = vld [vmem:[%s10535_s29 + $0x118] sm:$0x3] }
  0x7b   : > { %v1039_v60 = vmax.f32 %v1000_v52, %v851_v48 }
  0x7c   : > { %v1002_v21 = vmax.f32 %v968_v14, %v479_v6 }
  0x7d   : > { %v1071_v5 = vmax.f32 %v1039_v60, %v10627_v43  ;;  %v860_v43 = vrot.slane %v364_v28, 2 }
  0x7e   : > { %9000 = vmatmul.msk.f32.gmra.mxu1 %vm520_vm3, %v1147_v9  ;;  %v362_v9 = vld [vmem:[%s10535_s29 + $0xf0] sm:$0xff]  ;;  %v1041_v31 = vmax.f32 %v1002_v21, %v856_v17  ;;  %v10710_v21 = vld [vmem:[%s10535_s29 + $0x128] sm:$0xff] }
  0x7f   : > { %8969 = vmatmul.msk.f32.gmra.mxu0 %vm520_vm3, %v467_v61  ;;  %v967_v61 = vmax.f32 %v935_v51, %v359_v42  ;;  %v1113_v15 = vmax.f32 %v1071_v5, %v479_v6  ;;  %v480_v18 = vrot.slane %v362_v9, 1  ;;  %v857_v25 = vrot.slane %v362_v9, 2 }
  0x80   : > { %v969_v32 = vmax.f32 %v937_v20, %v362_v9  ;;  %v484_v42 = vsel %vm434_vm1, %v481_v19, %v483_v36  ;;  %v368_v20 = vld [vmem:[%s10535_s29 + $0x120] sm:$0xff]  ;;  %v491_v30 = vrot.slane %v10710_v21, 1 }
  0x81   : > { %v1001_v3 = vmax.f32 %v967_v61, %v477_v55  ;;  %v1152_v22 = vmax.f32 %v1113_v15, %v856_v17  ;;  %v1004_v57 = vmax.f32 %v970_v50, %v484_v42 }
  0x83   : > { %v1040_v13 = vmax.f32 %v1001_v3, %v854_v63  ;;  %v863_v63 = vrot.slane %v10678_v46, 2 }
  0x85   : > { %v1072_v23 = vmax.f32 %v1040_v13, %v362_v9 }
  0x86   : > { %9001 = vmatmul.msk.f32.gmra.mxu1 %vm520_vm3, %v1148_v24  ;;  %v482_v24 = vsel %vm434_vm1, %v480_v18, %v481_v19  ;;  %v865_v18 = vrot.slane %v367_v2, 2 }
  0x87   : > { %8970 = vmatmul.msk.f32.gmra.mxu0 %vm520_vm3, %v469_v11  ;;  %v1114_v33 = vmax.f32 %v1072_v23, %v482_v24  ;;  %v794_v48 = vmax.f32 %v362_v9, %v482_v24  ;;  %v864_v9 = vsel %vm806_vm2, %v862_v62, %v863_v63  ;;  %v10742_v62 = vld [vmem:[%s10535_s29 + $0x140] sm:$0xff] }
  0x88   : > { %v866_v28 = vsel %vm806_vm2, %v863_v63, %v865_v18 }
  0x8e   : > { %9002 = vmatmul.msk.f32.gmra.mxu1 %vm520_vm3, %v1149_v38  ;;  %v1003_v38 = vmax.f32 %v969_v32, %v482_v24 }
  0x8f   : > { %8971 = vmatmul.msk.f32.gmra.mxu0 %vm520_vm3, %v472_v26  ;;  %v858_v26 = vrot.slane %v10648_v10, 2 }
  0x91   : > { %v859_v35 = vsel %vm806_vm2, %v857_v25, %v858_v26 }
  0x92   : > { %v1153_v39 = vmax.f32 %v1114_v33, %v859_v35  ;;  %v1042_v49 = vmax.f32 %v1003_v38, %v859_v35  ;;  %v939_v56 = vmax.f32 %v794_v48, %v859_v35  ;;  %v867_v38 = vrot.slane %v368_v20, 2 }
  0x94   : > { %v1074_v59 = vmax.f32 %v1042_v49, %v365_v45 }
  0x96   : > { %9003 = vmatmul.msk.f32.gmra.mxu1 %vm520_vm3, %v1150_v53  ;;  %v861_v53 = vsel %vm806_vm2, %v858_v26, %v860_v43 }
  0x97   : > { %8972 = vmatmul.msk.f32.gmra.mxu0 %vm520_vm3, %v474_v40  ;;  %v1073_v40 = vmax.f32 %v1041_v31, %v10648_v10  ;;  %v1043_v5 = vmax.f32 %v1004_v57, %v861_v53 }
  0x99   : > { %v1115_v51 = vmax.f32 %v1073_v40, %v484_v42  ;;  %v1075_v14 = vmax.f32 %v1043_v5, %v10678_v46 }
  0x9b   : > { %v1154_v58 = vmax.f32 %v1115_v51, %v861_v53 }
  0x9c   : > { %v606_v8 = vpop.f32.mrf.mxu0 }
  0x9d   : > { %v607_v11 = vadd.f32 %v10642_v1, %v606_v8 }
  0x9e   : > { %9004 = vmatmul.msk.f32.gmra.mxu1 %vm520_vm3, %v1151_v4  ;;  %v795_v4 = vmax.f32 %v10648_v10, %v484_v42 }
  0x9f   : > { %v10653_v16 = vmax.f32 %v607_v11, 0.0  ;;  %8973 = vmatmul.msk.f32.gmra.mxu0 %vm520_vm3, %v477_v55  ;;  %v486_v55 = vrot.slane %v10678_v46, 1  ;;  %v488_v11 = vrot.slane %v367_v2, 1 }
  0xa0   : > { %v940_v12 = vmax.f32 %v795_v4, %v861_v53 }
  0xa1   : > { %16871 = vst [vmem:[#allocation7_spill] sm:$0xff] %v10653_v16  ;;  %1505 = vrot.lane.b32.xlu0 %v10653_v16, %s10416_s17  ;;  %v487_v61 = vsel %vm434_vm1, %v485_v54, %v486_v55  ;;  %v489_v17 = vsel %vm434_vm1, %v486_v55, %v488_v11 }
  0xa2   : > { %v1116_v7 = vmax.f32 %v1074_v59, %v487_v61  ;;  %v796_v23 = vmax.f32 %v365_v45, %v487_v61  ;;  %v972_v25 = vmax.f32 %v940_v12, %v10678_v46  ;;  %v1117_v26 = vmax.f32 %v1075_v14, %v489_v17 }
  0xa4   : > { %v609_v27 = vpop.f32.mrf.mxu0  ;;  %v1155_v10 = vmax.f32 %v1116_v7, %v864_v9  ;;  %v941_v31 = vmax.f32 %v796_v23, %v864_v9  ;;  %v1006_v32 = vmax.f32 %v972_v25, %v489_v17  ;;  %v1156_v33 = vmax.f32 %v1117_v26, %v866_v28 }
  0xa5   : > { %v610_v29 = vadd.f32 %v10642_v1, %v609_v27 }
  0xa6   : > { %9005 = vmatmul.msk.f32.gmra.mxu1 %vm520_vm3, %v1152_v22 }
  0xa7   : > { %v10666_v34 = vmax.f32 %v610_v29, 0.0  ;;  %8974 = vmatmul.msk.f32.gmra.mxu0 %vm520_vm3, %v479_v6  ;;  %v971_v6 = vmax.f32 %v939_v56, %v365_v45  ;;  %v490_v29 = vrot.slane %v368_v20, 1  ;;  %v1045_v45 = vmax.f32 %v1006_v32, %v866_v28 }
  0xa9   : > { %16872 = vst [vmem:[#allocation8_spill] sm:$0xff] %v10666_v34  ;;  %1507 = vrot.lane.b32.xlu0 %v10666_v34, %s10416_s17  ;;  %v1005_v13 = vmax.f32 %v971_v6, %v487_v61  ;;  %v492_v37 = vsel %vm434_vm1, %v490_v29, %v491_v30  ;;  %v1077_v55 = vmax.f32 %v1045_v45, %v10710_v21 }
  0xab   : > { %v10673_v41 = vpop.f32.mrf.mxu1 }
  0xac   : > { %v612_v44 = vpop.f32.mrf.mxu0 }
  0xad   : > { %v613_v47 = vadd.f32 %v10642_v1, %v612_v44  ;;  %v797_v44 = vmax.f32 %v10678_v46, %v489_v17 }
  0xae   : > { %9006 = vmatmul.msk.f32.gmra.mxu1 %vm520_vm3, %v1153_v39  ;;  %v868_v39 = vrot.slane %v10710_v21, 2 }
  0xaf   : > { %v10683_v52 = vmax.f32 %v613_v47, 0.0  ;;  %8975 = vmatmul.msk.f32.gmra.mxu0 %vm520_vm3, %v482_v24  ;;  %v1044_v24 = vmax.f32 %v1005_v13, %v864_v9  ;;  %v973_v47 = vmax.f32 %v941_v31, %v368_v20  ;;  %v942_v53 = vmax.f32 %v797_v44, %v866_v28 }
  0xb0   : > { %v869_v50 = vsel %vm806_vm2, %v867_v38, %v868_v39  ;;  %v496_v9 = vrot.slane %v10742_v62, 1 }
  0xb1   : > { %16873 = vst [vmem:[#allocation9_spill] sm:$0xff] %v10683_v52  ;;  %1509 = vrot.lane.b32.xlu1 %v10683_v52, %s10416_s17  ;;  %v1076_v35 = vmax.f32 %v1044_v24, %v368_v20  ;;  %v1007_v54 = vmax.f32 %v973_v47, %v492_v37 }
  0xb3   : > { %v10690_v60 = vpop.f32.mrf.mxu1  ;;  %v1118_v48 = vmax.f32 %v1076_v35, %v492_v37  ;;  %v1046_v2 = vmax.f32 %v1007_v54, %v869_v50 }
  0xb4   : > { %v615_v0 = vpop.f32.mrf.mxu0 }
  0xb5   : > { %v616_v3 = vadd.f32 %v10642_v1, %v615_v0  ;;  %v1157_v46 = vmax.f32 %v1118_v48, %v869_v50  ;;  %v798_v0 = vmax.f32 %v368_v20, %v492_v37 }
  0xb6   : > { %9007 = vmatmul.msk.f32.gmra.mxu1 %vm520_vm3, %v1154_v58 }
  0xb7   : > { %v10698_v8 = vmax.f32 %v616_v3, 0.0  ;;  %8976 = vmatmul.msk.f32.gmra.mxu0 %vm520_vm3, %v484_v42  ;;  %v370_v42 = vld [vmem:[%s10535_s29 + $0x130] sm:$0x3]  ;;  %v974_v3 = vmax.f32 %v942_v53, %v10710_v21  ;;  %v943_v11 = vmax.f32 %v798_v0, %v869_v50 }
  0xb8   : > { %v493_v51 = vrot.slane %v370_v42, 1  ;;  %v870_v58 = vrot.slane %v370_v42, 2  ;;  %v10773_v42 = vld [vmem:[%s10535_s29 + $0x150] sm:$0xff] }
  0xb9   : > { %16874 = vst [vmem:[#allocation10_spill] sm:$0xff] %v10698_v8  ;;  %1511 = vrot.lane.b32.xlu1 %v10698_v8, %s10416_s17  ;;  %v500_v54 = vrot.slane %v10773_v42, 1  ;;  %v877_v0 = vrot.slane %v10773_v42, 2 }
  0xba   : > { %v494_v57 = vsel %vm434_vm1, %v491_v30, %v493_v51  ;;  %v871_v6 = vsel %vm806_vm2, %v868_v39, %v870_v58 }
  0xbb   : > { %v10705_v15 = vpop.f32.mrf.mxu1  ;;  %v1119_v4 = vmax.f32 %v1077_v55, %v494_v57  ;;  %v1008_v12 = vmax.f32 %v974_v3, %v494_v57  ;;  %v799_v24 = vmax.f32 %v10710_v21, %v494_v57 }
  0xbc   : > { %v618_v19 = vpop.f32.mrf.mxu0 }
  0xbd   : > { %v619_v22 = vadd.f32 %v10642_v1, %v618_v19  ;;  %v1158_v13 = vmax.f32 %v1119_v4, %v871_v6  ;;  %v873_v19 = vrot.slane %v10742_v62, 2  ;;  %v1047_v25 = vmax.f32 %v1008_v12, %v871_v6  ;;  %v376_v4 = vld [vmem:[%s10535_s29 + $0x160] sm:$0x3] }
  0xbe   : > { %9008 = vmatmul.msk.f32.gmra.mxu1 %vm520_vm3, %v1155_v10  ;;  %v944_v32 = vmax.f32 %v799_v24, %v871_v6  ;;  %v16461_v6 = vmov 0.0  }
  0xbf   : > { %v10715_v27 = vmax.f32 %v619_v22, 0.0  ;;  %8977 = vmatmul.msk.f32.gmra.mxu0 %vm520_vm3, %v487_v61  ;;  %v371_v61 = vld [vmem:[%s10535_s29 + $0x138] sm:$0xff]  ;;  %v373_v22 = vld [vmem:[%s10535_s29 + $0x148] sm:$0x3]  ;;  %v1079_v35 = vmax.f32 %v1047_v25, %v10742_v62  ;;  %1418 = vst.msk [vmem:[#allocation2] sm:$0xff] %vm520_vm3, %v16461_v6 }
  0xc0   : > { %v495_v7 = vrot.slane %v371_v61, 1  ;;  %v1078_v10 = vmax.f32 %v1046_v2, %v371_v61  ;;  %v872_v18 = vrot.slane %v371_v61, 2  ;;  %v975_v26 = vmax.f32 %v943_v11, %v371_v61  ;;  %1419 = vst.msk [vmem:[#allocation2 + $0x8] sm:$0xff] %vm520_vm3, %v16461_v6 }
  0xc1   : > { %16875 = vst [vmem:[#allocation11_spill] sm:$0xff] %v10715_v27  ;;  %1513 = vrot.lane.b32.xlu2 %v10715_v27, %s10416_s17  ;;  %v498_v31 = vrot.slane %v373_v22, 1  ;;  %v875_v39 = vrot.slane %v373_v22, 2  ;;  %v976_v48 = vmax.f32 %v944_v32, %v10742_v62  ;;  %v10838_v32 = vld [vmem:[%s10535_s29 + $0x170] sm:$0xff] }
  0xc2   : > { %v874_v30 = vsel %vm806_vm2, %v872_v18, %v873_v19  ;;  %1422 = vst.msk [vmem:[#allocation2 + $0x18] sm:$0xff] %vm520_vm3, %v16461_v6  ;;  %v503_v18 = vrot.slane %v376_v4, 1 }
  0xc3   : > { %v10722_v36 = vpop.f32.mrf.mxu1  ;;  %v499_v38 = vsel %vm434_vm1, %v496_v9, %v498_v31  ;;  %v876_v53 = vsel %vm806_vm2, %v873_v19, %v875_v39  ;;  %1423 = vst.msk [vmem:[#allocation2 + $0x20] sm:$0xff] %vm520_vm3, %v16461_v6  ;;  %v1688_v19 = vld [vmem:[%s16456_s5] sm:$0xf]  ;;  %v10835_v31 = vld [vmem:[%s10535_s29 + $0x168] sm:$0xff] }
  0xc4   : > { %v621_v40 = vpop.f32.mrf.mxu0  ;;  %v1121_v50 = vmax.f32 %v1079_v35, %v499_v38  ;;  %1425 = vst.msk [vmem:[#allocation2 + $0x30] sm:$0xff] %vm520_vm3, %v16461_v6  ;;  %9056 = vmatpush.msk.msra.mxu3 %vm585_vm0, %v1688_v19  ;;  %v9089_v19 = vld [vmem:[%s16456_s5 + $0x8] sm:$0xf] }
  0xc5   : > { %v622_v43 = vadd.f32 %v10642_v1, %v621_v40  ;;  %1426 = vst.msk [vmem:[#allocation2 + $0x38] sm:$0xff] %vm520_vm3, %v16461_v6  ;;  %9090 = vmatpush.msk.msrb.mxu0 %vm585_vm0, %v9089_v19 }
  0xc6   : > { %9009 = vmatmul.msk.f32.gmra.mxu1 %vm520_vm3, %v1156_v33  ;;  %v1160_v58 = vmax.f32 %v1121_v50, %v876_v53  ;;  %1428 = vst.msk [vmem:[#allocation2 + $0x48] sm:$0xff] %vm520_vm3, %v16461_v6 }
  0xc7   : > { %v10730_v49 = vmax.f32 %v622_v43, 0.0  ;;  %8978 = vmatmul.msk.f32.gmra.mxu0 %vm520_vm3, %v489_v17  ;;  %v497_v17 = vsel %vm434_vm1, %v495_v7, %v496_v9  ;;  %v10776_v43 = vld [vmem:[%s10535_s29 + $0x158] sm:$0xff]  ;;  %v801_v9 = vmax.f32 %v10742_v62, %v499_v38  ;;  %1429 = vst.msk [vmem:[#allocation2 + $0x50] sm:$0xff] %vm520_vm3, %v16461_v6 }
  0xc8   : > { %v1120_v28 = vmax.f32 %v1078_v10, %v497_v17  ;;  %v1009_v33 = vmax.f32 %v975_v26, %v497_v17  ;;  %v800_v45 = vmax.f32 %v371_v61, %v497_v17  ;;  %v878_v2 = vrot.slane %v10776_v43, 2  ;;  %1431 = vst.msk [vmem:[#allocation2 + $0x60] sm:$0xff] %vm520_vm3, %v16461_v6 }
  0xc9   : > { %16876 = vst [vmem:[#allocation12_spill] sm:$0xff] %v10730_v49  ;;  %1515 = vrot.lane.b32.xlu2 %v10730_v49, %s10416_s17  ;;  %v946_v62 = vmax.f32 %v801_v9, %v876_v53  ;;  %v880_v26 = vrot.slane %v376_v4, 2  ;;  %v9022_v9 = vld [vmem:[%s16456_s5 + $0x4] sm:$0xf] }
  0xca   : > { %v1159_v21 = vmax.f32 %v1120_v28, %v874_v30  ;;  %v1048_v47 = vmax.f32 %v1009_v33, %v874_v30  ;;  %v945_v55 = vmax.f32 %v800_v45, %v874_v30  ;;  %v10830_v28 = vld [vmem:[#allocation2] sm:$0xff]  ;;  %1432 = vst.msk [vmem:[#allocation2 + $0x68] sm:$0xff] %vm520_vm3, %v16461_v6  ;;  %v505_v45 = vrot.slane %v10835_v31, 1  ;;  %9023 = vmatpush.msk.msra.mxu2 %vm585_vm0, %v9022_v9 }
  0xcb   : > { %v10737_v56 = vpop.f32.mrf.mxu1  ;;  %9057 = vmatmul.msk.f32.vlgmr.msra.gmra.mxu3 %vm520_vm3, %v10830_v28  ;;  %1434 = vst.msk [vmem:[#allocation2 + $0x78] sm:$0xff] %vm520_vm3, %v16461_v6 }
  0xcc   : > { %v624_v59 = vpop.f32.mrf.mxu0  ;;  %v977_v12 = vmax.f32 %v945_v55, %v10773_v42  ;;  %1435 = vst.msk [vmem:[#allocation2 + $0x80] sm:$0xff] %vm520_vm3, %v16461_v6 }
  0xcd   : > { %v625_v63 = vadd.f32 %v10642_v1, %v624_v59  ;;  %v1080_v59 = vmax.f32 %v1048_v47, %v10773_v42  ;;  %v506_v47 = vrot.slane %v10838_v32, 1  ;;  %1437 = vst.msk [vmem:[#allocation2 + $0x90] sm:$0xff] %vm520_vm3, %v16461_v6 }
  0xce   : > { %9010 = vmatmul.msk.f32.gmra.mxu1 %vm520_vm3, %v1157_v46  ;;  %v501_v46 = vrot.slane %v10776_v43, 1  ;;  %1438 = vst.msk [vmem:[#allocation2 + $0x98] sm:$0xff] %vm520_vm3, %v16461_v6 }
  0xcf   : > { %v10747_v5 = vmax.f32 %v625_v63, 0.0  ;;  %8979 = vmatmul.msk.f32.gmra.mxu0 %vm520_vm3, %v492_v37  ;;  %1440 = vst.msk [vmem:[#allocation2 + $0xa8] sm:$0xff] %vm520_vm3, %v16461_v6  ;;  %v10875_v55 = vsel %vm434_vm1, %v505_v45, %v506_v47 }
  0xd0   : > { %v502_v63 = vsel %vm434_vm1, %v500_v54, %v501_v46  ;;  %v10828_v25 = vsel %vm434_vm1, %v501_v46, %v503_v18  ;;  %v1737_v54 = vrot.slane %v10830_v28, 1  ;;  %1441 = vst.msk [vmem:[#allocation2 + $0xb0] sm:$0xff] %vm520_vm3, %v16461_v6 }
  0xd1   : > { %16877 = vst [vmem:[#allocation13_spill] sm:$0xff] %v10747_v5  ;;  %1517 = vrot.lane.b32.xlu0 %v10747_v5, %s10416_s17  ;;  %v802_v35 = vmax.f32 %v10773_v42, %v502_v63  ;;  %v803_v4 = vmax.f32 %v10776_v43, %v10828_v25 }
  0xd2   : > { %1443 = vst.msk [vmem:[#allocation2 + $0xc0] sm:$0xff] %vm520_vm3, %v16461_v6 }
  0xd3   : > { %v10754_v14 = vpop.f32.mrf.mxu1  ;;  %1444 = vst.msk [vmem:[#allocation2 + $0xc8] sm:$0xff] %vm520_vm3, %v16461_v6 }
  0xd4   : > { %v627_v20 = vpop.f32.mrf.mxu0  ;;  %1446 = vst.msk [vmem:[#allocation2 + $0xd8] sm:$0xff] %vm520_vm3, %v16461_v6 }
  0xd5   : > { %v628_v23 = vadd.f32 %v10642_v1, %v627_v20  ;;  %v1011_v20 = vmax.f32 %v977_v12, %v502_v63  ;;  %1447 = vst.msk [vmem:[#allocation2 + $0xe0] sm:$0xff] %vm520_vm3, %v16461_v6 }
  0xd6   : > { %9011 = vmatmul.msk.f32.gmra.mxu1 %vm520_vm3, %v1158_v13  ;;  %v1122_v13 = vmax.f32 %v1080_v59, %v502_v63  ;;  %v10881_v59 = vld [vmem:[#allocation2 + $0x8] sm:$0xff]  ;;  %1449 = vst.msk [vmem:[#allocation2 + $0xf0] sm:$0xff] %vm520_vm3, %v16461_v6 }
  0xd7   : > { %v10762_v29 = vmax.f32 %v628_v23, 0.0  ;;  %8980 = vmatmul.msk.f32.gmra.mxu0 %vm520_vm3, %v494_v57  ;;  %v1010_v57 = vmax.f32 %v976_v48, %v499_v38  ;;  %9058 = vmatmul.msk.f32.gmra.mxu3 %vm520_vm3, %v10881_v59  ;;  %1450 = vst.msk [vmem:[#allocation2 + $0xf8] sm:$0xff] %vm520_vm3, %v16461_v6 }
  0xd8   : > { %1452 = vst.msk [vmem:[#allocation2 + $0x108] sm:$0xff] %vm520_vm3, %v16461_v6 }
  0xd9   : > { %16878 = vst [vmem:[#allocation14_spill] sm:$0xff] %v10762_v29  ;;  %1519 = vrot.lane.b32.xlu1 %v10762_v29, %s10416_s17  ;;  %v1049_v11 = vmax.f32 %v1010_v57, %v876_v53  ;;  %v882_v57 = vrot.slane %v10835_v31, 2 }
  0xda   : > { %1453 = vst.msk [vmem:[#allocation2 + $0x110] sm:$0xff] %vm520_vm3, %v16461_v6 }
  0xdb   : > { %v10769_v37 = vpop.f32.mrf.mxu1  ;;  %v1081_v23 = vmax.f32 %v1049_v11, %v10776_v43  ;;  %1455 = vst.msk [vmem:[#allocation2 + $0x120] sm:$0xff] %vm520_vm3, %v16461_v6 }
  0xdc   : > { %v630_v40 = vpop.f32.mrf.mxu0  ;;  %1456 = vst.msk [vmem:[#allocation2 + $0x128] sm:$0xff] %vm520_vm3, %v16461_v6 }
  0xdd   : > { %v631_v44 = vadd.f32 %v10642_v1, %v630_v40  ;;  %v1123_v39 = vmax.f32 %v1081_v23, %v10828_v25  ;;  %v9123_v23 = vld [vmem:[%s16456_s5 + $0xc] sm:$0xf]  ;;  %1458 = vst.msk [vmem:[#allocation2 + $0x138] sm:$0xff] %vm520_vm3, %v16461_v6 }
  0xde   : > { %9012 = vmatmul.msk.f32.gmra.mxu1 %vm520_vm3, %v1159_v21  ;;  %v978_v21 = vmax.f32 %v946_v62, %v10776_v43  ;;  %v9157_v62 = vld [vmem:[%s16456_s5 + $0x10] sm:$0xf]  ;;  %1459 = vst.msk [vmem:[#allocation2 + $0x140] sm:$0xff] %vm520_vm3, %v16461_v6 }
  0xdf   : > { %v10781_v51 = vmax.f32 %v631_v44, 0.0  ;;  %8981 = vmatmul.msk.f32.gmra.mxu0 %vm520_vm3, %v497_v17  ;;  %v879_v17 = vsel %vm806_vm2, %v877_v0, %v878_v2  ;;  %v881_v44 = vsel %vm806_vm2, %v878_v2, %v880_v26  ;;  %v379_v0 = vld [vmem:[%s10535_s29 + $0x178] sm:$0x3]  ;;  %v1738_v2 = vrot.slane %v10881_v59, 1  ;;  %9158 = vmatpush.msk.msrb.mxu2 %vm585_vm0, %v9157_v62  ;;  %1461 = vst.msk [vmem:[#allocation2 + $0x150] sm:$0xff] %vm520_vm3, %v16461_v6 }
  0xe0   : > { %v1161_v22 = vmax.f32 %v1122_v13, %v879_v17  ;;  %v1012_v42 = vmax.f32 %v978_v21, %v10828_v25  ;;  %v947_v48 = vmax.f32 %v802_v35, %v879_v17  ;;  %v1162_v50 = vmax.f32 %v1123_v39, %v881_v44  ;;  %9124 = vmatpush.msk.msrb.mxu1 %vm585_vm0, %v9123_v23  ;;  %v380_v39 = vld [vmem:[%s10535_s29 + $0x180] sm:$0xff] }
  0xe1   : > { %16879 = vst [vmem:[#allocation15_spill] sm:$0xff] %v10781_v51  ;;  %1521 = vrot.lane.b32.xlu2 %v10781_v51, %s10416_s17  ;;  %v1739_v43 = vsel %vm434_vm1, %v1737_v54, %v1738_v2  ;;  %v508_v18 = vrot.slane %v379_v0, 1  ;;  %v885_v35 = vrot.slane %v379_v0, 2 }
  0xe2   : > { %v979_v11 = vmax.f32 %v947_v48, %v10835_v31  ;;  %9024 = vmatmul.msk.f32.vlgmr.msra.gmra.mxu2 %vm520_vm3, %v1739_v43  ;;  %1462 = vst.msk [vmem:[#allocation2 + $0x158] sm:$0xff] %vm520_vm3, %v16461_v6 }
  0xe3   : > { %v10790_v61 = vpop.f32.mrf.mxu1  ;;  %v509_v21 = vsel %vm434_vm1, %v506_v47, %v508_v18  ;;  %1464 = vst.msk [vmem:[#allocation2 + $0x168] sm:$0xff] %vm520_vm3, %v16461_v6 }
  0xe4   : > { %v633_v3 = vpop.f32.mrf.mxu0  ;;  %1465 = vst.msk [vmem:[#allocation2 + $0x170] sm:$0xff] %vm520_vm3, %v16461_v6 }
  0xe5   : > { %v634_v7 = vadd.f32 %v10642_v1, %v633_v3  ;;  %1467 = vst.msk [vmem:[#allocation2 + $0x180] sm:$0xff] %vm520_vm3, %v16461_v6 }
  0xe6   : > { %9013 = vmatmul.msk.f32.gmra.mxu1 %vm520_vm3, %v1160_v58  ;;  %v883_v58 = vrot.slane %v10838_v32, 2  ;;  %1468 = vst.msk [vmem:[#allocation2 + $0x188] sm:$0xff] %vm520_vm3, %v16461_v6 }
  0xe7   : > { %v10806_v10 = vmax.f32 %v634_v7, 0.0  ;;  %8982 = vmatmul.msk.f32.gmra.mxu0 %vm520_vm3, %v499_v38  ;;  %v1050_v38 = vmax.f32 %v1011_v20, %v879_v17  ;;  %v1051_v7 = vmax.f32 %v1012_v42, %v881_v44  ;;  %v9191_v20 = vld [vmem:[%s16456_s5 + $0x14] sm:$0xf]  ;;  %v804_v42 = vmax.f32 %v10835_v31, %v10875_v55  ;;  %1470 = vst.msk [vmem:[#allocation2 + $0x198] sm:$0xff] %vm520_vm3, %v16461_v6 }
  0xe8   : > { %v884_v17 = vsel %vm806_vm2, %v882_v57, %v883_v58  ;;  %9192 = vmatpush.msk.msrb.mxu3 %vm585_vm0, %v9191_v20  ;;  %v886_v54 = vsel %vm806_vm2, %v883_v58, %v885_v35  ;;  %1471 = vst.msk [vmem:[#allocation2 + $0x1a0] sm:$0xff] %vm520_vm3, %v16461_v6 }
  0xe9   : > { %16880 = vst [vmem:[#allocation16_spill] sm:$0xff] %v10806_v10  ;;  %1523 = vrot.lane.b32.xlu0 %v10806_v10, %s10416_s17  ;;  %v1082_v53 = vmax.f32 %v1050_v38, %v10835_v31  ;;  %v510_v31 = vrot.slane %v380_v39, 1 }
  0xea   : > { %1424 = vst.msk [vmem:[#allocation2 + $0x28] sm:$0x3] %vm1420_vm4, %v16461_v6 }
  0xeb   : > { %v10825_v24 = vpop.f32.mrf.mxu1  ;;  %v1124_v12 = vmax.f32 %v1082_v53, %v10875_v55  ;;  %1421 = vst.msk [vmem:[#allocation2 + $0x10] sm:$0x3] %vm1420_vm4, %v16461_v6 }
  0xec   : > { %v636_v30 = vpop.f32.mrf.mxu0  ;;  %1427 = vst.msk [vmem:[#allocation2 + $0x40] sm:$0x3] %vm1420_vm4, %v16461_v6 }
  0xed   : > { %v637_v33 = vadd.f32 %v10642_v1, %v636_v30  ;;  %v1163_v26 = vmax.f32 %v1124_v12, %v884_v17  ;;  %v1083_v30 = vmax.f32 %v1051_v7, %v10838_v32  ;;  %v1017_v7 = vrot.slane %v380_v39, 2  ;;  %v382_v12 = vld [vmem:[%s10535_s29 + $0x190] sm:$0x3]  ;;  %1430 = vst.msk [vmem:[#allocation2 + $0x58] sm:$0x3] %vm1420_vm4, %v16461_v6 }
  0xee   : > { %9014 = vmatmul.msk.f32.gmra.mxu1 %vm520_vm3, %v1161_v22  ;;  %v948_v22 = vmax.f32 %v803_v4, %v881_v44  ;;  %v10949_v44 = vld [vmem:[%s10535_s29 + $0x188] sm:$0xff]  ;;  %1433 = vst.msk [vmem:[#allocation2 + $0x70] sm:$0x3] %vm1420_vm4, %v16461_v6 }
  0xef   : > { %v10853_v40 = vmax.f32 %v637_v33, 0.0  ;;  %8983 = vmatmul.msk.f32.gmra.mxu0 %vm520_vm3, %v502_v63  ;;  %v511_v57 = vrot.slane %v10949_v44, 1  ;;  %v1018_v9 = vrot.slane %v10949_v44, 2  ;;  %1436 = vst.msk [vmem:[#allocation2 + $0x88] sm:$0x3] %vm1420_vm4, %v16461_v6 }
  0xf0   : > { %v980_v48 = vmax.f32 %v948_v22, %v10838_v32  ;;  %v513_v22 = vrot.slane %v382_v12, 1  ;;  %1439 = vst.msk [vmem:[#allocation2 + $0xa0] sm:$0x3] %vm1420_vm4, %v16461_v6 }
  0xf1   : > { %16881 = vst [vmem:[#allocation17_spill] sm:$0xff] %v10853_v40  ;;  %1525 = vrot.lane.b32.xlu1 %v10853_v40, %s10416_s17  ;;  %v512_v4 = vsel %vm434_vm1, %v510_v31, %v511_v57 }
  0xf2   : > { %v514_v35 = vsel %vm434_vm1, %v511_v57, %v513_v22  ;;  %1442 = vst.msk [vmem:[#allocation2 + $0xb8] sm:$0x3] %vm1420_vm4, %v16461_v6 }
  0xf3   : > { %v10872_v46 = vpop.f32.mrf.mxu1  ;;  %1445 = vst.msk [vmem:[#allocation2 + $0xd0] sm:$0x3] %vm1420_vm4, %v16461_v6 }
  0xf4   : > { %v639_v63 = vpop.f32.mrf.mxu0  ;;  %1448 = vst.msk [vmem:[#allocation2 + $0xe8] sm:$0x3] %vm1420_vm4, %v16461_v6 }
  0xf5   : > { %v640_v3 = vadd.f32 %v10642_v1, %v639_v63  ;;  %v949_v63 = vmax.f32 %v804_v42, %v884_v17  ;;  %v11014_v42 = vld [vmem:[%s10535_s29 + $0x1a0] sm:$0xff]  ;;  %1451 = vst.msk [vmem:[#allocation2 + $0x100] sm:$0x3] %vm1420_vm4, %v16461_v6 }
  0xf6   : > { %9015 = vmatmul.msk.f32.gmra.mxu1 %vm520_vm3, %v1162_v50  ;;  %v1125_v50 = vmax.f32 %v1083_v30, %v509_v21  ;;  %1454 = vst.msk [vmem:[#allocation2 + $0x118] sm:$0x3] %vm1420_vm4, %v16461_v6 }
  0xf7   : > { %v10906_v13 = vmax.f32 %v640_v3, 0.0  ;;  %8984 = vmatmul.msk.f32.gmra.mxu0 %vm520_vm3, %v10828_v25  ;;  %v1013_v25 = vmax.f32 %v979_v11, %v10875_v55  ;;  %v981_v62 = vmax.f32 %v949_v63, %v380_v39  ;;  %1457 = vst.msk [vmem:[#allocation2 + $0x130] sm:$0x3] %vm1420_vm4, %v16461_v6 }
  0xf8   : > { %v1164_v0 = vmax.f32 %v1125_v50, %v886_v54  ;;  %1460 = vst.msk [vmem:[#allocation2 + $0x148] sm:$0x3] %vm1420_vm4, %v16461_v6 }
  0xf9   : > { %16882 = vst [vmem:[#allocation18_spill] sm:$0xff] %v10906_v13  ;;  %1527 = vrot.lane.b32.xlu2 %v10906_v13, %s10416_s17  ;;  %v1052_v47 = vmax.f32 %v1013_v25, %v884_v17  ;;  %v805_v17 = vmax.f32 %v10838_v32, %v509_v21  ;;  %v1019_v32 = vsel %vm806_vm2, %v1017_v7, %v1018_v9 }
  0xfa   : > { %v1015_v25 = vmax.f32 %v981_v62, %v512_v4  ;;  %1463 = vst.msk [vmem:[#allocation2 + $0x160] sm:$0x3] %vm1420_vm4, %v16461_v6 }
  0xfb   : > { %v10940_v33 = vpop.f32.mrf.mxu1  ;;  %v1084_v58 = vmax.f32 %v1052_v47, %v380_v39  ;;  %v950_v23 = vmax.f32 %v805_v17, %v886_v54  ;;  %v1131_v17 = vrot.slane %v11014_v42, 2  ;;  %1466 = vst.msk [vmem:[#allocation2 + $0x178] sm:$0x3] %vm1420_vm4, %v16461_v6 }
  0xfc   : > { %v642_v38 = vpop.f32.mrf.mxu0  ;;  %1469 = vst.msk [vmem:[#allocation2 + $0x190] sm:$0x3] %vm1420_vm4, %v16461_v6 }
  0xfd   : > { %v643_v45 = vadd.f32 %v10642_v1, %v642_v38  ;;  %v1126_v19 = vmax.f32 %v1084_v58, %v512_v4  ;;  %v1020_v38 = vrot.slane %v382_v12, 2  ;;  %v982_v50 = vmax.f32 %v950_v23, %v10949_v44  ;;  %1472 = vst.msk [vmem:[#allocation2 + $0x1a8] sm:$0x3] %vm1420_vm4, %v16461_v6 }
  0xfe   : > { %9016 = vmatmul.msk.f32.gmra.mxu1 %vm520_vm3, %v1163_v26 }
  0xff   : > { %v10960_v53 = vmax.f32 %v643_v45, 0.0  ;;  %8985 = vmatmul.msk.f32.gmra.mxu0 %vm520_vm3, %v10875_v55  ;;  %v1014_v55 = vmax.f32 %v980_v48, %v509_v21  ;;  %v1165_v26 = vmax.f32 %v1126_v19, %v1019_v32  ;;  %v383_v45 = vld [vmem:[%s10535_s29 + $0x198] sm:$0xff]  ;;  %v1054_v48 = vmax.f32 %v1015_v25, %v1019_v32  ;;  %v385_v19 = vld [vmem:[%s10535_s29 + $0x1a8] sm:$0x3] }
 0x100   : > { %v1091_v57 = vrot.slane %v383_v45, 1  ;;  %v1021_v63 = vsel %vm806_vm2, %v1018_v9, %v1020_v38  ;;  %v2180_v38 = vrot.slane %v10881_v59, 2 }
 0x101   : > { %16883 = vst [vmem:[#allocation19_spill] sm:$0xff] %v10960_v53  ;;  %1529 = vrot.lane.b32.xlu0 %v10960_v53, %s10416_s17  ;;  %v1053_v18 = vmax.f32 %v1014_v55, %v886_v54  ;;  %v1092_v55 = vrot.slane %v11014_v42, 1  ;;  %v1086_v58 = vmax.f32 %v1054_v48, %v383_v45  ;;  %v1133_v48 = vrot.slane %v385_v19, 2 }
 0x103   : > { %v10976_v3 = vpop.f32.mrf.mxu1  ;;  %v1085_v30 = vmax.f32 %v1053_v18, %v10949_v44  ;;  %v11034_v44 = vld [vmem:[#allocation2 + $0x10] sm:$0x3]  ;;  %v1093_v12 = vsel %vm434_vm1, %v1091_v57, %v1092_v55 }
 0x104   : > { %v645_v11 = vpop.f32.mrf.mxu0  ;;  %v1128_v23 = vmax.f32 %v1086_v58, %v1093_v12  ;;  %v2182_v58 = vrot.slane %v11034_v44, 2 }
 0x105   : > { %v646_v43 = vadd.f32 %v10642_v1, %v645_v11  ;;  %v1127_v54 = vmax.f32 %v1085_v30, %v514_v35  ;;  %v2179_v30 = vrot.slane %v10830_v28, 2 }
 0x106   : > { %9017 = vmatmul.msk.f32.gmra.mxu1 %vm520_vm3, %v1164_v0  ;;  %v1740_v0 = vrot.slane %v11034_v44, 1 }
 0x107   : > { %v10992_v20 = vmax.f32 %v646_v43, 0.0  ;;  %8986 = vmatmul.msk.f32.gmra.mxu0 %vm520_vm3, %v509_v21  ;;  %v1166_v7 = vmax.f32 %v1127_v54, %v1021_v63  ;;  %v1130_v43 = vrot.slane %v383_v45, 2  ;;  %v2181_v57 = vsel %vm806_vm2, %v2179_v30, %v2180_v38 }
 0x108   : > { %v1741_v18 = vsel %vm434_vm1, %v1738_v2, %v1740_v0 }
 0x109   : > { %16884 = vst [vmem:[#allocation20_spill] sm:$0xff] %v10992_v20  ;;  %1531 = vrot.lane.b32.xlu1 %v10992_v20, %s10416_s17  ;;  %9025 = vmatmul.msk.f32.gmra.mxu2 %vm520_vm3, %v1741_v18  ;;  %v1132_v2 = vsel %vm806_vm2, %v1130_v43, %v1131_v17 }
 0x10b   : > { %v11007_v21 = vpop.f32.mrf.mxu1 }
 0x10c   : > { %v648_v39 = vpop.f32.mrf.mxu0 }
 0x10d   : > { %v649_v47 = vadd.f32 %v10642_v1, %v648_v39  ;;  %v1167_v39 = vmax.f32 %v1128_v23, %v1132_v2 }
 0x10e   : > { %9018 = vmatmul.msk.f32.gmra.mxu1 %vm520_vm3, %v1165_v26  ;;  %v1094_v26 = vrot.slane %v385_v19, 1 }
 0x10f   : > { %v11025_v31 = vmax.f32 %v649_v47, 0.0  ;;  %8987 = vmatmul.msk.f32.gmra.mxu0 %vm520_vm3, %v512_v4  ;;  %v1016_v4 = vmax.f32 %v982_v50, %v514_v35 }
 0x110   : > { %v1095_v59 = vsel %vm434_vm1, %v1092_v55, %v1094_v26  ;;  %v1134_v55 = vsel %vm806_vm2, %v1131_v17, %v1133_v48 }
 0x111   : > { %16885 = vst [vmem:[#allocation21_spill] sm:$0xff] %v11025_v31  ;;  %1533 = vrot.lane.b32.xlu2 %v11025_v31, %s10416_s17  ;;  %v1055_v22 = vmax.f32 %v1016_v4, %v1021_v63 }
 0x113   : > { %v1506_v9 = vpop.permute.xlu0 %1505  ;;  %v11043_v11 = vpop.f32.mrf.mxu1 }
 0x114   : > { %1602 = vst.msk [vmem:[#allocation2 + $0x19] sm:$0xff] %vm520_vm3, %v1506_v9  ;;  %v651_v62 = vpop.f32.mrf.mxu0 }
 0x115   : > { %v652_v32 = vadd.f32 %v10642_v1, %v651_v62  ;;  %v2183_v62 = vsel %vm806_vm2, %v2180_v38, %v2182_v58 }
 0x116   : > { %9019 = vmatmul.msk.f32.gmra.mxu1 %vm520_vm3, %v1166_v7 }
 0x117   : > { %v11061_v25 = vmax.f32 %v652_v32, 0.0  ;;  %8988 = vmatmul.msk.f32.gmra.mxu0 %vm520_vm3, %v514_v35  ;;  %v1087_v35 = vmax.f32 %v1055_v22, %v11014_v42 }
 0x119   : > { %16886 = vst [vmem:[#allocation22_spill] sm:$0xff] %v11061_v25  ;;  %1535 = vrot.lane.b32.xlu0 %v11061_v25, %s10416_s17  ;;  %v1129_v63 = vmax.f32 %v1087_v35, %v1095_v59 }
 0x11b   : > { %v1514_v45 = vpop.permute.xlu2 %1513  ;;  %v1508_v47 = vpop.permute.xlu0 %1507  ;;  %v1637_v28 = vld [vmem:[#allocation2 + $0x18] sm:$0xff]  ;;  %v1168_v4 = vmax.f32 %v1129_v63, %v1134_v55 }
 0x11c   : > { %1606 = vst.msk [vmem:[#allocation2 + $0x49] sm:$0xff] %vm520_vm3, %v1514_v45  ;;  %v654_v50 = vpop.f32.mrf.mxu0  ;;  %v11080_v54 = vpop.f32.mrf.mxu1  ;;  %9059 = vmatmul.msk.f32.gmra.mxu3 %vm520_vm3, %v1637_v28  ;;  %v1742_v44 = vrot.slane %v1637_v28, 1  ;;  %v2184_v38 = vrot.slane %v1637_v28, 2 }
 0x11d   : > { %1603 = vst.msk [vmem:[#allocation2 + $0x21] sm:$0xff] %vm520_vm3, %v1508_v47  ;;  %v655_v42 = vadd.f32 %v10642_v1, %v654_v50 }
 0x11e   : > { %9020 = vmatmul.msk.f32.gmra.mxu1 %vm520_vm3, %v1167_v39 }
 0x11f   : > { %v11087_v0 = vmax.f32 %v655_v42, 0.0  ;;  %9091 = vmatmul.msk.f32.vlgmr.msrb.gmra.mxu0 %vm520_vm3, %v2181_v57 }
 0x121   : > { %16887 = vst [vmem:[#allocation23_spill] sm:$0xff] %v11087_v0  ;;  %1537 = vrot.lane.b32.xlu1 %v11087_v0, %s10416_s17 }
 0x123   : > { %v1516_v7 = vpop.permute.xlu2 %1515  ;;  %v1510_v9 = vpop.permute.xlu1 %1509 }
 0x124   : > { %1607 = vst.msk [vmem:[#allocation2 + $0x51] sm:$0xff] %vm520_vm3, %v1516_v7  ;;  %v657_v12 = vpop.f32.mrf.mxu0  ;;  %v11095_v43 = vpop.f32.mrf.mxu1  ;;  %v1638_v18 = vld [vmem:[#allocation2 + $0x20] sm:$0xff]  ;;  %v1639_v23 = vld [vmem:[#allocation2 + $0x28] sm:$0x3] }
 0x125   : > { %1604 = vst.msk [vmem:[#allocation2 + $0x31] sm:$0xff] %vm520_vm3, %v1510_v9  ;;  %v658_v17 = vadd.f32 %v10642_v1, %v657_v12  ;;  %9060 = vmatmul.msk.f32.gmra.mxu3 %vm520_vm3, %v1638_v18  ;;  %v1743_v19 = vrot.slane %v1638_v18, 1  ;;  %v2185_v2 = vrot.slane %v1638_v18, 2  ;;  %v1745_v30 = vrot.slane %v1639_v23, 1 }
 0x126   : > { %9021 = vmatmul.msk.f32.gmra.mxu1 %vm520_vm3, %v1168_v4  ;;  %v2187_v57 = vrot.slane %v1639_v23, 2 }
 0x127   : > { %v11102_v32 = vmax.f32 %v658_v17, 0.0  ;;  %v11105_v22 = vsel %vm434_vm1, %v1742_v44, %v1743_v19  ;;  %9092 = vmatmul.msk.f32.gmra.mxu0 %vm520_vm3, %v2183_v62  ;;  %v11118_v59 = vsel %vm806_vm2, %v2184_v38, %v2185_v2  ;;  %v11124_v50 = vsel %vm434_vm1, %v1743_v19, %v1745_v30 }
 0x128   : > { %16889 = vst [vmem:[#allocation25_spill] sm:$0xff] %v11105_v22  ;;  %9026 = vmatmul.msk.f32.gmra.mxu2 %vm520_vm3, %v11105_v22  ;;  %v11140_v9 = vsel %vm806_vm2, %v2185_v2, %v2187_v57 }
 0x129   : > { %16888 = vst [vmem:[#allocation24_spill] sm:$0xff] %v11102_v32  ;;  %1539 = vrot.lane.b32.xlu2 %v11102_v32, %s10416_s17 }
 0x12a   : > { %16891 = vst [vmem:[#allocation27_spill] sm:$0xff] %v11118_v59 }
 0x12b   : > { %v1512_v26 = vpop.permute.xlu1 %1511  ;;  %16893 = vst [vmem:[#allocation29_spill] sm:$0xff] %v11124_v50  ;;  %v1644_v57 = vld [vmem:[#allocation2 + $0x50] sm:$0xff] }
 0x12c   : > { %1605 = vst.msk [vmem:[#allocation2 + $0x39] sm:$0xff] %vm520_vm3, %v1512_v26  ;;  %v660_v35 = vpop.f32.mrf.mxu0  ;;  %v11113_v39 = vpop.f32.mrf.mxu1  ;;  %v1640_v45 = vld [vmem:[#allocation2 + $0x30] sm:$0xff] }
 0x12d   : > { %16890 = vst [vmem:[#allocation26_spill] sm:$0xff] %v11113_v39  ;;  %v661_v47 = vadd.f32 %v10642_v1, %v660_v35  ;;  %9061 = vmatmul.msk.f32.gmra.mxu3 %vm520_vm3, %v1640_v45  ;;  %v2189_v26 = vrot.slane %v1640_v45, 2 }
 0x12e   : > { %9125 = vmatmul.msk.f32.vlgmr.msrb.gmra.mxu1 %vm520_vm3, %v1637_v28  ;;  %v1747_v28 = vrot.slane %v1640_v45, 1  ;;  %16895 = vst [vmem:[#allocation31_spill] sm:$0xff] %v11140_v9 }
 0x12f   : > { %v11121_v48 = vmax.f32 %v661_v47, 0.0  ;;  %9093 = vmatmul.msk.f32.gmra.mxu0 %vm520_vm3, %v11118_v59 }
 0x130   : > { %9027 = vmatmul.msk.f32.gmra.mxu2 %vm520_vm3, %v11124_v50 }
 0x131   : > { %16892 = vst [vmem:[#allocation28_spill] sm:$0xff] %v11121_v48  ;;  %1541 = vrot.lane.b32.xlu0 %v11121_v48, %s10416_s17 }
 0x133   : > { %v1641_v42 = vld [vmem:[#allocation2 + $0x38] sm:$0xff]  ;;  %v1642_v62 = vld [vmem:[#allocation2 + $0x40] sm:$0x3] }
 0x134   : > { %v663_v63 = vpop.f32.mrf.mxu0  ;;  %v11132_v55 = vpop.f32.mrf.mxu1  ;;  %v1748_v58 = vrot.slane %v1641_v42, 1  ;;  %v2190_v17 = vrot.slane %v1641_v42, 2  ;;  %v1750_v19 = vrot.slane %v1642_v62, 1 }
 0x135   : > { %v664_v4 = vadd.f32 %v10642_v1, %v663_v63  ;;  %9062 = vmatmul.msk.f32.gmra.mxu3 %vm520_vm3, %v1641_v42 }
 0x136   : > { %v11137_v7 = vsel %vm434_vm1, %v1747_v28, %v1748_v58  ;;  %9126 = vmatmul.msk.f32.gmra.mxu1 %vm520_vm3, %v1638_v18  ;;  %v1643_v18 = vld [vmem:[#allocation2 + $0x48] sm:$0xff]  ;;  %v11157_v38 = vsel %vm806_vm2, %v2189_v26, %v2190_v17  ;;  %v11163_v47 = vsel %vm434_vm1, %v1748_v58, %v1750_v19  ;;  %v1753_v28 = vrot.slane %v1644_v57, 1  ;;  %v11177_v58 = vld [vmem:[%s16453_s2] ss:$0 sm:$0xff] }
 0x137   : > { %16894 = vst [vmem:[#allocation30_spill] sm:$0xff] %v11137_v7  ;;  %v11143_v12 = vmax.f32 %v664_v4, 0.0  ;;  %9094 = vmatmul.msk.f32.gmra.mxu0 %vm520_vm3, %v11140_v9  ;;  %v1752_v19 = vrot.slane %v1643_v18, 1 }
 0x138   : > { %9028 = vmatmul.msk.f32.gmra.mxu2 %vm520_vm3, %v11137_v7  ;;  %16897 = vst [vmem:[#allocation33_spill] sm:$0xff] %v11157_v38 }
 0x139   : > { %16896 = vst [vmem:[#allocation32_spill] sm:$0xff] %v11143_v12  ;;  %1543 = vrot.lane.b32.xlu1 %v11143_v12, %s10416_s17  ;;  %v11188_v26 = vsel %vm434_vm1, %v1752_v19, %v1753_v28  ;;  %v2194_v19 = vrot.slane %v1643_v18, 2 }
 0x13a   : > { %16899 = vst [vmem:[#allocation35_spill] sm:$0xff] %v11163_v47 }
 0x13b   : > { %v1522_v44 = vpop.permute.xlu2 %1521  ;;  %16903 = vst [vmem:[#allocation39_spill] sm:$0xff] %v11188_v26 }
 0x13c   : > { %1610 = vst.msk [vmem:[#allocation2 + $0x79] sm:$0xff] %vm520_vm3, %v1522_v44  ;;  %v666_v23 = vpop.f32.mrf.mxu0  ;;  %v11152_v2 = vpop.f32.mrf.mxu1 }
 0x13d   : > { %v667_v30 = vadd.f32 %v10642_v1, %v666_v23  ;;  %9063 = vmatmul.msk.f32.gmra.mxu3 %vm520_vm3, %v1643_v18  ;;  %v2192_v1 = vrot.slane %v1642_v62, 2 }
 0x13e   : > { %9127 = vmatmul.msk.f32.gmra.mxu1 %vm520_vm3, %v1640_v45 }
 0x13f   : > { %v11160_v35 = vmax.f32 %v667_v30, 0.0  ;;  %9095 = vmatmul.msk.f32.gmra.mxu0 %vm520_vm3, %v11157_v38  ;;  %v11182_v23 = vsel %vm806_vm2, %v2190_v17, %v2192_v1  ;;  %v1645_v30 = vld [vmem:[#allocation2 + $0x58] sm:$0x3] }
 0x140   : > { %9029 = vmatmul.msk.f32.gmra.mxu2 %vm520_vm3, %v11163_v47  ;;  %16901 = vst [vmem:[#allocation37_spill] sm:$0xff] %v11182_v23 }
 0x141   : > { %16898 = vst [vmem:[#allocation34_spill] sm:$0xff] %v11160_v35  ;;  %1545 = vrot.lane.b32.xlu2 %v11160_v35, %s10416_s17 }
 0x143   : > { %v1518_v63 = vpop.permute.xlu0 %1517 }
 0x144   : > { %1608 = vst.msk [vmem:[#allocation2 + $0x61] sm:$0xff] %vm520_vm3, %v1518_v63  ;;  %v669_v45 = vpop.f32.mrf.mxu0  ;;  %v11172_v4 = vpop.f32.mrf.mxu1  ;;  %v2195_v63 = vrot.slane %v1644_v57, 2 }
 0x145   : > { %16900 = vst [vmem:[#allocation36_spill] sm:$0xff] %v11172_v4  ;;  %v670_v44 = vadd.f32 %v11177_v58, %v669_v45  ;;  %9064 = vmatmul.msk.f32.gmra.mxu3 %vm520_vm3, %v1644_v57  ;;  %v1755_v45 = vrot.slane %v1645_v30, 1 }
 0x146   : > { %9128 = vmatmul.msk.f32.gmra.mxu1 %vm520_vm3, %v1641_v42 }
 0x147   : > { %v11185_v62 = vmax.f32 %v670_v44, 0.0  ;;  %9096 = vmatmul.msk.f32.gmra.mxu0 %vm520_vm3, %v11182_v23  ;;  %v11208_v23 = vsel %vm434_vm1, %v1753_v28, %v1755_v45 }
 0x148   : > { %9030 = vmatmul.msk.f32.gmra.mxu2 %vm520_vm3, %v11188_v26  ;;  %v11202_v26 = vsel %vm806_vm2, %v2194_v19, %v2195_v63  ;;  %16907 = vst [vmem:[#allocation43_spill] sm:$0xff] %v11208_v23 }
 0x149   : > { %16902 = vst [vmem:[#allocation38_spill] sm:$0xff] %v11185_v62  ;;  %1547 = vrot.lane.b32.xlu0 %v11185_v62, %s10416_s17 }
 0x14a   : > { %16905 = vst [vmem:[#allocation41_spill] sm:$0xff] %v11202_v26 }
 0x14b   : > { %v1520_v17 = vpop.permute.xlu1 %1519  ;;  %v1646_v1 = vld [vmem:[#allocation2 + $0x60] sm:$0xff] }
 0x14c   : > { %1609 = vst.msk [vmem:[#allocation2 + $0x69] sm:$0xff] %vm520_vm3, %v1520_v17  ;;  %v672_v42 = vpop.f32.mrf.mxu0  ;;  %v11197_v44 = vpop.f32.mrf.mxu1  ;;  %v2197_v17 = vrot.slane %v1645_v30, 2  ;;  %v1757_v7 = vrot.slane %v1646_v1, 1 }
 0x14d   : > { %16904 = vst [vmem:[#allocation40_spill] sm:$0xff] %v11197_v44  ;;  %v673_v6 = vadd.f32 %v11177_v58, %v672_v42  ;;  %9065 = vmatmul.msk.f32.gmra.mxu3 %vm520_vm3, %v1646_v1 }
 0x14e   : > { %9129 = vmatmul.msk.f32.gmra.mxu1 %vm520_vm3, %v1643_v18 }
 0x14f   : > { %v11205_v47 = vmax.f32 %v673_v6, 0.0  ;;  %9097 = vmatmul.msk.f32.gmra.mxu0 %vm520_vm3, %v11202_v26 }
 0x150   : > { %9031 = vmatmul.msk.f32.gmra.mxu2 %vm520_vm3, %v11208_v23  ;;  %v11225_v23 = vsel %vm806_vm2, %v2195_v63, %v2197_v17 }
 0x151   : > { %16906 = vst [vmem:[#allocation42_spill] sm:$0xff] %v11205_v47  ;;  %1549 = vrot.lane.b32.xlu1 %v11205_v47, %s10416_s17 }
 0x152   : > { %16910 = vst [vmem:[#allocation46_spill] sm:$0xff] %v11225_v23 }
 0x153   : > { %v1528_v42 = vpop.permute.xlu2 %1527  ;;  %v1647_v19 = vld [vmem:[#allocation2 + $0x68] sm:$0xff] }
 0x154   : > { %1613 = vst.msk [vmem:[#allocation2 + $0x99] sm:$0xff] %vm520_vm3, %v1528_v42  ;;  %v675_v18 = vpop.f32.mrf.mxu0  ;;  %v11217_v6 = vpop.f32.mrf.mxu1  ;;  %v1758_v28 = vrot.slane %v1647_v19, 1  ;;  %v1648_v42 = vld [vmem:[#allocation2 + $0x70] sm:$0x3] }
 0x155   : > { %16908 = vst [vmem:[#allocation44_spill] sm:$0xff] %v11217_v6  ;;  %v676_v45 = vadd.f32 %v11177_v58, %v675_v18  ;;  %9066 = vmatmul.msk.f32.gmra.mxu3 %vm520_vm3, %v1647_v19  ;;  %v2200_v18 = vrot.slane %v1647_v19, 2  ;;  %v1760_v50 = vrot.slane %v1648_v42, 1 }
 0x156   : > { %v11222_v26 = vsel %vm434_vm1, %v1757_v7, %v1758_v28  ;;  %9130 = vmatmul.msk.f32.gmra.mxu1 %vm520_vm3, %v1644_v57  ;;  %v1649_v57 = vld [vmem:[#allocation2 + $0x78] sm:$0xff] }
 0x157   : > { %16909 = vst [vmem:[#allocation45_spill] sm:$0xff] %v11222_v26  ;;  %v11228_v30 = vmax.f32 %v676_v45, 0.0  ;;  %9098 = vmatmul.msk.f32.gmra.mxu0 %vm520_vm3, %v11225_v23  ;;  %v2199_v45 = vrot.slane %v1646_v1, 2  ;;  %v11248_v22 = vsel %vm434_vm1, %v1758_v28, %v1760_v50  ;;  %v1762_v9 = vrot.slane %v1649_v57, 1 }
 0x158   : > { %9032 = vmatmul.msk.f32.gmra.mxu2 %vm520_vm3, %v11222_v26  ;;  %16915 = vst [vmem:[#allocation51_spill] sm:$0xff] %v11248_v22 }
 0x159   : > { %16911 = vst [vmem:[#allocation47_spill] sm:$0xff] %v11228_v30  ;;  %1551 = vrot.lane.b32.xlu2 %v11228_v30, %s10416_s17  ;;  %v11242_v26 = vsel %vm806_vm2, %v2199_v45, %v2200_v18 }
 0x15a   : > { %16913 = vst [vmem:[#allocation49_spill] sm:$0xff] %v11242_v26 }
 0x15b   : > { %v1524_v7 = vpop.permute.xlu0 %1523 }
 0x15c   : > { %1611 = vst.msk [vmem:[#allocation2 + $0x81] sm:$0xff] %vm520_vm3, %v1524_v7  ;;  %v678_v63 = vpop.f32.mrf.mxu0  ;;  %v11237_v17 = vpop.f32.mrf.mxu1  ;;  %v2202_v7 = vrot.slane %v1648_v42, 2 }
 0x15d   : > { %16912 = vst [vmem:[#allocation48_spill] sm:$0xff] %v11237_v17  ;;  %v679_v38 = vadd.f32 %v11177_v58, %v678_v63  ;;  %9067 = vmatmul.msk.f32.gmra.mxu3 %vm520_vm3, %v1649_v57 }
 0x15e   : > { %9131 = vmatmul.msk.f32.gmra.mxu1 %vm520_vm3, %v1646_v1 }
 0x15f   : > { %v11245_v23 = vmax.f32 %v679_v38, 0.0  ;;  %9099 = vmatmul.msk.f32.gmra.mxu0 %vm520_vm3, %v11242_v26 }
 0x160   : > { %9033 = vmatmul.msk.f32.gmra.mxu2 %vm520_vm3, %v11248_v22  ;;  %v11265_v22 = vsel %vm806_vm2, %v2200_v18, %v2202_v7  ;;  %v2204_v7 = vrot.slane %v1649_v57, 2 }
 0x161   : > { %16914 = vst [vmem:[#allocation50_spill] sm:$0xff] %v11245_v23  ;;  %1553 = vrot.lane.b32.xlu0 %v11245_v23, %s10416_s17 }
 0x162   : > { %16918 = vst [vmem:[#allocation54_spill] sm:$0xff] %v11265_v22 }
 0x163   : > { %v1526_v63 = vpop.permute.xlu1 %1525  ;;  %v1650_v45 = vld [vmem:[#allocation2 + $0x80] sm:$0xff] }
 0x164   : > { %1612 = vst.msk [vmem:[#allocation2 + $0x91] sm:$0xff] %vm520_vm3, %v1526_v63  ;;  %v681_v1 = vpop.f32.mrf.mxu0  ;;  %v11257_v38 = vpop.f32.mrf.mxu1  ;;  %v1763_v50 = vrot.slane %v1650_v45, 1  ;;  %v1651_v63 = vld [vmem:[#allocation2 + $0x88] sm:$0x3] }
 0x165   : > { %16916 = vst [vmem:[#allocation52_spill] sm:$0xff] %v11257_v38  ;;  %v682_v28 = vadd.f32 %v11177_v58, %v681_v1  ;;  %9068 = vmatmul.msk.f32.gmra.mxu3 %vm520_vm3, %v1650_v45  ;;  %v2205_v1 = vrot.slane %v1650_v45, 2  ;;  %v1765_v38 = vrot.slane %v1651_v63, 1 }
 0x166   : > { %v11262_v26 = vsel %vm434_vm1, %v1762_v9, %v1763_v50  ;;  %9132 = vmatmul.msk.f32.gmra.mxu1 %vm520_vm3, %v1647_v19 }
 0x167   : > { %16917 = vst [vmem:[#allocation53_spill] sm:$0xff] %v11262_v26  ;;  %v11268_v42 = vmax.f32 %v682_v28, 0.0  ;;  %9100 = vmatmul.msk.f32.gmra.mxu0 %vm520_vm3, %v11265_v22  ;;  %v11288_v59 = vsel %vm434_vm1, %v1763_v50, %v1765_v38 }
 0x168   : > { %9034 = vmatmul.msk.f32.gmra.mxu2 %vm520_vm3, %v11262_v26  ;;  %v11282_v26 = vsel %vm806_vm2, %v2204_v7, %v2205_v1  ;;  %16923 = vst [vmem:[#allocation59_spill] sm:$0xff] %v11288_v59 }
 0x169   : > { %16919 = vst [vmem:[#allocation55_spill] sm:$0xff] %v11268_v42  ;;  %1555 = vrot.lane.b32.xlu1 %v11268_v42, %s10416_s17 }
 0x16a   : > { %16921 = vst [vmem:[#allocation57_spill] sm:$0xff] %v11282_v26 }
 0x16b   : > { %v1534_v9 = vpop.permute.xlu2 %1533  ;;  %v1652_v17 = vld [vmem:[#allocation2 + $0x90] sm:$0xff] }
 0x16c   : > { %1616 = vst.msk [vmem:[#allocation2 + $0xc1] sm:$0xff] %vm520_vm3, %v1534_v9  ;;  %v684_v18 = vpop.f32.mrf.mxu0  ;;  %v11277_v19 = vpop.f32.mrf.mxu1  ;;  %v1653_v9 = vld [vmem:[#allocation2 + $0x98] sm:$0xff] }
 0x16d   : > { %16920 = vst [vmem:[#allocation56_spill] sm:$0xff] %v11277_v19  ;;  %v685_v28 = vadd.f32 %v11177_v58, %v684_v18  ;;  %9069 = vmatmul.msk.f32.gmra.mxu3 %vm520_vm3, %v1652_v17  ;;  %v2207_v18 = vrot.slane %v1651_v63, 2  ;;  %v1767_v19 = vrot.slane %v1652_v17, 1  ;;  %v1768_v4 = vrot.slane %v1653_v9, 1 }
 0x16e   : > { %9133 = vmatmul.msk.f32.gmra.mxu1 %vm520_vm3, %v1649_v57 }
 0x16f   : > { %v11285_v22 = vmax.f32 %v685_v28, 0.0  ;;  %9101 = vmatmul.msk.f32.gmra.mxu0 %vm520_vm3, %v11282_v26  ;;  %v11302_v50 = vsel %vm806_vm2, %v2205_v1, %v2207_v18  ;;  %v11308_v63 = vsel %vm434_vm1, %v1767_v19, %v1768_v4  ;;  %v2210_v1 = vrot.slane %v1653_v9, 2 }
 0x170   : > { %9035 = vmatmul.msk.f32.gmra.mxu2 %vm520_vm3, %v11288_v59  ;;  %16925 = vst [vmem:[#allocation61_spill] sm:$0xff] %v11302_v50 }
 0x171   : > { %16922 = vst [vmem:[#allocation58_spill] sm:$0xff] %v11285_v22  ;;  %1557 = vrot.lane.b32.xlu2 %v11285_v22, %s10416_s17 }
 0x172   : > { %16927 = vst [vmem:[#allocation63_spill] sm:$0xff] %v11308_v63 }
 0x173   : > { %v1530_v7 = vpop.permute.xlu0 %1529 }
 0x174   : > { %1614 = vst.msk [vmem:[#allocation2 + $0xa9] sm:$0xff] %vm520_vm3, %v1530_v7  ;;  %v687_v57 = vpop.f32.mrf.mxu0  ;;  %v11297_v28 = vpop.f32.mrf.mxu1  ;;  %v1654_v7 = vld [vmem:[#allocation2 + $0xa0] sm:$0x3] }
 0x175   : > { %16924 = vst [vmem:[#allocation60_spill] sm:$0xff] %v11297_v28  ;;  %v688_v38 = vadd.f32 %v11177_v58, %v687_v57  ;;  %9070 = vmatmul.msk.f32.gmra.mxu3 %vm520_vm3, %v1653_v9  ;;  %v2209_v57 = vrot.slane %v1652_v17, 2 }
 0x176   : > { %9134 = vmatmul.msk.f32.gmra.mxu1 %vm520_vm3, %v1650_v45 }
 0x177   : > { %v11305_v59 = vmax.f32 %v688_v38, 0.0  ;;  %9102 = vmatmul.msk.f32.gmra.mxu0 %vm520_vm3, %v11302_v50  ;;  %v1770_v50 = vrot.slane %v1654_v7, 1 }
 0x178   : > { %9036 = vmatmul.msk.f32.gmra.mxu2 %vm520_vm3, %v11308_v63  ;;  %v11322_v63 = vsel %vm806_vm2, %v2209_v57, %v2210_v1 }
 0x179   : > { %16926 = vst [vmem:[#allocation62_spill] sm:$0xff] %v11305_v59  ;;  %1559 = vrot.lane.b32.xlu0 %v11305_v59, %s10416_s17  ;;  %v11328_v6 = vsel %vm434_vm1, %v1768_v4, %v1770_v50  ;;  %v2212_v4 = vrot.slane %v1654_v7, 2 }
 0x17a   : > { %16929 = vst [vmem:[#allocation65_spill] sm:$0xff] %v11322_v63 }
 0x17b   : > { %v1532_v18 = vpop.permute.xlu1 %1531  ;;  %v1655_v26 = vld [vmem:[#allocation2 + $0xa8] sm:$0xff]  ;;  %16931 = vst [vmem:[#allocation67_spill] sm:$0xff] %v11328_v6 }
 0x17c   : > { %1615 = vst.msk [vmem:[#allocation2 + $0xb1] sm:$0xff] %vm520_vm3, %v1532_v18  ;;  %v690_v45 = vpop.f32.mrf.mxu0  ;;  %v11317_v38 = vpop.f32.mrf.mxu1 }
 0x17d   : > { %16928 = vst [vmem:[#allocation64_spill] sm:$0xff] %v11317_v38  ;;  %v691_v19 = vadd.f32 %v11177_v58, %v690_v45  ;;  %9071 = vmatmul.msk.f32.gmra.mxu3 %vm520_vm3, %v1655_v26 }
 0x17e   : > { %9135 = vmatmul.msk.f32.gmra.mxu1 %vm520_vm3, %v1652_v17 }
 0x17f   : > { %v11325_v28 = vmax.f32 %v691_v19, 0.0  ;;  %9103 = vmatmul.msk.f32.gmra.mxu0 %vm520_vm3, %v11322_v63  ;;  %v1772_v19 = vrot.slane %v1655_v26, 1 }
 0x180   : > { %9037 = vmatmul.msk.f32.gmra.mxu2 %vm520_vm3, %v11328_v6  ;;  %v11345_v6 = vsel %vm806_vm2, %v2210_v1, %v2212_v4  ;;  %v1658_v4 = vld [vmem:[#allocation2 + $0xc0] sm:$0xff] }
 0x181   : > { %16930 = vst [vmem:[#allocation66_spill] sm:$0xff] %v11325_v28  ;;  %1561 = vrot.lane.b32.xlu1 %v11325_v28, %s10416_s17 }
 0x182   : > { %16934 = vst [vmem:[#allocation70_spill] sm:$0xff] %v11345_v6 }
 0x183   : > { %v1540_v18 = vpop.permute.xlu2 %1539  ;;  %v1656_v45 = vld [vmem:[#allocation2 + $0xb0] sm:$0xff]  ;;  %v1657_v7 = vld [vmem:[#allocation2 + $0xb8] sm:$0x3] }
 0x184   : > { %1619 = vst.msk [vmem:[#allocation2 + $0xe1] sm:$0xff] %vm520_vm3, %v1540_v18  ;;  %v693_v57 = vpop.f32.mrf.mxu0  ;;  %v11337_v17 = vpop.f32.mrf.mxu1  ;;  %v1773_v38 = vrot.slane %v1656_v45, 1  ;;  %v2215_v18 = vrot.slane %v1656_v45, 2 }
 0x185   : > { %16932 = vst [vmem:[#allocation68_spill] sm:$0xff] %v11337_v17  ;;  %v694_v50 = vadd.f32 %v11177_v58, %v693_v57  ;;  %9072 = vmatmul.msk.f32.gmra.mxu3 %vm520_vm3, %v1656_v45  ;;  %v11356_v17 = vpop.f32.mrf.mxu3 }
 0x186   : > { %v11342_v63 = vsel %vm434_vm1, %v1772_v19, %v1773_v38  ;;  %9136 = vmatmul.msk.f32.gmra.mxu1 %vm520_vm3, %v1653_v9  ;;  %v1775_v19 = vrot.slane %v1657_v7, 1  ;;  %16936 = vst [vmem:[#allocation72_spill] sm:$0xff] %v11356_v17 }
 0x187   : > { %16933 = vst [vmem:[#allocation69_spill] sm:$0xff] %v11342_v63  ;;  %v11348_v44 = vmax.f32 %v694_v50, 0.0  ;;  %9104 = vmatmul.msk.f32.gmra.mxu0 %vm520_vm3, %v11345_v6  ;;  %v2214_v50 = vrot.slane %v1655_v26, 2 }
 0x188   : > { %9038 = vmatmul.msk.f32.gmra.mxu2 %vm520_vm3, %v11342_v63  ;;  %v11370_v17 = vsel %vm434_vm1, %v1773_v38, %v1775_v19 }
 0x189   : > { %16935 = vst [vmem:[#allocation71_spill] sm:$0xff] %v11348_v44  ;;  %1563 = vrot.lane.b32.xlu2 %v11348_v44, %s10416_s17  ;;  %v11364_v63 = vsel %vm806_vm2, %v2214_v50, %v2215_v18 }
 0x18a   : > { %16937 = vst [vmem:[#allocation73_spill] sm:$0xff] %v11364_v63 }
 0x18b   : > { %v1536_v57 = vpop.permute.xlu0 %1535  ;;  %16939 = vst [vmem:[#allocation75_spill] sm:$0xff] %v11370_v17 }
 0x18c   : > { %1617 = vst.msk [vmem:[#allocation2 + $0xc9] sm:$0xff] %vm520_vm3, %v1536_v57  ;;  %v696_v9 = vpop.f32.mrf.mxu0  ;;  %v11359_v1 = vpop.f32.mrf.mxu1  ;;  %v2217_v57 = vrot.slane %v1657_v7, 2 }
 0x18d   : > { %v697_v6 = vadd.f32 %v11177_v58, %v696_v9  ;;  %9073 = vmatmul.msk.f32.gmra.mxu3 %vm520_vm3, %v1658_v4  ;;  %v1777_v9 = vrot.slane %v1658_v4, 1 }
 0x18e   : > { %9137 = vmatmul.msk.f32.gmra.mxu1 %vm520_vm3, %v1655_v26  ;;  %v11391_v7 = vsel %vm806_vm2, %v2215_v18, %v2217_v57 }
 0x18f   : > { %v11367_v39 = vmax.f32 %v697_v6, 0.0  ;;  %9105 = vmatmul.msk.f32.gmra.mxu0 %vm520_vm3, %v11364_v63  ;;  %16942 = vst [vmem:[#allocation78_spill] sm:$0xff] %v11391_v7 }
 0x190   : > { %9039 = vmatmul.msk.f32.gmra.mxu2 %vm520_vm3, %v11370_v17  ;;  %v11385_v17 = vpop.f32.mrf.mxu3 }
 0x191   : > { %16938 = vst [vmem:[#allocation74_spill] sm:$0xff] %v11367_v39  ;;  %3553 = vrot.lane.b32.xlu2 %v10653_v16, %s10418_s24  ;;  %1565 = vrot.lane.b32.xlu0 %v11367_v39, %s10416_s17 }
 0x192   : > { %16941 = vst [vmem:[#allocation77_spill] sm:$0xff] %v11385_v17  ;;  %v2219_v17 = vrot.slane %v1658_v4, 2 }
 0x193   : > { %v1538_v26 = vpop.permute.xlu1 %1537  ;;  %v1659_v6 = vld [vmem:[#allocation2 + $0xc8] sm:$0xff] }
 0x194   : > { %1618 = vst.msk [vmem:[#allocation2 + $0xd9] sm:$0xff] %vm520_vm3, %v1538_v26  ;;  %v699_v38 = vpop.f32.mrf.mxu0  ;;  %v11381_v19 = vpop.f32.mrf.mxu1  ;;  %v1778_v50 = vrot.slane %v1659_v6, 1 }
 0x195   : > { %16940 = vst [vmem:[#allocation76_spill] sm:$0xff] %v11381_v19  ;;  %v700_v63 = vadd.f32 %v11177_v58, %v699_v38  ;;  %9074 = vmatmul.msk.f32.gmra.mxu3 %vm520_vm3, %v1659_v6  ;;  %v11398_v19 = vpop.f32.mrf.mxu2  ;;  %v1660_v58 = vld [vmem:[#allocation2 + $0xd0] sm:$0x3] }
 0x196   : > { %v11388_v16 = vsel %vm434_vm1, %v1777_v9, %v1778_v50  ;;  %9138 = vmatmul.msk.f32.gmra.mxu1 %vm520_vm3, %v1656_v45  ;;  %16944 = vst [vmem:[#allocation80_spill] sm:$0xff] %v11398_v19  ;;  %v1780_v57 = vrot.slane %v1660_v58, 1 }
 0x197   : > { %v11394_v26 = vmax.f32 %v700_v63, 0.0  ;;  %9106 = vmatmul.msk.f32.gmra.mxu0 %vm520_vm3, %v11391_v7  ;;  %v2220_v63 = vrot.slane %v1659_v6, 2 }
 0x198   : > { %9040 = vmatmul.msk.f32.gmra.mxu2 %vm520_vm3, %v11388_v16 }
 0x199   : > { %16943 = vst [vmem:[#allocation79_spill] sm:$0xff] %v11394_v26  ;;  %1567 = vrot.lane.b32.xlu1 %v11394_v26, %s10416_s17  ;;  %3559 = vrot.lane.b32.xlu2 %v10698_v8, %s10418_s24  ;;  %v11415_v19 = vsel %vm806_vm2, %v2219_v17, %v2220_v63  ;;  %v11419_v8 = vsel %vm434_vm1, %v1778_v50, %v1780_v57  ;;  %s323_s17 = sand.u32 1, %s10406_s10  }
 0x19a   : > { %3555 = vrot.lane.b32.xlu0 %v10666_v34, %s10418_s24  ;;  %16947 = vst [vmem:[#allocation83_spill] sm:$0xff] %v11419_v8  ;;  %s8954_s25 = sshll.u32 %s323_s17, 8 }
 0x19b   : > { %v1546_v45 = vpop.permute.xlu2 %1545  ;;  %v1661_v18 = vld [vmem:[#allocation2 + $0xd8] sm:$0xff]  ;;  %s16099_s27 = scalar_lea.vmem [#allocation4], %s8954_s25 }
 0x19c   : > { %1622 = vst.msk [vmem:[#allocation2 + $0x109] sm:$0xff] %vm520_vm3, %v1546_v45  ;;  %v11409_v38 = vpop.f32.mrf.mxu1  ;;  %v11411_v9 = vpop.f32.mrf.mxu0  ;;  %v1662_v45 = vld [vmem:[#allocation2 + $0xe0] sm:$0xff]  ;;  %v1782_v57 = vrot.slane %v1661_v18, 1 }
 0x19d   : > { %16945 = vst [vmem:[#allocation81_spill] sm:$0xff] %v11409_v38  ;;  %9075 = vmatmul.msk.f32.gmra.mxu3 %vm520_vm3, %v1661_v18  ;;  %v11429_v17 = vpop.f32.mrf.mxu2  ;;  %v1783_v38 = vrot.slane %v1662_v45, 1 }
 0x19e   : > { %16946 = vst [vmem:[#allocation82_spill] sm:$0xff] %v11411_v9  ;;  %9139 = vmatmul.msk.f32.gmra.mxu1 %vm520_vm3, %v1658_v4  ;;  %v2222_v4 = vrot.slane %v1660_v58, 2 }
 0x19f   : > { %v2089_v34 = vpop.f32.mrf.mxu3  ;;  %9107 = vmatmul.msk.f32.gmra.mxu0 %vm520_vm3, %v11415_v19  ;;  %16948 = vst [vmem:[#allocation84_spill] sm:$0xff] %v11429_v17 }
 0x1a0   : > { %9041 = vmatmul.msk.f32.gmra.mxu2 %vm520_vm3, %v11419_v8 }
 0x1a1   : > { %3557 = vrot.lane.b32.xlu1 %v10683_v52, %s10418_s24  ;;  %3565 = vrot.lane.b32.xlu2 %v10747_v5, %s10418_s24  ;;  %v11440_v52 = vsel %vm806_vm2, %v2220_v63, %v2222_v4  ;;  %v11444_v5 = vsel %vm434_vm1, %v1782_v57, %v1783_v38  ;;  %v2224_v63 = vrot.slane %v1661_v18, 2  ;;  %v2225_v4 = vrot.slane %v1662_v45, 2 }
 0x1a2   : > { %3561 = vrot.lane.b32.xlu0 %v10715_v27, %s10418_s24  ;;  %16951 = vst [vmem:[#allocation87_spill] sm:$0xff] %v11440_v52 }
 0x1a3   : > { %v1542_v50 = vpop.permute.xlu0 %1541 }
 0x1a4   : > { %1620 = vst.msk [vmem:[#allocation2 + $0xf1] sm:$0xff] %vm520_vm3, %v1542_v50  ;;  %v11434_v9 = vpop.f32.mrf.mxu1  ;;  %v11436_v8 = vpop.f32.mrf.mxu0 }
 0x1a5   : > { %16949 = vst [vmem:[#allocation85_spill] sm:$0xff] %v11434_v9  ;;  %9076 = vmatmul.msk.f32.gmra.mxu3 %vm520_vm3, %v1662_v45 }
 0x1a6   : > { %16950 = vst [vmem:[#allocation86_spill] sm:$0xff] %v11436_v8  ;;  %9140 = vmatmul.msk.f32.gmra.mxu1 %vm520_vm3, %v1659_v6  ;;  %v1663_v6 = vld [vmem:[#allocation2 + $0xe8] sm:$0x3] }
 0x1a7   : > { %9108 = vmatmul.msk.f32.gmra.mxu0 %vm520_vm3, %v11440_v52 }
 0x1a8   : > { %9042 = vmatmul.msk.f32.gmra.mxu2 %vm520_vm3, %v11444_v5  ;;  %v2092_v58 = vpop.f32.mrf.mxu3 }
 0x1a9   : > { %3563 = vrot.lane.b32.xlu1 %v10730_v49, %s10418_s24  ;;  %3571 = vrot.lane.b32.xlu2 %v10806_v10, %s10418_s24  ;;  %v1785_v10 = vrot.slane %v1663_v6, 1  ;;  %v11465_v49 = vsel %vm806_vm2, %v2224_v63, %v2225_v4 }
 0x1aa   : > { %3567 = vrot.lane.b32.xlu0 %v10762_v29, %s10418_s24  ;;  %16953 = vst [vmem:[#allocation89_spill] sm:$0xff] %v11465_v49 }
 0x1ab   : > { %v1909_v50 = vpop.f32.mrf.mxu2  ;;  %v1544_v57 = vpop.permute.xlu1 %1543  ;;  %v1664_v9 = vld [vmem:[#allocation2 + $0xf0] sm:$0xff]  ;;  %v11469_v29 = vsel %vm434_vm1, %v1783_v38, %v1785_v10 }
 0x1ac   : > { %v11456_v27 = vadd.f32 %v2089_v34, %v1909_v50  ;;  %1621 = vst.msk [vmem:[#allocation2 + $0xf9] sm:$0xff] %vm520_vm3, %v1544_v57  ;;  %v11459_v8 = vpop.f32.mrf.mxu0  ;;  %v11461_v17 = vpop.f32.mrf.mxu1 }
 0x1ad   : > { %16952 = vst [vmem:[#allocation88_spill] sm:$0xff] %v11459_v8  ;;  %9077 = vmatmul.msk.f32.gmra.mxu3 %vm520_vm3, %v1664_v9 }
 0x1ae   : > { %9141 = vmatmul.msk.f32.gmra.mxu1 %vm520_vm3, %v1661_v18 }
 0x1af   : > { %9109 = vmatmul.msk.f32.gmra.mxu0 %vm520_vm3, %v11465_v49 }
 0x1b0   : > { %9043 = vmatmul.msk.f32.gmra.mxu2 %vm520_vm3, %v11469_v29  ;;  %v11475_v34 = vpop.f32.mrf.mxu3 }
 0x1b1   : > { %16954 = vst [vmem:[#allocation90_spill] sm:$0xff] %v11475_v34  ;;  %3569 = vrot.lane.b32.xlu1 %v10781_v51, %s10418_s24  ;;  %3577 = vrot.lane.b32.xlu2 %v10960_v53, %s10418_s24  ;;  %v1787_v34 = vrot.slane %v1664_v9, 1  ;;  %v2227_v51 = vrot.slane %v1663_v6, 2 }
 0x1b2   : > { %3573 = vrot.lane.b32.xlu0 %v10853_v40, %s10418_s24 }
 0x1b3   : > { %v1912_v18 = vpop.f32.mrf.mxu2  ;;  %v1552_v10 = vpop.permute.xlu2 %1551  ;;  %v1665_v38 = vld [vmem:[#allocation2 + $0xf8] sm:$0xff]  ;;  %v11495_v40 = vsel %vm806_vm2, %v2225_v4, %v2227_v51 }
 0x1b4   : > { %v11483_v63 = vadd.f32 %v2092_v58, %v1912_v18  ;;  %1625 = vst.msk [vmem:[#allocation2 + $0x129] sm:$0xff] %vm520_vm3, %v1552_v10  ;;  %v11486_v50 = vpop.f32.mrf.mxu0  ;;  %v11488_v57 = vpop.f32.mrf.mxu1  ;;  %v1788_v8 = vrot.slane %v1665_v38, 1  ;;  %v1666_v18 = vld [vmem:[#allocation2 + $0x100] sm:$0x3]  ;;  %v2230_v51 = vrot.slane %v1665_v38, 2 }
 0x1b5   : > { %16955 = vst [vmem:[#allocation91_spill] sm:$0xff] %v11486_v50  ;;  %9078 = vmatmul.msk.f32.gmra.mxu3 %vm520_vm3, %v1665_v38  ;;  %v1790_v4 = vrot.slane %v1666_v18, 1  ;;  %v2229_v50 = vrot.slane %v1664_v9, 2 }
 0x1b6   : > { %v11492_v53 = vsel %vm434_vm1, %v1787_v34, %v1788_v8  ;;  %16956 = vst [vmem:[#allocation92_spill] sm:$0xff] %v11495_v40  ;;  %9142 = vmatmul.msk.f32.gmra.mxu1 %vm520_vm3, %v1662_v45  ;;  %v1667_v34 = vld [vmem:[#allocation2 + $0x108] sm:$0xff] }
 0x1b7   : > { %9110 = vmatmul.msk.f32.gmra.mxu0 %vm520_vm3, %v11495_v40 }
 0x1b8   : > { %9044 = vmatmul.msk.f32.gmra.mxu2 %vm520_vm3, %v11492_v53  ;;  %v11502_v58 = vpop.f32.mrf.mxu3 }
 0x1b9   : > { %16957 = vst [vmem:[#allocation93_spill] sm:$0xff] %v11502_v58  ;;  %3575 = vrot.lane.b32.xlu1 %v10906_v13, %s10418_s24  ;;  %3583 = vrot.lane.b32.xlu2 %v11061_v25, %s10418_s24  ;;  %v11519_v25 = vsel %vm806_vm2, %v2229_v50, %v2230_v51 }
 0x1ba   : > { %3579 = vrot.lane.b32.xlu0 %v10992_v20, %s10418_s24  ;;  %v11523_v20 = vsel %vm434_vm1, %v1788_v8, %v1790_v4 }
 0x1bb   : > { %v11510_v45 = vpop.f32.mrf.mxu2  ;;  %v1548_v6 = vpop.permute.xlu0 %1547 }
 0x1bc   : > { %16958 = vst [vmem:[#allocation94_spill] sm:$0xff] %v11510_v45  ;;  %v11513_v10 = vpop.f32.mrf.mxu0  ;;  %v11515_v58 = vpop.f32.mrf.mxu1 }
 0x1bd   : > { %1623 = vst.msk [vmem:[#allocation2 + $0x111] sm:$0xff] %vm520_vm3, %v1548_v6  ;;  %9079 = vmatmul.msk.f32.gmra.mxu3 %vm520_vm3, %v1667_v34 }
 0x1be   : > { %16959 = vst [vmem:[#allocation95_spill] sm:$0xff] %v11513_v10  ;;  %9143 = vmatmul.msk.f32.gmra.mxu1 %vm520_vm3, %v1664_v9  ;;  %v2232_v9 = vrot.slane %v1666_v18, 2 }
 0x1bf   : > { %9111 = vmatmul.msk.f32.gmra.mxu0 %vm520_vm3, %v11519_v25 }
 0x1c0   : > { %9045 = vmatmul.msk.f32.gmra.mxu2 %vm520_vm3, %v11523_v20  ;;  %v11529_v6 = vpop.f32.mrf.mxu3 }
 0x1c1   : > { %16960 = vst [vmem:[#allocation96_spill] sm:$0xff] %v11529_v6  ;;  %3581 = vrot.lane.b32.xlu1 %v11025_v31, %s10418_s24  ;;  %3589 = vrot.lane.b32.xlu2 %v11121_v48, %s10418_s24  ;;  %v1792_v6 = vrot.slane %v1667_v34, 1 }
 0x1c2   : > { %3585 = vrot.lane.b32.xlu0 %v11087_v0, %s10418_s24  ;;  %v11549_v0 = vsel %vm806_vm2, %v2230_v51, %v2232_v9 }
 0x1c3   : > { %v11537_v8 = vpop.f32.mrf.mxu2  ;;  %v1550_v50 = vpop.permute.xlu1 %1549 }
 0x1c4   : > { %v1668_v4 = vld [vmem:[#allocation2 + $0x110] sm:$0xff]  ;;  %1624 = vst.msk [vmem:[#allocation2 + $0x121] sm:$0xff] %vm520_vm3, %v1550_v50  ;;  %v11540_v13 = vpop.f32.mrf.mxu0  ;;  %v11542_v10 = vpop.f32.mrf.mxu1  ;;  %v1669_v50 = vld [vmem:[#allocation2 + $0x118] sm:$0x3] }
 0x1c5   : > { %16961 = vst [vmem:[#allocation97_spill] sm:$0xff] %v11540_v13  ;;  %v1793_v45 = vrot.slane %v1668_v4, 1  ;;  %9080 = vmatmul.msk.f32.gmra.mxu3 %vm520_vm3, %v1668_v4  ;;  %v2235_v51 = vrot.slane %v1668_v4, 2  ;;  %v1795_v31 = vrot.slane %v1669_v50, 1 }
 0x1c6   : > { %9144 = vmatmul.msk.f32.gmra.mxu1 %vm520_vm3, %v1665_v38 }
 0x1c7   : > { %v11546_v48 = vsel %vm434_vm1, %v1792_v6, %v1793_v45  ;;  %9112 = vmatmul.msk.f32.gmra.mxu0 %vm520_vm3, %v11549_v0 }
 0x1c8   : > { %9046 = vmatmul.msk.f32.gmra.mxu2 %vm520_vm3, %v11546_v48  ;;  %v11556_v18 = vpop.f32.mrf.mxu3 }
 0x1c9   : > { %16962 = vst [vmem:[#allocation98_spill] sm:$0xff] %v11556_v18  ;;  %3587 = vrot.lane.b32.xlu1 %v11102_v32, %s10418_s24  ;;  %3595 = vrot.lane.b32.xlu2 %v11185_v62, %s10418_s24  ;;  %v2234_v32 = vrot.slane %v1667_v34, 2 }
 0x1ca   : > { %3591 = vrot.lane.b32.xlu0 %v11143_v12, %s10418_s24  ;;  %v16965_v12 = vmov 0.0  }
 0x1cb   : > { %v11564_v38 = vpop.f32.mrf.mxu2  ;;  %v1558_v6 = vpop.permute.xlu2 %1557  ;;  %v11566_v9 = vld [vmem:[#allocation2 + $0x120] sm:$0xff]  ;;  %v11576_v62 = vsel %vm806_vm2, %v2234_v32, %v2235_v51  ;;  %3499 = vst.msk [vmem:[#allocation3 + $0x30] sm:$0xff] %vm3491_vm5, %v16965_v12  ;;  %v11592_v32 = vld [vmem:[#allocation2 + $0x128] sm:$0xff] }
 0x1cc   : > { %16963 = vst [vmem:[#allocation99_spill] sm:$0xff] %v11564_v38  ;;  %v11569_v18 = vpop.f32.mrf.mxu0  ;;  %v11571_v13 = vpop.f32.mrf.mxu1  ;;  %v11582_v38 = vsel %vm434_vm1, %v1793_v45, %v1795_v31  ;;  %v2237_v31 = vrot.slane %v1669_v50, 2 }
 0x1cd   : > { %1628 = vst.msk [vmem:[#allocation2 + $0x151] sm:$0xff] %vm520_vm3, %v1558_v6  ;;  %9081 = vmatmul.msk.f32.gmra.mxu3 %vm520_vm3, %v11566_v9 }
 0x1ce   : > { %16964 = vst [vmem:[#allocation100_spill] sm:$0xff] %v11569_v18  ;;  %9145 = vmatmul.msk.f32.gmra.mxu1 %vm520_vm3, %v1667_v34  ;;  %v11622_v50 = vsel %vm806_vm2, %v2235_v51, %v2237_v31  ;;  %v2239_v51 = vrot.slane %v11566_v9, 2 }
 0x1cf   : > { %9113 = vmatmul.msk.f32.gmra.mxu0 %vm520_vm3, %v11576_v62  ;;  %3500 = vst.msk [vmem:[#allocation3 + $0x38] sm:$0xff] %vm3491_vm5, %v16965_v12 }
 0x1d0   : > { %9047 = vmatmul.msk.f32.gmra.mxu2 %vm520_vm3, %v11582_v38  ;;  %v11590_v6 = vpop.f32.mrf.mxu3  ;;  %3492 = vst.msk [vmem:[#allocation3] sm:$0xff] %vm3491_vm5, %v16965_v12 }
 0x1d1   : > { %16966 = vst [vmem:[#allocation101_spill] sm:$0xff] %v11590_v6  ;;  %3593 = vrot.lane.b32.xlu1 %v11160_v35, %s10418_s24  ;;  %3601 = vrot.lane.b32.xlu2 %v11245_v23, %s10418_s24  ;;  %v1797_v6 = vrot.slane %v11566_v9, 1  ;;  %v1798_v35 = vrot.slane %v11592_v32, 1 }
 0x1d2   : > { %3493 = vst.msk [vmem:[#allocation3 + $0x8] sm:$0xff] %vm3491_vm5, %v16965_v12  ;;  %3597 = vrot.lane.b32.xlu0 %v11205_v47, %s10418_s24 }
 0x1d3   : > { %3496 = vst.msk [vmem:[#allocation3 + $0x18] sm:$0xff] %vm3491_vm5, %v16965_v12  ;;  %v11606_v45 = vpop.f32.mrf.mxu2  ;;  %v1554_v34 = vpop.permute.xlu0 %1553 }
 0x1d4   : > { %16967 = vst [vmem:[#allocation102_spill] sm:$0xff] %v11606_v45  ;;  %v11613_v23 = vpop.f32.mrf.mxu0  ;;  %v11615_v18 = vpop.f32.mrf.mxu1 }
 0x1d5   : > { %3497 = vst.msk [vmem:[#allocation3 + $0x20] sm:$0xff] %vm3491_vm5, %v16965_v12  ;;  %9082 = vmatmul.msk.f32.gmra.mxu3 %vm520_vm3, %v11592_v32 }
 0x1d6   : > { %1626 = vst.msk [vmem:[#allocation2 + $0x139] sm:$0xff] %vm520_vm3, %v1554_v34  ;;  %9146 = vmatmul.msk.f32.gmra.mxu1 %vm520_vm3, %v1668_v4  ;;  %v11628_v34 = vsel %vm434_vm1, %v1797_v6, %v1798_v35  ;;  %v1672_v4 = vld [vmem:[#allocation2 + $0x130] sm:$0x3]  ;;  %v2240_v6 = vrot.slane %v11592_v32, 2 }
 0x1d7   : > { %16968 = vst [vmem:[#allocation103_spill] sm:$0xff] %v11613_v23  ;;  %9114 = vmatmul.msk.f32.gmra.mxu0 %vm520_vm3, %v11622_v50  ;;  %v1800_v23 = vrot.slane %v1672_v4, 1 }
 0x1d8   : > { %3502 = vst.msk [vmem:[#allocation3 + $0x48] sm:$0xff] %vm3491_vm5, %v16965_v12  ;;  %9048 = vmatmul.msk.f32.gmra.mxu2 %vm520_vm3, %v11628_v34  ;;  %v11636_v47 = vpop.f32.mrf.mxu3 }
 0x1d9   : > { %3503 = vst.msk [vmem:[#allocation3 + $0x50] sm:$0xff] %vm3491_vm5, %v16965_v12  ;;  %3599 = vrot.lane.b32.xlu1 %v11228_v30, %s10418_s24  ;;  %3607 = vrot.lane.b32.xlu2 %v11305_v59, %s10418_s24 }
 0x1da   : > { %3505 = vst.msk [vmem:[#allocation3 + $0x60] sm:$0xff] %vm3491_vm5, %v16965_v12  ;;  %3603 = vrot.lane.b32.xlu0 %v11268_v42, %s10418_s24 }
 0x1db   : > { %16969 = vst [vmem:[#allocation104_spill] sm:$0xff] %v11636_v47  ;;  %v11652_v31 = vpop.f32.mrf.mxu2  ;;  %v1556_v30 = vpop.permute.xlu1 %1555 }
 0x1dc   : > { %3506 = vst.msk [vmem:[#allocation3 + $0x68] sm:$0xff] %vm3491_vm5, %v16965_v12  ;;  %v11659_v59 = vpop.f32.mrf.mxu0  ;;  %v11661_v42 = vpop.f32.mrf.mxu1 }
 0x1dd   : > { %3508 = vst.msk [vmem:[#allocation3 + $0x78] sm:$0xff] %vm3491_vm5, %v16965_v12  ;;  %v11654_v47 = vld [vmem:[#allocation2 + $0x138] sm:$0xff] }
 0x1de   : > { %3509 = vst.msk [vmem:[#allocation3 + $0x80] sm:$0xff] %vm3491_vm5, %v16965_v12  ;;  %9083 = vmatmul.msk.f32.gmra.mxu3 %vm520_vm3, %v11654_v47  ;;  %9147 = vmatmul.msk.f32.gmra.mxu1 %vm520_vm3, %v11566_v9 }
 0x1df   : > { %16970 = vst [vmem:[#allocation105_spill] sm:$0xff] %v11652_v31  ;;  %v11668_v31 = vsel %vm806_vm2, %v2239_v51, %v2240_v6 }
 0x1e0   : > { %3511 = vst.msk [vmem:[#allocation3 + $0x90] sm:$0xff] %vm3491_vm5, %v16965_v12  ;;  %9115 = vmatmul.msk.f32.gmra.mxu0 %vm520_vm3, %v11668_v31  ;;  %v11688_v9 = vpop.f32.mrf.mxu3 }
 0x1e1   : > { %1627 = vst.msk [vmem:[#allocation2 + $0x141] sm:$0xff] %vm520_vm3, %v1556_v30  ;;  %v11677_v30 = vld [vmem:[%s16455_s4] ss:$0 sm:$0xff]  ;;  %3605 = vrot.lane.b32.xlu1 %v11285_v22, %s10418_s24  ;;  %3613 = vrot.lane.b32.xlu2 %v11367_v39, %s10418_s24 }
 0x1e2   : > { %16971 = vst [vmem:[#allocation106_spill] sm:$0xff] %v11659_v59  ;;  %v11680_v59 = vsel %vm434_vm1, %v1798_v35, %v1800_v23  ;;  %3609 = vrot.lane.b32.xlu0 %v11325_v28, %s10418_s24  ;;  %v1291_v35 = vadd.f32 %v11677_v30, %v10673_v41  ;;  %v1802_v28 = vrot.slane %v11654_v47, 1 }
 0x1e3   : > { %16972 = vst [vmem:[#allocation107_spill] sm:$0xff] %v11661_v42  ;;  %9049 = vmatmul.msk.f32.gmra.mxu2 %vm520_vm3, %v11680_v59  ;;  %v11704_v23 = vpop.f32.mrf.mxu2  ;;  %v1564_v51 = vpop.permute.xlu2 %1563  ;;  %v2242_v42 = vrot.slane %v1672_v4, 2  ;;  %v1297_v4 = vadd.f32 %v11677_v30, %v10705_v15  ;;  %v2244_v15 = vrot.slane %v11654_v47, 2 }
 0x1e4   : > { %3512 = vst.msk [vmem:[#allocation3 + $0x98] sm:$0xff] %vm3491_vm5, %v16965_v12  ;;  %v11711_v39 = vpop.f32.mrf.mxu0  ;;  %v11713_v22 = vpop.f32.mrf.mxu1 }
 0x1e5   : > { %3514 = vst.msk [vmem:[#allocation3 + $0xa8] sm:$0xff] %vm3491_vm5, %v16965_v12 }
 0x1e6   : > { %3515 = vst.msk [vmem:[#allocation3 + $0xb0] sm:$0xff] %vm3491_vm5, %v16965_v12  ;;  %9148 = vmatmul.msk.f32.gmra.mxu1 %vm520_vm3, %v11592_v32 }
 0x1e7   : > { %16973 = vst [vmem:[#allocation108_spill] sm:$0xff] %v11688_v9 }
 0x1e8   : > { %3517 = vst.msk [vmem:[#allocation3 + $0xc0] sm:$0xff] %vm3491_vm5, %v16965_v12  ;;  %v11706_v9 = vld [vmem:[#allocation2 + $0x140] sm:$0xff] }
 0x1e9   : > { %3518 = vst.msk [vmem:[#allocation3 + $0xc8] sm:$0xff] %vm3491_vm5, %v16965_v12  ;;  %v1803_v45 = vrot.slane %v11706_v9, 1  ;;  %9084 = vmatmul.msk.f32.gmra.mxu3 %vm520_vm3, %v11706_v9  ;;  %3611 = vrot.lane.b32.xlu1 %v11348_v44, %s10418_s24  ;;  %v2245_v32 = vrot.slane %v11706_v9, 2 }
 0x1ea   : > { %3520 = vst.msk [vmem:[#allocation3 + $0xd8] sm:$0xff] %vm3491_vm5, %v16965_v12  ;;  %3615 = vrot.lane.b32.xlu0 %v11394_v26, %s10418_s24  ;;  %v1294_v26 = vadd.f32 %v11677_v30, %v10690_v60  ;;  %s10421_s24 = smov 12  }
 0x1eb   : > { %16974 = vst [vmem:[#allocation109_spill] sm:$0xff] %v11704_v23  ;;  %v11722_v41 = vsel %vm434_vm1, %v1802_v28, %v1803_v45  ;;  %v11737_v28 = vpop.f32.mrf.mxu3  ;;  %v11776_v60 = vsel %vm806_vm2, %v2244_v15, %v2245_v32 }
 0x1ec   : > { %3521 = vst.msk [vmem:[#allocation3 + $0xe0] sm:$0xff] %vm3491_vm5, %v16965_v12  ;;  %9050 = vmatmul.msk.f32.gmra.mxu2 %vm520_vm3, %v11722_v41  ;;  %v11764_v23 = vpop.f32.mrf.mxu0 }
 0x1ed   : > { %1631 = vst.msk [vmem:[#allocation2 + $0x171] sm:$0xff] %vm520_vm3, %v1564_v51  ;;  %v11725_v51 = vsel %vm806_vm2, %v2240_v6, %v2242_v42  ;;  %v1675_v42 = vld [vmem:[#allocation2 + $0x148] sm:$0x3]  ;;  %v1300_v6 = vadd.f32 %v11677_v30, %v10722_v36  ;;  %v11771_v36 = vpop.f32.mrf.mxu1 }
 0x1ee   : > { %16975 = vst [vmem:[#allocation110_spill] sm:$0xff] %v11711_v39  ;;  %v1386_v39 = vmax.f32 %v1291_v35, 0.0  ;;  %9116 = vmatmul.msk.f32.gmra.mxu0 %vm520_vm3, %v11725_v51  ;;  %v11755_v35 = vpop.f32.mrf.mxu2  ;;  %v1805_v44 = vrot.slane %v1675_v42, 1  ;;  %9149 = vmatmul.msk.f32.gmra.mxu1 %vm520_vm3, %v11654_v47  ;;  %v2247_v47 = vrot.slane %v1675_v42, 2 }
 0x1ef   : > { %3523 = vst.msk [vmem:[#allocation3 + $0xf0] sm:$0xff] %vm3491_vm5, %v16965_v12 }
 0x1f0   : > { %3524 = vst.msk [vmem:[#allocation3 + $0xf8] sm:$0xff] %vm3491_vm5, %v16965_v12  ;;  %8645 = vrot.lane.b32.xlu2 %v1386_v39, %s10419_s26  ;;  %v3554_v39 = vpop.permute.xlu2 %3553 }
 0x1f1   : > { %3526 = vst.msk [vmem:[#allocation3 + $0x108] sm:$0xff] %vm3491_vm5, %v16965_v12 }
 0x1f2   : > { %16976 = vst [vmem:[#allocation111_spill] sm:$0xff] %v11737_v28  ;;  %v11762_v28 = vld [vmem:[#allocation2 + $0x150] sm:$0xff] }
 0x1f3   : > { %3527 = vst.msk [vmem:[#allocation3 + $0x110] sm:$0xff] %vm3491_vm5, %v16965_v12  ;;  %9085 = vmatmul.msk.f32.gmra.mxu3 %vm520_vm3, %v11762_v28  ;;  %v11791_v15 = vpop.f32.mrf.mxu3 }
 0x1f4   : > { %3529 = vst.msk [vmem:[#allocation3 + $0x120] sm:$0xff] %vm3491_vm5, %v16965_v12 }
 0x1f5   : > { %3530 = vst.msk [vmem:[#allocation3 + $0x128] sm:$0xff] %vm3491_vm5, %v16965_v12 }
 0x1f6   : > { %16977 = vst [vmem:[#allocation112_spill] sm:$0xff] %v11755_v35  ;;  %v11783_v35 = vsel %vm434_vm1, %v1803_v45, %v1805_v44  ;;  %9117 = vmatmul.msk.f32.gmra.mxu0 %vm520_vm3, %v11776_v60  ;;  %v1306_v44 = vadd.f32 %v11677_v30, %v10754_v14  ;;  %v11806_v45 = vpop.f32.mrf.mxu2  ;;  %v11816_v14 = vpop.f32.mrf.mxu1  ;;  %9150 = vmatmul.msk.f32.gmra.mxu1 %vm520_vm3, %v11706_v9 }
 0x1f7   : > { %3532 = vst.msk [vmem:[#allocation3 + $0x138] sm:$0xff] %vm3491_vm5, %v16965_v12  ;;  %9051 = vmatmul.msk.f32.gmra.mxu2 %vm520_vm3, %v11783_v35  ;;  %v1315_v9 = vadd.f32 %v11677_v30, %v10825_v24 }
 0x1f8   : > { %3650 = vst.msk [vmem:[#allocation3 + $0x32] sm:$0xff] %vm3491_vm5, %v3554_v39  ;;  %v1388_v39 = vmax.f32 %v1297_v4, 0.0  ;;  %v3560_v4 = vpop.permute.xlu2 %3559 }
 0x1f9   : > { %16978 = vst [vmem:[#allocation113_spill] sm:$0xff] %v11764_v23  ;;  %v1389_v23 = vmax.f32 %v1300_v6, 0.0  ;;  %v11812_v6 = vpop.f32.mrf.mxu0 }
 0x1fa   : > { %3533 = vst.msk [vmem:[#allocation3 + $0x140] sm:$0xff] %vm3491_vm5, %v16965_v12  ;;  %8649 = vrot.lane.b32.xlu1 %v1388_v39, %s10419_s26 }
 0x1fb   : > { %16979 = vst [vmem:[#allocation114_spill] sm:$0xff] %v11771_v36  ;;  %v1387_v36 = vmax.f32 %v1294_v26, 0.0  ;;  %8651 = vrot.lane.b32.xlu2 %v1389_v23, %s10419_s26  ;;  %v1309_v26 = vadd.f32 %v11677_v30, %v10769_v37  ;;  %v1303_v23 = vadd.f32 %v11677_v30, %v10737_v56  ;;  %v11821_v37 = vsel %vm806_vm2, %v2245_v32, %v2247_v47 }
 0x1fc   : > { %3535 = vst.msk [vmem:[#allocation3 + $0x150] sm:$0xff] %vm3491_vm5, %v16965_v12  ;;  %v1391_v56 = vmax.f32 %v1306_v44, 0.0  ;;  %v1318_v32 = vadd.f32 %v11677_v30, %v10872_v46  ;;  %v1312_v44 = vadd.f32 %v11677_v30, %v10790_v61  ;;  %v1394_v46 = vmax.f32 %v1315_v9, 0.0 }
 0x1fd   : > { %3536 = vst.msk [vmem:[#allocation3 + $0x158] sm:$0xff] %vm3491_vm5, %v16965_v12  ;;  %8647 = vrot.lane.b32.xlu0 %v1387_v36, %s10419_s26  ;;  %v1392_v42 = vmax.f32 %v1309_v26, 0.0  ;;  %v1560_v36 = vpop.permute.xlu0 %1559  ;;  %v1390_v39 = vmax.f32 %v1303_v23, 0.0 }
 0x1fe   : > { %3538 = vst.msk [vmem:[#allocation3 + $0x168] sm:$0xff] %vm3491_vm5, %v16965_v12  ;;  %9118 = vmatmul.msk.f32.gmra.mxu0 %vm520_vm3, %v11821_v37  ;;  %v11844_v47 = vpop.f32.mrf.mxu2  ;;  %v11855_v24 = vpop.f32.mrf.mxu1  ;;  %9151 = vmatmul.msk.f32.gmra.mxu1 %vm520_vm3, %v11762_v28  ;;  %v1393_v61 = vmax.f32 %v1312_v44, 0.0 }
 0x1ff   : > { %16980 = vst [vmem:[#allocation115_spill] sm:$0xff] %v11791_v15  ;;  %v1562_v15 = vpop.permute.xlu1 %1561 }
 0x200   : > { %3539 = vst.msk [vmem:[#allocation3 + $0x170] sm:$0xff] %vm3491_vm5, %v16965_v12  ;;  %v11850_v26 = vpop.permute.xlu2 %3565 }
 0x201   : > { %3541 = vst.msk [vmem:[#allocation3 + $0x180] sm:$0xff] %vm3491_vm5, %v16965_v12  ;;  %v11852_v23 = vpop.f32.mrf.mxu0 }
 0x202   : > { %3542 = vst.msk [vmem:[#allocation3 + $0x188] sm:$0xff] %vm3491_vm5, %v16965_v12  ;;  %8655 = vrot.lane.b32.xlu1 %v1391_v56, %s10419_s26 }
 0x203   : > { %16981 = vst [vmem:[#allocation116_spill] sm:$0xff] %v11806_v45  ;;  %8657 = vrot.lane.b32.xlu2 %v1392_v42, %s10419_s26  ;;  %v1324_v42 = vadd.f32 %v11677_v30, %v10976_v3  ;;  %v1336_v45 = vadd.f32 %v11677_v30, %v11095_v43 }
 0x204   : > { %3544 = vst.msk [vmem:[#allocation3 + $0x198] sm:$0xff] %vm3491_vm5, %v16965_v12 }
 0x205   : > { %16982 = vst [vmem:[#allocation117_spill] sm:$0xff] %v11812_v6  ;;  %v11831_v6 = vpop.f32.mrf.mxu3  ;;  %8653 = vrot.lane.b32.xlu0 %v1390_v39, %s10419_s26  ;;  %v11892_v44 = vpop.permute.xlu0 %1565 }
 0x206   : > { %3545 = vst.msk [vmem:[#allocation3 + $0x1a0] sm:$0xff] %vm3491_vm5, %v16965_v12 }
 0x207   : > { %3547 = vst.msk [vmem:[#allocation3 + $0x1b0] sm:$0xff] %vm3491_vm5, %v16965_v12 }
 0x208   : > { %3548 = vst.msk [vmem:[#allocation3 + $0x1b8] sm:$0xff] %vm3491_vm5, %v16965_v12 }
 0x209   : > { %3550 = vst.msk [vmem:[#allocation3 + $0x1c8] sm:$0xff] %vm3491_vm5, %v16965_v12 }
 0x20a   : > { %16983 = vst [vmem:[#allocation118_spill] sm:$0xff] %v11831_v6  ;;  %8661 = vrot.lane.b32.xlu1 %v1394_v46, %s10419_s26 }
 0x20b   : > { %3551 = vst.msk [vmem:[#allocation3 + $0x1d0] sm:$0xff] %vm3491_vm5, %v16965_v12 }
 0x20c   : > { %1629 = vst.msk [vmem:[#allocation2 + $0x159] sm:$0xff] %vm520_vm3, %v1560_v36  ;;  %v1327_v36 = vadd.f32 %v11677_v30, %v11007_v21  ;;  %v2249_v21 = vrot.slane %v11762_v28, 2 }
 0x20d   : > { %1630 = vst.msk [vmem:[#allocation2 + $0x169] sm:$0xff] %vm520_vm3, %v1562_v15  ;;  %v1395_v15 = vmax.f32 %v1318_v32, 0.0  ;;  %v11865_v56 = vpop.f32.mrf.mxu3  ;;  %8659 = vrot.lane.b32.xlu0 %v1393_v61, %s10419_s26  ;;  %v11890_v32 = vpop.f32.mrf.mxu2 }
 0x20e   : > { %16984 = vst [vmem:[#allocation119_spill] sm:$0xff] %v11844_v47  ;;  %v11904_v61 = vpop.f32.mrf.mxu0 }
 0x20f   : > { %3504 = vst.msk [vmem:[#allocation3 + $0x58] sm:$0xf] %vm3494_vm6, %v16965_v12  ;;  %8663 = vrot.lane.b32.xlu2 %v1395_v15, %s10419_s26 }
 0x210   : > { %16985 = vst [vmem:[#allocation120_spill] sm:$0xff] %v11852_v23  ;;  %v1398_v23 = vmax.f32 %v1327_v36, 0.0 }
 0x211   : > { %3653 = vst.msk [vmem:[#allocation3 + $0x52] sm:$0xff] %vm3491_vm5, %v3560_v4  ;;  %v1321_v4 = vadd.f32 %v11677_v30, %v10940_v33  ;;  %v1807_v33 = vrot.slane %v11762_v28, 1 }
 0x212   : > { %16986 = vst [vmem:[#allocation121_spill] sm:$0xff] %v11855_v24  ;;  %v1401_v24 = vmax.f32 %v1336_v45, 0.0 }
 0x213   : > { %3495 = vst.msk [vmem:[#allocation3 + $0x10] sm:$0xf] %vm3494_vm6, %v16965_v12  ;;  %v11875_v39 = vld [vmem:[#allocation2 + $0x158] sm:$0xff]  ;;  %v1678_v15 = vld [vmem:[#allocation2 + $0x160] sm:$0x3]  ;;  %v1396_v6 = vmax.f32 %v1321_v4, 0.0 }
 0x214   : > { %3498 = vst.msk [vmem:[#allocation3 + $0x28] sm:$0xf] %vm3494_vm6, %v16965_v12  ;;  %9086 = vmatmul.msk.f32.gmra.mxu3 %vm520_vm3, %v11875_v39  ;;  %v1808_v3 = vrot.slane %v11875_v39, 1  ;;  %v2250_v9 = vrot.slane %v11875_v39, 2  ;;  %9152 = vmatmul.msk.f32.gmra.mxu1 %vm520_vm3, %v11875_v39  ;;  %v9225_v4 = vld [vmem:[%s16456_s5 + $0x18] sm:$0xf] }
 0x215   : > { %3501 = vst.msk [vmem:[#allocation3 + $0x40] sm:$0xf] %vm3494_vm6, %v16965_v12  ;;  %v1810_v47 = vrot.slane %v1678_v15, 1  ;;  %v11934_v36 = vpop.f32.mrf.mxu3  ;;  %9226 = vmatpush.msk.msra.mxu0 %vm585_vm0, %v9225_v4  ;;  %8665 = vrot.lane.b32.xlu0 %v1396_v6, %s10419_s26  ;;  %v11956_v43 = vld [vmem:[#allocation2 + $0x170] sm:$0xff]  ;;  %v11958_v4 = vpop.f32.mrf.mxu2 }
 0x216   : > { %16987 = vst [vmem:[#allocation122_spill] sm:$0xff] %v11865_v56  ;;  %v11897_v46 = vsel %vm434_vm1, %v1807_v33, %v1808_v3  ;;  %v11900_v28 = vsel %vm806_vm2, %v2249_v21, %v2250_v9  ;;  %v11902_v56 = vpop.permute.xlu2 %3571  ;;  %v11912_v33 = vpop.f32.mrf.mxu1  ;;  %v9293_v21 = vld [vmem:[%s16456_s5 + $0x20] sm:$0xf]  ;;  %v1813_v45 = vrot.slane %v11956_v43, 1 }
 0x217   : > { %3507 = vst.msk [vmem:[#allocation3 + $0x70] sm:$0xf] %vm3494_vm6, %v16965_v12  ;;  %9052 = vmatmul.msk.f32.gmra.mxu2 %vm520_vm3, %v11897_v46  ;;  %9119 = vmatmul.msk.f32.gmra.mxu0 %vm520_vm3, %v11900_v28  ;;  %v11966_v6 = vsel %vm434_vm1, %v1808_v3, %v1810_v47 }
 0x218   : > { %3510 = vst.msk [vmem:[#allocation3 + $0x88] sm:$0xf] %vm3494_vm6, %v16965_v12  ;;  %9294 = vmatpush.msk.msra.mxu2 %vm585_vm0, %v9293_v21  ;;  %v2252_v21 = vrot.slane %v1678_v15, 2  ;;  %8669 = vrot.lane.b32.xlu2 %v1398_v23, %s10419_s26  ;;  %v1333_v15 = vadd.f32 %v11677_v30, %v11080_v54  ;;  %v1330_v23 = vadd.f32 %v11677_v30, %v11043_v11  ;;  %v11977_v11 = vpop.f32.mrf.mxu0 }
 0x219   : > { %3513 = vst.msk [vmem:[#allocation3 + $0xa0] sm:$0xf] %vm3494_vm6, %v16965_v12 }
 0x21a   : > { %16988 = vst [vmem:[#allocation123_spill] sm:$0xff] %v11890_v32  ;;  %v1397_v32 = vmax.f32 %v1324_v42, 0.0  ;;  %v9259_v42 = vld [vmem:[%s16456_s5 + $0x1c] sm:$0xf]  ;;  %v11969_v54 = vsel %vm806_vm2, %v2250_v9, %v2252_v21  ;;  %v1400_v3 = vmax.f32 %v1333_v15, 0.0  ;;  %v1399_v9 = vmax.f32 %v1330_v23, 0.0 }
 0x21b   : > { %3516 = vst.msk [vmem:[#allocation3 + $0xb8] sm:$0xf] %vm3494_vm6, %v16965_v12  ;;  %9260 = vmatpush.msk.msra.mxu1 %vm585_vm0, %v9259_v42 }
 0x21c   : > { %16989 = vst [vmem:[#allocation124_spill] sm:$0xff] %v11904_v61  ;;  %v11927_v61 = vld [vmem:[#allocation2 + $0x168] sm:$0xff]  ;;  %8667 = vrot.lane.b32.xlu1 %v1397_v32, %s10419_s26  ;;  %v1568_v32 = vpop.permute.xlu1 %1567 }
 0x21d   : > { %3519 = vst.msk [vmem:[#allocation3 + $0xd0] sm:$0xf] %vm3494_vm6, %v16965_v12  ;;  %9087 = vmatmul.msk.f32.gmra.mxu3 %vm520_vm3, %v11927_v61  ;;  %v1812_v47 = vrot.slane %v11927_v61, 1  ;;  %9153 = vmatmul.msk.f32.gmra.mxu1 %vm520_vm3, %v11927_v61  ;;  %v11991_v21 = vpop.f32.mrf.mxu3 }
 0x21e   : > { %16990 = vst [vmem:[#allocation125_spill] sm:$0xff] %v11912_v33  ;;  %v9327_v33 = vld [vmem:[%s16458_s7 + $0x2] sm:$0x3]  ;;  %v3578_v42 = vpop.permute.xlu2 %3577  ;;  %8671 = vrot.lane.b32.xlu0 %v1399_v9, %s10419_s26 }
 0x21f   : > { %3522 = vst.msk [vmem:[#allocation3 + $0xe8] sm:$0xf] %vm3494_vm6, %v16965_v12  ;;  %9328 = vmatpush.msk.msra.mxu3 %vm3937_vm7, %v9327_v33  ;;  %9053 = vmatmul.msk.f32.gmra.mxu2 %vm520_vm3, %v11966_v6  ;;  %v11979_v33 = vpop.f32.mrf.mxu1 }
 0x220   : > { %3525 = vst.msk [vmem:[#allocation3 + $0x100] sm:$0xf] %vm3494_vm6, %v16965_v12  ;;  %9120 = vmatmul.msk.f32.gmra.mxu0 %vm520_vm3, %v11969_v54  ;;  %8675 = vrot.lane.b32.xlu2 %v1401_v24, %s10419_s26 }
 0x221   : > { %3528 = vst.msk [vmem:[#allocation3 + $0x118] sm:$0xf] %vm3494_vm6, %v16965_v12 }
 0x222   : > { %16991 = vst [vmem:[#allocation126_spill] sm:$0xff] %v11934_v36  ;;  %v3556_v36 = vpop.permute.xlu0 %3555 }
 0x223   : > { %3531 = vst.msk [vmem:[#allocation3 + $0x130] sm:$0xf] %vm3494_vm6, %v16965_v12 }
 0x224   : > { %3534 = vst.msk [vmem:[#allocation3 + $0x148] sm:$0xf] %vm3494_vm6, %v16965_v12  ;;  %8673 = vrot.lane.b32.xlu1 %v1400_v3, %s10419_s26 }
 0x225   : > { %3537 = vst.msk [vmem:[#allocation3 + $0x160] sm:$0xf] %vm3494_vm6, %v16965_v12  ;;  %9088 = vmatmul.msk.f32.gmra.mxu3 %vm520_vm3, %v11956_v43  ;;  %9154 = vmatmul.msk.f32.gmra.mxu1 %vm520_vm3, %v11956_v43 }
 0x226   : > { %16992 = vst [vmem:[#allocation127_spill] sm:$0xff] %v11958_v4  ;;  %v2255_v4 = vrot.slane %v11956_v43, 2 }
 0x227   : > { %3540 = vst.msk [vmem:[#allocation3 + $0x178] sm:$0xf] %vm3494_vm6, %v16965_v12  ;;  %v12028_v9 = vpop.f32.mrf.mxu1 }
 0x228   : > { %16993 = vst [vmem:[#allocation128_spill] sm:$0xff] %v11966_v6  ;;  %v1345_v6 = vadd.f32 %v11677_v30, %v11152_v2  ;;  %v12015_v2 = vpop.f32.mrf.mxu2 }
 0x229   : > { %3543 = vst.msk [vmem:[#allocation3 + $0x190] sm:$0xf] %vm3494_vm6, %v16965_v12 }
 0x22a   : > { %16994 = vst [vmem:[#allocation129_spill] sm:$0xff] %v11977_v11  ;;  %v2254_v11 = vrot.slane %v11927_v61, 2  ;;  %v3562_v23 = vpop.permute.xlu0 %3561 }
 0x22b   : > { %16995 = vst [vmem:[#allocation130_spill] sm:$0xff] %v11979_v33  ;;  %v1342_v33 = vadd.f32 %v11677_v30, %v11132_v55  ;;  %v12010_v55 = vsel %vm434_vm1, %v1812_v47, %v1813_v45  ;;  %v1681_v47 = vld [vmem:[#allocation2 + $0x178] sm:$0x3] }
 0x22c   : > { %3546 = vst.msk [vmem:[#allocation3 + $0x1a8] sm:$0xf] %vm3494_vm6, %v16965_v12  ;;  %v12019_v24 = vsel %vm806_vm2, %v2254_v11, %v2255_v4  ;;  %9054 = vmatmul.msk.f32.gmra.mxu2 %vm520_vm3, %v12010_v55  ;;  %v2257_v11 = vrot.slane %v1681_v47, 2 }
 0x22d   : > { %3549 = vst.msk [vmem:[#allocation3 + $0x1c0] sm:$0xf] %vm3494_vm6, %v16965_v12  ;;  %v1403_v3 = vmax.f32 %v1342_v33, 0.0  ;;  %9121 = vmatmul.msk.f32.gmra.mxu0 %vm520_vm3, %v12019_v24  ;;  %v17001_v33 = vld [vmem:[#allocation40_spill] sm:$0xff] }
 0x22e   : > { %3552 = vst.msk [vmem:[#allocation3 + $0x1d8] sm:$0xf] %vm3494_vm6, %v16965_v12  ;;  %v16997_v12 = vld [vmem:[#allocation26_spill] sm:$0xff] }
 0x22f   : > { %16996 = vst [vmem:[#allocation131_spill] sm:$0xff] %v11991_v21  ;;  %v1339_v15 = vadd.f32 %v11677_v30, %v16997_v12  ;;  %v1404_v12 = vmax.f32 %v1345_v6, 0.0  ;;  %v1815_v6 = vrot.slane %v1681_v47, 1  ;;  %v1351_v21 = vadd.f32 %v11677_v30, %v17001_v33  ;;  %8679 = vrot.lane.b32.xlu1 %v1403_v3, %s10419_s26 }
 0x230   : > { %3656 = vst.msk [vmem:[#allocation3 + $0x7a] sm:$0xff] %vm3491_vm5, %v11850_v26  ;;  %v3558_v26 = vpop.permute.xlu1 %3557 }
 0x231   : > { %3659 = vst.msk [vmem:[#allocation3 + $0x9a] sm:$0xff] %vm3491_vm5, %v11902_v56  ;;  %v3584_v56 = vpop.permute.xlu2 %3583  ;;  %8681 = vrot.lane.b32.xlu2 %v1404_v12, %s10419_s26 }
 0x232   : > { %1632 = vst.msk [vmem:[#allocation2 + $0x181] sm:$0xff] %vm520_vm3, %v11892_v44  ;;  %v12026_v44 = vpop.f32.mrf.mxu0  ;;  %v3568_v12 = vpop.permute.xlu0 %3567 }
 0x233   : > { %16998 = vst [vmem:[#allocation26_spill] sm:$0xff] %v12015_v2 }
 0x234   : > { %1633 = vst.msk [vmem:[#allocation2 + $0x189] sm:$0xff] %vm520_vm3, %v1568_v32  ;;  %v1402_v32 = vmax.f32 %v1339_v15, 0.0 }
 0x235   : > { %3662 = vst.msk [vmem:[#allocation3 + $0xc2] sm:$0xff] %vm3491_vm5, %v3578_v42  ;;  %v12035_v42 = vpop.f32.mrf.mxu3 }
 0x236   : > { %16999 = vst [vmem:[#allocation132_spill] sm:$0xff] %v12026_v44  ;;  %v17002_v44 = vld [vmem:[#allocation44_spill] sm:$0xff]  ;;  %8677 = vrot.lane.b32.xlu0 %v1402_v32, %s10419_s26 }
 0x237   : > { %3651 = vst.msk [vmem:[#allocation3 + $0x3a] sm:$0xff] %vm3491_vm5, %v3556_v36  ;;  %v1354_v2 = vadd.f32 %v11677_v30, %v17002_v44  ;;  %v17003_v36 = vld [vmem:[#allocation36_spill] sm:$0xff]  ;;  %v12054_v44 = vsel %vm434_vm1, %v1813_v45, %v1815_v6  ;;  %v12067_v45 = vpop.f32.mrf.mxu1 }
 0x238   : > { %3652 = vst.msk [vmem:[#allocation3 + $0x4a] sm:$0xff] %vm3491_vm5, %v3558_v26  ;;  %v1348_v15 = vadd.f32 %v11677_v30, %v17003_v36  ;;  %v17004_v26 = vld [vmem:[#allocation27_spill] sm:$0xff]  ;;  %v3564_v47 = vpop.permute.xlu1 %3563  ;;  %v1406_v36 = vmax.f32 %v1351_v21, 0.0  ;;  %9055 = vmatmul.msk.f32.gmra.mxu2 %vm520_vm3, %v12054_v44 }
 0x239   : > { %3665 = vst.msk [vmem:[#allocation3 + $0xe2] sm:$0xff] %vm3491_vm5, %v3584_v56  ;;  %9193 = vmatmul.msk.f32.vlgmr.msrb.gmra.mxu3 %vm520_vm3, %v17004_v26  ;;  %v12049_v56 = vpop.f32.mrf.mxu2  ;;  %v12051_v33 = vld [vmem:[#allocation2 + $0x180] sm:$0xff]  ;;  %v3590_v3 = vpop.permute.xlu2 %3589 }
 0x23a   : > { %17000 = vst [vmem:[#allocation133_spill] sm:$0xff] %v12035_v42  ;;  %v1407_v42 = vmax.f32 %v1354_v2, 0.0  ;;  %v12065_v32 = vpop.f32.mrf.mxu0  ;;  %9155 = vmatmul.msk.f32.gmra.mxu1 %vm520_vm3, %v12051_v33  ;;  %v17009_v2 = vld [vmem:[#allocation52_spill] sm:$0xff]  ;;  %8685 = vrot.lane.b32.xlu1 %v1406_v36, %s10419_s26 }
 0x23b   : > { %3654 = vst.msk [vmem:[#allocation3 + $0x62] sm:$0xff] %vm3491_vm5, %v3562_v23  ;;  %v12057_v23 = vsel %vm806_vm2, %v2255_v4, %v2257_v11  ;;  %v1405_v4 = vmax.f32 %v1348_v15, 0.0  ;;  %v1360_v6 = vadd.f32 %v11677_v30, %v17009_v2  ;;  %v17010_v11 = vld [vmem:[#allocation56_spill] sm:$0xff] }
 0x23c   : > { %17005 = vst [vmem:[#allocation40_spill] sm:$0xff] %v12049_v56  ;;  %9122 = vmatmul.msk.f32.gmra.mxu0 %vm520_vm3, %v12057_v23  ;;  %v1363_v26 = vadd.f32 %v11677_v30, %v17010_v11  ;;  %8687 = vrot.lane.b32.xlu2 %v1407_v42, %s10419_s26  ;;  %v3574_v11 = vpop.permute.xlu0 %3573  ;;  %v17014_v42 = vld [vmem:[#allocation25_spill] sm:$0xff] }
 0x23d   : > { %3655 = vst.msk [vmem:[#allocation3 + $0x6a] sm:$0xff] %vm3491_vm5, %v3564_v47  ;;  %v12072_v21 = vpop.f32.mrf.mxu3  ;;  %v17011_v47 = vld [vmem:[#allocation48_spill] sm:$0xff]  ;;  %v1409_v36 = vmax.f32 %v1360_v6, 0.0 }
 0x23e   : > { %3668 = vst.msk [vmem:[#allocation3 + $0x10a] sm:$0xff] %vm3491_vm5, %v3590_v3  ;;  %v1357_v15 = vadd.f32 %v11677_v30, %v17011_v47  ;;  %v17012_v3 = vld [vmem:[#allocation31_spill] sm:$0xff]  ;;  %8683 = vrot.lane.b32.xlu0 %v1405_v4, %s10419_s26  ;;  %v1410_v56 = vmax.f32 %v1363_v26, 0.0  ;;  %v17018_v6 = vld [vmem:[#allocation64_spill] sm:$0xff] }
 0x23f   : > { %17006 = vst [vmem:[#allocation44_spill] sm:$0xff] %v12065_v32  ;;  %v12087_v32 = vld [vmem:[#allocation2 + $0x188] sm:$0xff]  ;;  %v10235_v47 = vld [vmem:[#allocation2 + $0x30] sm:$0xff]  ;;  %v1369_v26 = vadd.f32 %v11677_v30, %v17018_v6 }
 0x240   : > { %17007 = vst [vmem:[#allocation36_spill] sm:$0xff] %v12067_v45  ;;  %9159 = vmatmul.msk.f32.vlgmr.msrb.gmra.mxu2 %vm520_vm3, %v17014_v42  ;;  %v17019_v42 = vld [vmem:[#allocation68_spill] sm:$0xff] }
 0x241   : > { %3657 = vst.msk [vmem:[#allocation3 + $0x82] sm:$0xff] %vm3491_vm5, %v3568_v12  ;;  %9194 = vmatmul.msk.f32.gmra.mxu3 %vm520_vm3, %v17012_v3  ;;  %v12085_v12 = vpop.f32.mrf.mxu2  ;;  %v3596_v2 = vpop.permute.xlu2 %3595 }
 0x242   : > { %17008 = vst [vmem:[#allocation27_spill] sm:$0xff] %v12072_v21  ;;  %v3570_v21 = vpop.permute.xlu1 %3569  ;;  %v12094_v4 = vpop.f32.mrf.mxu0  ;;  %9156 = vmatmul.msk.f32.gmra.mxu1 %vm520_vm3, %v12087_v32  ;;  %8691 = vrot.lane.b32.xlu1 %v1409_v36, %s10419_s26  ;;  %v17023_v36 = vld [vmem:[#allocation29_spill] sm:$0xff] }
 0x243   : > { %17013 = vst [vmem:[#allocation52_spill] sm:$0xff] %v12085_v12  ;;  %v12096_v3 = vpop.f32.mrf.mxu1  ;;  %v1408_v12 = vmax.f32 %v1357_v15, 0.0 }
 0x244   : > { %3658 = vst.msk [vmem:[#allocation3 + $0x92] sm:$0xff] %vm3491_vm5, %v3570_v21  ;;  %9227 = vmatmul.msk.f32.vlgmr.msra.gmra.mxu0 %vm520_vm3, %v10235_v47  ;;  %v1372_v47 = vadd.f32 %v11677_v30, %v17019_v42  ;;  %8693 = vrot.lane.b32.xlu2 %v1410_v56, %s10419_s26  ;;  %v1412_v42 = vmax.f32 %v1369_v26, 0.0  ;;  %v10236_v56 = vld [vmem:[#allocation2 + $0x38] sm:$0xff] }
 0x245   : > { %3671 = vst.msk [vmem:[#allocation3 + $0x12a] sm:$0xff] %vm3491_vm5, %v3596_v2  ;;  %v12101_v21 = vpop.f32.mrf.mxu3  ;;  %v17020_v2 = vld [vmem:[#allocation60_spill] sm:$0xff] }
 0x246   : > { %17015 = vst [vmem:[#allocation56_spill] sm:$0xff] %v12094_v4  ;;  %v1366_v15 = vadd.f32 %v11677_v30, %v17020_v2  ;;  %v17021_v4 = vld [vmem:[#allocation33_spill] sm:$0xff]  ;;  %8689 = vrot.lane.b32.xlu0 %v1408_v12, %s10419_s26  ;;  %v1413_v45 = vmax.f32 %v1372_v47, 0.0  ;;  %v1375_v47 = vadd.f32 %v11677_v30, %v11359_v1 }
 0x247   : > { %17016 = vst [vmem:[#allocation48_spill] sm:$0xff] %v12096_v3  ;;  %v3580_v3 = vpop.permute.xlu0 %3579 }
 0x248   : > { %3660 = vst.msk [vmem:[#allocation3 + $0xaa] sm:$0xff] %vm3491_vm5, %v3574_v11  ;;  %9160 = vmatmul.msk.f32.gmra.mxu2 %vm520_vm3, %v17023_v36 }
 0x249   : > { %17017 = vst [vmem:[#allocation31_spill] sm:$0xff] %v12101_v21  ;;  %9195 = vmatmul.msk.f32.gmra.mxu3 %vm520_vm3, %v17021_v4  ;;  %v12114_v11 = vpop.f32.mrf.mxu2  ;;  %v3602_v6 = vpop.permute.xlu2 %3601 }
 0x24a   : > { %17022 = vst [vmem:[#allocation25_spill] sm:$0xff] %v12114_v11  ;;  %v3576_v21 = vpop.permute.xlu1 %3575  ;;  %v12121_v2 = vpop.f32.mrf.mxu0  ;;  %v1411_v11 = vmax.f32 %v1366_v15, 0.0  ;;  %8697 = vrot.lane.b32.xlu1 %v1412_v42, %s10419_s26  ;;  %v10237_v42 = vld [vmem:[#allocation2 + $0x48] sm:$0xff] }
 0x24b   : > { %3661 = vst.msk [vmem:[#allocation3 + $0xb2] sm:$0xff] %vm3491_vm5, %v3576_v21  ;;  %v12123_v12 = vpop.f32.mrf.mxu1  ;;  %v17025_v21 = vld [vmem:[#allocation30_spill] sm:$0xff] }
 0x24c   : > { %9228 = vmatmul.msk.f32.gmra.mxu0 %vm520_vm3, %v10236_v56  ;;  %3674 = vst.msk [vmem:[#allocation3 + $0x152] sm:$0xff] %vm3491_vm5, %v3602_v6  ;;  %9261 = vmatmul.msk.f32.vlgmr.msra.gmra.mxu1 %vm520_vm3, %v17025_v21  ;;  %v17027_v6 = vld [vmem:[#allocation37_spill] sm:$0xff] }
 0x24d   : > { %17024 = vst [vmem:[#allocation64_spill] sm:$0xff] %v12121_v2  ;;  %v12128_v26 = vpop.f32.mrf.mxu3  ;;  %8699 = vrot.lane.b32.xlu2 %v1413_v45, %s10419_s26  ;;  %v1414_v45 = vmax.f32 %v1375_v47, 0.0  ;;  %v10238_v47 = vld [vmem:[#allocation2 + $0x50] sm:$0xff] }
 0x24e   : > { %3663 = vst.msk [vmem:[#allocation3 + $0xca] sm:$0xff] %vm3491_vm5, %v3580_v3  ;;  %8695 = vrot.lane.b32.xlu0 %v1411_v11, %s10419_s26  ;;  %v17030_v11 = vld [vmem:[#allocation35_spill] sm:$0xff] }
 0x24f   : > { %17026 = vst [vmem:[#allocation68_spill] sm:$0xff] %v12128_v26  ;;  %v3586_v56 = vpop.permute.xlu0 %3585  ;;  %v17032_v26 = vld [vmem:[#allocation41_spill] sm:$0xff] }
 0x250   : > { %9161 = vmatmul.msk.f32.gmra.mxu2 %vm520_vm3, %v17025_v21  ;;  %3666 = vst.msk [vmem:[#allocation3 + $0xf2] sm:$0xff] %vm3491_vm5, %v3586_v56 }
 0x251   : > { %9196 = vmatmul.msk.f32.gmra.mxu3 %vm520_vm3, %v17027_v6  ;;  %v12137_v15 = vpop.f32.mrf.mxu2  ;;  %v3608_v36 = vpop.permute.xlu2 %3607 }
 0x252   : > { %17028 = vst [vmem:[#allocation60_spill] sm:$0xff] %v12137_v15  ;;  %v3582_v3 = vpop.permute.xlu1 %3581  ;;  %v12144_v1 = vpop.f32.mrf.mxu0 }
 0x253   : > { %3664 = vst.msk [vmem:[#allocation3 + $0xda] sm:$0xff] %vm3491_vm5, %v3582_v3  ;;  %v12146_v30 = vpop.f32.mrf.mxu1 }
 0x254   : > { %9229 = vmatmul.msk.f32.gmra.mxu0 %vm520_vm3, %v10237_v42  ;;  %3677 = vst.msk [vmem:[#allocation3 + $0x172] sm:$0xff] %vm3491_vm5, %v3608_v36  ;;  %9262 = vmatmul.msk.f32.gmra.mxu1 %vm520_vm3, %v17030_v11 }
 0x255   : > { %17029 = vst [vmem:[#allocation33_spill] sm:$0xff] %v12144_v1  ;;  %v12151_v3 = vpop.f32.mrf.mxu3 }
 0x256   : > { %17031 = vst [vmem:[#allocation29_spill] sm:$0xff] %v12151_v3  ;;  %8701 = vrot.lane.b32.xlu0 %v1414_v45, %s10419_s26  ;;  %v17036_v45 = vld [vmem:[#allocation39_spill] sm:$0xff] }
 0x257   : > { %v3592_v1 = vpop.permute.xlu0 %3591 }
 0x258   : > { %9162 = vmatmul.msk.f32.gmra.mxu2 %vm520_vm3, %v17030_v11  ;;  %3669 = vst.msk [vmem:[#allocation3 + $0x112] sm:$0xff] %vm3491_vm5, %v3592_v1 }
 0x259   : > { %9197 = vmatmul.msk.f32.gmra.mxu3 %vm520_vm3, %v17032_v26  ;;  %v12156_v21 = vpop.f32.mrf.mxu2  ;;  %v3614_v42 = vpop.permute.xlu2 %3613 }
 0x25a   : > { %17033 = vst [vmem:[#allocation30_spill] sm:$0xff] %v12156_v21  ;;  %v3588_v36 = vpop.permute.xlu1 %3587  ;;  %v12163_v56 = vpop.f32.mrf.mxu0  ;;  %v17038_v21 = vld [vmem:[#allocation46_spill] sm:$0xff] }
 0x25b   : > { %3667 = vst.msk [vmem:[#allocation3 + $0xfa] sm:$0xff] %vm3491_vm5, %v3588_v36  ;;  %v12165_v3 = vpop.f32.mrf.mxu1 }
 0x25c   : > { %9230 = vmatmul.msk.f32.gmra.mxu0 %vm520_vm3, %v10238_v47  ;;  %3680 = vst.msk [vmem:[#allocation3 + $0x19a] sm:$0xff] %vm3491_vm5, %v3614_v42  ;;  %9263 = vmatmul.msk.f32.gmra.mxu1 %vm520_vm3, %v17036_v45  ;;  %v10239_v47 = vld [vmem:[#allocation2 + $0x60] sm:$0xff] }
 0x25d   : > { %17034 = vst [vmem:[#allocation37_spill] sm:$0xff] %v12163_v56  ;;  %v12170_v36 = vpop.f32.mrf.mxu3  ;;  %v17042_v56 = vld [vmem:[#allocation43_spill] sm:$0xff] }
 0x25e   : > { %17035 = vst [vmem:[#allocation35_spill] sm:$0xff] %v12165_v3 }
 0x25f   : > { %17037 = vst [vmem:[#allocation39_spill] sm:$0xff] %v12170_v36  ;;  %v3598_v42 = vpop.permute.xlu0 %3597 }
 0x260   : > { %9163 = vmatmul.msk.f32.gmra.mxu2 %vm520_vm3, %v17036_v45  ;;  %3672 = vst.msk [vmem:[#allocation3 + $0x13a] sm:$0xff] %vm3491_vm5, %v3598_v42  ;;  %v10240_v42 = vld [vmem:[#allocation2 + $0x68] sm:$0xff] }
 0x261   : > { %9198 = vmatmul.msk.f32.gmra.mxu3 %vm520_vm3, %v17038_v21  ;;  %v12174_v11 = vpop.f32.mrf.mxu2  ;;  %v17044_v21 = vld [vmem:[#allocation49_spill] sm:$0xff] }
 0x262   : > { %17039 = vst [vmem:[#allocation134_spill] sm:$0xff] %v12174_v11  ;;  %v3594_v15 = vpop.permute.xlu1 %3593  ;;  %v12181_v1 = vpop.f32.mrf.mxu0 }
 0x263   : > { %3670 = vst.msk [vmem:[#allocation3 + $0x122] sm:$0xff] %vm3491_vm5, %v3594_v15  ;;  %v12183_v36 = vpop.f32.mrf.mxu1 }
 0x264   : > { %9231 = vmatmul.msk.f32.gmra.mxu0 %vm520_vm3, %v10239_v47  ;;  %17040 = vst [vmem:[#allocation135_spill] sm:$0xff] %v12181_v1  ;;  %9264 = vmatmul.msk.f32.gmra.mxu1 %vm520_vm3, %v17042_v56  ;;  %v17048_v1 = vld [vmem:[#allocation45_spill] sm:$0xff] }
 0x265   : > { %17041 = vst [vmem:[#allocation136_spill] sm:$0xff] %v12183_v36  ;;  %v12187_v11 = vpop.f32.mrf.mxu3 }
 0x266   : > { %17043 = vst [vmem:[#allocation43_spill] sm:$0xff] %v12187_v11 }
 0x267   : > { %v3604_v45 = vpop.permute.xlu0 %3603 }
 0x268   : > { %9164 = vmatmul.msk.f32.gmra.mxu2 %vm520_vm3, %v17042_v56  ;;  %3675 = vst.msk [vmem:[#allocation3 + $0x15a] sm:$0xff] %vm3491_vm5, %v3604_v45  ;;  %v10241_v45 = vld [vmem:[#allocation2 + $0x78] sm:$0xff] }
 0x269   : > { %9199 = vmatmul.msk.f32.gmra.mxu3 %vm520_vm3, %v17044_v21  ;;  %v12191_v3 = vpop.f32.mrf.mxu2  ;;  %v17049_v21 = vld [vmem:[#allocation54_spill] sm:$0xff] }
 0x26a   : > { %v3600_v15 = vpop.permute.xlu1 %3599  ;;  %17045 = vst [vmem:[#allocation137_spill] sm:$0xff] %v12191_v3  ;;  %v12198_v47 = vpop.f32.mrf.mxu0 }
 0x26b   : > { %3673 = vst.msk [vmem:[#allocation3 + $0x142] sm:$0xff] %vm3491_vm5, %v3600_v15  ;;  %v12200_v11 = vpop.f32.mrf.mxu1 }
 0x26c   : > { %9232 = vmatmul.msk.f32.gmra.mxu0 %vm520_vm3, %v10240_v42  ;;  %17046 = vst [vmem:[#allocation138_spill] sm:$0xff] %v12198_v47  ;;  %9265 = vmatmul.msk.f32.gmra.mxu1 %vm520_vm3, %v17048_v1 }
 0x26d   : > { %17047 = vst [vmem:[#allocation139_spill] sm:$0xff] %v12200_v11  ;;  %v12206_v15 = vpop.f32.mrf.mxu3 }
 0x26e   : > { %17050 = vst [vmem:[#allocation45_spill] sm:$0xff] %v12206_v15  ;;  %v17055_v15 = vld [vmem:[#allocation57_spill] sm:$0xff] }
 0x26f   : > { %v3610_v56 = vpop.permute.xlu0 %3609 }
 0x270   : > { %9165 = vmatmul.msk.f32.gmra.mxu2 %vm520_vm3, %v17048_v1  ;;  %3678 = vst.msk [vmem:[#allocation3 + $0x182] sm:$0xff] %vm3491_vm5, %v3610_v56  ;;  %v10242_v56 = vld [vmem:[#allocation2 + $0x80] sm:$0xff] }
 0x271   : > { %9200 = vmatmul.msk.f32.gmra.mxu3 %vm520_vm3, %v17049_v21  ;;  %v12217_v11 = vpop.f32.mrf.mxu2  ;;  %v17054_v21 = vld [vmem:[#allocation51_spill] sm:$0xff] }
 0x272   : > { %v3606_v3 = vpop.permute.xlu1 %3605  ;;  %v12213_v42 = vpop.f32.mrf.mxu0  ;;  %17053 = vst [vmem:[#allocation142_spill] sm:$0xff] %v12217_v11  ;;  %v17059_v11 = vld [vmem:[#allocation53_spill] sm:$0xff] }
 0x273   : > { %3676 = vst.msk [vmem:[#allocation3 + $0x16a] sm:$0xff] %vm3491_vm5, %v3606_v3  ;;  %v12215_v47 = vpop.f32.mrf.mxu1 }
 0x274   : > { %9233 = vmatmul.msk.f32.gmra.mxu0 %vm520_vm3, %v10241_v45  ;;  %17051 = vst [vmem:[#allocation140_spill] sm:$0xff] %v12213_v42  ;;  %9266 = vmatmul.msk.f32.gmra.mxu1 %vm520_vm3, %v17054_v21 }
 0x275   : > { %17052 = vst [vmem:[#allocation141_spill] sm:$0xff] %v12215_v47  ;;  %v12223_v36 = vpop.f32.mrf.mxu3 }
 0x276   : > { %17056 = vst [vmem:[#allocation51_spill] sm:$0xff] %v12223_v36  ;;  %v17061_v36 = vld [vmem:[#allocation61_spill] sm:$0xff] }
 0x277   : > { %v3616_v1 = vpop.permute.xlu0 %3615 }
 0x278   : > { %9166 = vmatmul.msk.f32.gmra.mxu2 %vm520_vm3, %v17054_v21  ;;  %3681 = vst.msk [vmem:[#allocation3 + $0x1a2] sm:$0xff] %vm3491_vm5, %v3616_v1  ;;  %v10243_v21 = vld [vmem:[#allocation2 + $0x90] sm:$0xff] }
 0x279   : > { %9201 = vmatmul.msk.f32.gmra.mxu3 %vm520_vm3, %v17055_v15  ;;  %v12236_v15 = vpop.f32.mrf.mxu2 }
 0x27a   : > { %v3612_v3 = vpop.permute.xlu1 %3611  ;;  %v12230_v45 = vpop.f32.mrf.mxu0  ;;  %17060 = vst [vmem:[#allocation53_spill] sm:$0xff] %v12236_v15 }
 0x27b   : > { %3679 = vst.msk [vmem:[#allocation3 + $0x18a] sm:$0xff] %vm3491_vm5, %v3612_v3  ;;  %v12232_v42 = vpop.f32.mrf.mxu1 }
 0x27c   : > { %9234 = vmatmul.msk.f32.gmra.mxu0 %vm520_vm3, %v10242_v56  ;;  %17057 = vst [vmem:[#allocation143_spill] sm:$0xff] %v12230_v45  ;;  %9267 = vmatmul.msk.f32.gmra.mxu1 %vm520_vm3, %v17059_v11  ;;  %v17064_v56 = vld [vmem:[#allocation59_spill] sm:$0xff] }
 0x27d   : > { %17058 = vst [vmem:[#allocation144_spill] sm:$0xff] %v12232_v42  ;;  %v12249_v45 = vpop.f32.mrf.mxu3  ;;  %v17066_v42 = vld [vmem:[#allocation65_spill] sm:$0xff] }
 0x27e   : > { %17065 = vst [vmem:[#allocation59_spill] sm:$0xff] %v12249_v45  ;;  %v17072_v45 = vld [vmem:[#allocation70_spill] sm:$0xff] }
 0x280   : > { %9167 = vmatmul.msk.f32.gmra.mxu2 %vm520_vm3, %v17059_v11  ;;  %v10244_v11 = vld [vmem:[#allocation2 + $0x98] sm:$0xff] }
 0x281   : > { %9202 = vmatmul.msk.f32.gmra.mxu3 %vm520_vm3, %v17061_v36  ;;  %v12253_v15 = vpop.f32.mrf.mxu2 }
 0x282   : > { %v12243_v3 = vpop.f32.mrf.mxu0  ;;  %17067 = vst [vmem:[#allocation147_spill] sm:$0xff] %v12253_v15  ;;  %v17075_v15 = vld [vmem:[#allocation67_spill] sm:$0xff] }
 0x283   : > { %17062 = vst [vmem:[#allocation145_spill] sm:$0xff] %v12243_v3  ;;  %v12245_v1 = vpop.f32.mrf.mxu1 }
 0x284   : > { %9235 = vmatmul.msk.f32.gmra.mxu0 %vm520_vm3, %v10243_v21  ;;  %17063 = vst [vmem:[#allocation146_spill] sm:$0xff] %v12245_v1  ;;  %9268 = vmatmul.msk.f32.gmra.mxu1 %vm520_vm3, %v17064_v56  ;;  %v17070_v1 = vld [vmem:[#allocation63_spill] sm:$0xff] }
 0x285   : > { %v12264_v36 = vpop.f32.mrf.mxu3 }
 0x286   : > { %17071 = vst [vmem:[#allocation63_spill] sm:$0xff] %v12264_v36 }
 0x288   : > { %9168 = vmatmul.msk.f32.gmra.mxu2 %vm520_vm3, %v17064_v56  ;;  %v10245_v56 = vld [vmem:[#allocation2 + $0xa8] sm:$0xff] }
 0x289   : > { %9203 = vmatmul.msk.f32.gmra.mxu3 %vm520_vm3, %v17066_v42  ;;  %v12268_v42 = vpop.f32.mrf.mxu2 }
 0x28a   : > { %v12260_v3 = vpop.f32.mrf.mxu0  ;;  %17073 = vst [vmem:[#allocation150_spill] sm:$0xff] %v12268_v42  ;;  %v10246_v42 = vld [vmem:[#allocation2 + $0xb0] sm:$0xff] }
 0x28b   : > { %v12258_v21 = vpop.f32.mrf.mxu1  ;;  %17069 = vst [vmem:[#allocation149_spill] sm:$0xff] %v12260_v3 }
 0x28c   : > { %9236 = vmatmul.msk.f32.gmra.mxu0 %vm520_vm3, %v10244_v11  ;;  %17068 = vst [vmem:[#allocation148_spill] sm:$0xff] %v12258_v21  ;;  %9269 = vmatmul.msk.f32.gmra.mxu1 %vm520_vm3, %v17070_v1  ;;  %v17077_v21 = vld [vmem:[#allocation73_spill] sm:$0xff] }
 0x28d   : > { %v2167_v36 = vpop.f32.mrf.mxu3 }
 0x290   : > { %9169 = vmatmul.msk.f32.gmra.mxu2 %vm520_vm3, %v17070_v1 }
 0x291   : > { %9204 = vmatmul.msk.f32.gmra.mxu3 %vm520_vm3, %v17072_v45 }
 0x292   : > { %v12277_v3 = vpop.f32.mrf.mxu0 }
 0x293   : > { %v12273_v11 = vpop.f32.mrf.mxu1  ;;  %17076 = vst [vmem:[#allocation67_spill] sm:$0xff] %v12277_v3 }
 0x294   : > { %9237 = vmatmul.msk.f32.gmra.mxu0 %vm520_vm3, %v10245_v56  ;;  %17074 = vst [vmem:[#allocation151_spill] sm:$0xff] %v12273_v11  ;;  %9270 = vmatmul.msk.f32.gmra.mxu1 %vm520_vm3, %v17075_v15  ;;  %v12286_v56 = vpop.f32.mrf.mxu2  ;;  %v17080_v11 = vld [vmem:[#allocation69_spill] sm:$0xff] }
 0x295   : > { %17079 = vst [vmem:[#allocation153_spill] sm:$0xff] %v12286_v56 }
 0x297   : > { %v2170_v45 = vpop.f32.mrf.mxu3 }
 0x298   : > { %9170 = vmatmul.msk.f32.gmra.mxu2 %vm520_vm3, %v17075_v15 }
 0x299   : > { %9205 = vmatmul.msk.f32.gmra.mxu3 %vm520_vm3, %v17077_v21  ;;  %v10247_v21 = vld [vmem:[#allocation2 + $0xc0] sm:$0xff] }
 0x29a   : > { %v2429_v3 = vpop.f32.mrf.mxu0 }
 0x29b   : > { %v12284_v1 = vpop.f32.mrf.mxu1 }
 0x29c   : > { %9238 = vmatmul.msk.f32.gmra.mxu0 %vm520_vm3, %v10246_v42  ;;  %17078 = vst [vmem:[#allocation152_spill] sm:$0xff] %v12284_v1  ;;  %9271 = vmatmul.msk.f32.gmra.mxu1 %vm520_vm3, %v17080_v11  ;;  %v17082_v42 = vld [vmem:[#allocation75_spill] sm:$0xff]  ;;  %v1987_v56 = vpop.f32.mrf.mxu2 }
 0x29d   : > { %v2168_v1 = vadd.f32 %v2167_v36, %v1987_v56 }
 0x2a0   : > { %9171 = vmatmul.msk.f32.gmra.mxu2 %vm520_vm3, %v17080_v11  ;;  %v2173_v26 = vpop.f32.mrf.mxu3  ;;  %v10248_v11 = vld [vmem:[#allocation2 + $0xc8] sm:$0xff] }
 0x2a1   : > { %9206 = vmatmul.msk.f32.gmra.mxu3 %vm520_vm3, %v11391_v7  ;;  %v2469_v7 = vadd.f32 %v2429_v3, %v2168_v1 }
 0x2a2   : > { %v2432_v47 = vpop.f32.mrf.mxu0 }
 0x2a3   : > { %v12295_v15 = vpop.f32.mrf.mxu1 }
 0x2a4   : > { %9239 = vmatmul.msk.f32.gmra.mxu0 %vm520_vm3, %v10247_v21  ;;  %17081 = vst [vmem:[#allocation69_spill] sm:$0xff] %v12295_v15  ;;  %9272 = vmatmul.msk.f32.gmra.mxu1 %vm520_vm3, %v17082_v42  ;;  %v1990_v15 = vpop.f32.mrf.mxu2 }
 0x2a5   : > { %v2171_v36 = vadd.f32 %v2170_v45, %v1990_v15 }
 0x2a7   : > { %v2470_v3 = vadd.f32 %v2432_v47, %v2171_v36  ;;  %v10250_v36 = vld [vmem:[#allocation2 + $0xe0] sm:$0xff] }
 0x2a8   : > { %9172 = vmatmul.msk.f32.gmra.mxu2 %vm520_vm3, %v17082_v42  ;;  %v2176_v1 = vpop.f32.mrf.mxu3  ;;  %v10249_v42 = vld [vmem:[#allocation2 + $0xd8] sm:$0xff] }
 0x2a9   : > { %9207 = vmatmul.msk.f32.gmra.mxu3 %vm520_vm3, %v11415_v19 }
 0x2aa   : > { %v2435_v56 = vpop.f32.mrf.mxu0 }
 0x2ab   : > { %v2585_v21 = vpop.f32.mrf.mxu1 }
 0x2ac   : > { %9240 = vmatmul.msk.f32.gmra.mxu0 %vm520_vm3, %v10248_v11  ;;  %v12304_v2 = vadd.f32 %v2585_v21, %v2469_v7  ;;  %9273 = vmatmul.msk.f32.gmra.mxu1 %vm520_vm3, %v11388_v16  ;;  %v17085_v21 = vld [vmem:[#allocation83_spill] sm:$0xff] }
 0x2ae   : > { %17083 = vst [vmem:[#allocation75_spill] sm:$0xff] %v12304_v2 }
 0x2af   : > { %v1993_v2 = vpop.f32.mrf.mxu2 }
 0x2b0   : > { %9173 = vmatmul.msk.f32.gmra.mxu2 %vm520_vm3, %v11388_v16  ;;  %v2174_v45 = vadd.f32 %v2173_v26, %v1993_v2  ;;  %v17087_v2 = vld [vmem:[#allocation80_spill] sm:$0xff] }
 0x2b1   : > { %9208 = vmatmul.msk.f32.gmra.mxu3 %vm520_vm3, %v11440_v52  ;;  %v17088_v26 = vld [vmem:[#allocation72_spill] sm:$0xff] }
 0x2b2   : > { %v2471_v47 = vadd.f32 %v2435_v56, %v2174_v45  ;;  %v17089_v45 = vld [vmem:[#allocation82_spill] sm:$0xff] }
 0x2b3   : > { %v2588_v11 = vpop.f32.mrf.mxu1 }
 0x2b4   : > { %9241 = vmatmul.msk.f32.gmra.mxu0 %vm520_vm3, %v10249_v42  ;;  %v12313_v7 = vadd.f32 %v2588_v11, %v2470_v3  ;;  %9274 = vmatmul.msk.f32.gmra.mxu1 %vm520_vm3, %v17085_v21 }
 0x2b6   : > { %17084 = vst [vmem:[#allocation154_spill] sm:$0xff] %v12313_v7  ;;  %v2084_v7 = vadd.f32 %v17088_v26, %v17087_v2  ;;  %v17090_v2 = vld [vmem:[#allocation84_spill] sm:$0xff] }
 0x2b8   : > { %9174 = vmatmul.msk.f32.gmra.mxu2 %vm520_vm3, %v17085_v21  ;;  %v2441_v52 = vadd.f32 %v17089_v45, %v2084_v7  ;;  %v17092_v45 = vld [vmem:[#allocation86_spill] sm:$0xff] }
 0x2b9   : > { %9209 = vmatmul.msk.f32.gmra.mxu3 %vm520_vm3, %v11465_v49  ;;  %v2438_v15 = vpop.f32.mrf.mxu0 }
 0x2bb   : > { %v2591_v42 = vpop.f32.mrf.mxu1  ;;  %v1996_v11 = vpop.f32.mrf.mxu2 }
 0x2bc   : > { %v2820_v16 = vpop.f32.mrf.mxu3  ;;  %9242 = vmatmul.msk.f32.gmra.mxu0 %vm520_vm3, %v10250_v36  ;;  %v12322_v3 = vadd.f32 %v2591_v42, %v2471_v47  ;;  %9275 = vmatmul.msk.f32.gmra.mxu1 %vm520_vm3, %v11444_v5  ;;  %v2177_v49 = vadd.f32 %v2176_v1, %v1996_v11  ;;  %v10251_v36 = vld [vmem:[#allocation2 + $0xf0] sm:$0xff]  ;;  %v2597_v1 = vadd.f32 %v11461_v17, %v2441_v52 }
 0x2be   : > { %17086 = vst [vmem:[#allocation83_spill] sm:$0xff] %v12322_v3  ;;  %v2472_v21 = vadd.f32 %v2438_v15, %v2177_v49  ;;  %v17091_v49 = vld [vmem:[#allocation77_spill] sm:$0xff] }
 0x2bf   : > { %v2087_v15 = vadd.f32 %v17091_v49, %v17090_v2 }
 0x2c0   : > { %9175 = vmatmul.msk.f32.gmra.mxu2 %vm520_vm3, %v11444_v5 }
 0x2c1   : > { %9210 = vmatmul.msk.f32.gmra.mxu3 %vm520_vm3, %v11495_v40  ;;  %v2976_v56 = vpop.f32.mrf.mxu0 }
 0x2c3   : > { %v2594_v42 = vpop.f32.mrf.mxu1  ;;  %v2661_v11 = vpop.f32.mrf.mxu2 }
 0x2c4   : > { %v2823_v47 = vpop.f32.mrf.mxu3  ;;  %9243 = vmatmul.msk.f32.gmra.mxu0 %vm520_vm3, %v10251_v36  ;;  %v12334_v3 = vadd.f32 %v2594_v42, %v2472_v21  ;;  %9276 = vmatmul.msk.f32.gmra.mxu1 %vm520_vm3, %v11469_v29  ;;  %v2757_v7 = vadd.f32 %v2661_v11, %v2597_v1  ;;  %v2442_v36 = vadd.f32 %v17092_v45, %v2087_v15  ;;  %v10252_v42 = vld [vmem:[#allocation2 + $0xf8] sm:$0xff] }
 0x2c6   : > { %v2916_v26 = vadd.f32 %v2820_v16, %v2757_v7  ;;  %v2598_v17 = vadd.f32 %v11488_v57, %v2442_v36 }
 0x2c8   : > { %v3072_v40 = vadd.f32 %v2976_v56, %v2916_v26  ;;  %9176 = vmatmul.msk.f32.gmra.mxu2 %vm520_vm3, %v11469_v29  ;;  %v17093_v29 = vld [vmem:[#allocation88_spill] sm:$0xff]  ;;  %v10253_v26 = vld [vmem:[#allocation2 + $0x108] sm:$0xff] }
 0x2c9   : > { %9211 = vmatmul.msk.f32.gmra.mxu3 %vm520_vm3, %v11519_v25  ;;  %v2979_v5 = vpop.f32.mrf.mxu0  ;;  %v2443_v49 = vadd.f32 %v17093_v29, %v11456_v27  ;;  %v17095_v29 = vld [vmem:[#allocation94_spill] sm:$0xff] }
 0x2cb   : > { %v3136_v52 = vpop.f32.mrf.mxu1  ;;  %v2664_v11 = vpop.f32.mrf.mxu2  ;;  %v2599_v57 = vadd.f32 %v11515_v58, %v2443_v49  ;;  %v17096_v49 = vld [vmem:[#allocation90_spill] sm:$0xff] }
 0x2cc   : > { %v2826_v21 = vpop.f32.mrf.mxu3  ;;  %9244 = vmatmul.msk.f32.gmra.mxu0 %vm520_vm3, %v10252_v42  ;;  %9277 = vmatmul.msk.f32.gmra.mxu1 %vm520_vm3, %v11492_v53  ;;  %v12350_v1 = vadd.f32 %v3136_v52, %v3072_v40  ;;  %v2758_v16 = vadd.f32 %v2664_v11, %v2598_v17  ;;  %v10254_v11 = vld [vmem:[#allocation2 + $0x110] sm:$0xff] }
 0x2ce   : > { %v2917_v2 = vadd.f32 %v2823_v47, %v2758_v16 }
 0x2d0   : > { %v3073_v15 = vadd.f32 %v2979_v5, %v2917_v2  ;;  %9177 = vmatmul.msk.f32.gmra.mxu2 %vm520_vm3, %v11492_v53  ;;  %v17094_v53 = vld [vmem:[#allocation91_spill] sm:$0xff] }
 0x2d1   : > { %9212 = vmatmul.msk.f32.gmra.mxu3 %vm520_vm3, %v11549_v0  ;;  %v2982_v56 = vpop.f32.mrf.mxu0  ;;  %v2444_v42 = vadd.f32 %v17094_v53, %v11483_v63  ;;  %v2096_v63 = vadd.f32 %v17096_v49, %v17095_v29 }
 0x2d3   : > { %v3139_v40 = vpop.f32.mrf.mxu1  ;;  %v2667_v47 = vpop.f32.mrf.mxu2  ;;  %v2600_v16 = vadd.f32 %v11542_v10, %v2444_v42  ;;  %v10255_v10 = vld [vmem:[#allocation2 + $0x120] sm:$0xff] }
 0x2d4   : > { %v2829_v7 = vpop.f32.mrf.mxu3  ;;  %9245 = vmatmul.msk.f32.gmra.mxu0 %vm520_vm3, %v10253_v26  ;;  %9278 = vmatmul.msk.f32.gmra.mxu1 %vm520_vm3, %v11523_v20  ;;  %v12362_v45 = vadd.f32 %v3139_v40, %v3073_v15  ;;  %v2759_v36 = vadd.f32 %v2667_v47, %v2599_v57  ;;  %v17097_v26 = vld [vmem:[#allocation95_spill] sm:$0xff] }
 0x2d5   : > { %v2445_v40 = vadd.f32 %v17097_v26, %v2096_v63 }
 0x2d6   : > { %v2918_v5 = vadd.f32 %v2826_v21, %v2759_v36 }
 0x2d8   : > { %v3074_v52 = vadd.f32 %v2982_v56, %v2918_v5  ;;  %9178 = vmatmul.msk.f32.gmra.mxu2 %vm520_vm3, %v11523_v20  ;;  %v2601_v5 = vadd.f32 %v11571_v13, %v2445_v40  ;;  %v10256_v13 = vld [vmem:[#allocation2 + $0x128] sm:$0xff] }
 0x2d9   : > { %9213 = vmatmul.msk.f32.gmra.mxu3 %vm520_vm3, %v11576_v62  ;;  %v2985_v27 = vpop.f32.mrf.mxu0 }
 0x2db   : > { %v3142_v58 = vpop.f32.mrf.mxu1  ;;  %v2670_v21 = vpop.f32.mrf.mxu2 }
 0x2dc   : > { %v2832_v17 = vpop.f32.mrf.mxu3  ;;  %9246 = vmatmul.msk.f32.gmra.mxu0 %vm520_vm3, %v10254_v11  ;;  %9279 = vmatmul.msk.f32.gmra.mxu1 %vm520_vm3, %v11546_v48  ;;  %v12374_v2 = vadd.f32 %v3142_v58, %v3074_v52  ;;  %v2760_v56 = vadd.f32 %v2670_v21, %v2600_v16  ;;  %v17099_v58 = vld [vmem:[#allocation97_spill] sm:$0xff] }
 0x2de   : > { %v2919_v15 = vadd.f32 %v2829_v7, %v2760_v56  ;;  %v17098_v7 = vld [vmem:[#allocation93_spill] sm:$0xff] }
 0x2df   : > { %v2099_v52 = vadd.f32 %v17098_v7, %v11537_v8  ;;  %v17103_v7 = vld [vmem:[#allocation107_spill] sm:$0xff] }
 0x2e0   : > { %v3075_v57 = vadd.f32 %v2985_v27, %v2919_v15  ;;  %9179 = vmatmul.msk.f32.gmra.mxu2 %vm520_vm3, %v11546_v48  ;;  %v17101_v15 = vld [vmem:[#allocation96_spill] sm:$0xff] }
 0x2e1   : > { %9214 = vmatmul.msk.f32.gmra.mxu3 %vm520_vm3, %v11622_v50  ;;  %v2988_v20 = vpop.f32.mrf.mxu0  ;;  %v2446_v16 = vadd.f32 %v17099_v58, %v2099_v52  ;;  %v17105_v58 = vld [vmem:[#allocation98_spill] sm:$0xff] }
 0x2e3   : > { %v3145_v36 = vpop.f32.mrf.mxu1  ;;  %v2673_v42 = vpop.f32.mrf.mxu2  ;;  %v2602_v8 = vadd.f32 %v11615_v18, %v2446_v16  ;;  %v10257_v18 = vld [vmem:[#allocation2 + $0x138] sm:$0xff] }
 0x2e4   : > { %v2835_v47 = vpop.f32.mrf.mxu3  ;;  %9247 = vmatmul.msk.f32.gmra.mxu0 %vm520_vm3, %v10255_v10  ;;  %9280 = vmatmul.msk.f32.gmra.mxu1 %vm520_vm3, %v11582_v38  ;;  %v12387_v53 = vadd.f32 %v3145_v36, %v3075_v57  ;;  %v2761_v27 = vadd.f32 %v2673_v42, %v2601_v5  ;;  %v17102_v57 = vld [vmem:[#allocation100_spill] sm:$0xff] }
 0x2e6   : > { %v2920_v11 = vadd.f32 %v2832_v17, %v2761_v27  ;;  %v17100_v17 = vld [vmem:[#allocation99_spill] sm:$0xff] }
 0x2e7   : > { %v2102_v26 = vadd.f32 %v17101_v15, %v17100_v17  ;;  %v10258_v17 = vld [vmem:[#allocation2 + $0x140] sm:$0xff] }
 0x2e8   : > { %v3076_v21 = vadd.f32 %v2988_v20, %v2920_v11  ;;  %9180 = vmatmul.msk.f32.gmra.mxu2 %vm520_vm3, %v11582_v38 }
 0x2e9   : > { %9215 = vmatmul.msk.f32.gmra.mxu3 %vm520_vm3, %v11668_v31  ;;  %v2991_v48 = vpop.f32.mrf.mxu0  ;;  %v2447_v10 = vadd.f32 %v17102_v57, %v2102_v26  ;;  %v17108_v57 = vld [vmem:[#allocation101_spill] sm:$0xff] }
 0x2eb   : > { %v3148_v49 = vpop.f32.mrf.mxu1  ;;  %v2676_v56 = vpop.f32.mrf.mxu2  ;;  %v2603_v52 = vadd.f32 %v17103_v7, %v2447_v10 }
 0x2ec   : > { %v2838_v29 = vpop.f32.mrf.mxu3  ;;  %9248 = vmatmul.msk.f32.gmra.mxu0 %vm520_vm3, %v10256_v13  ;;  %9281 = vmatmul.msk.f32.gmra.mxu1 %vm520_vm3, %v11628_v34  ;;  %v12400_v63 = vadd.f32 %v3148_v49, %v3076_v21  ;;  %v2762_v20 = vadd.f32 %v2676_v56, %v2602_v8  ;;  %v17106_v13 = vld [vmem:[#allocation103_spill] sm:$0xff] }
 0x2ee   : > { %v2921_v40 = vadd.f32 %v2835_v47, %v2762_v20  ;;  %v17104_v47 = vld [vmem:[#allocation102_spill] sm:$0xff] }
 0x2ef   : > { %v2105_v16 = vadd.f32 %v17105_v58, %v17104_v47  ;;  %v17110_v47 = vld [vmem:[#allocation114_spill] sm:$0xff] }
 0x2f0   : > { %v3077_v36 = vadd.f32 %v2991_v48, %v2921_v40  ;;  %9181 = vmatmul.msk.f32.gmra.mxu2 %vm520_vm3, %v11628_v34 }
 0x2f1   : > { %9216 = vmatmul.msk.f32.gmra.mxu3 %vm520_vm3, %v11725_v51  ;;  %v2994_v38 = vpop.f32.mrf.mxu0  ;;  %v2448_v49 = vadd.f32 %v17106_v13, %v2105_v16 }
 0x2f3   : > { %v3151_v42 = vpop.f32.mrf.mxu1  ;;  %v2679_v11 = vpop.f32.mrf.mxu2  ;;  %v2604_v26 = vadd.f32 %v11713_v22, %v2448_v49  ;;  %v10259_v22 = vld [vmem:[#allocation2 + $0x150] sm:$0xff] }
 0x2f4   : > { %v2841_v5 = vpop.f32.mrf.mxu3  ;;  %9249 = vmatmul.msk.f32.gmra.mxu0 %vm520_vm3, %v10257_v18  ;;  %9282 = vmatmul.msk.f32.gmra.mxu1 %vm520_vm3, %v11680_v59  ;;  %v12413_v27 = vadd.f32 %v3151_v42, %v3077_v36  ;;  %v2763_v48 = vadd.f32 %v2679_v11, %v2603_v52  ;;  %v17109_v18 = vld [vmem:[#allocation106_spill] sm:$0xff] }
 0x2f6   : > { %v2922_v21 = vadd.f32 %v2838_v29, %v2763_v48  ;;  %v17107_v29 = vld [vmem:[#allocation105_spill] sm:$0xff] }
 0x2f7   : > { %v2108_v10 = vadd.f32 %v17108_v57, %v17107_v29 }
 0x2f8   : > { %v3078_v8 = vadd.f32 %v2994_v38, %v2922_v21  ;;  %9182 = vmatmul.msk.f32.gmra.mxu2 %vm520_vm3, %v11680_v59  ;;  %v17112_v21 = vld [vmem:[#allocation104_spill] sm:$0xff] }
 0x2f9   : > { %9217 = vmatmul.msk.f32.gmra.mxu3 %vm520_vm3, %v11776_v60  ;;  %v2997_v34 = vpop.f32.mrf.mxu0  ;;  %v2449_v42 = vadd.f32 %v17109_v18, %v2108_v10 }
 0x2fb   : > { %v3154_v15 = vpop.f32.mrf.mxu1  ;;  %v2682_v40 = vpop.f32.mrf.mxu2  ;;  %v2605_v58 = vadd.f32 %v17110_v47, %v2449_v42  ;;  %v17116_v42 = vld [vmem:[#allocation113_spill] sm:$0xff] }
 0x2fc   : > { %v2844_v56 = vpop.f32.mrf.mxu3  ;;  %9250 = vmatmul.msk.f32.gmra.mxu0 %vm520_vm3, %v10258_v17  ;;  %9283 = vmatmul.msk.f32.gmra.mxu1 %vm520_vm3, %v11722_v41  ;;  %v12426_v20 = vadd.f32 %v3154_v15, %v3078_v8  ;;  %v2764_v38 = vadd.f32 %v2682_v40, %v2604_v26  ;;  %v17113_v8 = vld [vmem:[#allocation110_spill] sm:$0xff]  ;;  %v17118_v47 = vld [vmem:[#allocation121_spill] sm:$0xff] }
 0x2fe   : > { %v2923_v36 = vadd.f32 %v2841_v5, %v2764_v38  ;;  %v17111_v5 = vld [vmem:[#allocation109_spill] sm:$0xff]  ;;  %v17115_v38 = vld [vmem:[#allocation108_spill] sm:$0xff] }
 0x2ff   : > { %v2111_v13 = vadd.f32 %v17112_v21, %v17111_v5  ;;  %v17120_v21 = vld [vmem:[#allocation111_spill] sm:$0xff] }
 0x300   : > { %v3079_v7 = vadd.f32 %v2997_v34, %v2923_v36  ;;  %9183 = vmatmul.msk.f32.gmra.mxu2 %vm520_vm3, %v11722_v41 }
 0x301   : > { %9218 = vmatmul.msk.f32.gmra.mxu3 %vm520_vm3, %v11821_v37  ;;  %v3000_v59 = vpop.f32.mrf.mxu0  ;;  %v2450_v17 = vadd.f32 %v17113_v8, %v2111_v13 }
 0x303   : > { %v3157_v11 = vpop.f32.mrf.mxu1  ;;  %v2685_v48 = vpop.f32.mrf.mxu2  ;;  %v2606_v29 = vadd.f32 %v11816_v14, %v2450_v17 }
 0x304   : > { %v2847_v52 = vpop.f32.mrf.mxu3  ;;  %9251 = vmatmul.msk.f32.gmra.mxu0 %vm520_vm3, %v10259_v22  ;;  %9284 = vmatmul.msk.f32.gmra.mxu1 %vm520_vm3, %v11783_v35  ;;  %v12439_v16 = vadd.f32 %v3157_v11, %v3079_v7  ;;  %v2765_v34 = vadd.f32 %v2685_v48, %v2605_v58  ;;  %v17117_v11 = vld [vmem:[#allocation128_spill] sm:$0xff] }
 0x306   : > { %v2924_v49 = vadd.f32 %v2844_v56, %v2765_v34  ;;  %v17114_v56 = vld [vmem:[#allocation112_spill] sm:$0xff] }
 0x307   : > { %v2114_v36 = vadd.f32 %v17115_v38, %v17114_v56  ;;  %v17124_v38 = vld [vmem:[#allocation115_spill] sm:$0xff] }
 0x308   : > { %v3080_v15 = vadd.f32 %v3000_v59, %v2924_v49  ;;  %9184 = vmatmul.msk.f32.gmra.mxu2 %vm520_vm3, %v11783_v35  ;;  %v17121_v49 = vld [vmem:[#allocation117_spill] sm:$0xff] }
 0x309   : > { %9219 = vmatmul.msk.f32.gmra.mxu3 %vm520_vm3, %v11900_v28  ;;  %v3003_v41 = vpop.f32.mrf.mxu0 }
 0x30b   : > { %v3160_v40 = vpop.f32.mrf.mxu1  ;;  %v2688_v10 = vpop.f32.mrf.mxu2 }
 0x30c   : > { %v2850_v26 = vpop.f32.mrf.mxu3  ;;  %9252 = vmatmul.msk.f32.gmra.mxu0 %vm520_vm3, %v11875_v39  ;;  %9285 = vmatmul.msk.f32.gmra.mxu1 %vm520_vm3, %v11897_v46  ;;  %v12453_v57 = vadd.f32 %v3160_v40, %v3080_v15  ;;  %v2766_v59 = vadd.f32 %v2688_v10, %v2606_v29  ;;  %v2451_v39 = vadd.f32 %v17116_v42, %v2114_v36  ;;  %v17122_v40 = vld [vmem:[#allocation125_spill] sm:$0xff] }
 0x30e   : > { %v2925_v18 = vadd.f32 %v2847_v52, %v2766_v59  ;;  %v2607_v58 = vadd.f32 %v17118_v47, %v2451_v39  ;;  %v17119_v52 = vld [vmem:[#allocation116_spill] sm:$0xff] }
 0x30f   : > { %v2117_v13 = vadd.f32 %v17120_v21, %v17119_v52  ;;  %v17125_v39 = vld [vmem:[#allocation120_spill] sm:$0xff] }
 0x310   : > { %v3081_v7 = vadd.f32 %v3003_v41, %v2925_v18  ;;  %9185 = vmatmul.msk.f32.gmra.mxu2 %vm520_vm3, %v11897_v46  ;;  %v2789_v18 = vrot.slane %v12051_v33, 2 }
 0x311   : > { %9220 = vmatmul.msk.f32.gmra.mxu3 %vm520_vm3, %v11969_v54  ;;  %v3006_v35 = vpop.f32.mrf.mxu0 }
 0x313   : > { %v3163_v14 = vpop.f32.mrf.mxu1  ;;  %v2691_v5 = vpop.f32.mrf.mxu2 }
 0x314   : > { %v2853_v22 = vpop.f32.mrf.mxu3  ;;  %9253 = vmatmul.msk.f32.gmra.mxu0 %vm520_vm3, %v11927_v61  ;;  %9286 = vmatmul.msk.f32.gmra.mxu1 %vm520_vm3, %v17117_v11  ;;  %v12467_v48 = vadd.f32 %v3163_v14, %v3081_v7  ;;  %v2767_v34 = vadd.f32 %v2691_v5, %v2607_v58  ;;  %v2452_v61 = vadd.f32 %v17121_v49, %v2117_v13  ;;  %v9428_v58 = vld [vmem:[%s16458_s7 + $0x6] sm:$0x3]  ;;  %v17126_v5 = vld [vmem:[#allocation130_spill] sm:$0xff] }
 0x315   : > { %9429 = vmatpush.msk.msrb.mxu2 %vm3937_vm7, %v9428_v58  ;;  %v9462_v13 = vld [vmem:[%s16458_s7 + $0x8] sm:$0x3] }
 0x316   : > { %v2926_v41 = vadd.f32 %v2850_v26, %v2767_v34  ;;  %v2608_v29 = vadd.f32 %v17122_v40, %v2452_v61  ;;  %v17123_v26 = vld [vmem:[#allocation119_spill] sm:$0xff]  ;;  %9463 = vmatpush.msk.msrb.mxu3 %vm3937_vm7, %v9462_v13  ;;  %v2630_v61 = vrot.slane %v12051_v33, 1  ;;  %v9394_v40 = vld [vmem:[%s16458_s7 + $0x4] sm:$0x3] }
 0x317   : > { %v2120_v36 = vadd.f32 %v17124_v38, %v17123_v26  ;;  %9395 = vmatpush.msk.msrb.mxu1 %vm3937_vm7, %v9394_v40  ;;  %v17129_v38 = vld [vmem:[#allocation124_spill] sm:$0xff] }
 0x318   : > { %v3082_v8 = vadd.f32 %v3006_v35, %v2926_v41  ;;  %9186 = vmatmul.msk.f32.gmra.mxu2 %vm520_vm3, %v17117_v11  ;;  %v17128_v41 = vld [vmem:[#allocation118_spill] sm:$0xff] }
 0x319   : > { %9221 = vmatmul.msk.f32.gmra.mxu3 %vm520_vm3, %v12019_v24  ;;  %v3009_v46 = vpop.f32.mrf.mxu0  ;;  %v2453_v7 = vadd.f32 %v17125_v39, %v2120_v36 }
 0x31b   : > { %v3166_v15 = vpop.f32.mrf.mxu1  ;;  %v2694_v56 = vpop.f32.mrf.mxu2 }
 0x31c   : > { %v2856_v17 = vpop.f32.mrf.mxu3  ;;  %9254 = vmatmul.msk.f32.gmra.mxu0 %vm520_vm3, %v11956_v43  ;;  %9287 = vmatmul.msk.f32.gmra.mxu1 %vm520_vm3, %v12010_v55  ;;  %v12481_v10 = vadd.f32 %v3166_v15, %v3082_v8  ;;  %v2768_v59 = vadd.f32 %v2694_v56, %v2608_v29  ;;  %v2790_v43 = vrot.slane %v12087_v32, 2  ;;  %v2631_v8 = vrot.slane %v12087_v32, 1  ;;  %v1684_v29 = vld [vmem:[#allocation2 + $0x190] sm:$0x3] }
 0x31e   : > { %v2927_v42 = vadd.f32 %v2853_v22, %v2768_v59  ;;  %v3742_v22 = vld [vmem:[%s16458_s7] sm:$0x3]  ;;  %v12505_v52 = vsel %vm806_vm2, %v2789_v18, %v2790_v43  ;;  %v2792_v18 = vrot.slane %v1684_v29, 2 }
 0x31f   : > { %9361 = vmatpush.msk.msrb.mxu0 %vm3937_vm7, %v3742_v22  ;;  %v12536_v22 = vld [vmem:[#allocation3] sm:$0xff] }
 0x320   : > { %v3083_v14 = vadd.f32 %v3009_v46, %v2927_v42  ;;  %9187 = vmatmul.msk.f32.gmra.mxu2 %vm520_vm3, %v12010_v55  ;;  %v2609_v55 = vadd.f32 %v17126_v5, %v2453_v7  ;;  %v17127_v46 = vld [vmem:[#allocation123_spill] sm:$0xff]  ;;  %v2632_v42 = vsel %vm434_vm1, %v2630_v61, %v2631_v8 }
 0x321   : > { %9222 = vmatmul.msk.f32.gmra.mxu3 %vm520_vm3, %v12057_v23  ;;  %v3012_v35 = vpop.f32.mrf.mxu0  ;;  %v2123_v49 = vadd.f32 %v17128_v41, %v17127_v46  ;;  %v3791_v46 = vrot.slane %v12536_v22, 1 }
 0x323   : > { %v3169_v47 = vpop.f32.mrf.mxu1  ;;  %v2697_v34 = vpop.f32.mrf.mxu2  ;;  %v2454_v36 = vadd.f32 %v17129_v38, %v2123_v49  ;;  %v17132_v49 = vld [vmem:[#allocation129_spill] sm:$0xff] }
 0x324   : > { %v2859_v11 = vpop.f32.mrf.mxu3  ;;  %9255 = vmatmul.msk.f32.gmra.mxu0 %vm520_vm3, %v12051_v33  ;;  %9288 = vmatmul.msk.f32.gmra.mxu1 %vm520_vm3, %v12054_v44  ;;  %v12507_v21 = vadd.f32 %v3169_v47, %v3083_v14  ;;  %v2769_v15 = vadd.f32 %v2697_v34, %v2609_v55  ;;  %v17131_v47 = vld [vmem:[#allocation122_spill] sm:$0xff]  ;;  %v12541_v55 = vsel %vm806_vm2, %v2790_v43, %v2792_v18 }
 0x325   : > { %v2610_v7 = vadd.f32 %v12028_v9, %v2454_v36  ;;  %v1685_v9 = vld [vmem:[#allocation2 + $0x198] sm:$0xff]  ;;  %v1686_v36 = vld [vmem:[#allocation2 + $0x1a0] sm:$0xff] }
 0x326   : > { %v2928_v26 = vadd.f32 %v2856_v17, %v2769_v15  ;;  %v17130_v17 = vld [vmem:[#allocation127_spill] sm:$0xff] }
 0x328   : > { %v3084_v59 = vadd.f32 %v3012_v35, %v2928_v26  ;;  %9188 = vmatmul.msk.f32.gmra.mxu2 %vm520_vm3, %v12054_v44  ;;  %v2126_v35 = vadd.f32 %v17131_v47, %v17130_v17  ;;  %v12538_v44 = vld [vmem:[#allocation3 + $0x8] sm:$0xff]  ;;  %v17135_v17 = vld [vmem:[#allocation126_spill] sm:$0xff] }
 0x329   : > { %9223 = vmatmul.msk.f32.gmra.mxu3 %vm520_vm3, %v12505_v52  ;;  %v3015_v56 = vpop.f32.mrf.mxu0  ;;  %v3792_v41 = vrot.slane %v12538_v44, 1  ;;  %v17133_v26 = vld [vmem:[#allocation36_spill] sm:$0xff] }
 0x32a   : > { %v2455_v61 = vadd.f32 %v17132_v49, %v2126_v35 }
 0x32b   : > { %v3172_v39 = vpop.f32.mrf.mxu1  ;;  %v2700_v58 = vpop.f32.mrf.mxu2 }
 0x32c   : > { %v2862_v33 = vpop.f32.mrf.mxu3  ;;  %9256 = vmatmul.msk.f32.gmra.mxu0 %vm520_vm3, %v12087_v32  ;;  %9289 = vmatmul.msk.f32.gmra.mxu1 %vm520_vm3, %v2632_v42  ;;  %v12532_v14 = vadd.f32 %v3172_v39, %v3084_v59  ;;  %v2770_v5 = vadd.f32 %v2700_v58, %v2610_v7  ;;  %v2633_v32 = vrot.slane %v1684_v29, 1  ;;  %v2611_v38 = vadd.f32 %v17133_v26, %v2455_v61  ;;  %v12556_v7 = vld [vmem:[#allocation3 + $0x10] sm:$0xf] }
 0x32d   : > { %v3105_v59 = vrot.slane %v1685_v9, 1  ;;  %v3106_v39 = vrot.slane %v1686_v36, 1 }
 0x32e   : > { %v2929_v34 = vadd.f32 %v2859_v11, %v2770_v5  ;;  %v2634_v43 = vsel %vm434_vm1, %v2631_v8, %v2633_v32  ;;  %v3793_v11 = vsel %vm434_vm1, %v3791_v46, %v3792_v41  ;;  %v3794_v5 = vrot.slane %v12556_v7, 1 }
 0x32f   : > { %v3107_v32 = vsel %vm434_vm1, %v3105_v59, %v3106_v39  ;;  %v17138_v59 = vld [vmem:[#allocation40_spill] sm:$0xff] }
 0x330   : > { %v3085_v15 = vadd.f32 %v3015_v56, %v2929_v34  ;;  %9189 = vmatmul.msk.f32.gmra.mxu2 %vm520_vm3, %v2632_v42  ;;  %v17134_v42 = vld [vmem:[#allocation26_spill] sm:$0xff] }
 0x331   : > { %9224 = vmatmul.msk.f32.gmra.mxu3 %vm520_vm3, %v12541_v55  ;;  %v3018_v13 = vpop.f32.mrf.mxu0  ;;  %v2129_v8 = vadd.f32 %v17135_v17, %v17134_v42  ;;  %v1687_v34 = vld [vmem:[#allocation2 + $0x1a8] sm:$0x3] }
 0x333   : > { %v3175_v29 = vpop.f32.mrf.mxu1  ;;  %v2703_v56 = vpop.f32.mrf.mxu2 }
 0x334   : > { %v2865_v40 = vpop.f32.mrf.mxu3  ;;  %9257 = vmatmul.msk.f32.gmra.mxu0 %vm520_vm3, %v1685_v9  ;;  %9290 = vmatmul.msk.f32.gmra.mxu1 %vm520_vm3, %v2634_v43  ;;  %v12554_v18 = vadd.f32 %v3175_v29, %v3085_v15  ;;  %v2771_v47 = vadd.f32 %v2703_v56, %v2611_v38  ;;  %v17136_v9 = vld [vmem:[#allocation132_spill] sm:$0xff]  ;;  %v17139_v56 = vld [vmem:[#allocation131_spill] sm:$0xff] }
 0x335   : > { %v2456_v46 = vadd.f32 %v17136_v9, %v2129_v8  ;;  %v17137_v29 = vld [vmem:[#allocation48_spill] sm:$0xff]  ;;  %v2132_v42 = vadd.f32 %v17139_v56, %v17138_v59 }
 0x336   : > { %v2930_v58 = vadd.f32 %v2862_v33, %v2771_v47  ;;  %v3795_v33 = vsel %vm434_vm1, %v3792_v41, %v3794_v5 }
 0x337   : > { %v2612_v26 = vadd.f32 %v17137_v29, %v2456_v46 }
 0x338   : > { %v3086_v49 = vadd.f32 %v3018_v13, %v2930_v58  ;;  %9190 = vmatmul.msk.f32.gmra.mxu2 %vm520_vm3, %v2634_v43  ;;  %v12573_v13 = vld [vmem:[#allocation3 + $0x18] sm:$0xff]  ;;  %v12575_v43 = vld [vmem:[#allocation3 + $0x20] sm:$0xff] }
 0x339   : > { %9329 = vmatmul.msk.f32.vlgmr.msra.gmra.mxu3 %vm3491_vm5, %v3793_v11  ;;  %v3021_v35 = vpop.f32.mrf.mxu0  ;;  %v3108_v11 = vrot.slane %v1687_v34, 1  ;;  %v3796_v58 = vrot.slane %v12573_v13, 1  ;;  %v3797_v41 = vrot.slane %v12575_v43, 1 }
 0x33b   : > { %v3178_v15 = vpop.f32.mrf.mxu1  ;;  %v2706_v17 = vpop.f32.mrf.mxu2  ;;  %v3109_v5 = vsel %vm434_vm1, %v3106_v39, %v3108_v11  ;;  %v4234_v39 = vrot.slane %v12536_v22, 2  ;;  %v17142_v11 = vld [vmem:[#allocation133_spill] sm:$0xff] }
 0x33c   : > { %v2868_v61 = vpop.f32.mrf.mxu3  ;;  %9258 = vmatmul.msk.f32.gmra.mxu0 %vm520_vm3, %v1686_v36  ;;  %9291 = vmatmul.msk.f32.gmra.mxu1 %vm520_vm3, %v3107_v32  ;;  %v12569_v38 = vadd.f32 %v3178_v15, %v3086_v49  ;;  %v2772_v8 = vadd.f32 %v2706_v17, %v2612_v26  ;;  %v17140_v32 = vld [vmem:[#allocation44_spill] sm:$0xff] }
 0x33d   : > { %v2457_v34 = vadd.f32 %v17140_v32, %v2132_v42 }
 0x33e   : > { %v2931_v47 = vadd.f32 %v2865_v40, %v2772_v8  ;;  %v12589_v40 = vsel %vm434_vm1, %v3796_v58, %v3797_v41 }
 0x33f   : > { %v2613_v15 = vadd.f32 %v12123_v12, %v2457_v34 }
 0x340   : > { %v3087_v9 = vadd.f32 %v3021_v35, %v2931_v47  ;;  %9295 = vmatmul.msk.f32.vlgmr.msra.gmra.mxu2 %vm520_vm3, %v17021_v4  ;;  %v4235_v35 = vrot.slane %v12538_v44, 2  ;;  %v17141_v4 = vld [vmem:[#allocation52_spill] sm:$0xff] }
 0x341   : > { %9330 = vmatmul.msk.f32.gmra.mxu3 %vm3491_vm5, %v3795_v33  ;;  %v3024_v36 = vpop.f32.mrf.mxu0  ;;  %v12595_v33 = vld [vmem:[#allocation3 + $0x28] sm:$0xf]  ;;  %v2135_v59 = vadd.f32 %v17142_v11, %v17141_v4  ;;  %v12620_v4 = vld [vmem:[#allocation3 + $0x38] sm:$0xff] }
 0x342   : > { %v3799_v17 = vrot.slane %v12595_v33, 1  ;;  %v4236_v8 = vsel %vm806_vm2, %v4234_v39, %v4235_v35  ;;  %v17143_v47 = vld [vmem:[#allocation56_spill] sm:$0xff]  ;;  %v17145_v39 = vld [vmem:[#allocation27_spill] sm:$0xff] }
 0x343   : > { %v3181_v49 = vpop.f32.mrf.mxu1  ;;  %v2709_v26 = vpop.f32.mrf.mxu2 }
 0x344   : > { %v2871_v46 = vpop.f32.mrf.mxu3  ;;  %9362 = vmatmul.msk.f32.vlgmr.msrb.gmra.mxu0 %vm3491_vm5, %v12536_v22  ;;  %9292 = vmatmul.msk.f32.gmra.mxu1 %vm520_vm3, %v3109_v5  ;;  %v12591_v29 = vadd.f32 %v3181_v49, %v3087_v9  ;;  %v2773_v56 = vadd.f32 %v2709_v26, %v2613_v15  ;;  %v2458_v22 = vadd.f32 %v17143_v47, %v2135_v59  ;;  %v4237_v49 = vrot.slane %v12556_v7, 2  ;;  %v17144_v15 = vld [vmem:[#allocation25_spill] sm:$0xff]  ;;  %v17146_v59 = vld [vmem:[#allocation64_spill] sm:$0xff] }
 0x345   : > { %v2138_v26 = vadd.f32 %v17145_v39, %v17144_v15 }
 0x346   : > { %v2932_v42 = vadd.f32 %v2868_v61, %v2773_v56  ;;  %v2614_v34 = vadd.f32 %v12146_v30, %v2458_v22  ;;  %v12611_v61 = vsel %vm434_vm1, %v3797_v41, %v3799_v17  ;;  %v12622_v30 = vld [vmem:[#allocation3 + $0x30] sm:$0xff]  ;;  %v4238_v41 = vsel %vm806_vm2, %v4235_v35, %v4237_v49  ;;  %v17149_v49 = vld [vmem:[#allocation60_spill] sm:$0xff] }
 0x347   : > { %v2459_v56 = vadd.f32 %v17146_v59, %v2138_v26  ;;  %v17147_v17 = vld [vmem:[#allocation41_spill] sm:$0xff]  ;;  %v3801_v22 = vrot.slane %v12622_v30, 1 }
 0x348   : > { %v3088_v58 = vadd.f32 %v3024_v36, %v2932_v42  ;;  %9296 = vmatmul.msk.f32.gmra.mxu2 %vm520_vm3, %v17027_v6 }
 0x349   : > { %9331 = vmatmul.msk.f32.gmra.mxu3 %vm3491_vm5, %v12589_v40  ;;  %v3027_v12 = vpop.f32.mrf.mxu0 }
 0x34b   : > { %v3184_v32 = vpop.f32.mrf.mxu1  ;;  %v2712_v36 = vpop.f32.mrf.mxu2 }
 0x34c   : > { %v2874_v5 = vpop.f32.mrf.mxu3  ;;  %9363 = vmatmul.msk.f32.gmra.mxu0 %vm3491_vm5, %v12538_v44  ;;  %9396 = vmatmul.msk.f32.vlgmr.msrb.gmra.mxu1 %vm3491_vm5, %v4236_v8  ;;  %v12613_v9 = vadd.f32 %v3184_v32, %v3088_v58  ;;  %v2774_v6 = vadd.f32 %v2712_v36, %v2614_v34  ;;  %v3802_v8 = vrot.slane %v12620_v4, 1  ;;  %v4240_v32 = vrot.slane %v12575_v43, 2  ;;  %v17150_v36 = vld [vmem:[#allocation31_spill] sm:$0xff] }
 0x34d   : > { %v2141_v15 = vadd.f32 %v17150_v36, %v17149_v49  ;;  %v17156_v49 = vld [vmem:[#allocation30_spill] sm:$0xff]  ;;  %v17157_v36 = vld [vmem:[#allocation68_spill] sm:$0xff] }
 0x34e   : > { %v2933_v11 = vadd.f32 %v2871_v46, %v2774_v6  ;;  %v17148_v46 = vld [vmem:[#allocation35_spill] sm:$0xff]  ;;  %v12641_v26 = vsel %vm434_vm1, %v3801_v22, %v3802_v8 }
 0x34f   : > { %v2615_v58 = vadd.f32 %v17148_v46, %v2459_v56  ;;  %17151 = vst [vmem:[#allocation80_spill] sm:$0xff] %v12641_v26 }
 0x350   : > { %v3089_v42 = vadd.f32 %v3027_v12, %v2933_v11  ;;  %9297 = vmatmul.msk.f32.gmra.mxu2 %vm520_vm3, %v17147_v17  ;;  %v4239_v12 = vrot.slane %v12573_v13, 2  ;;  %v12645_v11 = vld [vmem:[#allocation3 + $0x40] sm:$0xf] }
 0x351   : > { %9332 = vmatmul.msk.f32.gmra.mxu3 %vm3491_vm5, %v12611_v61  ;;  %v3030_v44 = vpop.f32.mrf.mxu0  ;;  %v3804_v22 = vrot.slane %v12645_v11, 1 }
 0x352   : > { %v12648_v59 = vsel %vm806_vm2, %v4239_v12, %v4240_v32 }
 0x353   : > { %v3187_v47 = vpop.f32.mrf.mxu1  ;;  %v2715_v34 = vpop.f32.mrf.mxu2  ;;  %17152 = vst [vmem:[#allocation72_spill] sm:$0xff] %v12648_v59 }
 0x354   : > { %v2877_v7 = vpop.f32.mrf.mxu3  ;;  %9364 = vmatmul.msk.f32.gmra.mxu0 %vm3491_vm5, %v12573_v13  ;;  %9397 = vmatmul.msk.f32.gmra.mxu1 %vm3491_vm5, %v4238_v41  ;;  %v12634_v35 = vadd.f32 %v3187_v47, %v3089_v42  ;;  %v2775_v39 = vadd.f32 %v2715_v34, %v2615_v58  ;;  %v17153_v13 = vld [vmem:[#allocation33_spill] sm:$0xff]  ;;  %v17154_v47 = vld [vmem:[#allocation46_spill] sm:$0xff]  ;;  %v4242_v34 = vrot.slane %v12595_v33, 2 }
 0x355   : > { %v2460_v56 = vadd.f32 %v17153_v13, %v2141_v15  ;;  %v2144_v15 = vadd.f32 %v17157_v36, %v17156_v49  ;;  %v12669_v13 = vld [vmem:[#allocation3 + $0x48] sm:$0xff]  ;;  %v17160_v33 = vld [vmem:[#allocation37_spill] sm:$0xff]  ;;  %v17164_v36 = vld [vmem:[#allocation134_spill] sm:$0xff] }
 0x356   : > { %v2934_v41 = vadd.f32 %v2874_v5, %v2775_v39  ;;  %v17155_v5 = vld [vmem:[#allocation136_spill] sm:$0xff] }
 0x357   : > { %v2616_v58 = vadd.f32 %v17155_v5, %v2460_v56 }
 0x358   : > { %v3090_v42 = vadd.f32 %v3030_v44, %v2934_v41  ;;  %9298 = vmatmul.msk.f32.gmra.mxu2 %vm520_vm3, %v17154_v47  ;;  %v12665_v41 = vsel %vm434_vm1, %v3802_v8, %v3804_v22  ;;  %v12671_v47 = vld [vmem:[#allocation3 + $0x50] sm:$0xff]  ;;  %v3806_v8 = vrot.slane %v12669_v13, 1 }
 0x359   : > { %9333 = vmatmul.msk.f32.gmra.mxu3 %vm3491_vm5, %v12641_v26  ;;  %v3033_v6 = vpop.f32.mrf.mxu0  ;;  %17158 = vst [vmem:[#allocation82_spill] sm:$0xff] %v12665_v41  ;;  %v3807_v22 = vrot.slane %v12671_v47, 1 }
 0x35b   : > { %v3190_v46 = vpop.f32.mrf.mxu1  ;;  %v2718_v44 = vpop.f32.mrf.mxu2 }
 0x35c   : > { %v2880_v17 = vpop.f32.mrf.mxu3  ;;  %9365 = vmatmul.msk.f32.gmra.mxu0 %vm3491_vm5, %v12575_v43  ;;  %9398 = vmatmul.msk.f32.gmra.mxu1 %vm3491_vm5, %v12648_v59  ;;  %v12659_v12 = vadd.f32 %v3190_v46, %v3090_v42  ;;  %v2776_v39 = vadd.f32 %v2718_v44, %v2616_v58  ;;  %v12674_v42 = vsel %vm806_vm2, %v4240_v32, %v4242_v34  ;;  %v17161_v58 = vld [vmem:[#allocation49_spill] sm:$0xff] }
 0x35d   : > { %17159 = vst [vmem:[#allocation84_spill] sm:$0xff] %v12674_v42  ;;  %v2461_v46 = vadd.f32 %v17160_v33, %v2144_v15  ;;  %v17165_v15 = vld [vmem:[#allocation29_spill] sm:$0xff]  ;;  %v12691_v33 = vsel %vm434_vm1, %v3806_v8, %v3807_v22 }
 0x35e   : > { %v2935_v56 = vadd.f32 %v2877_v7, %v2776_v39  ;;  %v17162_v7 = vld [vmem:[#allocation139_spill] sm:$0xff]  ;;  %v2147_v39 = vadd.f32 %v17165_v15, %v17164_v36  ;;  %17166 = vst [vmem:[#allocation86_spill] sm:$0xff] %v12691_v33  ;;  %v17168_v36 = vld [vmem:[#allocation54_spill] sm:$0xff] }
 0x35f   : > { %v2617_v32 = vadd.f32 %v17162_v7, %v2461_v46  ;;  %v12697_v46 = vld [vmem:[#allocation3 + $0x58] sm:$0xf] }
 0x360   : > { %v3091_v5 = vadd.f32 %v3033_v6, %v2935_v56  ;;  %9299 = vmatmul.msk.f32.gmra.mxu2 %vm520_vm3, %v17161_v58  ;;  %v4245_v58 = vrot.slane %v12620_v4, 2 }
 0x361   : > { %9334 = vmatmul.msk.f32.gmra.mxu3 %vm3491_vm5, %v12665_v41  ;;  %v3036_v43 = vpop.f32.mrf.mxu0 }
 0x363   : > { %v3193_v44 = vpop.f32.mrf.mxu1  ;;  %v2721_v6 = vpop.f32.mrf.mxu2 }
 0x364   : > { %v2883_v49 = vpop.f32.mrf.mxu3  ;;  %9366 = vmatmul.msk.f32.gmra.mxu0 %vm3491_vm5, %v12622_v30  ;;  %9399 = vmatmul.msk.f32.gmra.mxu1 %vm3491_vm5, %v12674_v42  ;;  %v12686_v34 = vadd.f32 %v3193_v44, %v3091_v5  ;;  %v2777_v56 = vadd.f32 %v2721_v6, %v2617_v32  ;;  %v4244_v42 = vrot.slane %v12622_v30, 2  ;;  %v17167_v5 = vld [vmem:[#allocation135_spill] sm:$0xff]  ;;  %v17170_v30 = vld [vmem:[#allocation141_spill] sm:$0xff]  ;;  %v3809_v6 = vrot.slane %v12697_v46, 1 }
 0x365   : > { %v2462_v44 = vadd.f32 %v17167_v5, %v2147_v39  ;;  %v17173_v39 = vld [vmem:[#allocation39_spill] sm:$0xff] }
 0x366   : > { %17163 = vst [vmem:[#allocation77_spill] sm:$0xff] %v12686_v34  ;;  %v2936_v41 = vadd.f32 %v2880_v17, %v2777_v56  ;;  %v12705_v32 = vsel %vm806_vm2, %v4244_v42, %v4245_v58  ;;  %v4247_v42 = vrot.slane %v12645_v11, 2 }
 0x367   : > { %17169 = vst [vmem:[#allocation88_spill] sm:$0xff] %v12705_v32  ;;  %v2618_v17 = vadd.f32 %v17170_v30, %v2462_v44  ;;  %v12723_v30 = vld [vmem:[#allocation3 + $0x60] sm:$0xff] }
 0x368   : > { %v3092_v7 = vadd.f32 %v3036_v43, %v2936_v41  ;;  %9300 = vmatmul.msk.f32.gmra.mxu2 %vm520_vm3, %v17168_v36  ;;  %v17172_v43 = vld [vmem:[#allocation137_spill] sm:$0xff] }
 0x369   : > { %9335 = vmatmul.msk.f32.gmra.mxu3 %vm3491_vm5, %v12691_v33  ;;  %v3039_v59 = vpop.f32.mrf.mxu0  ;;  %v2150_v56 = vadd.f32 %v17173_v39, %v17172_v43  ;;  %v17176_v43 = vld [vmem:[#allocation57_spill] sm:$0xff] }
 0x36b   : > { %v3196_v8 = vpop.f32.mrf.mxu1  ;;  %v2724_v41 = vpop.f32.mrf.mxu2 }
 0x36c   : > { %v2886_v34 = vpop.f32.mrf.mxu3  ;;  %9367 = vmatmul.msk.f32.gmra.mxu0 %vm3491_vm5, %v12620_v4  ;;  %9400 = vmatmul.msk.f32.gmra.mxu1 %vm3491_vm5, %v12705_v32  ;;  %v12711_v15 = vadd.f32 %v3196_v8, %v3092_v7  ;;  %v2778_v5 = vadd.f32 %v2724_v41, %v2618_v17  ;;  %v12716_v4 = vsel %vm434_vm1, %v3807_v22, %v3809_v6  ;;  %v12721_v32 = vld [vmem:[#allocation3 + $0x68] sm:$0xff]  ;;  %v17175_v7 = vld [vmem:[#allocation138_spill] sm:$0xff] }
 0x36d   : > { %17174 = vst [vmem:[#allocation94_spill] sm:$0xff] %v12716_v4  ;;  %v2463_v8 = vadd.f32 %v17175_v7, %v2150_v56  ;;  %v3812_v22 = vrot.slane %v12721_v32, 1  ;;  %v12732_v17 = vsel %vm806_vm2, %v4245_v58, %v4247_v42  ;;  %v4249_v56 = vrot.slane %v12669_v13, 2 }
 0x36e   : > { %17171 = vst [vmem:[#allocation91_spill] sm:$0xff] %v12711_v15  ;;  %v2937_v44 = vadd.f32 %v2883_v49, %v2778_v5  ;;  %v17178_v49 = vld [vmem:[#allocation144_spill] sm:$0xff]  ;;  %v17180_v5 = vld [vmem:[#allocation142_spill] sm:$0xff]  ;;  %v4250_v58 = vrot.slane %v12671_v47, 2 }
 0x36f   : > { %17177 = vst [vmem:[#allocation90_spill] sm:$0xff] %v12732_v17  ;;  %v2619_v6 = vadd.f32 %v17178_v49, %v2463_v8  ;;  %v12749_v8 = vld [vmem:[#allocation3 + $0x70] sm:$0xf] }
 0x370   : > { %v3093_v33 = vadd.f32 %v3039_v59, %v2937_v44  ;;  %9301 = vmatmul.msk.f32.gmra.mxu2 %vm520_vm3, %v17176_v43  ;;  %v3811_v59 = vrot.slane %v12723_v30, 1  ;;  %v17181_v44 = vld [vmem:[#allocation43_spill] sm:$0xff] }
 0x371   : > { %9336 = vmatmul.msk.f32.gmra.mxu3 %vm3491_vm5, %v12716_v4  ;;  %v3042_v36 = vpop.f32.mrf.mxu0  ;;  %v2153_v7 = vadd.f32 %v17181_v44, %v17180_v5 }
 0x372   : > { %v12744_v4 = vsel %vm434_vm1, %v3811_v59, %v3812_v22 }
 0x373   : > { %v3199_v11 = vpop.f32.mrf.mxu1  ;;  %v2727_v39 = vpop.f32.mrf.mxu2  ;;  %17182 = vst [vmem:[#allocation93_spill] sm:$0xff] %v12744_v4 }
 0x374   : > { %v2889_v15 = vpop.f32.mrf.mxu3  ;;  %9368 = vmatmul.msk.f32.gmra.mxu0 %vm3491_vm5, %v12669_v13  ;;  %9401 = vmatmul.msk.f32.gmra.mxu1 %vm3491_vm5, %v12732_v17  ;;  %v12738_v41 = vadd.f32 %v3199_v11, %v3093_v33  ;;  %v2779_v43 = vadd.f32 %v2727_v39, %v2619_v6  ;;  %v17183_v11 = vld [vmem:[#allocation140_spill] sm:$0xff]  ;;  %v3814_v6 = vrot.slane %v12749_v8, 1  ;;  %v12758_v39 = vsel %vm806_vm2, %v4249_v56, %v4250_v58  ;;  %v12772_v56 = vld [vmem:[#allocation3 + $0x80] sm:$0xff] }
 0x375   : > { %v2464_v49 = vadd.f32 %v17183_v11, %v2153_v7  ;;  %17185 = vst [vmem:[#allocation97_spill] sm:$0xff] %v12758_v39  ;;  %v17188_v7 = vld [vmem:[#allocation53_spill] sm:$0xff] }
 0x376   : > { %17179 = vst [vmem:[#allocation95_spill] sm:$0xff] %v12738_v41  ;;  %v2938_v33 = vadd.f32 %v2886_v34, %v2779_v43  ;;  %v17184_v41 = vld [vmem:[#allocation61_spill] sm:$0xff]  ;;  %v17186_v34 = vld [vmem:[#allocation146_spill] sm:$0xff]  ;;  %v12768_v11 = vsel %vm434_vm1, %v3812_v22, %v3814_v6  ;;  %v3817_v22 = vrot.slane %v12772_v56, 1 }
 0x377   : > { %v2620_v5 = vadd.f32 %v17186_v34, %v2464_v49  ;;  %v17189_v43 = vld [vmem:[#allocation45_spill] sm:$0xff]  ;;  %17190 = vst [vmem:[#allocation96_spill] sm:$0xff] %v12768_v11  ;;  %v12775_v49 = vld [vmem:[#allocation3 + $0x78] sm:$0xff] }
 0x378   : > { %v3094_v17 = vadd.f32 %v3042_v36, %v2938_v33  ;;  %9302 = vmatmul.msk.f32.gmra.mxu2 %vm520_vm3, %v17184_v41  ;;  %v2156_v41 = vadd.f32 %v17189_v43, %v17188_v7  ;;  %v17192_v7 = vld [vmem:[#allocation65_spill] sm:$0xff]  ;;  %v17196_v43 = vld [vmem:[#allocation147_spill] sm:$0xff] }
 0x379   : > { %9337 = vmatmul.msk.f32.gmra.mxu3 %vm3491_vm5, %v12744_v4  ;;  %v3045_v42 = vpop.f32.mrf.mxu0 }
 0x37b   : > { %v3202_v59 = vpop.f32.mrf.mxu1  ;;  %v2730_v36 = vpop.f32.mrf.mxu2 }
 0x37c   : > { %v2892_v13 = vpop.f32.mrf.mxu3  ;;  %9369 = vmatmul.msk.f32.gmra.mxu0 %vm3491_vm5, %v12671_v47  ;;  %9402 = vmatmul.msk.f32.gmra.mxu1 %vm3491_vm5, %v12758_v39  ;;  %v12763_v44 = vadd.f32 %v3202_v59, %v3094_v17  ;;  %v2780_v33 = vadd.f32 %v2730_v36, %v2620_v5  ;;  %v4252_v39 = vrot.slane %v12697_v46, 2  ;;  %v17191_v17 = vld [vmem:[#allocation143_spill] sm:$0xff]  ;;  %v17194_v46 = vld [vmem:[#allocation148_spill] sm:$0xff] }
 0x37d   : > { %v2465_v59 = vadd.f32 %v17191_v17, %v2156_v41  ;;  %v17197_v41 = vld [vmem:[#allocation51_spill] sm:$0xff] }
 0x37e   : > { %17187 = vst [vmem:[#allocation99_spill] sm:$0xff] %v12763_v44  ;;  %v2939_v4 = vadd.f32 %v2889_v15, %v2780_v33  ;;  %v12784_v5 = vsel %vm806_vm2, %v4250_v58, %v4252_v39  ;;  %v2159_v33 = vadd.f32 %v17197_v41, %v17196_v43  ;;  %v4255_v58 = vrot.slane %v12721_v32, 2  ;;  %v17200_v43 = vld [vmem:[#allocation70_spill] sm:$0xff] }
 0x37f   : > { %17193 = vst [vmem:[#allocation100_spill] sm:$0xff] %v12784_v5  ;;  %v2621_v15 = vadd.f32 %v17194_v46, %v2465_v59 }
 0x380   : > { %v3095_v34 = vadd.f32 %v3045_v42, %v2939_v4  ;;  %9303 = vmatmul.msk.f32.gmra.mxu2 %vm520_vm3, %v17192_v7  ;;  %v3816_v4 = vrot.slane %v12775_v49, 1 }
 0x381   : > { %9338 = vmatmul.msk.f32.gmra.mxu3 %vm3491_vm5, %v12768_v11  ;;  %v3048_v47 = vpop.f32.mrf.mxu0 }
 0x382   : > { %v12795_v7 = vsel %vm434_vm1, %v3816_v4, %v3817_v22 }
 0x383   : > { %v3205_v6 = vpop.f32.mrf.mxu1  ;;  %v2733_v36 = vpop.f32.mrf.mxu2  ;;  %17198 = vst [vmem:[#allocation102_spill] sm:$0xff] %v12795_v7 }
 0x384   : > { %v2895_v44 = vpop.f32.mrf.mxu3  ;;  %9370 = vmatmul.msk.f32.gmra.mxu0 %vm3491_vm5, %v12723_v30  ;;  %9403 = vmatmul.msk.f32.gmra.mxu1 %vm3491_vm5, %v12784_v5  ;;  %v12790_v42 = vadd.f32 %v3205_v6, %v3095_v34  ;;  %v2781_v17 = vadd.f32 %v2733_v36, %v2621_v15  ;;  %v12800_v5 = vld [vmem:[#allocation3 + $0x88] sm:$0xf]  ;;  %v4254_v34 = vrot.slane %v12723_v30, 2  ;;  %v17199_v6 = vld [vmem:[#allocation145_spill] sm:$0xff]  ;;  %v17202_v30 = vld [vmem:[#allocation151_spill] sm:$0xff] }
 0x385   : > { %v2466_v46 = vadd.f32 %v17199_v6, %v2159_v33  ;;  %v3819_v15 = vrot.slane %v12800_v5, 1  ;;  %v4257_v33 = vrot.slane %v12749_v8, 2  ;;  %v17208_v8 = vld [vmem:[#allocation149_spill] sm:$0xff] }
 0x386   : > { %17195 = vst [vmem:[#allocation107_spill] sm:$0xff] %v12790_v42  ;;  %v2940_v59 = vadd.f32 %v2892_v13, %v2781_v17  ;;  %v12810_v36 = vsel %vm806_vm2, %v4254_v34, %v4255_v58  ;;  %v17204_v17 = vld [vmem:[#allocation150_spill] sm:$0xff] }
 0x387   : > { %17201 = vst [vmem:[#allocation98_spill] sm:$0xff] %v12810_v36  ;;  %v2622_v13 = vadd.f32 %v17202_v30, %v2466_v46  ;;  %v12830_v46 = vsel %vm806_vm2, %v4255_v58, %v4257_v33 }
 0x388   : > { %v3096_v11 = vadd.f32 %v3048_v47, %v2940_v59  ;;  %9304 = vmatmul.msk.f32.gmra.mxu2 %vm520_vm3, %v17200_v43  ;;  %v17205_v59 = vld [vmem:[#allocation59_spill] sm:$0xff]  ;;  %17207 = vst [vmem:[#allocation101_spill] sm:$0xff] %v12830_v46 }
 0x389   : > { %9339 = vmatmul.msk.f32.gmra.mxu3 %vm3491_vm5, %v12795_v7  ;;  %v3051_v39 = vpop.f32.mrf.mxu0  ;;  %v2162_v6 = vadd.f32 %v17205_v59, %v17204_v17  ;;  %v12825_v7 = vld [vmem:[#allocation3 + $0x90] sm:$0xff] }
 0x38a   : > { %v17212_v59 = vld [vmem:[#allocation153_spill] sm:$0xff] }
 0x38b   : > { %v3208_v4 = vpop.f32.mrf.mxu1  ;;  %v2736_v47 = vpop.f32.mrf.mxu2 }
 0x38c   : > { %v2898_v42 = vpop.f32.mrf.mxu3  ;;  %9371 = vmatmul.msk.f32.gmra.mxu0 %vm3491_vm5, %v12721_v32  ;;  %9404 = vmatmul.msk.f32.gmra.mxu1 %vm3491_vm5, %v12810_v36  ;;  %v12815_v41 = vadd.f32 %v3208_v4, %v3096_v11  ;;  %v2782_v43 = vadd.f32 %v2736_v47, %v2622_v13  ;;  %v12821_v32 = vsel %vm434_vm1, %v3817_v22, %v3819_v15  ;;  %v12827_v36 = vld [vmem:[#allocation3 + $0x98] sm:$0xff]  ;;  %v17209_v13 = vld [vmem:[#allocation73_spill] sm:$0xff]  ;;  %v3821_v22 = vrot.slane %v12825_v7, 1 }
 0x38d   : > { %17206 = vst [vmem:[#allocation105_spill] sm:$0xff] %v12821_v32  ;;  %v2467_v4 = vadd.f32 %v17208_v8, %v2162_v6  ;;  %v3822_v15 = vrot.slane %v12827_v36, 1  ;;  %v17213_v6 = vld [vmem:[#allocation63_spill] sm:$0xff] }
 0x38e   : > { %17203 = vst [vmem:[#allocation103_spill] sm:$0xff] %v12815_v41  ;;  %v2941_v11 = vadd.f32 %v2895_v44, %v2782_v43  ;;  %v17210_v44 = vld [vmem:[#allocation152_spill] sm:$0xff]  ;;  %v2165_v43 = vadd.f32 %v17213_v6, %v17212_v59  ;;  %v17216_v59 = vld [vmem:[#allocation78_spill] sm:$0xff] }
 0x38f   : > { %v2623_v58 = vadd.f32 %v17210_v44, %v2467_v4  ;;  %v12847_v8 = vsel %vm434_vm1, %v3821_v22, %v3822_v15  ;;  %v12853_v4 = vld [vmem:[#allocation3 + $0xa0] sm:$0xf] }
 0x390   : > { %v3097_v30 = vadd.f32 %v3051_v39, %v2941_v11  ;;  %9305 = vmatmul.msk.f32.gmra.mxu2 %vm520_vm3, %v17209_v13  ;;  %17214 = vst [vmem:[#allocation114_spill] sm:$0xff] %v12847_v8  ;;  %v4260_v13 = vrot.slane %v12772_v56, 2 }
 0x391   : > { %9340 = vmatmul.msk.f32.gmra.mxu3 %vm3491_vm5, %v12821_v32  ;;  %v3054_v34 = vpop.f32.mrf.mxu0 }
 0x393   : > { %v3211_v47 = vpop.f32.mrf.mxu1  ;;  %v2739_v39 = vpop.f32.mrf.mxu2 }
 0x394   : > { %v2901_v17 = vpop.f32.mrf.mxu3  ;;  %9372 = vmatmul.msk.f32.gmra.mxu0 %vm3491_vm5, %v12775_v49  ;;  %9405 = vmatmul.msk.f32.gmra.mxu1 %vm3491_vm5, %v12830_v46  ;;  %v12842_v33 = vadd.f32 %v3211_v47, %v3097_v30  ;;  %v2783_v11 = vadd.f32 %v2739_v39, %v2623_v58  ;;  %v4259_v46 = vrot.slane %v12775_v49, 2  ;;  %v17215_v30 = vld [vmem:[#allocation67_spill] sm:$0xff]  ;;  %v17218_v49 = vld [vmem:[#allocation69_spill] sm:$0xff]  ;;  %v3824_v39 = vrot.slane %v12853_v4, 1 }
 0x395   : > { %v2468_v47 = vadd.f32 %v17215_v30, %v2165_v43 }
 0x396   : > { %17211 = vst [vmem:[#allocation106_spill] sm:$0xff] %v12842_v33  ;;  %v2942_v41 = vadd.f32 %v2898_v42, %v2783_v11  ;;  %v12861_v58 = vsel %vm806_vm2, %v4259_v46, %v4260_v13  ;;  %v12870_v43 = vsel %vm434_vm1, %v3822_v15, %v3824_v39  ;;  %v12875_v11 = vld [vmem:[#allocation3 + $0xb0] sm:$0xff] }
 0x397   : > { %17217 = vst [vmem:[#allocation109_spill] sm:$0xff] %v12861_v58  ;;  %v2624_v42 = vadd.f32 %v17218_v49, %v2468_v47 }
 0x398   : > { %v3098_v44 = vadd.f32 %v3054_v34, %v2942_v41  ;;  %9306 = vmatmul.msk.f32.gmra.mxu2 %vm520_vm3, %v17216_v59  ;;  %17219 = vst [vmem:[#allocation104_spill] sm:$0xff] %v12870_v43  ;;  %v12877_v59 = vld [vmem:[#allocation3 + $0xa8] sm:$0xff] }
 0x399   : > { %9341 = vmatmul.msk.f32.gmra.mxu3 %vm3491_vm5, %v12847_v8  ;;  %v3057_v32 = vpop.f32.mrf.mxu0 }
 0x39b   : > { %v3214_v22 = vpop.f32.mrf.mxu1  ;;  %v2742_v41 = vpop.f32.mrf.mxu2 }
 0x39c   : > { %v2904_v33 = vpop.f32.mrf.mxu3  ;;  %9373 = vmatmul.msk.f32.gmra.mxu0 %vm3491_vm5, %v12772_v56  ;;  %9406 = vmatmul.msk.f32.gmra.mxu1 %vm3491_vm5, %v12861_v58  ;;  %v12867_v6 = vadd.f32 %v3214_v22, %v3098_v44  ;;  %v2784_v34 = vadd.f32 %v2742_v41, %v2624_v42  ;;  %v4262_v56 = vrot.slane %v12800_v5, 2  ;;  %v3827_v44 = vrot.slane %v12875_v11, 1  ;;  %v17221_v42 = vld [vmem:[#allocation75_spill] sm:$0xff] }
 0x39d   : > { %v4264_v41 = vrot.slane %v12825_v7, 2 }
 0x39e   : > { %v2943_v30 = vadd.f32 %v2901_v17, %v2784_v34  ;;  %v12885_v15 = vsel %vm806_vm2, %v4260_v13, %v4262_v56  ;;  %v3826_v17 = vrot.slane %v12877_v59, 1  ;;  %v4265_v34 = vrot.slane %v12827_v36, 2  ;;  %v12900_v56 = vld [vmem:[#allocation3 + $0xb8] sm:$0xf] }
 0x39f   : > { %17220 = vst [vmem:[#allocation110_spill] sm:$0xff] %v12885_v15 }
 0x3a0   : > { %v3099_v47 = vadd.f32 %v3057_v32, %v2943_v30  ;;  %9307 = vmatmul.msk.f32.gmra.mxu2 %vm520_vm3, %v11415_v19  ;;  %v12894_v19 = vsel %vm434_vm1, %v3826_v17, %v3827_v44  ;;  %v12908_v17 = vsel %vm806_vm2, %v4264_v41, %v4265_v34  ;;  %v4267_v41 = vrot.slane %v12853_v4, 2 }
 0x3a1   : > { %9342 = vmatmul.msk.f32.gmra.mxu3 %vm3491_vm5, %v12870_v43  ;;  %v3060_v46 = vpop.f32.mrf.mxu0  ;;  %17222 = vst [vmem:[#allocation112_spill] sm:$0xff] %v12894_v19 }
 0x3a2   : > { %17224 = vst [vmem:[#allocation108_spill] sm:$0xff] %v12908_v17 }
 0x3a3   : > { %v3217_v5 = vpop.f32.mrf.mxu1  ;;  %v2745_v32 = vpop.f32.mrf.mxu2 }
 0x3a4   : > { %v2907_v49 = vpop.f32.mrf.mxu3  ;;  %9374 = vmatmul.msk.f32.gmra.mxu0 %vm3491_vm5, %v12825_v7  ;;  %9407 = vmatmul.msk.f32.gmra.mxu1 %vm3491_vm5, %v12885_v15  ;;  %v12890_v22 = vadd.f32 %v3217_v5, %v3099_v47  ;;  %v2785_v39 = vadd.f32 %v2745_v32, %v17221_v42  ;;  %v17223_v5 = vld [vmem:[#allocation87_spill] sm:$0xff]  ;;  %v3829_v32 = vrot.slane %v12900_v56, 1 }
 0x3a6   : > { %v2944_v30 = vadd.f32 %v2904_v33, %v2785_v39 }
 0x3a8   : > { %v3100_v15 = vadd.f32 %v3060_v46, %v2944_v30  ;;  %9308 = vmatmul.msk.f32.gmra.mxu2 %vm520_vm3, %v17223_v5  ;;  %v17226_v46 = vld [vmem:[#allocation154_spill] sm:$0xff]  ;;  %v12916_v30 = vsel %vm434_vm1, %v3827_v44, %v3829_v32  ;;  %v12931_v32 = vsel %vm806_vm2, %v4265_v34, %v4267_v41  ;;  %v12945_v41 = vld [vmem:[#allocation3 + $0xd0] sm:$0xf] }
 0x3a9   : > { %9343 = vmatmul.msk.f32.gmra.mxu3 %vm3491_vm5, %v12894_v19  ;;  %v3063_v13 = vpop.f32.mrf.mxu0  ;;  %17227 = vst [vmem:[#allocation128_spill] sm:$0xff] %v12916_v30  ;;  %v12923_v19 = vld [vmem:[#allocation3 + $0xc0] sm:$0xff] }
 0x3aa   : > { %17229 = vst [vmem:[#allocation121_spill] sm:$0xff] %v12931_v32  ;;  %v3831_v4 = vrot.slane %v12923_v19, 1 }
 0x3ab   : > { %v3220_v7 = vpop.f32.mrf.mxu1  ;;  %v2748_v33 = vpop.f32.mrf.mxu2 }
 0x3ac   : > { %v2910_v47 = vpop.f32.mrf.mxu3  ;;  %9375 = vmatmul.msk.f32.gmra.mxu0 %vm3491_vm5, %v12827_v36  ;;  %9408 = vmatmul.msk.f32.gmra.mxu1 %vm3491_vm5, %v12908_v17  ;;  %v12912_v42 = vadd.f32 %v3220_v7, %v3100_v15  ;;  %v2786_v39 = vadd.f32 %v2748_v33, %v17226_v46  ;;  %v12920_v36 = vld [vmem:[#allocation3 + $0xc8] sm:$0xff]  ;;  %v17228_v7 = vld [vmem:[#allocation89_spill] sm:$0xff] }
 0x3ad   : > { %v3832_v33 = vrot.slane %v12920_v36, 1 }
 0x3ae   : > { %17225 = vst [vmem:[#allocation113_spill] sm:$0xff] %v12912_v42  ;;  %v2945_v58 = vadd.f32 %v2907_v49, %v2786_v39 }
 0x3af   : > { %v12940_v39 = vsel %vm434_vm1, %v3831_v4, %v3832_v33 }
 0x3b0   : > { %v3101_v17 = vadd.f32 %v3063_v13, %v2945_v58  ;;  %9309 = vmatmul.msk.f32.gmra.mxu2 %vm520_vm3, %v17228_v7  ;;  %v17230_v13 = vld [vmem:[#allocation83_spill] sm:$0xff]  ;;  %17231 = vst [vmem:[#allocation116_spill] sm:$0xff] %v12940_v39  ;;  %v4270_v7 = vrot.slane %v12875_v11, 2 }
 0x3b1   : > { %9344 = vmatmul.msk.f32.gmra.mxu3 %vm3491_vm5, %v12916_v30  ;;  %v3066_v5 = vpop.f32.mrf.mxu0 }
 0x3b3   : > { %v3223_v44 = vpop.f32.mrf.mxu1  ;;  %v2751_v58 = vpop.f32.mrf.mxu2 }
 0x3b4   : > { %v2913_v15 = vpop.f32.mrf.mxu3  ;;  %9376 = vmatmul.msk.f32.gmra.mxu0 %vm3491_vm5, %v12877_v59  ;;  %9409 = vmatmul.msk.f32.gmra.mxu1 %vm3491_vm5, %v12931_v32  ;;  %v12936_v49 = vadd.f32 %v3223_v44, %v3101_v17  ;;  %v2787_v46 = vadd.f32 %v2751_v58, %v17230_v13  ;;  %v4269_v32 = vrot.slane %v12877_v59, 2  ;;  %v17232_v17 = vld [vmem:[#allocation92_spill] sm:$0xff]  ;;  %v3834_v58 = vrot.slane %v12945_v41, 1 }
 0x3b6   : > { %v2946_v30 = vadd.f32 %v2910_v47, %v2787_v46  ;;  %v12954_v13 = vsel %vm806_vm2, %v4269_v32, %v4270_v7  ;;  %v4272_v46 = vrot.slane %v12900_v56, 2  ;;  %v12969_v32 = vld [vmem:[#allocation3 + $0xe0] sm:$0xff] }
 0x3b7   : > { %17233 = vst [vmem:[#allocation111_spill] sm:$0xff] %v12954_v13 }
 0x3b8   : > { %v3102_v42 = vadd.f32 %v3066_v5, %v2946_v30  ;;  %9310 = vmatmul.msk.f32.gmra.mxu2 %vm520_vm3, %v17232_v17  ;;  %v12962_v5 = vsel %vm434_vm1, %v3832_v33, %v3834_v58  ;;  %v3837_v33 = vrot.slane %v12969_v32, 1  ;;  %v12978_v58 = vsel %vm806_vm2, %v4270_v7, %v4272_v46 }
 0x3b9   : > { %9345 = vmatmul.msk.f32.gmra.mxu3 %vm3491_vm5, %v12940_v39  ;;  %v3069_v34 = vpop.f32.mrf.mxu0  ;;  %17234 = vst [vmem:[#allocation117_spill] sm:$0xff] %v12962_v5  ;;  %v4274_v46 = vrot.slane %v12923_v19, 2 }
 0x3ba   : > { %17235 = vst [vmem:[#allocation125_spill] sm:$0xff] %v12978_v58 }
 0x3bb   : > { %v3226_v4 = vpop.f32.mrf.mxu1  ;;  %v2754_v59 = vpop.f32.mrf.mxu2 }
 0x3bc   : > { %v3958_v44 = vpop.f32.mrf.mxu3  ;;  %9377 = vmatmul.msk.f32.gmra.mxu0 %vm3491_vm5, %v12875_v11  ;;  %9410 = vmatmul.msk.f32.gmra.mxu1 %vm3491_vm5, %v12954_v13  ;;  %v12958_v47 = vadd.f32 %v3226_v4, %v3102_v42  ;;  %v2788_v30 = vadd.f32 %v2754_v59, %v12334_v3  ;;  %v12967_v11 = vld [vmem:[#allocation3 + $0xd8] sm:$0xff]  ;;  %v4275_v59 = vrot.slane %v12920_v36, 2 }
 0x3bd   : > { %v3836_v3 = vrot.slane %v12967_v11, 1 }
 0x3be   : > { %v2947_v39 = vadd.f32 %v2913_v15, %v2788_v30  ;;  %v12985_v15 = vld [vmem:[%s16457_s6] ss:$0 sm:$0xff] }
 0x3bf   : > { %v12991_v4 = vsel %vm434_vm1, %v3836_v3, %v3837_v33 }
 0x3c0   : > { %v3103_v13 = vadd.f32 %v3069_v34, %v2947_v39  ;;  %9311 = vmatmul.msk.f32.gmra.mxu2 %vm520_vm3, %v11519_v25  ;;  %17236 = vst [vmem:[#allocation119_spill] sm:$0xff] %v12991_v4 }
 0x3c1   : > { %9346 = vmatmul.msk.f32.gmra.mxu3 %vm3491_vm5, %v12962_v5  ;;  %v4138_v17 = vpop.f32.mrf.mxu0  ;;  %v12998_v5 = vld [vmem:[#allocation3 + $0xe8] sm:$0xf] }
 0x3c3   : > { %v3229_v56 = vpop.f32.mrf.mxu1  ;;  %v3295_v39 = vpop.f32.mrf.mxu2 }
 0x3c4   : > { %v3961_v42 = vpop.f32.mrf.mxu3  ;;  %9378 = vmatmul.msk.f32.gmra.mxu0 %vm3491_vm5, %v12923_v19  ;;  %9411 = vmatmul.msk.f32.gmra.mxu1 %vm3491_vm5, %v12978_v58  ;;  %v12987_v25 = vadd.f32 %v3229_v56, %v3103_v13  ;;  %v3391_v34 = vadd.f32 %v3295_v39, %v12350_v1  ;;  %v4139_v58 = vadd.f32 %v4138_v17, %v3958_v44  ;;  %v3839_v19 = vrot.slane %v12998_v5, 1 }
 0x3c5   : > { %v13005_v56 = vsel %vm806_vm2, %v4274_v46, %v4275_v59 }
 0x3c6   : > { %v3427_v30 = vadd.f32 %v12985_v15, %v3391_v34  ;;  %17237 = vst [vmem:[#allocation115_spill] sm:$0xff] %v13005_v56  ;;  %v13015_v17 = vsel %vm434_vm1, %v3837_v33, %v3839_v19 }
 0x3c7   : > { %17238 = vst [vmem:[#allocation120_spill] sm:$0xff] %v13015_v17 }
 0x3c8   : > { %9312 = vmatmul.msk.f32.gmra.mxu2 %vm520_vm3, %v11549_v0  ;;  %v3459_v13 = vmax.f32 %v3427_v30, 0.0 }
 0x3c9   : > { %9347 = vmatmul.msk.f32.gmra.mxu3 %vm3491_vm5, %v12991_v4  ;;  %v4141_v7 = vpop.f32.mrf.mxu0 }
 0x3ca   : > { %8389 = vrot.lane.b32.xlu1 %v3459_v13, %s10420_s23  ;;  %v4142_v46 = vadd.f32 %v4141_v7, %v3961_v42  ;;  %v13023_v13 = vld [vmem:[#allocation3 + $0xf0] sm:$0xff] }
 0x3cb   : > { %v4400_v3 = vpop.f32.mrf.mxu1  ;;  %v3298_v0 = vpop.f32.mrf.mxu2 }
 0x3cc   : > { %v3964_v1 = vpop.f32.mrf.mxu3  ;;  %9379 = vmatmul.msk.f32.gmra.mxu0 %vm3491_vm5, %v12920_v36  ;;  %v13007_v39 = vadd.f32 %v4400_v3, %v4139_v58  ;;  %9412 = vmatmul.msk.f32.gmra.mxu1 %vm3491_vm5, %v13005_v56  ;;  %v3392_v44 = vadd.f32 %v3298_v0, %v12362_v45  ;;  %v4277_v36 = vrot.slane %v12945_v41, 2  ;;  %v13020_v58 = vld [vmem:[#allocation3 + $0xf8] sm:$0xff] }
 0x3cd   : > { %v3842_v33 = vrot.slane %v13020_v58, 1 }
 0x3ce   : > { %v3428_v30 = vadd.f32 %v12985_v15, %v3392_v44  ;;  %v13031_v19 = vsel %vm806_vm2, %v4275_v59, %v4277_v36  ;;  %v4280_v59 = vrot.slane %v12969_v32, 2  ;;  %v13047_v36 = vld [vmem:[#allocation3 + $0x100] sm:$0xf] }
 0x3cf   : > { %17239 = vst [vmem:[#allocation130_spill] sm:$0xff] %v13031_v19 }
 0x3d0   : > { %9313 = vmatmul.msk.f32.gmra.mxu2 %vm520_vm3, %v11576_v62  ;;  %v3460_v3 = vmax.f32 %v3428_v30, 0.0  ;;  %v3841_v62 = vrot.slane %v13023_v13, 1  ;;  %v4279_v30 = vrot.slane %v12967_v11, 2 }
 0x3d1   : > { %9348 = vmatmul.msk.f32.gmra.mxu3 %vm3491_vm5, %v13015_v17  ;;  %v4144_v34 = vpop.f32.mrf.mxu0 }
 0x3d2   : > { %8391 = vrot.lane.b32.xlu2 %v3460_v3, %s10420_s23  ;;  %v13041_v44 = vsel %vm434_vm1, %v3841_v62, %v3842_v33  ;;  %v3844_v62 = vrot.slane %v13047_v36, 1 }
 0x3d3   : > { %v4403_v41 = vpop.f32.mrf.mxu1  ;;  %v3301_v42 = vpop.f32.mrf.mxu2  ;;  %17240 = vst [vmem:[#allocation123_spill] sm:$0xff] %v13041_v44 }
 0x3d4   : > { %v3967_v45 = vpop.f32.mrf.mxu3  ;;  %9380 = vmatmul.msk.f32.gmra.mxu0 %vm3491_vm5, %v12967_v11  ;;  %v13033_v0 = vadd.f32 %v4403_v41, %v4142_v46  ;;  %9413 = vmatmul.msk.f32.gmra.mxu1 %vm3491_vm5, %v13031_v19  ;;  %v3393_v7 = vadd.f32 %v3301_v42, %v12374_v2  ;;  %v4145_v41 = vadd.f32 %v4144_v34, %v3964_v1 }
 0x3d5   : > { %v13056_v19 = vsel %vm806_vm2, %v4279_v30, %v4280_v59  ;;  %v13065_v34 = vsel %vm434_vm1, %v3842_v33, %v3844_v62 }
 0x3d6   : > { %v3429_v3 = vadd.f32 %v12985_v15, %v3393_v7  ;;  %17241 = vst [vmem:[#allocation118_spill] sm:$0xff] %v13056_v19 }
 0x3d7   : > { %17242 = vst [vmem:[#allocation124_spill] sm:$0xff] %v13065_v34 }
 0x3d8   : > { %9314 = vmatmul.msk.f32.gmra.mxu2 %vm520_vm3, %v11622_v50  ;;  %v3461_v42 = vmax.f32 %v3429_v3, 0.0  ;;  %v4282_v3 = vrot.slane %v12998_v5, 2 }
 0x3d9   : > { %9349 = vmatmul.msk.f32.gmra.mxu3 %vm3491_vm5, %v13041_v44  ;;  %v4147_v46 = vpop.f32.mrf.mxu0 }
 0x3da   : > { %8393 = vrot.lane.b32.xlu0 %v3461_v42, %s10420_s23 }
 0x3db   : > { %v4406_v11 = vpop.f32.mrf.mxu1  ;;  %v3304_v1 = vpop.f32.mrf.mxu2 }
 0x3dc   : > { %v3970_v2 = vpop.f32.mrf.mxu3  ;;  %9381 = vmatmul.msk.f32.gmra.mxu0 %vm3491_vm5, %v12969_v32  ;;  %v13058_v56 = vadd.f32 %v4406_v11, %v4145_v41  ;;  %9414 = vmatmul.msk.f32.gmra.mxu1 %vm3491_vm5, %v13056_v19  ;;  %v3394_v50 = vadd.f32 %v3304_v1, %v12387_v53  ;;  %v13069_v32 = vld [vmem:[#allocation3 + $0x110] sm:$0xff]  ;;  %v4148_v41 = vadd.f32 %v4147_v46, %v3967_v45  ;;  %v13073_v11 = vld [vmem:[#allocation3 + $0x108] sm:$0xff] }
 0x3dd   : > { %v3847_v33 = vrot.slane %v13069_v32, 1  ;;  %v13081_v1 = vsel %vm806_vm2, %v4280_v59, %v4282_v3  ;;  %v13096_v59 = vld [vmem:[#allocation3 + $0x118] sm:$0xf] }
 0x3de   : > { %v3430_v30 = vadd.f32 %v12985_v15, %v3394_v50  ;;  %17243 = vst [vmem:[#allocation127_spill] sm:$0xff] %v13081_v1 }
 0x3e0   : > { %9315 = vmatmul.msk.f32.gmra.mxu2 %vm520_vm3, %v11668_v31  ;;  %v3462_v42 = vmax.f32 %v3430_v30, 0.0  ;;  %v3846_v31 = vrot.slane %v13073_v11, 1  ;;  %v4285_v30 = vrot.slane %v13020_v58, 2 }
 0x3e1   : > { %9350 = vmatmul.msk.f32.gmra.mxu3 %vm3491_vm5, %v13065_v34  ;;  %v4150_v7 = vpop.f32.mrf.mxu0 }
 0x3e2   : > { %8395 = vrot.lane.b32.xlu1 %v3462_v42, %s10420_s23  ;;  %v13091_v46 = vsel %vm434_vm1, %v3846_v31, %v3847_v33  ;;  %v4284_v42 = vrot.slane %v13023_v13, 2  ;;  %v3849_v31 = vrot.slane %v13096_v59, 1 }
 0x3e3   : > { %v4409_v62 = vpop.f32.mrf.mxu1  ;;  %v3307_v5 = vpop.f32.mrf.mxu2  ;;  %17244 = vst [vmem:[#allocation122_spill] sm:$0xff] %v13091_v46 }
 0x3e4   : > { %v3973_v53 = vpop.f32.mrf.mxu3  ;;  %9382 = vmatmul.msk.f32.gmra.mxu0 %vm3491_vm5, %v13023_v13  ;;  %v13083_v50 = vadd.f32 %v4409_v62, %v4148_v41  ;;  %9415 = vmatmul.msk.f32.gmra.mxu1 %vm3491_vm5, %v13081_v1  ;;  %v3395_v45 = vadd.f32 %v3307_v5, %v12400_v63  ;;  %v4151_v62 = vadd.f32 %v4150_v7, %v3970_v2  ;;  %v4287_v7 = vrot.slane %v13047_v36, 2 }
 0x3e5   : > { %v13106_v19 = vsel %vm806_vm2, %v4284_v42, %v4285_v30  ;;  %v13115_v2 = vsel %vm434_vm1, %v3847_v33, %v3849_v31 }
 0x3e6   : > { %v3431_v41 = vadd.f32 %v12985_v15, %v3395_v45  ;;  %17245 = vst [vmem:[#allocation129_spill] sm:$0xff] %v13106_v19  ;;  %v13132_v31 = vsel %vm806_vm2, %v4285_v30, %v4287_v7 }
 0x3e7   : > { %17246 = vst [vmem:[#allocation36_spill] sm:$0xff] %v13115_v2 }
 0x3e8   : > { %9316 = vmatmul.msk.f32.gmra.mxu2 %vm520_vm3, %v11725_v51  ;;  %v3463_v5 = vmax.f32 %v3431_v41, 0.0  ;;  %17247 = vst [vmem:[#allocation26_spill] sm:$0xff] %v13132_v31 }
 0x3e9   : > { %9351 = vmatmul.msk.f32.gmra.mxu3 %vm3491_vm5, %v13091_v46  ;;  %v4153_v3 = vpop.f32.mrf.mxu0 }
 0x3ea   : > { %8397 = vrot.lane.b32.xlu2 %v3463_v5, %s10420_s23  ;;  %v4154_v42 = vadd.f32 %v4153_v3, %v3973_v53 }
 0x3eb   : > { %v4412_v1 = vpop.f32.mrf.mxu1  ;;  %v3310_v13 = vpop.f32.mrf.mxu2 }
 0x3ec   : > { %v3976_v63 = vpop.f32.mrf.mxu3  ;;  %9383 = vmatmul.msk.f32.gmra.mxu0 %vm3491_vm5, %v13020_v58  ;;  %v13108_v46 = vadd.f32 %v4412_v1, %v4151_v62  ;;  %9416 = vmatmul.msk.f32.gmra.mxu1 %vm3491_vm5, %v13106_v19  ;;  %v3396_v51 = vadd.f32 %v3310_v13, %v12413_v27  ;;  %v13120_v58 = vld [vmem:[#allocation3 + $0x120] sm:$0xff]  ;;  %v13122_v1 = vld [vmem:[#allocation3 + $0x128] sm:$0xff] }
 0x3ed   : > { %v3851_v33 = vrot.slane %v13120_v58, 1  ;;  %v3852_v36 = vrot.slane %v13122_v1, 1 }
 0x3ee   : > { %v3432_v41 = vadd.f32 %v12985_v15, %v3396_v51  ;;  %v4290_v51 = vrot.slane %v13069_v32, 2 }
 0x3ef   : > { %v13141_v3 = vsel %vm434_vm1, %v3851_v33, %v3852_v36 }
 0x3f0   : > { %9317 = vmatmul.msk.f32.gmra.mxu2 %vm520_vm3, %v11776_v60  ;;  %v3464_v62 = vmax.f32 %v3432_v41, 0.0  ;;  %17248 = vst [vmem:[#allocation126_spill] sm:$0xff] %v13141_v3  ;;  %v4289_v41 = vrot.slane %v13073_v11, 2 }
 0x3f1   : > { %9352 = vmatmul.msk.f32.gmra.mxu3 %vm3491_vm5, %v13115_v2  ;;  %v4156_v45 = vpop.f32.mrf.mxu0 }
 0x3f2   : > { %8399 = vrot.lane.b32.xlu0 %v3464_v62, %s10420_s23 }
 0x3f3   : > { %v4415_v5 = vpop.f32.mrf.mxu1  ;;  %v3313_v60 = vpop.f32.mrf.mxu2 }
 0x3f4   : > { %v3979_v27 = vpop.f32.mrf.mxu3  ;;  %9384 = vmatmul.msk.f32.gmra.mxu0 %vm3491_vm5, %v13073_v11  ;;  %v13134_v13 = vadd.f32 %v4415_v5, %v4154_v42  ;;  %9417 = vmatmul.msk.f32.gmra.mxu1 %vm3491_vm5, %v13132_v31  ;;  %v3397_v53 = vadd.f32 %v3313_v60, %v12426_v20  ;;  %v4157_v42 = vadd.f32 %v4156_v45, %v3976_v63  ;;  %v13148_v5 = vld [vmem:[#allocation3 + $0x130] sm:$0xf] }
 0x3f5   : > { %v13155_v60 = vsel %vm806_vm2, %v4289_v41, %v4290_v51  ;;  %v3854_v11 = vrot.slane %v13148_v5, 1 }
 0x3f6   : > { %v3433_v7 = vadd.f32 %v12985_v15, %v3397_v53  ;;  %17249 = vst [vmem:[#allocation132_spill] sm:$0xff] %v13155_v60  ;;  %v13170_v53 = vld [vmem:[#allocation3 + $0x140] sm:$0xff] }
 0x3f7   : > { %v13165_v45 = vsel %vm434_vm1, %v3852_v36, %v3854_v11  ;;  %v3857_v36 = vrot.slane %v13170_v53, 1 }
 0x3f8   : > { %9318 = vmatmul.msk.f32.gmra.mxu2 %vm520_vm3, %v11821_v37  ;;  %v3465_v62 = vmax.f32 %v3433_v7, 0.0  ;;  %17250 = vst [vmem:[#allocation48_spill] sm:$0xff] %v13165_v45 }
 0x3f9   : > { %9353 = vmatmul.msk.f32.gmra.mxu3 %vm3491_vm5, %v13141_v3  ;;  %v4159_v30 = vpop.f32.mrf.mxu0 }
 0x3fa   : > { %8401 = vrot.lane.b32.xlu1 %v3465_v62, %s10420_s23  ;;  %v13173_v62 = vld [vmem:[#allocation3 + $0x138] sm:$0xff] }
 0x3fb   : > { %v4418_v33 = vpop.f32.mrf.mxu1  ;;  %v3316_v63 = vpop.f32.mrf.mxu2 }
 0x3fc   : > { %v3982_v20 = vpop.f32.mrf.mxu3  ;;  %9385 = vmatmul.msk.f32.gmra.mxu0 %vm3491_vm5, %v13069_v32  ;;  %v13157_v31 = vadd.f32 %v4418_v33, %v4157_v42  ;;  %9418 = vmatmul.msk.f32.gmra.mxu1 %vm3491_vm5, %v13155_v60  ;;  %v3398_v37 = vadd.f32 %v3316_v63, %v12439_v16  ;;  %v4292_v32 = vrot.slane %v13096_v59, 2  ;;  %v4160_v42 = vadd.f32 %v4159_v30, %v3979_v27 }
 0x3fe   : > { %v3434_v41 = vadd.f32 %v12985_v15, %v3398_v37  ;;  %v13181_v11 = vsel %vm806_vm2, %v4290_v51, %v4292_v32  ;;  %v4295_v51 = vrot.slane %v13122_v1, 2  ;;  %v13197_v32 = vld [vmem:[#allocation3 + $0x148] sm:$0xf] }
 0x3ff   : > { %17251 = vst [vmem:[#allocation40_spill] sm:$0xff] %v13181_v11 }
 0x400   : > { %9319 = vmatmul.msk.f32.gmra.mxu2 %vm520_vm3, %v11900_v28  ;;  %v3466_v33 = vmax.f32 %v3434_v41, 0.0  ;;  %v3856_v28 = vrot.slane %v13173_v62, 1  ;;  %v4294_v41 = vrot.slane %v13120_v58, 2 }
 0x401   : > { %9354 = vmatmul.msk.f32.gmra.mxu3 %vm3491_vm5, %v13165_v45  ;;  %v4162_v7 = vpop.f32.mrf.mxu0 }
 0x402   : > { %8403 = vrot.lane.b32.xlu2 %v3466_v33, %s10420_s23  ;;  %v13191_v37 = vsel %vm434_vm1, %v3856_v28, %v3857_v36  ;;  %v3859_v28 = vrot.slane %v13197_v32, 1 }
 0x403   : > { %v4421_v59 = vpop.f32.mrf.mxu1  ;;  %v3319_v27 = vpop.f32.mrf.mxu2  ;;  %17252 = vst [vmem:[#allocation131_spill] sm:$0xff] %v13191_v37 }
 0x404   : > { %v3985_v16 = vpop.f32.mrf.mxu3  ;;  %9386 = vmatmul.msk.f32.gmra.mxu0 %vm3491_vm5, %v13120_v58  ;;  %v13183_v63 = vadd.f32 %v4421_v59, %v4160_v42  ;;  %9419 = vmatmul.msk.f32.gmra.mxu1 %vm3491_vm5, %v13181_v11  ;;  %v3399_v30 = vadd.f32 %v3319_v27, %v12453_v57  ;;  %v4163_v59 = vadd.f32 %v4162_v7, %v3982_v20  ;;  %v10260_v20 = vld [vmem:[#allocation2 + $0x198] sm:$0xff] }
 0x405   : > { %v13206_v11 = vsel %vm806_vm2, %v4294_v41, %v4295_v51  ;;  %v3264_v7 = vrot.slane %v10260_v20, 2  ;;  %v13218_v19 = vsel %vm434_vm1, %v3857_v36, %v3859_v28  ;;  %v13222_v41 = vld [vmem:[#allocation3 + $0x158] sm:$0xff]  ;;  %v4297_v20 = vrot.slane %v13148_v5, 2 }
 0x406   : > { %v3435_v33 = vadd.f32 %v12985_v15, %v3399_v30  ;;  %17253 = vst [vmem:[#allocation44_spill] sm:$0xff] %v13206_v11  ;;  %v13212_v30 = vld [vmem:[#allocation2 + $0x1a0] sm:$0xff] }
 0x407   : > { %17254 = vst [vmem:[#allocation52_spill] sm:$0xff] %v13218_v19  ;;  %v13239_v5 = vsel %vm806_vm2, %v4295_v51, %v4297_v20 }
 0x408   : > { %9320 = vmatmul.msk.f32.gmra.mxu2 %vm520_vm3, %v11969_v54  ;;  %v3467_v27 = vmax.f32 %v3435_v33, 0.0  ;;  %v16623_v54 = vrot.slane %v13212_v30, 2  ;;  %17255 = vst [vmem:[#allocation133_spill] sm:$0xff] %v13239_v5 }
 0x409   : > { %9355 = vmatmul.msk.f32.gmra.mxu3 %vm3491_vm5, %v13191_v37  ;;  %v4165_v42 = vpop.f32.mrf.mxu0 }
 0x40a   : > { %8405 = vrot.lane.b32.xlu0 %v3467_v27, %s10420_s23  ;;  %v13229_v27 = vsel %vm806_vm2, %v3264_v7, %v16623_v54 }
 0x40b   : > { %v4424_v58 = vpop.f32.mrf.mxu1  ;;  %v3322_v33 = vpop.f32.mrf.mxu2 }
 0x40c   : > { %v3988_v57 = vpop.f32.mrf.mxu3  ;;  %9387 = vmatmul.msk.f32.gmra.mxu0 %vm3491_vm5, %v13122_v1  ;;  %v13208_v60 = vadd.f32 %v4424_v58, %v4163_v59  ;;  %9420 = vmatmul.msk.f32.gmra.mxu1 %vm3491_vm5, %v13206_v11  ;;  %v3400_v1 = vadd.f32 %v3322_v33, %v12467_v48  ;;  %v4166_v11 = vadd.f32 %v4165_v42, %v3985_v16  ;;  %v13231_v48 = vld [vmem:[#allocation3 + $0x150] sm:$0xff]  ;;  %v3862_v33 = vrot.slane %v13222_v41, 1 }
 0x40e   : > { %v3436_v58 = vadd.f32 %v12985_v15, %v3400_v1 }
 0x410   : > { %9321 = vmatmul.msk.f32.gmra.mxu2 %vm520_vm3, %v12019_v24  ;;  %v3468_v28 = vmax.f32 %v3436_v58, 0.0  ;;  %v3861_v24 = vrot.slane %v13231_v48, 1  ;;  %v4300_v58 = vrot.slane %v13170_v53, 2 }
 0x411   : > { %9356 = vmatmul.msk.f32.gmra.mxu3 %vm3491_vm5, %v13218_v19  ;;  %v4168_v59 = vpop.f32.mrf.mxu0 }
 0x412   : > { %8407 = vrot.lane.b32.xlu1 %v3468_v28, %s10420_s23  ;;  %v13249_v7 = vsel %vm434_vm1, %v3861_v24, %v3862_v33  ;;  %v4299_v28 = vrot.slane %v13173_v62, 2 }
 0x413   : > { %v4427_v1 = vpop.f32.mrf.mxu1  ;;  %v3325_v16 = vpop.f32.mrf.mxu2  ;;  %17256 = vst [vmem:[#allocation56_spill] sm:$0xff] %v13249_v7 }
 0x414   : > { %v3991_v36 = vpop.f32.mrf.mxu3  ;;  %9388 = vmatmul.msk.f32.gmra.mxu0 %vm3491_vm5, %v13173_v62  ;;  %v13241_v19 = vadd.f32 %v4427_v1, %v4166_v11  ;;  %9421 = vmatmul.msk.f32.gmra.mxu1 %vm3491_vm5, %v13239_v5  ;;  %v3401_v42 = vadd.f32 %v3325_v16, %v12481_v10  ;;  %v13254_v11 = vld [vmem:[#allocation3 + $0x160] sm:$0xf]  ;;  %v4169_v1 = vadd.f32 %v4168_v59, %v3988_v57  ;;  %v4302_v59 = vrot.slane %v13197_v32, 2 }
 0x415   : > { %v3864_v24 = vrot.slane %v13254_v11, 1  ;;  %v13264_v5 = vsel %vm806_vm2, %v4299_v28, %v4300_v58 }
 0x416   : > { %v3437_v20 = vadd.f32 %v12985_v15, %v3401_v42  ;;  %17257 = vst [vmem:[#allocation25_spill] sm:$0xff] %v13264_v5 }
 0x417   : > { %v13273_v57 = vsel %vm434_vm1, %v3862_v33, %v3864_v24  ;;  %v13290_v24 = vsel %vm806_vm2, %v4300_v58, %v4302_v59  ;;  %v9598_v58 = vld [vmem:[%s16458_s7 + $0x10] sm:$0x3] }
 0x418   : > { %9322 = vmatmul.msk.f32.gmra.mxu2 %vm520_vm3, %v12057_v23  ;;  %v3469_v16 = vmax.f32 %v3437_v20, 0.0  ;;  %17258 = vst [vmem:[#allocation27_spill] sm:$0xff] %v13273_v57  ;;  %9599 = vmatpush.msk.msra.mxu3 %vm3937_vm7, %v9598_v58  ;;  %v13321_v58 = vld [vmem:[#allocation3 + $0x178] sm:$0xf] }
 0x419   : > { %9357 = vmatmul.msk.f32.gmra.mxu3 %vm3491_vm5, %v13249_v7  ;;  %v4171_v51 = vpop.f32.mrf.mxu0  ;;  %17259 = vst [vmem:[#allocation64_spill] sm:$0xff] %v13290_v24 }
 0x41a   : > { %8409 = vrot.lane.b32.xlu2 %v3469_v16, %s10420_s23  ;;  %v4172_v28 = vadd.f32 %v4171_v51, %v3991_v36  ;;  %v9564_v36 = vld [vmem:[%s16458_s7 + $0xe] sm:$0x3] }
 0x41b   : > { %v4430_v54 = vpop.f32.mrf.mxu1  ;;  %v3328_v62 = vpop.f32.mrf.mxu2  ;;  %9565 = vmatpush.msk.msra.mxu2 %vm3937_vm7, %v9564_v36  ;;  %v9530_v36 = vld [vmem:[%s16458_s7 + $0xc] sm:$0x3] }
 0x41c   : > { %v3994_v10 = vpop.f32.mrf.mxu3  ;;  %9389 = vmatmul.msk.f32.gmra.mxu0 %vm3491_vm5, %v13170_v53  ;;  %v13266_v7 = vadd.f32 %v4430_v54, %v4169_v1  ;;  %9422 = vmatmul.msk.f32.gmra.mxu1 %vm3491_vm5, %v13264_v5  ;;  %v3402_v23 = vadd.f32 %v3328_v62, %v12507_v21  ;;  %v13278_v53 = vld [vmem:[#allocation3 + $0x168] sm:$0xff]  ;;  %v13280_v54 = vld [vmem:[#allocation3 + $0x170] sm:$0xff] }
 0x41d   : > { %v3866_v33 = vrot.slane %v13278_v53, 1  ;;  %v3867_v32 = vrot.slane %v13280_v54, 1  ;;  %9531 = vmatpush.msk.msra.mxu1 %vm3937_vm7, %v9530_v36 }
 0x41e   : > { %v3438_v20 = vadd.f32 %v12985_v15, %v3402_v23 }
 0x41f   : > { %v13311_v59 = vsel %vm434_vm1, %v3866_v33, %v3867_v32 }
 0x420   : > { %9323 = vmatmul.msk.f32.gmra.mxu2 %vm520_vm3, %v12505_v52  ;;  %v3470_v1 = vmax.f32 %v3438_v20, 0.0  ;;  %v9496_v52 = vld [vmem:[%s16458_s7 + $0xa] sm:$0x3]  ;;  %17260 = vst [vmem:[#allocation41_spill] sm:$0xff] %v13311_v59  ;;  %v4305_v20 = vrot.slane %v13222_v41, 2 }
 0x421   : > { %9358 = vmatmul.msk.f32.gmra.mxu3 %vm3491_vm5, %v13273_v57  ;;  %v4174_v42 = vpop.f32.mrf.mxu0  ;;  %9497 = vmatpush.msk.msra.mxu0 %vm3937_vm7, %v9496_v52 }
 0x422   : > { %8411 = vrot.lane.b32.xlu0 %v3470_v1, %s10420_s23  ;;  %v4304_v1 = vrot.slane %v13231_v48, 2  ;;  %v4175_v52 = vadd.f32 %v4174_v42, %v3994_v10  ;;  %v3869_v10 = vrot.slane %v13321_v58, 1 }
 0x423   : > { %v4433_v16 = vpop.f32.mrf.mxu1  ;;  %v3331_v62 = vpop.f32.mrf.mxu2 }
 0x424   : > { %v3997_v21 = vpop.f32.mrf.mxu3  ;;  %9390 = vmatmul.msk.f32.gmra.mxu0 %vm3491_vm5, %v13231_v48  ;;  %v13295_v51 = vadd.f32 %v4433_v16, %v4172_v28  ;;  %9423 = vmatmul.msk.f32.gmra.mxu1 %vm3491_vm5, %v13290_v24  ;;  %v3403_v23 = vadd.f32 %v3331_v62, %v12532_v14  ;;  %v13329_v48 = vsel %vm806_vm2, %v4304_v1, %v4305_v20 }
 0x425   : > { %17261 = vst [vmem:[#allocation35_spill] sm:$0xff] %v13329_v48 }
 0x426   : > { %v3439_v16 = vadd.f32 %v12985_v15, %v3403_v23 }
 0x428   : > { %9324 = vmatmul.msk.f32.gmra.mxu2 %vm520_vm3, %v12541_v55  ;;  %v3471_v33 = vmax.f32 %v3439_v16, 0.0  ;;  %v13339_v16 = vsel %vm434_vm1, %v3867_v32, %v3869_v10 }
 0x429   : > { %9359 = vmatmul.msk.f32.gmra.mxu3 %vm3491_vm5, %v13311_v59  ;;  %v4177_v28 = vpop.f32.mrf.mxu0  ;;  %17262 = vst [vmem:[#allocation60_spill] sm:$0xff] %v13339_v16 }
 0x42a   : > { %8413 = vrot.lane.b32.xlu1 %v3471_v33, %s10420_s23  ;;  %v4178_v24 = vadd.f32 %v4177_v28, %v3997_v21 }
 0x42b   : > { %v4436_v62 = vpop.f32.mrf.mxu1  ;;  %v3334_v42 = vpop.f32.mrf.mxu2 }
 0x42c   : > { %v4000_v14 = vpop.f32.mrf.mxu3  ;;  %9391 = vmatmul.msk.f32.gmra.mxu0 %vm3491_vm5, %v13222_v41  ;;  %v13331_v23 = vadd.f32 %v4436_v62, %v4175_v52  ;;  %9424 = vmatmul.msk.f32.gmra.mxu1 %vm3491_vm5, %v13329_v48  ;;  %v3404_v55 = vadd.f32 %v3334_v42, %v12554_v18  ;;  %v4307_v41 = vrot.slane %v13254_v11, 2  ;;  %v10262_v52 = vld [vmem:[#allocation3] sm:$0xff]  ;;  %v13345_v48 = vld [vmem:[#allocation3 + $0x8] sm:$0xff]  ;;  %v10264_v42 = vld [vmem:[#allocation2 + $0x1a8] sm:$0x3] }
 0x42d   : > { %v4823_v62 = vrot.slane %v10262_v52, 4  ;;  %v4824_v33 = vrot.slane %v13345_v48, 4 }
 0x42e   : > { %v3440_v36 = vadd.f32 %v12985_v15, %v3404_v55  ;;  %v13353_v10 = vsel %vm806_vm2, %v4305_v20, %v4307_v41  ;;  %v3267_v55 = vrot.slane %v10264_v42, 2  ;;  %v17264_v20 = vrot.slane %v13212_v30, 2  ;;  %v10265_v42 = vld [vmem:[#allocation3 + $0x10] sm:$0xf] }
 0x42f   : > { %17263 = vst [vmem:[#allocation31_spill] sm:$0xff] %v13353_v10  ;;  %v4529_v30 = vrot.slane %v10262_v52, 3 }
 0x430   : > { %9325 = vmatmul.msk.f32.gmra.mxu2 %vm520_vm3, %v13229_v27  ;;  %v3472_v32 = vmax.f32 %v3440_v36, 0.0  ;;  %v4825_v27 = vsel %vm585_vm0, %v4823_v62, %v4824_v33  ;;  %v4309_v36 = vrot.slane %v13278_v53, 2 }
 0x431   : > { %9360 = vmatmul.msk.f32.gmra.mxu3 %vm3491_vm5, %v13339_v16  ;;  %v4180_v1 = vpop.f32.mrf.mxu0  ;;  %v4310_v16 = vrot.slane %v13280_v54, 2 }
 0x432   : > { %8415 = vrot.lane.b32.xlu2 %v3472_v32, %s10420_s23  ;;  %v4826_v32 = vrot.slane %v10265_v42, 4 }
 0x433   : > { %v4439_v11 = vpop.f32.mrf.mxu1  ;;  %v3337_v21 = vpop.f32.mrf.mxu2 }
 0x434   : > { %v4003_v18 = vpop.f32.mrf.mxu3  ;;  %9392 = vmatmul.msk.f32.gmra.mxu0 %vm3491_vm5, %v13278_v53  ;;  %v13355_v5 = vadd.f32 %v4439_v11, %v4178_v24  ;;  %9425 = vmatmul.msk.f32.gmra.mxu1 %vm3491_vm5, %v13353_v10  ;;  %v3405_v28 = vadd.f32 %v3337_v21, %v12569_v38  ;;  %v3268_v24 = vsel %vm806_vm2, %v17264_v20, %v3267_v55  ;;  %v4530_v55 = vrot.slane %v13345_v48, 3  ;;  %v10267_v20 = vld [vmem:[#allocation3 + $0x20] sm:$0xff] }
 0x435   : > { %v4181_v10 = vadd.f32 %v4180_v1, %v4000_v14  ;;  %v4827_v14 = vsel %vm585_vm0, %v4824_v33, %v4826_v32 }
 0x436   : > { %v3441_v11 = vadd.f32 %v12985_v15, %v3405_v28 }
 0x438   : > { %9326 = vmatmul.msk.f32.gmra.mxu2 %vm520_vm3, %v3268_v24  ;;  %v3473_v38 = vmax.f32 %v3441_v11, 0.0  ;;  %v4829_v24 = vrot.slane %v10267_v20, 4  ;;  %v4312_v11 = vrot.slane %v13321_v58, 2 }
 0x439   : > { %9464 = vmatmul.msk.f32.vlgmr.msrb.gmra.mxu3 %vm3491_vm5, %v4825_v27  ;;  %v4183_v41 = vpop.f32.mrf.mxu0  ;;  %v13373_v27 = vsel %vm806_vm2, %v4309_v36, %v4310_v16 }
 0x43a   : > { %17265 = vst [vmem:[#allocation33_spill] sm:$0xff] %v13373_v27  ;;  %8417 = vrot.lane.b32.xlu0 %v3473_v38, %s10420_s23  ;;  %v4184_v38 = vadd.f32 %v4183_v41, %v4003_v18  ;;  %v13390_v32 = vsel %vm806_vm2, %v4310_v16, %v4312_v11 }
 0x43b   : > { %v4442_v53 = vpop.f32.mrf.mxu1  ;;  %v3340_v1 = vpop.f32.mrf.mxu2  ;;  %17266 = vst [vmem:[#allocation46_spill] sm:$0xff] %v13390_v32 }
 0x43c   : > { %v4006_v62 = vpop.f32.mrf.mxu3  ;;  %9393 = vmatmul.msk.f32.gmra.mxu0 %vm3491_vm5, %v13280_v54  ;;  %v13376_v21 = vadd.f32 %v4442_v53, %v4181_v10  ;;  %9426 = vmatmul.msk.f32.gmra.mxu1 %vm3491_vm5, %v13373_v27  ;;  %v3406_v28 = vadd.f32 %v3340_v1, %v12591_v29  ;;  %v4531_v54 = vsel %vm4528_vm8, %v4529_v30, %v4530_v55  ;;  %v10266_v10 = vld [vmem:[#allocation3 + $0x18] sm:$0xff]  ;;  %v4532_v30 = vrot.slane %v10265_v42, 3 }
 0x43d   : > { %v4828_v36 = vrot.slane %v10266_v10, 4 }
 0x43e   : > { %v3442_v48 = vadd.f32 %v12985_v15, %v3406_v28  ;;  %v4533_v16 = vsel %vm4528_vm8, %v4530_v55, %v4532_v30  ;;  %v10268_v28 = vld [vmem:[#allocation3 + $0x28] sm:$0xf] }
 0x43f   : > { %v13398_v58 = vsel %vm585_vm0, %v4828_v36, %v4829_v24 }
 0x440   : > { %9430 = vmatmul.msk.f32.vlgmr.msrb.gmra.mxu2 %vm3491_vm5, %v4531_v54  ;;  %v3474_v33 = vmax.f32 %v3442_v48, 0.0  ;;  %v4831_v54 = vrot.slane %v10268_v28, 4 }
 0x441   : > { %9465 = vmatmul.msk.f32.gmra.mxu3 %vm3491_vm5, %v4827_v14  ;;  %v4186_v52 = vpop.f32.mrf.mxu0 }
 0x442   : > { %8419 = vrot.lane.b32.xlu1 %v3474_v33, %s10420_s23  ;;  %v4187_v48 = vadd.f32 %v4186_v52, %v4006_v62  ;;  %v4534_v33 = vrot.slane %v10266_v10, 3  ;;  %v13413_v55 = vsel %vm585_vm0, %v4829_v24, %v4831_v54  ;;  %v10269_v24 = vld [vmem:[#allocation3 + $0x38] sm:$0xff]  ;;  %v4537_v54 = vrot.slane %v10268_v28, 3 }
 0x443   : > { %v4445_v29 = vpop.f32.mrf.mxu1  ;;  %v3343_v18 = vpop.f32.mrf.mxu2 }
 0x444   : > { %v4009_v53 = vpop.f32.mrf.mxu3  ;;  %9498 = vmatmul.msk.f32.vlgmr.msra.gmra.mxu0 %vm3491_vm5, %v10266_v10  ;;  %v13392_v14 = vadd.f32 %v4445_v29, %v4184_v38  ;;  %9427 = vmatmul.msk.f32.gmra.mxu1 %vm3491_vm5, %v13390_v32  ;;  %v3407_v41 = vadd.f32 %v3343_v18, %v12613_v9  ;;  %v4535_v9 = vrot.slane %v10267_v20, 3  ;;  %v17271_v32 = vld [vmem:[#allocation82_spill] sm:$0xff] }
 0x446   : > { %v3443_v42 = vadd.f32 %v12985_v15, %v3407_v41  ;;  %v13419_v30 = vsel %vm4528_vm8, %v4534_v33, %v4535_v9  ;;  %v13437_v33 = vsel %vm4528_vm8, %v4535_v9, %v4537_v54  ;;  %v4540_v54 = vrot.slane %v10269_v24, 3 }
 0x448   : > { %9431 = vmatmul.msk.f32.gmra.mxu2 %vm3491_vm5, %v4533_v16  ;;  %v3475_v38 = vmax.f32 %v3443_v42, 0.0  ;;  %v4834_v16 = vrot.slane %v10269_v24, 4  ;;  %v10270_v42 = vld [vmem:[#allocation3 + $0x30] sm:$0xff] }
 0x449   : > { %9466 = vmatmul.msk.f32.gmra.mxu3 %vm3491_vm5, %v13398_v58  ;;  %v4189_v1 = vpop.f32.mrf.mxu0 }
 0x44a   : > { %8421 = vrot.lane.b32.xlu2 %v3475_v38, %s10420_s23  ;;  %v4190_v18 = vadd.f32 %v4189_v1, %v4009_v53  ;;  %v4833_v53 = vrot.slane %v10270_v42, 4 }
 0x44b   : > { %v4448_v36 = vpop.f32.mrf.mxu1  ;;  %v3346_v62 = vpop.f32.mrf.mxu2 }
 0x44c   : > { %v4012_v11 = vpop.f32.mrf.mxu3  ;;  %9499 = vmatmul.msk.f32.gmra.mxu0 %vm3491_vm5, %v10267_v20  ;;  %v13407_v29 = vadd.f32 %v4448_v36, %v4187_v48  ;;  %9532 = vmatmul.msk.f32.vlgmr.msra.gmra.mxu1 %vm3491_vm5, %v12589_v40  ;;  %v3408_v52 = vadd.f32 %v3346_v62, %v12634_v35  ;;  %v13432_v36 = vsel %vm585_vm0, %v4833_v53, %v4834_v16 }
 0x44e   : > { %v3444_v20 = vadd.f32 %v12985_v15, %v3408_v52 }
 0x450   : > { %9432 = vmatmul.msk.f32.gmra.mxu2 %vm3491_vm5, %v13419_v30  ;;  %v3476_v40 = vmax.f32 %v3444_v20, 0.0 }
 0x451   : > { %9467 = vmatmul.msk.f32.gmra.mxu3 %vm3491_vm5, %v13413_v55  ;;  %v4192_v10 = vpop.f32.mrf.mxu0 }
 0x452   : > { %8423 = vrot.lane.b32.xlu0 %v3476_v40, %s10420_s23  ;;  %v4193_v52 = vadd.f32 %v4192_v10, %v4012_v11  ;;  %v17268_v11 = vld [vmem:[#allocation77_spill] sm:$0xff] }
 0x453   : > { %v4451_v35 = vpop.f32.mrf.mxu1  ;;  %v3349_v1 = vpop.f32.mrf.mxu2 }
 0x454   : > { %v4015_v41 = vpop.f32.mrf.mxu3  ;;  %9500 = vmatmul.msk.f32.gmra.mxu0 %vm3491_vm5, %v10270_v42  ;;  %v13425_v48 = vadd.f32 %v4451_v35, %v4190_v18  ;;  %9533 = vmatmul.msk.f32.gmra.mxu1 %vm3491_vm5, %v12611_v61  ;;  %v3409_v38 = vadd.f32 %v3349_v1, %v12659_v12  ;;  %v10271_v18 = vld [vmem:[#allocation3 + $0x40] sm:$0xf]  ;;  %v4539_v1 = vrot.slane %v10270_v42, 3 }
 0x455   : > { %v4836_v12 = vrot.slane %v10271_v18, 4 }
 0x456   : > { %v3445_v62 = vadd.f32 %v12985_v15, %v3409_v38 }
 0x457   : > { %v13450_v53 = vsel %vm585_vm0, %v4834_v16, %v4836_v12  ;;  %v10273_v16 = vld [vmem:[#allocation3 + $0x50] sm:$0xff] }
 0x458   : > { %9433 = vmatmul.msk.f32.gmra.mxu2 %vm3491_vm5, %v13437_v33  ;;  %v3477_v20 = vmax.f32 %v3445_v62, 0.0  ;;  %17269 = vst [vmem:[#allocation30_spill] sm:$0xff] %v13450_v53  ;;  %v4839_v12 = vrot.slane %v10273_v16, 4 }
 0x459   : > { %9468 = vmatmul.msk.f32.gmra.mxu3 %vm3491_vm5, %v13432_v36  ;;  %v4195_v28 = vpop.f32.mrf.mxu0 }
 0x45a   : > { %8425 = vrot.lane.b32.xlu1 %v3477_v20, %s10420_s23  ;;  %v10272_v20 = vld [vmem:[#allocation3 + $0x48] sm:$0xff] }
 0x45b   : > { %v4454_v40 = vpop.f32.mrf.mxu1  ;;  %v3352_v9 = vpop.f32.mrf.mxu2 }
 0x45c   : > { %v4018_v61 = vpop.f32.mrf.mxu3  ;;  %9501 = vmatmul.msk.f32.gmra.mxu0 %vm3491_vm5, %v10269_v24  ;;  %v13443_v35 = vadd.f32 %v4454_v40, %v4193_v52  ;;  %9534 = vmatmul.msk.f32.gmra.mxu1 %vm3491_vm5, %v12641_v26  ;;  %v3410_v10 = vadd.f32 %v3352_v9, %v17268_v11  ;;  %v4196_v52 = vadd.f32 %v4195_v28, %v4015_v41  ;;  %v4838_v9 = vrot.slane %v10272_v20, 4 }
 0x45d   : > { %v13456_v40 = vsel %vm4528_vm8, %v4539_v1, %v4540_v54  ;;  %v4542_v28 = vrot.slane %v10271_v18, 3 }
 0x45e   : > { %17267 = vst [vmem:[#allocation136_spill] sm:$0xff] %v13443_v35  ;;  %v3446_v62 = vadd.f32 %v12985_v15, %v3410_v10  ;;  %v17272_v10 = vld [vmem:[#allocation91_spill] sm:$0xff] }
 0x460   : > { %9434 = vmatmul.msk.f32.gmra.mxu2 %vm3491_vm5, %v13456_v40  ;;  %v3478_v24 = vmax.f32 %v3446_v62, 0.0  ;;  %v13468_v62 = vsel %vm585_vm0, %v4838_v9, %v4839_v12 }
 0x461   : > { %9469 = vmatmul.msk.f32.gmra.mxu3 %vm3491_vm5, %v13450_v53  ;;  %v4198_v38 = vpop.f32.mrf.mxu0  ;;  %17273 = vst [vmem:[#allocation37_spill] sm:$0xff] %v13468_v62 }
 0x462   : > { %8427 = vrot.lane.b32.xlu2 %v3478_v24, %s10420_s23 }
 0x463   : > { %v4457_v11 = vpop.f32.mrf.mxu1  ;;  %v3355_v41 = vpop.f32.mrf.mxu2 }
 0x464   : > { %v4021_v26 = vpop.f32.mrf.mxu3  ;;  %9502 = vmatmul.msk.f32.gmra.mxu0 %vm3491_vm5, %v10272_v20  ;;  %v13461_v42 = vadd.f32 %v4457_v11, %v4196_v52  ;;  %9535 = vmatmul.msk.f32.gmra.mxu1 %vm3491_vm5, %v17271_v32  ;;  %v3411_v1 = vadd.f32 %v3355_v41, %v17272_v10  ;;  %v4199_v52 = vadd.f32 %v4198_v38, %v4018_v61  ;;  %v17275_v41 = vld [vmem:[#allocation86_spill] sm:$0xff] }
 0x465   : > { %v13474_v11 = vsel %vm4528_vm8, %v4540_v54, %v4542_v28  ;;  %v10274_v10 = vld [vmem:[#allocation3 + $0x58] sm:$0xf]  ;;  %v4544_v54 = vrot.slane %v10272_v20, 3  ;;  %v4545_v28 = vrot.slane %v10273_v16, 3 }
 0x466   : > { %17270 = vst [vmem:[#allocation68_spill] sm:$0xff] %v13461_v42  ;;  %v3447_v53 = vadd.f32 %v12985_v15, %v3411_v1  ;;  %v4841_v61 = vrot.slane %v10274_v10, 4  ;;  %v17276_v1 = vld [vmem:[#allocation95_spill] sm:$0xff] }
 0x468   : > { %9435 = vmatmul.msk.f32.gmra.mxu2 %vm3491_vm5, %v13474_v11  ;;  %v3479_v18 = vmax.f32 %v3447_v53, 0.0  ;;  %v13486_v42 = vsel %vm585_vm0, %v4839_v12, %v4841_v61 }
 0x469   : > { %9470 = vmatmul.msk.f32.gmra.mxu3 %vm3491_vm5, %v13468_v62  ;;  %v4201_v27 = vpop.f32.mrf.mxu0  ;;  %17277 = vst [vmem:[#allocation139_spill] sm:$0xff] %v13486_v42 }
 0x46a   : > { %8429 = vrot.lane.b32.xlu0 %v3479_v18, %s10420_s23 }
 0x46b   : > { %v4460_v24 = vpop.f32.mrf.mxu1  ;;  %v3358_v38 = vpop.f32.mrf.mxu2 }
 0x46c   : > { %v4024_v32 = vpop.f32.mrf.mxu3  ;;  %9503 = vmatmul.msk.f32.gmra.mxu0 %vm3491_vm5, %v10273_v16  ;;  %v13479_v9 = vadd.f32 %v4460_v24, %v4199_v52  ;;  %9536 = vmatmul.msk.f32.gmra.mxu1 %vm3491_vm5, %v17275_v41  ;;  %v3412_v62 = vadd.f32 %v3358_v38, %v17276_v1  ;;  %v4202_v24 = vadd.f32 %v4201_v27, %v4021_v26  ;;  %v10275_v16 = vld [vmem:[#allocation3 + $0x68] sm:$0xff]  ;;  %v10276_v1 = vld [vmem:[#allocation3 + $0x60] sm:$0xff] }
 0x46d   : > { %v13492_v41 = vsel %vm4528_vm8, %v4544_v54, %v4545_v28  ;;  %v4844_v38 = vrot.slane %v10275_v16, 4  ;;  %v4843_v26 = vrot.slane %v10276_v1, 4 }
 0x46e   : > { %17274 = vst [vmem:[#allocation49_spill] sm:$0xff] %v13479_v9  ;;  %v3448_v52 = vadd.f32 %v12985_v15, %v3412_v62  ;;  %v17281_v62 = vld [vmem:[#allocation99_spill] sm:$0xff] }
 0x46f   : > { %17278 = vst [vmem:[#allocation134_spill] sm:$0xff] %v13492_v41  ;;  %v13504_v9 = vsel %vm585_vm0, %v4843_v26, %v4844_v38 }
 0x470   : > { %9436 = vmatmul.msk.f32.gmra.mxu2 %vm3491_vm5, %v13492_v41  ;;  %v3480_v20 = vmax.f32 %v3448_v52, 0.0  ;;  %17282 = vst [vmem:[#allocation135_spill] sm:$0xff] %v13504_v9  ;;  %v4547_v52 = vrot.slane %v10274_v10, 3  ;;  %v17285_v10 = vld [vmem:[#allocation93_spill] sm:$0xff] }
 0x471   : > { %9471 = vmatmul.msk.f32.gmra.mxu3 %vm3491_vm5, %v13486_v42  ;;  %v4204_v53 = vpop.f32.mrf.mxu0  ;;  %v17280_v42 = vld [vmem:[#allocation94_spill] sm:$0xff] }
 0x472   : > { %8431 = vrot.lane.b32.xlu1 %v3480_v20, %s10420_s23 }
 0x473   : > { %v4463_v12 = vpop.f32.mrf.mxu1  ;;  %v3361_v27 = vpop.f32.mrf.mxu2 }
 0x474   : > { %v4027_v18 = vpop.f32.mrf.mxu3  ;;  %9504 = vmatmul.msk.f32.gmra.mxu0 %vm3491_vm5, %v10276_v1  ;;  %v13497_v61 = vadd.f32 %v4463_v12, %v4202_v24  ;;  %9537 = vmatmul.msk.f32.gmra.mxu1 %vm3491_vm5, %v17280_v42  ;;  %v3413_v54 = vadd.f32 %v3361_v27, %v17281_v62  ;;  %v4205_v12 = vadd.f32 %v4204_v53, %v4024_v32  ;;  %v10277_v27 = vld [vmem:[#allocation3 + $0x70] sm:$0xf]  ;;  %v17286_v53 = vld [vmem:[#allocation107_spill] sm:$0xff] }
 0x475   : > { %v4846_v62 = vrot.slane %v10277_v27, 4 }
 0x476   : > { %17279 = vst [vmem:[#allocation29_spill] sm:$0xff] %v13497_v61  ;;  %v3449_v24 = vadd.f32 %v12985_v15, %v3413_v54  ;;  %v13510_v61 = vsel %vm4528_vm8, %v4545_v28, %v4547_v52  ;;  %v4550_v28 = vrot.slane %v10275_v16, 3 }
 0x477   : > { %17283 = vst [vmem:[#allocation54_spill] sm:$0xff] %v13510_v61  ;;  %v13522_v52 = vsel %vm585_vm0, %v4844_v38, %v4846_v62  ;;  %v10279_v38 = vld [vmem:[#allocation3 + $0x78] sm:$0xff] }
 0x478   : > { %9437 = vmatmul.msk.f32.gmra.mxu2 %vm3491_vm5, %v13510_v61  ;;  %v3481_v20 = vmax.f32 %v3449_v24, 0.0  ;;  %17287 = vst [vmem:[#allocation137_spill] sm:$0xff] %v13522_v52  ;;  %v4549_v24 = vrot.slane %v10276_v1, 3  ;;  %v17290_v1 = vld [vmem:[#allocation96_spill] sm:$0xff] }
 0x479   : > { %9472 = vmatmul.msk.f32.gmra.mxu3 %vm3491_vm5, %v13504_v9  ;;  %v4207_v41 = vpop.f32.mrf.mxu0 }
 0x47a   : > { %8433 = vrot.lane.b32.xlu2 %v3481_v20, %s10420_s23  ;;  %v10278_v20 = vld [vmem:[#allocation3 + $0x80] sm:$0xff] }
 0x47b   : > { %v4466_v26 = vpop.f32.mrf.mxu1  ;;  %v3364_v32 = vpop.f32.mrf.mxu2 }
 0x47c   : > { %v4030_v42 = vpop.f32.mrf.mxu3  ;;  %9505 = vmatmul.msk.f32.gmra.mxu0 %vm3491_vm5, %v10275_v16  ;;  %v13515_v35 = vadd.f32 %v4466_v26, %v4205_v12  ;;  %9538 = vmatmul.msk.f32.gmra.mxu1 %vm3491_vm5, %v17285_v10  ;;  %v3414_v54 = vadd.f32 %v3364_v32, %v17286_v53  ;;  %v4208_v26 = vadd.f32 %v4207_v41, %v4027_v18  ;;  %v4849_v32 = vrot.slane %v10278_v20, 4 }
 0x47d   : > { %v4848_v41 = vrot.slane %v10279_v38, 4 }
 0x47e   : > { %17284 = vst [vmem:[#allocation141_spill] sm:$0xff] %v13515_v35  ;;  %v3450_v12 = vadd.f32 %v12985_v15, %v3414_v54  ;;  %v13528_v35 = vsel %vm4528_vm8, %v4549_v24, %v4550_v28  ;;  %v4552_v54 = vrot.slane %v10277_v27, 3  ;;  %v17291_v24 = vld [vmem:[#allocation103_spill] sm:$0xff] }
 0x47f   : > { %17288 = vst [vmem:[#allocation39_spill] sm:$0xff] %v13528_v35 }
 0x480   : > { %9438 = vmatmul.msk.f32.gmra.mxu2 %vm3491_vm5, %v13528_v35  ;;  %v3482_v16 = vmax.f32 %v3450_v12, 0.0  ;;  %v13540_v12 = vsel %vm585_vm0, %v4848_v41, %v4849_v32 }
 0x481   : > { %9473 = vmatmul.msk.f32.gmra.mxu3 %vm3491_vm5, %v13522_v52  ;;  %v4210_v9 = vpop.f32.mrf.mxu0  ;;  %17292 = vst [vmem:[#allocation57_spill] sm:$0xff] %v13540_v12 }
 0x482   : > { %8435 = vrot.lane.b32.xlu0 %v3482_v16, %s10420_s23  ;;  %v10280_v16 = vld [vmem:[#allocation3 + $0x88] sm:$0xf] }
 0x483   : > { %v4469_v62 = vpop.f32.mrf.mxu1  ;;  %v3367_v18 = vpop.f32.mrf.mxu2 }
 0x484   : > { %v4033_v10 = vpop.f32.mrf.mxu3  ;;  %9506 = vmatmul.msk.f32.gmra.mxu0 %vm3491_vm5, %v10279_v38  ;;  %v13533_v53 = vadd.f32 %v4469_v62, %v4208_v26  ;;  %9539 = vmatmul.msk.f32.gmra.mxu1 %vm3491_vm5, %v17290_v1  ;;  %v3415_v52 = vadd.f32 %v3367_v18, %v17291_v24  ;;  %v4211_v62 = vadd.f32 %v4210_v9, %v4030_v42  ;;  %v4851_v18 = vrot.slane %v10280_v16, 4  ;;  %v17296_v9 = vld [vmem:[#allocation106_spill] sm:$0xff] }
 0x485   : > { %v4555_v42 = vrot.slane %v10278_v20, 3 }
 0x486   : > { %17289 = vst [vmem:[#allocation138_spill] sm:$0xff] %v13533_v53  ;;  %v3451_v26 = vadd.f32 %v12985_v15, %v3415_v52  ;;  %v13546_v53 = vsel %vm4528_vm8, %v4550_v28, %v4552_v54  ;;  %v13558_v52 = vsel %vm585_vm0, %v4849_v32, %v4851_v18  ;;  %v4554_v54 = vrot.slane %v10279_v38, 3  ;;  %v13573_v18 = vld [vmem:[#allocation3 + $0x90] sm:$0xff] }
 0x487   : > { %17293 = vst [vmem:[#allocation144_spill] sm:$0xff] %v13546_v53  ;;  %v4853_v38 = vrot.slane %v13573_v18, 4 }
 0x488   : > { %9439 = vmatmul.msk.f32.gmra.mxu2 %vm3491_vm5, %v13546_v53  ;;  %v3483_v27 = vmax.f32 %v3451_v26, 0.0  ;;  %17297 = vst [vmem:[#allocation43_spill] sm:$0xff] %v13558_v52 }
 0x489   : > { %9474 = vmatmul.msk.f32.gmra.mxu3 %vm3491_vm5, %v13540_v12  ;;  %v4213_v35 = vpop.f32.mrf.mxu0  ;;  %v17295_v12 = vld [vmem:[#allocation102_spill] sm:$0xff] }
 0x48a   : > { %8437 = vrot.lane.b32.xlu1 %v3483_v27, %s10420_s23  ;;  %v4214_v27 = vadd.f32 %v4213_v35, %v4033_v10  ;;  %v17299_v35 = vld [vmem:[#allocation105_spill] sm:$0xff] }
 0x48b   : > { %v4472_v41 = vpop.f32.mrf.mxu1  ;;  %v3370_v15 = vpop.f32.mrf.mxu2 }
 0x48c   : > { %v4036_v1 = vpop.f32.mrf.mxu3  ;;  %9507 = vmatmul.msk.f32.gmra.mxu0 %vm3491_vm5, %v10278_v20  ;;  %v13551_v24 = vadd.f32 %v4472_v41, %v4211_v62  ;;  %9540 = vmatmul.msk.f32.gmra.mxu1 %vm3491_vm5, %v17295_v12  ;;  %v3416_v28 = vadd.f32 %v3370_v15, %v17296_v9  ;;  %v13565_v62 = vld [vmem:[%s16457_s6] ss:$0 sm:$0xff]  ;;  %v13569_v20 = vsel %vm4528_vm8, %v4554_v54, %v4555_v42  ;;  %v10283_v9 = vld [vmem:[#allocation3 + $0x98] sm:$0xff]  ;;  %v4557_v54 = vrot.slane %v10280_v16, 3 }
 0x48d   : > { %17298 = vst [vmem:[#allocation140_spill] sm:$0xff] %v13569_v20  ;;  %v4854_v12 = vrot.slane %v10283_v9, 4 }
 0x48e   : > { %17294 = vst [vmem:[#allocation142_spill] sm:$0xff] %v13551_v24  ;;  %v3452_v41 = vadd.f32 %v13565_v62, %v3416_v28 }
 0x48f   : > { %v13585_v24 = vsel %vm585_vm0, %v4853_v38, %v4854_v12  ;;  %v10284_v38 = vld [vmem:[#allocation3 + $0xa0] sm:$0xf] }
 0x490   : > { %9440 = vmatmul.msk.f32.gmra.mxu2 %vm3491_vm5, %v13569_v20  ;;  %v3484_v32 = vmax.f32 %v3452_v41, 0.0  ;;  %17300 = vst [vmem:[#allocation61_spill] sm:$0xff] %v13585_v24 }
 0x491   : > { %9475 = vmatmul.msk.f32.gmra.mxu3 %vm3491_vm5, %v13558_v52  ;;  %v4216_v26 = vpop.f32.mrf.mxu0 }
 0x492   : > { %8439 = vrot.lane.b32.xlu2 %v3484_v32, %s10420_s23 }
 0x493   : > { %v4475_v52 = vpop.f32.mrf.mxu1  ;;  %v3373_v10 = vpop.f32.mrf.mxu2 }
 0x494   : > { %v4039_v15 = vpop.f32.mrf.mxu3  ;;  %9508 = vmatmul.msk.f32.gmra.mxu0 %vm3491_vm5, %v13573_v18  ;;  %v13578_v28 = vadd.f32 %v4475_v52, %v4214_v27  ;;  %9541 = vmatmul.msk.f32.gmra.mxu1 %vm3491_vm5, %v17299_v35  ;;  %v3417_v41 = vadd.f32 %v3373_v10, %v12867_v6  ;;  %v4217_v52 = vadd.f32 %v4216_v26, %v4036_v1  ;;  %v4856_v1 = vrot.slane %v10284_v38, 4 }
 0x495   : > { %v13591_v27 = vsel %vm4528_vm8, %v4555_v42, %v4557_v54  ;;  %v4559_v42 = vrot.slane %v13573_v18, 3  ;;  %v4560_v10 = vrot.slane %v10283_v9, 3 }
 0x496   : > { %v3453_v53 = vadd.f32 %v13565_v62, %v3417_v41  ;;  %17301 = vst [vmem:[#allocation146_spill] sm:$0xff] %v13591_v27 }
 0x498   : > { %9441 = vmatmul.msk.f32.gmra.mxu2 %vm3491_vm5, %v13591_v27  ;;  %v3485_v16 = vmax.f32 %v3453_v53, 0.0  ;;  %v13604_v53 = vsel %vm585_vm0, %v4854_v12, %v4856_v1  ;;  %v13617_v12 = vld [vmem:[#allocation3 + $0xa8] sm:$0xff] }
 0x499   : > { %9476 = vmatmul.msk.f32.gmra.mxu3 %vm3491_vm5, %v13585_v24  ;;  %v4219_v20 = vpop.f32.mrf.mxu0  ;;  %17303 = vst [vmem:[#allocation45_spill] sm:$0xff] %v13604_v53 }
 0x49a   : > { %8441 = vrot.lane.b32.xlu0 %v3485_v16, %s10420_s23  ;;  %v13610_v16 = vsel %vm4528_vm8, %v4559_v42, %v4560_v10  ;;  %17306 = vst [vmem:[#allocation148_spill] sm:$0xff] %v13617_v12  ;;  %v17308_v42 = vld [vmem:[#allocation113_spill] sm:$0xff] }
 0x49b   : > { %v4478_v6 = vpop.f32.mrf.mxu1  ;;  %v3376_v26 = vpop.f32.mrf.mxu2  ;;  %17304 = vst [vmem:[#allocation143_spill] sm:$0xff] %v13610_v16 }
 0x49c   : > { %v4042_v35 = vpop.f32.mrf.mxu3  ;;  %9509 = vmatmul.msk.f32.gmra.mxu0 %vm3491_vm5, %v10283_v9  ;;  %v13596_v32 = vadd.f32 %v4478_v6, %v4217_v52  ;;  %9542 = vmatmul.msk.f32.gmra.mxu1 %vm3491_vm5, %v12847_v8  ;;  %v3418_v54 = vadd.f32 %v3376_v26, %v12890_v22  ;;  %v4220_v6 = vadd.f32 %v4219_v20, %v4039_v15  ;;  %v4858_v20 = vrot.slane %v13617_v12, 4 }
 0x49e   : > { %17302 = vst [vmem:[#allocation53_spill] sm:$0xff] %v13596_v32  ;;  %v3454_v52 = vadd.f32 %v13565_v62, %v3418_v54  ;;  %v13614_v32 = vld [vmem:[#allocation3 + $0xb0] sm:$0xff] }
 0x49f   : > { %17305 = vst [vmem:[#allocation65_spill] sm:$0xff] %v13614_v32  ;;  %v4859_v22 = vrot.slane %v13614_v32, 4 }
 0x4a0   : > { %9442 = vmatmul.msk.f32.gmra.mxu2 %vm3491_vm5, %v13610_v16  ;;  %v3486_v9 = vmax.f32 %v3454_v52, 0.0 }
 0x4a1   : > { %9477 = vmatmul.msk.f32.gmra.mxu3 %vm3491_vm5, %v13604_v53  ;;  %v4222_v41 = vpop.f32.mrf.mxu0  ;;  %v13629_v52 = vsel %vm585_vm0, %v4858_v20, %v4859_v22  ;;  %v4562_v53 = vrot.slane %v10284_v38, 3  ;;  %v17312_v38 = vld [vmem:[#allocation112_spill] sm:$0xff] }
 0x4a2   : > { %8443 = vrot.lane.b32.xlu1 %v3486_v9, %s10420_s23  ;;  %17309 = vst [vmem:[#allocation51_spill] sm:$0xff] %v13629_v52 }
 0x4a3   : > { %v4481_v1 = vpop.f32.mrf.mxu1  ;;  %v3379_v15 = vpop.f32.mrf.mxu2 }
 0x4a4   : > { %v4045_v8 = vpop.f32.mrf.mxu3  ;;  %9510 = vmatmul.msk.f32.gmra.mxu0 %vm3491_vm5, %v13617_v12  ;;  %v13621_v26 = vadd.f32 %v4481_v1, %v4220_v6  ;;  %9543 = vmatmul.msk.f32.gmra.mxu1 %vm3491_vm5, %v12870_v43  ;;  %v3419_v54 = vadd.f32 %v3379_v15, %v17308_v42  ;;  %v4223_v1 = vadd.f32 %v4222_v41, %v4042_v35  ;;  %v10287_v15 = vld [vmem:[#allocation3 + $0xb8] sm:$0xf] }
 0x4a5   : > { %v13635_v43 = vsel %vm4528_vm8, %v4560_v10, %v4562_v53  ;;  %v4861_v42 = vrot.slane %v10287_v15, 4  ;;  %v4565_v10 = vrot.slane %v13614_v32, 3 }
 0x4a6   : > { %17307 = vst [vmem:[#allocation147_spill] sm:$0xff] %v13621_v26  ;;  %v3455_v6 = vadd.f32 %v13565_v62, %v3419_v54  ;;  %v4564_v54 = vrot.slane %v13617_v12, 3 }
 0x4a7   : > { %17310 = vst [vmem:[#allocation145_spill] sm:$0xff] %v13635_v43  ;;  %v13649_v41 = vsel %vm585_vm0, %v4859_v22, %v4861_v42  ;;  %v13663_v42 = vld [vmem:[#allocation3 + $0xc0] sm:$0xff] }
 0x4a8   : > { %9443 = vmatmul.msk.f32.gmra.mxu2 %vm3491_vm5, %v13635_v43  ;;  %v3487_v26 = vmax.f32 %v3455_v6, 0.0  ;;  %17313 = vst [vmem:[#allocation151_spill] sm:$0xff] %v13649_v41 }
 0x4a9   : > { %9478 = vmatmul.msk.f32.gmra.mxu3 %vm3491_vm5, %v13629_v52  ;;  %v4225_v24 = vpop.f32.mrf.mxu0  ;;  %17316 = vst [vmem:[#allocation149_spill] sm:$0xff] %v13663_v42 }
 0x4aa   : > { %8445 = vrot.lane.b32.xlu2 %v3487_v26, %s10420_s23 }
 0x4ab   : > { %v4484_v20 = vpop.f32.mrf.mxu1  ;;  %v3382_v35 = vpop.f32.mrf.mxu2 }
 0x4ac   : > { %v4048_v9 = vpop.f32.mrf.mxu3  ;;  %9511 = vmatmul.msk.f32.gmra.mxu0 %vm3491_vm5, %v13614_v32  ;;  %v13641_v52 = vadd.f32 %v4484_v20, %v4223_v1  ;;  %9544 = vmatmul.msk.f32.gmra.mxu1 %vm3491_vm5, %v17312_v38  ;;  %v3420_v53 = vadd.f32 %v3382_v35, %v12936_v49  ;;  %v4226_v20 = vadd.f32 %v4225_v24, %v4045_v8  ;;  %v13660_v35 = vld [vmem:[#allocation3 + $0xc8] sm:$0xff]  ;;  %v4863_v24 = vrot.slane %v13663_v42, 4 }
 0x4ad   : > { %v13656_v38 = vsel %vm4528_vm8, %v4564_v54, %v4565_v10  ;;  %17315 = vst [vmem:[#allocation59_spill] sm:$0xff] %v13660_v35  ;;  %v4864_v22 = vrot.slane %v13660_v35, 4  ;;  %v17318_v8 = vld [vmem:[#allocation128_spill] sm:$0xff] }
 0x4ae   : > { %17311 = vst [vmem:[#allocation70_spill] sm:$0xff] %v13641_v52  ;;  %v3456_v1 = vadd.f32 %v13565_v62, %v3420_v53 }
 0x4af   : > { %17314 = vst [vmem:[#allocation150_spill] sm:$0xff] %v13656_v38  ;;  %v13675_v32 = vsel %vm585_vm0, %v4863_v24, %v4864_v22 }
 0x4b0   : > { %9444 = vmatmul.msk.f32.gmra.mxu2 %vm3491_vm5, %v13656_v38  ;;  %v3488_v49 = vmax.f32 %v3456_v1, 0.0  ;;  %v4567_v1 = vrot.slane %v10287_v15, 3  ;;  %17319 = vst [vmem:[#allocation152_spill] sm:$0xff] %v13675_v32 }
 0x4b1   : > { %9479 = vmatmul.msk.f32.gmra.mxu3 %vm3491_vm5, %v13649_v41  ;;  %v4228_v6 = vpop.f32.mrf.mxu0 }
 0x4b2   : > { %8447 = vrot.lane.b32.xlu0 %v3488_v49, %s10420_s23 }
 0x4b3   : > { %v4487_v41 = vpop.f32.mrf.mxu1  ;;  %v3385_v54 = vpop.f32.mrf.mxu2 }
 0x4b4   : > { %v4051_v26 = vpop.f32.mrf.mxu3  ;;  %9512 = vmatmul.msk.f32.gmra.mxu0 %vm3491_vm5, %v13663_v42  ;;  %v13667_v53 = vadd.f32 %v4487_v41, %v4226_v20  ;;  %9545 = vmatmul.msk.f32.gmra.mxu1 %vm3491_vm5, %v17318_v8  ;;  %v3421_v52 = vadd.f32 %v3385_v54, %v12958_v47  ;;  %v4229_v20 = vadd.f32 %v4228_v6, %v4048_v9  ;;  %v4570_v9 = vrot.slane %v13660_v35, 3 }
 0x4b5   : > { %v13681_v8 = vsel %vm4528_vm8, %v4565_v10, %v4567_v1  ;;  %v4569_v1 = vrot.slane %v13663_v42, 3 }
 0x4b6   : > { %17317 = vst [vmem:[#allocation73_spill] sm:$0xff] %v13667_v53  ;;  %v3457_v41 = vadd.f32 %v13565_v62, %v3421_v52  ;;  %v10290_v53 = vld [vmem:[#allocation3 + $0xd0] sm:$0xf] }
 0x4b7   : > { %17320 = vst [vmem:[#allocation153_spill] sm:$0xff] %v13681_v8  ;;  %v4866_v47 = vrot.slane %v10290_v53, 4 }
 0x4b8   : > { %9445 = vmatmul.msk.f32.gmra.mxu2 %vm3491_vm5, %v13681_v8  ;;  %v3489_v15 = vmax.f32 %v3457_v41, 0.0 }
 0x4b9   : > { %9480 = vmatmul.msk.f32.gmra.mxu3 %vm3491_vm5, %v13675_v32  ;;  %v4231_v12 = vpop.f32.mrf.mxu0  ;;  %v17322_v32 = vld [vmem:[#allocation116_spill] sm:$0xff]  ;;  %v13695_v6 = vsel %vm585_vm0, %v4864_v22, %v4866_v47  ;;  %v13709_v47 = vld [vmem:[#allocation3 + $0xe0] sm:$0xff] }
 0x4ba   : > { %8449 = vrot.lane.b32.xlu1 %v3489_v15, %s10420_s23  ;;  %17323 = vst [vmem:[#allocation67_spill] sm:$0xff] %v13695_v6 }
 0x4bb   : > { %v4490_v24 = vpop.f32.mrf.mxu1  ;;  %v3388_v52 = vpop.f32.mrf.mxu2  ;;  %17325 = vst [vmem:[#allocation69_spill] sm:$0xff] %v13709_v47 }
 0x4bc   : > { %v4989_v49 = vpop.f32.mrf.mxu3  ;;  %9513 = vmatmul.msk.f32.gmra.mxu0 %vm3491_vm5, %v13660_v35  ;;  %v13687_v54 = vadd.f32 %v4490_v24, %v4229_v20  ;;  %9546 = vmatmul.msk.f32.gmra.mxu1 %vm3491_vm5, %v17322_v32  ;;  %v3422_v10 = vadd.f32 %v3388_v52, %v12987_v25  ;;  %v4232_v24 = vadd.f32 %v4231_v12, %v4051_v26  ;;  %v13706_v52 = vld [vmem:[#allocation3 + $0xd8] sm:$0xff]  ;;  %v17326_v26 = vld [vmem:[#allocation117_spill] sm:$0xff] }
 0x4bd   : > { %v13702_v32 = vsel %vm4528_vm8, %v4569_v1, %v4570_v9  ;;  %v4868_v22 = vrot.slane %v13706_v52, 4  ;;  %v4572_v1 = vrot.slane %v10290_v53, 3  ;;  %v10293_v53 = vld [vmem:[#allocation3 + $0xe8] sm:$0xf] }
 0x4be   : > { %17321 = vst [vmem:[#allocation63_spill] sm:$0xff] %v13687_v54  ;;  %v3458_v20 = vadd.f32 %v13565_v62, %v3422_v10 }
 0x4bf   : > { %17324 = vst [vmem:[#allocation78_spill] sm:$0xff] %v13702_v32 }
 0x4c0   : > { %9446 = vmatmul.msk.f32.gmra.mxu2 %vm3491_vm5, %v13702_v32  ;;  %v3490_v25 = vmax.f32 %v3458_v20, 0.0 }
 0x4c1   : > { %9481 = vmatmul.msk.f32.gmra.mxu3 %vm3491_vm5, %v13695_v6  ;;  %v5145_v41 = vpop.f32.mrf.mxu0  ;;  %v4869_v6 = vrot.slane %v13709_v47, 4 }
 0x4c2   : > { %8451 = vrot.lane.b32.xlu2 %v3490_v25, %s10420_s23  ;;  %s8873_s23 = scalar_lea.sflag [#allocation5], %s323_s17 }
 0x4c3   : > { %v4493_v62 = vpop.f32.mrf.mxu1  ;;  %v4695_v10 = vpop.f32.mrf.mxu2  ;;  %v13721_v54 = vsel %vm585_vm0, %v4868_v22, %v4869_v6  ;;  %v4871_v22 = vrot.slane %v10293_v53, 4 }
 0x4c4   : > { %v4992_v15 = vpop.f32.mrf.mxu3  ;;  %9514 = vmatmul.msk.f32.gmra.mxu0 %vm3491_vm5, %v13706_v52  ;;  %v13714_v12 = vadd.f32 %v4493_v62, %v4232_v24  ;;  %9547 = vmatmul.msk.f32.gmra.mxu1 %vm3491_vm5, %v17326_v26  ;;  %v4791_v20 = vadd.f32 %v4695_v10, %v13007_v39  ;;  %17327 = vst [vmem:[#allocation75_spill] sm:$0xff] %v13721_v54 }
 0x4c5   : > { %v13726_v24 = vsel %vm4528_vm8, %v4570_v9, %v4572_v1  ;;  %v4574_v9 = vrot.slane %v13706_v52, 3  ;;  %v13740_v1 = vsel %vm585_vm0, %v4869_v6, %v4871_v22 }
 0x4c6   : > { %v5085_v42 = vadd.f32 %v4989_v49, %v4791_v20  ;;  %17328 = vst [vmem:[#allocation87_spill] sm:$0xff] %v13726_v24 }
 0x4c7   : > { %17330 = vst [vmem:[#allocation89_spill] sm:$0xff] %v13740_v1 }
 0x4c8   : > { %v5241_v62 = vadd.f32 %v5145_v41, %v5085_v42  ;;  %9447 = vmatmul.msk.f32.gmra.mxu2 %vm3491_vm5, %v13726_v24  ;;  %v4575_v42 = vrot.slane %v13709_v47, 3 }
 0x4c9   : > { %9482 = vmatmul.msk.f32.gmra.mxu3 %vm3491_vm5, %v13721_v54  ;;  %v5148_v35 = vpop.f32.mrf.mxu0 }
 0x4cb   : > { %v5305_v39 = vpop.f32.mrf.mxu1  ;;  %v4698_v49 = vpop.f32.mrf.mxu2 }
 0x4cc   : > { %v4995_v25 = vpop.f32.mrf.mxu3  ;;  %9515 = vmatmul.msk.f32.gmra.mxu0 %vm3491_vm5, %v13709_v47  ;;  %9548 = vmatmul.msk.f32.gmra.mxu1 %vm3491_vm5, %v12991_v4  ;;  %v13734_v10 = vadd.f32 %v5305_v39, %v5241_v62  ;;  %v4792_v41 = vadd.f32 %v4698_v49, %v13033_v0  ;;  %v13745_v4 = vsel %vm4528_vm8, %v4574_v9, %v4575_v42  ;;  %v13752_v49 = vld [vmem:[#allocation3 + $0xf0] sm:$0xff] }
 0x4cd   : > { %17331 = vst [vmem:[#allocation83_spill] sm:$0xff] %v13745_v4 }
 0x4ce   : > { %17329 = vst [vmem:[#allocation154_spill] sm:$0xff] %v13734_v10  ;;  %v5086_v26 = vadd.f32 %v4992_v15, %v4792_v41  ;;  %v13749_v10 = vld [vmem:[#allocation3 + $0xf8] sm:$0xff]  ;;  %v4873_v15 = vrot.slane %v13752_v49, 4  ;;  %v4577_v41 = vrot.slane %v10293_v53, 3 }
 0x4cf   : > { %17332 = vst [vmem:[#allocation92_spill] sm:$0xff] %v13749_v10  ;;  %v4874_v0 = vrot.slane %v13749_v10, 4 }
 0x4d0   : > { %v5242_v62 = vadd.f32 %v5148_v35, %v5086_v26  ;;  %9448 = vmatmul.msk.f32.gmra.mxu2 %vm3491_vm5, %v13745_v4  ;;  %v13768_v54 = vsel %vm4528_vm8, %v4575_v42, %v4577_v41  ;;  %v4580_v42 = vrot.slane %v13749_v10, 3 }
 0x4d1   : > { %9483 = vmatmul.msk.f32.gmra.mxu3 %vm3491_vm5, %v13740_v1  ;;  %v5151_v20 = vpop.f32.mrf.mxu0  ;;  %v13763_v9 = vsel %vm585_vm0, %v4873_v15, %v4874_v0  ;;  %17335 = vst [vmem:[#allocation95_spill] sm:$0xff] %v13768_v54  ;;  %v4579_v15 = vrot.slane %v13752_v49, 3 }
 0x4d2   : > { %17334 = vst [vmem:[#allocation91_spill] sm:$0xff] %v13763_v9 }
 0x4d3   : > { %v5308_v6 = vpop.f32.mrf.mxu1  ;;  %v4701_v26 = vpop.f32.mrf.mxu2  ;;  %v13787_v41 = vsel %vm4528_vm8, %v4579_v15, %v4580_v42 }
 0x4d4   : > { %v4998_v39 = vpop.f32.mrf.mxu3  ;;  %9516 = vmatmul.msk.f32.gmra.mxu0 %vm3491_vm5, %v13752_v49  ;;  %9549 = vmatmul.msk.f32.gmra.mxu1 %vm3491_vm5, %v13015_v17  ;;  %v13759_v35 = vadd.f32 %v5308_v6, %v5242_v62  ;;  %v4793_v22 = vadd.f32 %v4701_v26, %v13058_v56  ;;  %v10296_v6 = vld [vmem:[#allocation3 + $0x100] sm:$0xf]  ;;  %17338 = vst [vmem:[#allocation103_spill] sm:$0xff] %v13787_v41 }
 0x4d6   : > { %17333 = vst [vmem:[#allocation77_spill] sm:$0xff] %v13759_v35  ;;  %v5087_v47 = vadd.f32 %v4995_v25, %v4793_v22  ;;  %v4876_v35 = vrot.slane %v10296_v6, 4 }
 0x4d8   : > { %v5243_v17 = vadd.f32 %v5151_v20, %v5087_v47  ;;  %9449 = vmatmul.msk.f32.gmra.mxu2 %vm3491_vm5, %v13768_v54  ;;  %v13781_v20 = vsel %vm585_vm0, %v4874_v0, %v4876_v35  ;;  %v13794_v0 = vld [vmem:[#allocation3 + $0x108] sm:$0xff] }
 0x4d9   : > { %9484 = vmatmul.msk.f32.gmra.mxu3 %vm3491_vm5, %v13763_v9  ;;  %v5154_v1 = vpop.f32.mrf.mxu0  ;;  %17337 = vst [vmem:[#allocation107_spill] sm:$0xff] %v13781_v20 }
 0x4da   : > { %17340 = vst [vmem:[#allocation113_spill] sm:$0xff] %v13794_v0 }
 0x4db   : > { %v5311_v56 = vpop.f32.mrf.mxu1  ;;  %v4704_v25 = vpop.f32.mrf.mxu2 }
 0x4dc   : > { %v5001_v62 = vpop.f32.mrf.mxu3  ;;  %9517 = vmatmul.msk.f32.gmra.mxu0 %vm3491_vm5, %v13749_v10  ;;  %9550 = vmatmul.msk.f32.gmra.mxu1 %vm3491_vm5, %v13041_v44  ;;  %v13776_v53 = vadd.f32 %v5311_v56, %v5243_v17  ;;  %v4794_v47 = vadd.f32 %v4704_v25, %v13083_v50  ;;  %v13791_v44 = vld [vmem:[#allocation3 + $0x110] sm:$0xff] }
 0x4dd   : > { %17339 = vst [vmem:[#allocation106_spill] sm:$0xff] %v13791_v44  ;;  %v4879_v50 = vrot.slane %v13791_v44, 4 }
 0x4de   : > { %17336 = vst [vmem:[#allocation99_spill] sm:$0xff] %v13776_v53  ;;  %v5088_v22 = vadd.f32 %v4998_v39, %v4794_v47  ;;  %v4878_v39 = vrot.slane %v13794_v0, 4  ;;  %v4582_v47 = vrot.slane %v10296_v6, 3 }
 0x4e0   : > { %v5244_v17 = vadd.f32 %v5154_v1, %v5088_v22  ;;  %9450 = vmatmul.msk.f32.gmra.mxu2 %vm3491_vm5, %v13787_v41  ;;  %v13805_v22 = vsel %vm585_vm0, %v4878_v39, %v4879_v50  ;;  %v13810_v10 = vsel %vm4528_vm8, %v4580_v42, %v4582_v47  ;;  %v17344_v39 = vld [vmem:[#allocation122_spill] sm:$0xff]  ;;  %v4585_v42 = vrot.slane %v13791_v44, 3 }
 0x4e1   : > { %9485 = vmatmul.msk.f32.gmra.mxu3 %vm3491_vm5, %v13781_v20  ;;  %v5157_v26 = vpop.f32.mrf.mxu0  ;;  %17342 = vst [vmem:[#allocation156_spill] sm:$0xff] %v13805_v22  ;;  %v4584_v47 = vrot.slane %v13794_v0, 3 }
 0x4e2   : > { %17343 = vst [vmem:[#allocation157_spill] sm:$0xff] %v13810_v10 }
 0x4e3   : > { %v5314_v35 = vpop.f32.mrf.mxu1  ;;  %v4707_v25 = vpop.f32.mrf.mxu2 }
 0x4e4   : > { %v5004_v56 = vpop.f32.mrf.mxu3  ;;  %9518 = vmatmul.msk.f32.gmra.mxu0 %vm3491_vm5, %v13794_v0  ;;  %9551 = vmatmul.msk.f32.gmra.mxu1 %vm3491_vm5, %v13065_v34  ;;  %v13801_v1 = vadd.f32 %v5314_v35, %v5244_v17  ;;  %v4795_v15 = vadd.f32 %v4707_v25, %v13108_v46  ;;  %v10299_v35 = vld [vmem:[#allocation3 + $0x118] sm:$0xf] }
 0x4e5   : > { %v4881_v6 = vrot.slane %v10299_v35, 4 }
 0x4e6   : > { %17341 = vst [vmem:[#allocation155_spill] sm:$0xff] %v13801_v1  ;;  %v5089_v53 = vadd.f32 %v5001_v62, %v4795_v15  ;;  %v13829_v1 = vsel %vm4528_vm8, %v4584_v47, %v4585_v42 }
 0x4e7   : > { %17347 = vst [vmem:[#allocation160_spill] sm:$0xff] %v13829_v1 }
 0x4e8   : > { %v5245_v34 = vadd.f32 %v5157_v26, %v5089_v53  ;;  %9451 = vmatmul.msk.f32.gmra.mxu2 %vm3491_vm5, %v13810_v10  ;;  %v13823_v26 = vsel %vm585_vm0, %v4879_v50, %v4881_v6  ;;  %v13836_v50 = vld [vmem:[#allocation3 + $0x128] sm:$0xff] }
 0x4e9   : > { %9486 = vmatmul.msk.f32.gmra.mxu3 %vm3491_vm5, %v13805_v22  ;;  %v5160_v20 = vpop.f32.mrf.mxu0  ;;  %17346 = vst [vmem:[#allocation159_spill] sm:$0xff] %v13823_v26  ;;  %v4884_v6 = vrot.slane %v13836_v50, 4 }
 0x4ea   : > { %17348 = vst [vmem:[#allocation161_spill] sm:$0xff] %v13836_v50 }
 0x4eb   : > { %v5317_v46 = vpop.f32.mrf.mxu1  ;;  %v4710_v62 = vpop.f32.mrf.mxu2 }
 0x4ec   : > { %v5007_v17 = vpop.f32.mrf.mxu3  ;;  %9519 = vmatmul.msk.f32.gmra.mxu0 %vm3491_vm5, %v13791_v44  ;;  %9552 = vmatmul.msk.f32.gmra.mxu1 %vm3491_vm5, %v17344_v39  ;;  %v13818_v25 = vadd.f32 %v5317_v46, %v5245_v34  ;;  %v4796_v53 = vadd.f32 %v4710_v62, %v13134_v13  ;;  %v13833_v39 = vld [vmem:[#allocation3 + $0x120] sm:$0xff]  ;;  %v4587_v62 = vrot.slane %v10299_v35, 3  ;;  %v10302_v35 = vld [vmem:[#allocation3 + $0x130] sm:$0xf] }
 0x4ed   : > { %v4883_v13 = vrot.slane %v13833_v39, 4 }
 0x4ee   : > { %17345 = vst [vmem:[#allocation158_spill] sm:$0xff] %v13818_v25  ;;  %v5090_v22 = vadd.f32 %v5004_v56, %v4796_v53  ;;  %v13852_v44 = vsel %vm4528_vm8, %v4585_v42, %v4587_v62  ;;  %v4589_v42 = vrot.slane %v13833_v39, 3 }
 0x4ef   : > { %v13847_v47 = vsel %vm585_vm0, %v4883_v13, %v4884_v6  ;;  %17350 = vst [vmem:[#allocation163_spill] sm:$0xff] %v13852_v44  ;;  %v4886_v13 = vrot.slane %v10302_v35, 4 }
 0x4f0   : > { %v5246_v34 = vadd.f32 %v5160_v20, %v5090_v22  ;;  %9452 = vmatmul.msk.f32.gmra.mxu2 %vm3491_vm5, %v13829_v1  ;;  %17349 = vst [vmem:[#allocation162_spill] sm:$0xff] %v13847_v47 }
 0x4f1   : > { %9487 = vmatmul.msk.f32.gmra.mxu3 %vm3491_vm5, %v13823_v26  ;;  %v5163_v15 = vpop.f32.mrf.mxu0 }
 0x4f3   : > { %v5320_v56 = vpop.f32.mrf.mxu1  ;;  %v4713_v22 = vpop.f32.mrf.mxu2 }
 0x4f4   : > { %v5010_v46 = vpop.f32.mrf.mxu3  ;;  %9520 = vmatmul.msk.f32.gmra.mxu0 %vm3491_vm5, %v13833_v39  ;;  %9553 = vmatmul.msk.f32.gmra.mxu1 %vm3491_vm5, %v13115_v2  ;;  %v13843_v20 = vadd.f32 %v5320_v56, %v5246_v34  ;;  %v4797_v53 = vadd.f32 %v4713_v22, %v13157_v31  ;;  %v13866_v22 = vsel %vm585_vm0, %v4884_v6, %v4886_v13  ;;  %v13875_v2 = vld [vmem:[#allocation3 + $0x140] sm:$0xff] }
 0x4f5   : > { %17352 = vst [vmem:[#allocation165_spill] sm:$0xff] %v13866_v22 }
 0x4f6   : > { %v5091_v25 = vadd.f32 %v5007_v17, %v4797_v53  ;;  %17354 = vst [vmem:[#allocation167_spill] sm:$0xff] %v13875_v2 }
 0x4f8   : > { %v5247_v0 = vadd.f32 %v5163_v15, %v5091_v25  ;;  %9453 = vmatmul.msk.f32.gmra.mxu2 %vm3491_vm5, %v13852_v44  ;;  %v4590_v25 = vrot.slane %v13836_v50, 3 }
 0x4f9   : > { %9488 = vmatmul.msk.f32.gmra.mxu3 %vm3491_vm5, %v13847_v47  ;;  %v5166_v26 = vpop.f32.mrf.mxu0 }
 0x4fb   : > { %v5323_v31 = vpop.f32.mrf.mxu1  ;;  %v4716_v17 = vpop.f32.mrf.mxu2 }
 0x4fc   : > { %v5013_v34 = vpop.f32.mrf.mxu3  ;;  %9521 = vmatmul.msk.f32.gmra.mxu0 %vm3491_vm5, %v13836_v50  ;;  %9554 = vmatmul.msk.f32.gmra.mxu1 %vm3491_vm5, %v13141_v3  ;;  %v13860_v56 = vadd.f32 %v5323_v31, %v5247_v0  ;;  %v4798_v15 = vadd.f32 %v4716_v17, %v13183_v63  ;;  %v13871_v3 = vsel %vm4528_vm8, %v4589_v42, %v4590_v25  ;;  %v4889_v63 = vrot.slane %v13875_v2, 4  ;;  %v13878_v17 = vld [vmem:[#allocation3 + $0x138] sm:$0xff] }
 0x4fd   : > { %17353 = vst [vmem:[#allocation166_spill] sm:$0xff] %v13871_v3 }
 0x4fe   : > { %17351 = vst [vmem:[#allocation164_spill] sm:$0xff] %v13860_v56  ;;  %v5092_v53 = vadd.f32 %v5010_v46, %v4798_v15  ;;  %v4888_v46 = vrot.slane %v13878_v17, 4 }
 0x500   : > { %v5248_v0 = vadd.f32 %v5166_v26, %v5092_v53  ;;  %9454 = vmatmul.msk.f32.gmra.mxu2 %vm3491_vm5, %v13871_v3  ;;  %v13889_v15 = vsel %vm585_vm0, %v4888_v46, %v4889_v63  ;;  %v4592_v53 = vrot.slane %v10302_v35, 3  ;;  %v4594_v46 = vrot.slane %v13878_v17, 3 }
 0x501   : > { %9489 = vmatmul.msk.f32.gmra.mxu3 %vm3491_vm5, %v13866_v22  ;;  %v5169_v62 = vpop.f32.mrf.mxu0  ;;  %17356 = vst [vmem:[#allocation169_spill] sm:$0xff] %v13889_v15 }
 0x502   : > { %v13894_v50 = vsel %vm4528_vm8, %v4590_v25, %v4592_v53  ;;  %v4595_v25 = vrot.slane %v13875_v2, 3 }
 0x503   : > { %v5326_v6 = vpop.f32.mrf.mxu1  ;;  %v4719_v13 = vpop.f32.mrf.mxu2  ;;  %17357 = vst [vmem:[#allocation170_spill] sm:$0xff] %v13894_v50 }
 0x504   : > { %v5016_v31 = vpop.f32.mrf.mxu3  ;;  %9522 = vmatmul.msk.f32.gmra.mxu0 %vm3491_vm5, %v13878_v17  ;;  %9555 = vmatmul.msk.f32.gmra.mxu1 %vm3491_vm5, %v13165_v45  ;;  %v13885_v26 = vadd.f32 %v5326_v6, %v5248_v0  ;;  %v4799_v42 = vadd.f32 %v4719_v13, %v13208_v60  ;;  %v10305_v6 = vld [vmem:[#allocation3 + $0x148] sm:$0xf]  ;;  %v13913_v53 = vsel %vm4528_vm8, %v4594_v46, %v4595_v25 }
 0x505   : > { %17360 = vst [vmem:[#allocation173_spill] sm:$0xff] %v13913_v53  ;;  %v4597_v46 = vrot.slane %v10305_v6, 3 }
 0x506   : > { %17355 = vst [vmem:[#allocation168_spill] sm:$0xff] %v13885_v26  ;;  %v5093_v56 = vadd.f32 %v5013_v34, %v4799_v42  ;;  %v4891_v26 = vrot.slane %v10305_v6, 4 }
 0x508   : > { %v5249_v45 = vadd.f32 %v5169_v62, %v5093_v56  ;;  %9455 = vmatmul.msk.f32.gmra.mxu2 %vm3491_vm5, %v13894_v50  ;;  %v13907_v62 = vsel %vm585_vm0, %v4889_v63, %v4891_v26  ;;  %v13920_v63 = vld [vmem:[#allocation3 + $0x150] sm:$0xff] }
 0x509   : > { %9490 = vmatmul.msk.f32.gmra.mxu3 %vm3491_vm5, %v13889_v15  ;;  %v5172_v22 = vpop.f32.mrf.mxu0  ;;  %17359 = vst [vmem:[#allocation172_spill] sm:$0xff] %v13907_v62  ;;  %v13936_v15 = vsel %vm4528_vm8, %v4595_v25, %v4597_v46  ;;  %v4599_v46 = vrot.slane %v13920_v63, 3 }
 0x50a   : > { %17362 = vst [vmem:[#allocation175_spill] sm:$0xff] %v13920_v63 }
 0x50b   : > { %v5329_v60 = vpop.f32.mrf.mxu1  ;;  %v4722_v34 = vpop.f32.mrf.mxu2  ;;  %17366 = vst [vmem:[#allocation178_spill] sm:$0xff] %v13936_v15 }
 0x50c   : > { %v5019_v0 = vpop.f32.mrf.mxu3  ;;  %9523 = vmatmul.msk.f32.gmra.mxu0 %vm3491_vm5, %v13875_v2  ;;  %9556 = vmatmul.msk.f32.gmra.mxu1 %vm3491_vm5, %v13191_v37  ;;  %v13902_v35 = vadd.f32 %v5329_v60, %v5249_v45  ;;  %v4800_v56 = vadd.f32 %v4722_v34, %v13241_v19  ;;  %v13917_v37 = vld [vmem:[#allocation3 + $0x158] sm:$0xff]  ;;  %v17363_v34 = vld [vmem:[#allocation52_spill] sm:$0xff] }
 0x50d   : > { %17361 = vst [vmem:[#allocation174_spill] sm:$0xff] %v13917_v37  ;;  %v4894_v19 = vrot.slane %v13917_v37, 4  ;;  %v4600_v25 = vrot.slane %v13917_v37, 3 }
 0x50e   : > { %17358 = vst [vmem:[#allocation171_spill] sm:$0xff] %v13902_v35  ;;  %v5094_v42 = vadd.f32 %v5016_v31, %v4800_v56  ;;  %v4893_v31 = vrot.slane %v13920_v63, 4 }
 0x510   : > { %v5250_v45 = vadd.f32 %v5172_v22, %v5094_v42  ;;  %9456 = vmatmul.msk.f32.gmra.mxu2 %vm3491_vm5, %v13913_v53 }
 0x511   : > { %9491 = vmatmul.msk.f32.gmra.mxu3 %vm3491_vm5, %v13907_v62  ;;  %v5175_v13 = vpop.f32.mrf.mxu0  ;;  %v13931_v62 = vsel %vm585_vm0, %v4893_v31, %v4894_v19  ;;  %v17367_v31 = vld [vmem:[#allocation56_spill] sm:$0xff] }
 0x512   : > { %17365 = vst [vmem:[#allocation177_spill] sm:$0xff] %v13931_v62 }
 0x513   : > { %v5332_v26 = vpop.f32.mrf.mxu1  ;;  %v4725_v56 = vpop.f32.mrf.mxu2 }
 0x514   : > { %v5022_v60 = vpop.f32.mrf.mxu3  ;;  %9524 = vmatmul.msk.f32.gmra.mxu0 %vm3491_vm5, %v13920_v63  ;;  %9557 = vmatmul.msk.f32.gmra.mxu1 %vm3491_vm5, %v17363_v34  ;;  %v13927_v22 = vadd.f32 %v5332_v26, %v5250_v45  ;;  %v4801_v42 = vadd.f32 %v4725_v56, %v13266_v7  ;;  %v10308_v26 = vld [vmem:[#allocation3 + $0x160] sm:$0xf]  ;;  %v9666_v63 = vld [vmem:[%s16458_s7 + $0x14] sm:$0x3] }
 0x515   : > { %v4896_v6 = vrot.slane %v10308_v26, 4  ;;  %9667 = vmatpush.msk.msrb.mxu1 %vm3937_vm7, %v9666_v63 }
 0x516   : > { %17364 = vst [vmem:[#allocation176_spill] sm:$0xff] %v13927_v22  ;;  %v5095_v2 = vadd.f32 %v5019_v0, %v4801_v42  ;;  %v13955_v22 = vsel %vm4528_vm8, %v4599_v46, %v4600_v25 }
 0x517   : > { %17370 = vst [vmem:[#allocation181_spill] sm:$0xff] %v13955_v22 }
 0x518   : > { %v5251_v34 = vadd.f32 %v5175_v13, %v5095_v2  ;;  %9457 = vmatmul.msk.f32.gmra.mxu2 %vm3491_vm5, %v13936_v15  ;;  %v13949_v13 = vsel %vm585_vm0, %v4894_v19, %v4896_v6 }
 0x519   : > { %9492 = vmatmul.msk.f32.gmra.mxu3 %vm3491_vm5, %v13931_v62  ;;  %v5178_v35 = vpop.f32.mrf.mxu0  ;;  %17369 = vst [vmem:[#allocation180_spill] sm:$0xff] %v13949_v13 }
 0x51b   : > { %v5335_v7 = vpop.f32.mrf.mxu1  ;;  %v4728_v0 = vpop.f32.mrf.mxu2 }
 0x51c   : > { %v5025_v45 = vpop.f32.mrf.mxu3  ;;  %9525 = vmatmul.msk.f32.gmra.mxu0 %vm3491_vm5, %v13917_v37  ;;  %9558 = vmatmul.msk.f32.gmra.mxu1 %vm3491_vm5, %v17367_v31  ;;  %v13944_v56 = vadd.f32 %v5335_v7, %v5251_v34  ;;  %v4802_v2 = vadd.f32 %v4728_v0, %v13295_v51  ;;  %v13957_v34 = vld [vmem:[#allocation3 + $0x168] sm:$0xff]  ;;  %v13960_v31 = vld [vmem:[#allocation3 + $0x170] sm:$0xff]  ;;  %v9700_v0 = vld [vmem:[%s16458_s7 + $0x16] sm:$0x3] }
 0x51d   : > { %v4898_v7 = vrot.slane %v13957_v34, 4  ;;  %17371 = vst [vmem:[#allocation182_spill] sm:$0xff] %v13960_v31  ;;  %v4899_v51 = vrot.slane %v13960_v31, 4  ;;  %9701 = vmatpush.msk.msrb.mxu2 %vm3937_vm7, %v9700_v0 }
 0x51e   : > { %17368 = vst [vmem:[#allocation179_spill] sm:$0xff] %v13944_v56  ;;  %v5096_v62 = vadd.f32 %v5022_v60, %v4802_v2  ;;  %v9632_v2 = vld [vmem:[%s16458_s7 + $0x12] sm:$0x3] }
 0x51f   : > { %9633 = vmatpush.msk.msrb.mxu0 %vm3937_vm7, %v9632_v2  ;;  %v13985_v37 = vsel %vm585_vm0, %v4898_v7, %v4899_v51  ;;  %v10311_v2 = vld [vmem:[#allocation3 + $0x178] sm:$0xf] }
 0x520   : > { %v5252_v19 = vadd.f32 %v5178_v35, %v5096_v62  ;;  %9458 = vmatmul.msk.f32.gmra.mxu2 %vm3491_vm5, %v13955_v22  ;;  %v9734_v35 = vld [vmem:[%s16458_s7 + $0x18] sm:$0x3]  ;;  %17372 = vst [vmem:[#allocation183_spill] sm:$0xff] %v13985_v37 }
 0x521   : > { %9493 = vmatmul.msk.f32.gmra.mxu3 %vm3491_vm5, %v13949_v13  ;;  %v5181_v42 = vpop.f32.mrf.mxu0  ;;  %v4602_v13 = vrot.slane %v10308_v26, 3 }
 0x522   : > { %9735 = vmatpush.msk.msrb.mxu3 %vm3937_vm7, %v9734_v35  ;;  %v4901_v35 = vrot.slane %v10311_v2, 4 }
 0x523   : > { %v5338_v60 = vpop.f32.mrf.mxu1  ;;  %v4731_v46 = vpop.f32.mrf.mxu2  ;;  %v13994_v0 = vsel %vm4528_vm8, %v4600_v25, %v4602_v13 }
 0x524   : > { %v5028_v6 = vpop.f32.mrf.mxu3  ;;  %9526 = vmatmul.msk.f32.gmra.mxu0 %vm3491_vm5, %v13957_v34  ;;  %9559 = vmatmul.msk.f32.gmra.mxu1 %vm3491_vm5, %v13273_v57  ;;  %v13979_v62 = vadd.f32 %v5338_v60, %v5252_v19  ;;  %v4803_v56 = vadd.f32 %v4731_v46, %v13331_v23  ;;  %17373 = vst [vmem:[#allocation184_spill] sm:$0xff] %v13994_v0 }
 0x525   : > { %v14008_v13 = vsel %vm585_vm0, %v4899_v51, %v4901_v35  ;;  %v14021_v51 = vld [vmem:[#allocation3 + $0x188] sm:$0xff] }
 0x526   : > { %v5097_v60 = vadd.f32 %v5025_v45, %v4803_v56  ;;  %v4604_v45 = vrot.slane %v13957_v34, 3  ;;  %v4605_v56 = vrot.slane %v13960_v31, 3  ;;  %17375 = vst [vmem:[#allocation186_spill] sm:$0xff] %v14008_v13  ;;  %v17377_v35 = vld [vmem:[#allocation60_spill] sm:$0xff] }
 0x528   : > { %v5253_v26 = vadd.f32 %v5181_v42, %v5097_v60  ;;  %9459 = vmatmul.msk.f32.gmra.mxu2 %vm3491_vm5, %v13994_v0 }
 0x529   : > { %9494 = vmatmul.msk.f32.gmra.mxu3 %vm3491_vm5, %v13985_v37  ;;  %v5184_v19 = vpop.f32.mrf.mxu0 }
 0x52b   : > { %v5341_v7 = vpop.f32.mrf.mxu1  ;;  %v4734_v63 = vpop.f32.mrf.mxu2 }
 0x52c   : > { %v5031_v23 = vpop.f32.mrf.mxu3  ;;  %9527 = vmatmul.msk.f32.gmra.mxu0 %vm3491_vm5, %v13960_v31  ;;  %9560 = vmatmul.msk.f32.gmra.mxu1 %vm3491_vm5, %v13311_v59  ;;  %v14002_v46 = vadd.f32 %v5341_v7, %v5253_v26  ;;  %v4804_v25 = vadd.f32 %v4734_v63, %v13355_v5  ;;  %v14013_v59 = vsel %vm4528_vm8, %v4604_v45, %v4605_v56  ;;  %v14015_v26 = vld [vmem:[#allocation3 + $0x180] sm:$0xff] }
 0x52d   : > { %17376 = vst [vmem:[#allocation187_spill] sm:$0xff] %v14013_v59 }
 0x52e   : > { %17374 = vst [vmem:[#allocation185_spill] sm:$0xff] %v14002_v46  ;;  %v5098_v60 = vadd.f32 %v5028_v6, %v4804_v25  ;;  %v4607_v25 = vrot.slane %v10311_v2, 3  ;;  %v5274_v46 = vrot.slane %v14015_v26, 1 }
 0x530   : > { %v5254_v7 = vadd.f32 %v5184_v19, %v5098_v60  ;;  %9460 = vmatmul.msk.f32.gmra.mxu2 %vm3491_vm5, %v14013_v59  ;;  %v5275_v19 = vrot.slane %v14021_v51, 1  ;;  %v14033_v31 = vsel %vm4528_vm8, %v4605_v56, %v4607_v25  ;;  %v17380_v25 = vld [vmem:[#allocation72_spill] sm:$0xff] }
 0x531   : > { %9495 = vmatmul.msk.f32.gmra.mxu3 %vm3491_vm5, %v14008_v13  ;;  %v5187_v42 = vpop.f32.mrf.mxu0  ;;  %17378 = vst [vmem:[#allocation188_spill] sm:$0xff] %v14033_v31 }
 0x533   : > { %v5344_v5 = vpop.f32.mrf.mxu1  ;;  %v4737_v63 = vpop.f32.mrf.mxu2 }
 0x534   : > { %v5034_v57 = vpop.f32.mrf.mxu3  ;;  %9528 = vmatmul.msk.f32.gmra.mxu0 %vm3491_vm5, %v14015_v26  ;;  %9561 = vmatmul.msk.f32.gmra.mxu1 %vm3491_vm5, %v17377_v35  ;;  %v14025_v6 = vadd.f32 %v5344_v5, %v5254_v7  ;;  %v4805_v45 = vadd.f32 %v4737_v63, %v13376_v21  ;;  %v14040_v5 = vsel %vm434_vm1, %v5274_v46, %v5275_v19  ;;  %v17391_v35 = vld [vmem:[#allocation97_spill] sm:$0xff] }
 0x535   : > { %17379 = vst [vmem:[#allocation189_spill] sm:$0xff] %v14040_v5 }
 0x536   : > { %v5099_v13 = vadd.f32 %v5031_v23, %v4805_v45 }
 0x538   : > { %v5255_v37 = vadd.f32 %v5187_v42, %v5099_v13  ;;  %9461 = vmatmul.msk.f32.gmra.mxu2 %vm3491_vm5, %v14033_v31 }
 0x539   : > { %9600 = vmatmul.msk.f32.vlgmr.msra.gmra.mxu3 %vm3491_vm5, %v13419_v30  ;;  %v5190_v60 = vpop.f32.mrf.mxu0  ;;  %v14044_v30 = vld [vmem:[#allocation3 + $0x190] sm:$0xf] }
 0x53a   : > { %v5277_v13 = vrot.slane %v14044_v30, 1 }
 0x53b   : > { %v5347_v21 = vpop.f32.mrf.mxu1  ;;  %v4740_v2 = vpop.f32.mrf.mxu2 }
 0x53c   : > { %v5037_v7 = vpop.f32.mrf.mxu3  ;;  %9529 = vmatmul.msk.f32.gmra.mxu0 %vm3491_vm5, %v14021_v51  ;;  %9562 = vmatmul.msk.f32.gmra.mxu1 %vm3491_vm5, %v14040_v5  ;;  %v14046_v23 = vadd.f32 %v5347_v21, %v5255_v37  ;;  %v4806_v56 = vadd.f32 %v4740_v2, %v13392_v14  ;;  %v14057_v21 = vsel %vm434_vm1, %v5275_v19, %v5277_v13  ;;  %v10312_v13 = vld [vmem:[#allocation3 + $0x30] sm:$0xff] }
 0x53d   : > { %17381 = vst [vmem:[#allocation72_spill] sm:$0xff] %v14057_v21 }
 0x53e   : > { %v5100_v63 = vadd.f32 %v5034_v57, %v4806_v56 }
 0x540   : > { %v5256_v45 = vadd.f32 %v5190_v60, %v5100_v63  ;;  %9566 = vmatmul.msk.f32.vlgmr.msra.gmra.mxu2 %vm3491_vm5, %v17380_v25 }
 0x541   : > { %9601 = vmatmul.msk.f32.gmra.mxu3 %vm3491_vm5, %v13437_v33  ;;  %v5193_v42 = vpop.f32.mrf.mxu0 }
 0x543   : > { %v5350_v37 = vpop.f32.mrf.mxu1  ;;  %v4743_v33 = vpop.f32.mrf.mxu2 }
 0x544   : > { %v5040_v46 = vpop.f32.mrf.mxu3  ;;  %9634 = vmatmul.msk.f32.vlgmr.msrb.gmra.mxu0 %vm3491_vm5, %v13398_v58  ;;  %9563 = vmatmul.msk.f32.gmra.mxu1 %vm3491_vm5, %v14057_v21  ;;  %v14061_v14 = vadd.f32 %v5350_v37, %v5256_v45  ;;  %v4807_v57 = vadd.f32 %v4743_v33, %v13407_v29  ;;  %v17382_v58 = vld [vmem:[#allocation84_spill] sm:$0xff]  ;;  %v17388_v21 = vld [vmem:[#allocation30_spill] sm:$0xff] }
 0x546   : > { %v5101_v2 = vadd.f32 %v5037_v7, %v4807_v57  ;;  %v17383_v57 = vld [vmem:[#allocation88_spill] sm:$0xff] }
 0x548   : > { %v5257_v56 = vadd.f32 %v5193_v42, %v5101_v2  ;;  %9567 = vmatmul.msk.f32.gmra.mxu2 %vm3491_vm5, %v17382_v58  ;;  %v10313_v2 = vld [vmem:[#allocation3 + $0x38] sm:$0xff]  ;;  %v17385_v58 = vld [vmem:[#allocation136_spill] sm:$0xff] }
 0x549   : > { %9602 = vmatmul.msk.f32.gmra.mxu3 %vm3491_vm5, %v13456_v40  ;;  %v5196_v60 = vpop.f32.mrf.mxu0 }
 0x54b   : > { %v5353_v19 = vpop.f32.mrf.mxu1  ;;  %v4746_v29 = vpop.f32.mrf.mxu2 }
 0x54c   : > { %v5043_v63 = vpop.f32.mrf.mxu3  ;;  %9635 = vmatmul.msk.f32.gmra.mxu0 %vm3491_vm5, %v13413_v55  ;;  %9668 = vmatmul.msk.f32.vlgmr.msrb.gmra.mxu1 %vm3491_vm5, %v10312_v13  ;;  %v14071_v45 = vadd.f32 %v5353_v19, %v5257_v56  ;;  %v4808_v25 = vadd.f32 %v4746_v29, %v13425_v48  ;;  %v17386_v13 = vld [vmem:[#allocation134_spill] sm:$0xff] }
 0x54e   : > { %v5102_v42 = vadd.f32 %v5040_v46, %v4808_v25 }
 0x550   : > { %v5258_v37 = vadd.f32 %v5196_v60, %v5102_v42  ;;  %9568 = vmatmul.msk.f32.gmra.mxu2 %vm3491_vm5, %v17383_v57  ;;  %v17387_v42 = vld [vmem:[#allocation90_spill] sm:$0xff] }
 0x551   : > { %9603 = vmatmul.msk.f32.gmra.mxu3 %vm3491_vm5, %v13474_v11  ;;  %v5199_v7 = vpop.f32.mrf.mxu0 }
 0x553   : > { %v5356_v55 = vpop.f32.mrf.mxu1  ;;  %v4749_v48 = vpop.f32.mrf.mxu2 }
 0x554   : > { %v5046_v33 = vpop.f32.mrf.mxu3  ;;  %9636 = vmatmul.msk.f32.gmra.mxu0 %vm3491_vm5, %v13432_v36  ;;  %9669 = vmatmul.msk.f32.gmra.mxu1 %vm3491_vm5, %v10313_v2  ;;  %v14081_v56 = vadd.f32 %v5356_v55, %v5258_v37  ;;  %v4809_v19 = vadd.f32 %v4749_v48, %v17385_v58  ;;  %v10314_v2 = vld [vmem:[#allocation3 + $0x48] sm:$0xff] }
 0x555   : > { %v17390_v48 = vld [vmem:[#allocation68_spill] sm:$0xff] }
 0x556   : > { %17384 = vst [vmem:[#allocation84_spill] sm:$0xff] %v14081_v56  ;;  %v5103_v60 = vadd.f32 %v5043_v63, %v4809_v19 }
 0x558   : > { %v5259_v29 = vadd.f32 %v5199_v7, %v5103_v60  ;;  %9569 = vmatmul.msk.f32.gmra.mxu2 %vm3491_vm5, %v17387_v42 }
 0x559   : > { %9604 = vmatmul.msk.f32.gmra.mxu3 %vm3491_vm5, %v17386_v13  ;;  %v5202_v46 = vpop.f32.mrf.mxu0 }
 0x55b   : > { %v5359_v5 = vpop.f32.mrf.mxu1  ;;  %v4752_v55 = vpop.f32.mrf.mxu2 }
 0x55c   : > { %v5049_v25 = vpop.f32.mrf.mxu3  ;;  %9637 = vmatmul.msk.f32.gmra.mxu0 %vm3491_vm5, %v17388_v21  ;;  %9670 = vmatmul.msk.f32.gmra.mxu1 %vm3491_vm5, %v10314_v2  ;;  %v14091_v37 = vadd.f32 %v5359_v5, %v5259_v29  ;;  %v4810_v58 = vadd.f32 %v4752_v55, %v17390_v48  ;;  %v17392_v21 = vld [vmem:[#allocation37_spill] sm:$0xff] }
 0x55d   : > { %v10315_v2 = vld [vmem:[#allocation3 + $0x50] sm:$0xff] }
 0x55e   : > { %17389 = vst [vmem:[#allocation88_spill] sm:$0xff] %v14091_v37  ;;  %v5104_v7 = vadd.f32 %v5046_v33, %v4810_v58  ;;  %v17394_v55 = vld [vmem:[#allocation49_spill] sm:$0xff]  ;;  %v17396_v37 = vld [vmem:[#allocation100_spill] sm:$0xff] }
 0x560   : > { %v5260_v19 = vadd.f32 %v5202_v46, %v5104_v7  ;;  %9570 = vmatmul.msk.f32.gmra.mxu2 %vm3491_vm5, %v17391_v35 }
 0x561   : > { %9605 = vmatmul.msk.f32.gmra.mxu3 %vm3491_vm5, %v13510_v61  ;;  %v5205_v63 = vpop.f32.mrf.mxu0  ;;  %v17395_v61 = vld [vmem:[#allocation39_spill] sm:$0xff] }
 0x563   : > { %v5362_v13 = vpop.f32.mrf.mxu1  ;;  %v4755_v29 = vpop.f32.mrf.mxu2 }
 0x564   : > { %v5052_v60 = vpop.f32.mrf.mxu3  ;;  %9638 = vmatmul.msk.f32.gmra.mxu0 %vm3491_vm5, %v17392_v21  ;;  %9671 = vmatmul.msk.f32.gmra.mxu1 %vm3491_vm5, %v10315_v2  ;;  %v14101_v5 = vadd.f32 %v5362_v13, %v5260_v19  ;;  %v4811_v48 = vadd.f32 %v4755_v29, %v17394_v55  ;;  %v17397_v21 = vld [vmem:[#allocation139_spill] sm:$0xff]  ;;  %v17399_v29 = vld [vmem:[#allocation29_spill] sm:$0xff] }
 0x565   : > { %v10316_v2 = vld [vmem:[#allocation3 + $0x60] sm:$0xff] }
 0x566   : > { %17393 = vst [vmem:[#allocation136_spill] sm:$0xff] %v14101_v5  ;;  %v5105_v46 = vadd.f32 %v5049_v25, %v4811_v48  ;;  %v17401_v5 = vld [vmem:[#allocation98_spill] sm:$0xff] }
 0x568   : > { %v5261_v58 = vadd.f32 %v5205_v63, %v5105_v46  ;;  %9571 = vmatmul.msk.f32.gmra.mxu2 %vm3491_vm5, %v17396_v37 }
 0x569   : > { %9606 = vmatmul.msk.f32.gmra.mxu3 %vm3491_vm5, %v17395_v61  ;;  %v5208_v33 = vpop.f32.mrf.mxu0  ;;  %v17400_v61 = vld [vmem:[#allocation144_spill] sm:$0xff] }
 0x56b   : > { %v5365_v56 = vpop.f32.mrf.mxu1  ;;  %v4758_v19 = vpop.f32.mrf.mxu2 }
 0x56c   : > { %v5055_v7 = vpop.f32.mrf.mxu3  ;;  %9639 = vmatmul.msk.f32.gmra.mxu0 %vm3491_vm5, %v17397_v21  ;;  %9672 = vmatmul.msk.f32.gmra.mxu1 %vm3491_vm5, %v10316_v2  ;;  %v14111_v13 = vadd.f32 %v5365_v56, %v5261_v58  ;;  %v4812_v55 = vadd.f32 %v4758_v19, %v17399_v29  ;;  %v17402_v21 = vld [vmem:[#allocation135_spill] sm:$0xff]  ;;  %v10317_v2 = vld [vmem:[#allocation3 + $0x68] sm:$0xff]  ;;  %v17404_v19 = vld [vmem:[#allocation141_spill] sm:$0xff] }
 0x56e   : > { %17398 = vst [vmem:[#allocation90_spill] sm:$0xff] %v14111_v13  ;;  %v5106_v63 = vadd.f32 %v5052_v60, %v4812_v55  ;;  %v17406_v13 = vld [vmem:[#allocation101_spill] sm:$0xff] }
 0x570   : > { %v5262_v48 = vadd.f32 %v5208_v33, %v5106_v63  ;;  %9572 = vmatmul.msk.f32.gmra.mxu2 %vm3491_vm5, %v17401_v5 }
 0x571   : > { %9607 = vmatmul.msk.f32.gmra.mxu3 %vm3491_vm5, %v17400_v61  ;;  %v5211_v25 = vpop.f32.mrf.mxu0  ;;  %v17405_v61 = vld [vmem:[#allocation140_spill] sm:$0xff] }
 0x573   : > { %v5368_v37 = vpop.f32.mrf.mxu1  ;;  %v4761_v58 = vpop.f32.mrf.mxu2 }
 0x574   : > { %v5058_v46 = vpop.f32.mrf.mxu3  ;;  %9640 = vmatmul.msk.f32.gmra.mxu0 %vm3491_vm5, %v17402_v21  ;;  %9673 = vmatmul.msk.f32.gmra.mxu1 %vm3491_vm5, %v10317_v2  ;;  %v14121_v56 = vadd.f32 %v5368_v37, %v5262_v48  ;;  %v4813_v29 = vadd.f32 %v4761_v58, %v17404_v19  ;;  %v17407_v21 = vld [vmem:[#allocation137_spill] sm:$0xff]  ;;  %v10318_v2 = vld [vmem:[#allocation3 + $0x78] sm:$0xff] }
 0x575   : > { %v17409_v58 = vld [vmem:[#allocation138_spill] sm:$0xff] }
 0x576   : > { %17403 = vst [vmem:[#allocation68_spill] sm:$0xff] %v14121_v56  ;;  %v5107_v33 = vadd.f32 %v5055_v7, %v4813_v29 }
 0x578   : > { %v5263_v55 = vadd.f32 %v5211_v25, %v5107_v33  ;;  %9573 = vmatmul.msk.f32.gmra.mxu2 %vm3491_vm5, %v17406_v13 }
 0x579   : > { %9608 = vmatmul.msk.f32.gmra.mxu3 %vm3491_vm5, %v17405_v61  ;;  %v5214_v60 = vpop.f32.mrf.mxu0  ;;  %v17410_v61 = vld [vmem:[#allocation109_spill] sm:$0xff] }
 0x57b   : > { %v5371_v5 = vpop.f32.mrf.mxu1  ;;  %v4764_v48 = vpop.f32.mrf.mxu2 }
 0x57c   : > { %v5061_v63 = vpop.f32.mrf.mxu3  ;;  %9641 = vmatmul.msk.f32.gmra.mxu0 %vm3491_vm5, %v17407_v21  ;;  %9674 = vmatmul.msk.f32.gmra.mxu1 %vm3491_vm5, %v10318_v2  ;;  %v14131_v37 = vadd.f32 %v5371_v5, %v5263_v55  ;;  %v4814_v19 = vadd.f32 %v4764_v48, %v17409_v58  ;;  %v17411_v21 = vld [vmem:[#allocation57_spill] sm:$0xff]  ;;  %v10319_v2 = vld [vmem:[#allocation3 + $0x80] sm:$0xff]  ;;  %v17412_v48 = vld [vmem:[#allocation142_spill] sm:$0xff] }
 0x57e   : > { %17408 = vst [vmem:[#allocation97_spill] sm:$0xff] %v14131_v37  ;;  %v5108_v25 = vadd.f32 %v5058_v46, %v4814_v19 }
 0x580   : > { %v5264_v29 = vadd.f32 %v5214_v60, %v5108_v25  ;;  %9574 = vmatmul.msk.f32.gmra.mxu2 %vm3491_vm5, %v17410_v61 }
 0x581   : > { %9609 = vmatmul.msk.f32.gmra.mxu3 %vm3491_vm5, %v13591_v27  ;;  %v5217_v7 = vpop.f32.mrf.mxu0  ;;  %v17413_v27 = vld [vmem:[#allocation110_spill] sm:$0xff] }
 0x583   : > { %v5374_v56 = vpop.f32.mrf.mxu1  ;;  %v4767_v55 = vpop.f32.mrf.mxu2 }
 0x584   : > { %v5064_v33 = vpop.f32.mrf.mxu3  ;;  %9642 = vmatmul.msk.f32.gmra.mxu0 %vm3491_vm5, %v17411_v21  ;;  %9675 = vmatmul.msk.f32.gmra.mxu1 %vm3491_vm5, %v10319_v2  ;;  %v14141_v5 = vadd.f32 %v5374_v56, %v5264_v29  ;;  %v4815_v58 = vadd.f32 %v4767_v55, %v17412_v48  ;;  %v17414_v21 = vld [vmem:[#allocation43_spill] sm:$0xff] }
 0x586   : > { %v5109_v60 = vadd.f32 %v5061_v63, %v4815_v58  ;;  %v17416_v58 = vld [vmem:[#allocation108_spill] sm:$0xff] }
 0x588   : > { %v5265_v19 = vadd.f32 %v5217_v7, %v5109_v60  ;;  %9575 = vmatmul.msk.f32.gmra.mxu2 %vm3491_vm5, %v17413_v27  ;;  %v17417_v60 = vld [vmem:[#allocation61_spill] sm:$0xff] }
 0x589   : > { %9610 = vmatmul.msk.f32.gmra.mxu3 %vm3491_vm5, %v13610_v16  ;;  %v5220_v46 = vpop.f32.mrf.mxu0 }
 0x58b   : > { %v5377_v37 = vpop.f32.mrf.mxu1  ;;  %v4770_v29 = vpop.f32.mrf.mxu2 }
 0x58c   : > { %v5067_v25 = vpop.f32.mrf.mxu3  ;;  %9643 = vmatmul.msk.f32.gmra.mxu0 %vm3491_vm5, %v17414_v21  ;;  %9676 = vmatmul.msk.f32.gmra.mxu1 %vm3491_vm5, %v13573_v18  ;;  %v14152_v56 = vadd.f32 %v5377_v37, %v5265_v19  ;;  %v4816_v2 = vadd.f32 %v4770_v29, %v13578_v28  ;;  %v10320_v18 = vld [vmem:[#allocation3 + $0x98] sm:$0xff]  ;;  %v17419_v19 = vld [vmem:[#allocation53_spill] sm:$0xff] }
 0x58e   : > { %17415 = vst [vmem:[#allocation49_spill] sm:$0xff] %v14152_v56  ;;  %v5110_v7 = vadd.f32 %v5064_v33, %v4816_v2 }
 0x590   : > { %v5266_v55 = vadd.f32 %v5220_v46, %v5110_v7  ;;  %9576 = vmatmul.msk.f32.gmra.mxu2 %vm3491_vm5, %v17416_v58 }
 0x591   : > { %9611 = vmatmul.msk.f32.gmra.mxu3 %vm3491_vm5, %v13635_v43  ;;  %v5223_v63 = vpop.f32.mrf.mxu0  ;;  %v17420_v43 = vld [vmem:[#allocation121_spill] sm:$0xff] }
 0x593   : > { %v5380_v21 = vpop.f32.mrf.mxu1  ;;  %v4773_v28 = vpop.f32.mrf.mxu2 }
 0x594   : > { %v5070_v48 = vpop.f32.mrf.mxu3  ;;  %9644 = vmatmul.msk.f32.gmra.mxu0 %vm3491_vm5, %v17417_v60  ;;  %9677 = vmatmul.msk.f32.gmra.mxu1 %vm3491_vm5, %v10320_v18  ;;  %v14162_v37 = vadd.f32 %v5380_v21, %v5266_v55  ;;  %v4817_v29 = vadd.f32 %v4773_v28, %v17419_v19  ;;  %v17421_v60 = vld [vmem:[#allocation45_spill] sm:$0xff]  ;;  %v17422_v18 = vld [vmem:[#allocation148_spill] sm:$0xff]  ;;  %v17424_v28 = vld [vmem:[#allocation147_spill] sm:$0xff] }
 0x596   : > { %17418 = vst [vmem:[#allocation29_spill] sm:$0xff] %v14162_v37  ;;  %v5111_v46 = vadd.f32 %v5067_v25, %v4817_v29 }
 0x598   : > { %v5267_v2 = vadd.f32 %v5223_v63, %v5111_v46  ;;  %9577 = vmatmul.msk.f32.gmra.mxu2 %vm3491_vm5, %v17420_v43 }
 0x599   : > { %9612 = vmatmul.msk.f32.gmra.mxu3 %vm3491_vm5, %v13656_v38  ;;  %v5226_v33 = vpop.f32.mrf.mxu0  ;;  %v17425_v38 = vld [vmem:[#allocation111_spill] sm:$0xff] }
 0x59b   : > { %v5383_v56 = vpop.f32.mrf.mxu1  ;;  %v4776_v55 = vpop.f32.mrf.mxu2 }
 0x59c   : > { %v5073_v7 = vpop.f32.mrf.mxu3  ;;  %9645 = vmatmul.msk.f32.gmra.mxu0 %vm3491_vm5, %v17421_v60  ;;  %9678 = vmatmul.msk.f32.gmra.mxu1 %vm3491_vm5, %v17422_v18  ;;  %v14173_v21 = vadd.f32 %v5383_v56, %v5267_v2  ;;  %v4818_v19 = vadd.f32 %v4776_v55, %v17424_v28  ;;  %v17426_v60 = vld [vmem:[#allocation51_spill] sm:$0xff]  ;;  %v17427_v18 = vld [vmem:[#allocation65_spill] sm:$0xff]  ;;  %v17429_v55 = vld [vmem:[#allocation70_spill] sm:$0xff] }
 0x59e   : > { %17423 = vst [vmem:[#allocation141_spill] sm:$0xff] %v14173_v21  ;;  %v5112_v63 = vadd.f32 %v5070_v48, %v4818_v19 }
 0x5a0   : > { %v5268_v29 = vadd.f32 %v5226_v33, %v5112_v63  ;;  %9578 = vmatmul.msk.f32.gmra.mxu2 %vm3491_vm5, %v17425_v38 }
 0x5a1   : > { %9613 = vmatmul.msk.f32.gmra.mxu3 %vm3491_vm5, %v13681_v8  ;;  %v5229_v25 = vpop.f32.mrf.mxu0  ;;  %v17430_v8 = vld [vmem:[#allocation125_spill] sm:$0xff] }
 0x5a3   : > { %v5386_v37 = vpop.f32.mrf.mxu1  ;;  %v4779_v2 = vpop.f32.mrf.mxu2 }
 0x5a4   : > { %v5076_v46 = vpop.f32.mrf.mxu3  ;;  %9646 = vmatmul.msk.f32.gmra.mxu0 %vm3491_vm5, %v17426_v60  ;;  %9679 = vmatmul.msk.f32.gmra.mxu1 %vm3491_vm5, %v17427_v18  ;;  %v14184_v56 = vadd.f32 %v5386_v37, %v5268_v29  ;;  %v4819_v28 = vadd.f32 %v4779_v2, %v17429_v55  ;;  %v17431_v60 = vld [vmem:[#allocation151_spill] sm:$0xff]  ;;  %v17432_v18 = vld [vmem:[#allocation149_spill] sm:$0xff] }
 0x5a5   : > { %v17434_v2 = vld [vmem:[#allocation73_spill] sm:$0xff] }
 0x5a6   : > { %17428 = vst [vmem:[#allocation138_spill] sm:$0xff] %v14184_v56  ;;  %v5113_v33 = vadd.f32 %v5073_v7, %v4819_v28 }
 0x5a8   : > { %v5269_v19 = vadd.f32 %v5229_v25, %v5113_v33  ;;  %9579 = vmatmul.msk.f32.gmra.mxu2 %vm3491_vm5, %v17430_v8 }
 0x5a9   : > { %9614 = vmatmul.msk.f32.gmra.mxu3 %vm3491_vm5, %v13702_v32  ;;  %v5232_v48 = vpop.f32.mrf.mxu0  ;;  %v17435_v32 = vld [vmem:[#allocation115_spill] sm:$0xff] }
 0x5ab   : > { %v5389_v21 = vpop.f32.mrf.mxu1  ;;  %v4782_v29 = vpop.f32.mrf.mxu2 }
 0x5ac   : > { %v5079_v63 = vpop.f32.mrf.mxu3  ;;  %9647 = vmatmul.msk.f32.gmra.mxu0 %vm3491_vm5, %v17431_v60  ;;  %9680 = vmatmul.msk.f32.gmra.mxu1 %vm3491_vm5, %v17432_v18  ;;  %v14195_v37 = vadd.f32 %v5389_v21, %v5269_v19  ;;  %v4820_v55 = vadd.f32 %v4782_v29, %v17434_v2  ;;  %v17436_v60 = vld [vmem:[#allocation152_spill] sm:$0xff]  ;;  %v17437_v18 = vld [vmem:[#allocation59_spill] sm:$0xff] }
 0x5ad   : > { %v17438_v29 = vld [vmem:[#allocation63_spill] sm:$0xff] }
 0x5ae   : > { %17433 = vst [vmem:[#allocation142_spill] sm:$0xff] %v14195_v37  ;;  %v5114_v25 = vadd.f32 %v5076_v46, %v4820_v55 }
 0x5b0   : > { %v5270_v28 = vadd.f32 %v5232_v48, %v5114_v25  ;;  %9580 = vmatmul.msk.f32.gmra.mxu2 %vm3491_vm5, %v17435_v32  ;;  %v17439_v25 = vld [vmem:[#allocation130_spill] sm:$0xff] }
 0x5b1   : > { %9615 = vmatmul.msk.f32.gmra.mxu3 %vm3491_vm5, %v13726_v24  ;;  %v5235_v7 = vpop.f32.mrf.mxu0 }
 0x5b3   : > { %v5392_v56 = vpop.f32.mrf.mxu1  ;;  %v4785_v19 = vpop.f32.mrf.mxu2 }
 0x5b4   : > { %v5082_v33 = vpop.f32.mrf.mxu3  ;;  %9648 = vmatmul.msk.f32.gmra.mxu0 %vm3491_vm5, %v17436_v60  ;;  %9681 = vmatmul.msk.f32.gmra.mxu1 %vm3491_vm5, %v17437_v18  ;;  %v14206_v21 = vadd.f32 %v5392_v56, %v5270_v28  ;;  %v4821_v2 = vadd.f32 %v4785_v19, %v17438_v29  ;;  %v17440_v60 = vld [vmem:[#allocation67_spill] sm:$0xff]  ;;  %v17442_v29 = vld [vmem:[#allocation118_spill] sm:$0xff] }
 0x5b6   : > { %v5115_v48 = vadd.f32 %v5079_v63, %v4821_v2 }
 0x5b8   : > { %v5271_v55 = vadd.f32 %v5235_v7, %v5115_v48  ;;  %9581 = vmatmul.msk.f32.gmra.mxu2 %vm3491_vm5, %v17439_v25  ;;  %v17443_v48 = vld [vmem:[#allocation75_spill] sm:$0xff] }
 0x5b9   : > { %9616 = vmatmul.msk.f32.gmra.mxu3 %vm3491_vm5, %v13745_v4  ;;  %v5238_v46 = vpop.f32.mrf.mxu0 }
 0x5bb   : > { %v5395_v37 = vpop.f32.mrf.mxu1  ;;  %v4788_v28 = vpop.f32.mrf.mxu2 }
 0x5bc   : > { %v5623_v24 = vpop.f32.mrf.mxu3  ;;  %9649 = vmatmul.msk.f32.gmra.mxu0 %vm3491_vm5, %v17440_v60  ;;  %9682 = vmatmul.msk.f32.gmra.mxu1 %vm3491_vm5, %v13706_v52  ;;  %v14217_v56 = vadd.f32 %v5395_v37, %v5271_v55  ;;  %v4822_v18 = vadd.f32 %v4788_v28, %v13714_v12  ;;  %v17444_v52 = vld [vmem:[#allocation69_spill] sm:$0xff]  ;;  %v17445_v55 = vld [vmem:[#allocation154_spill] sm:$0xff] }
 0x5be   : > { %17441 = vst [vmem:[#allocation53_spill] sm:$0xff] %v14217_v56  ;;  %v5116_v7 = vadd.f32 %v5082_v33, %v4822_v18 }
 0x5c0   : > { %v5272_v19 = vadd.f32 %v5238_v46, %v5116_v7  ;;  %9582 = vmatmul.msk.f32.gmra.mxu2 %vm3491_vm5, %v17442_v29  ;;  %v17446_v7 = vld [vmem:[#allocation127_spill] sm:$0xff] }
 0x5c1   : > { %9617 = vmatmul.msk.f32.gmra.mxu3 %vm3491_vm5, %v13768_v54  ;;  %v5782_v63 = vpop.f32.mrf.mxu0 }
 0x5c3   : > { %v5398_v60 = vpop.f32.mrf.mxu1  ;;  %v5464_v12 = vpop.f32.mrf.mxu2 }
 0x5c4   : > { %v5626_v2 = vpop.f32.mrf.mxu3  ;;  %9650 = vmatmul.msk.f32.gmra.mxu0 %vm3491_vm5, %v17443_v48  ;;  %9683 = vmatmul.msk.f32.gmra.mxu1 %vm3491_vm5, %v17444_v52  ;;  %v14228_v37 = vadd.f32 %v5398_v60, %v5272_v19  ;;  %v5560_v28 = vadd.f32 %v5464_v12, %v17445_v55  ;;  %v17447_v48 = vld [vmem:[#allocation89_spill] sm:$0xff] }
 0x5c5   : > { %v17449_v52 = vld [vmem:[#allocation77_spill] sm:$0xff] }
 0x5c6   : > { %v5719_v46 = vadd.f32 %v5623_v24, %v5560_v28  ;;  %v17450_v28 = vld [vmem:[#allocation129_spill] sm:$0xff] }
 0x5c8   : > { %v5878_v18 = vadd.f32 %v5782_v63, %v5719_v46  ;;  %9583 = vmatmul.msk.f32.gmra.mxu2 %vm3491_vm5, %v17446_v7 }
 0x5c9   : > { %9618 = vmatmul.msk.f32.gmra.mxu3 %vm3491_vm5, %v13787_v41  ;;  %v5785_v33 = vpop.f32.mrf.mxu0 }
 0x5cb   : > { %v5938_v56 = vpop.f32.mrf.mxu1  ;;  %v5467_v19 = vpop.f32.mrf.mxu2 }
 0x5cc   : > { %v5629_v54 = vpop.f32.mrf.mxu3  ;;  %9651 = vmatmul.msk.f32.gmra.mxu0 %vm3491_vm5, %v17447_v48  ;;  %9684 = vmatmul.msk.f32.gmra.mxu1 %vm3491_vm5, %v13752_v49  ;;  %v14239_v60 = vadd.f32 %v5938_v56, %v5878_v18  ;;  %v5561_v12 = vadd.f32 %v5467_v19, %v17449_v52  ;;  %v17451_v49 = vld [vmem:[#allocation92_spill] sm:$0xff]  ;;  %v17453_v19 = vld [vmem:[#allocation99_spill] sm:$0xff] }
 0x5ce   : > { %17448 = vst [vmem:[#allocation148_spill] sm:$0xff] %v14239_v60  ;;  %v5720_v63 = vadd.f32 %v5626_v2, %v5561_v12 }
 0x5d0   : > { %v5879_v55 = vadd.f32 %v5785_v33, %v5720_v63  ;;  %9584 = vmatmul.msk.f32.gmra.mxu2 %vm3491_vm5, %v17450_v28  ;;  %v17454_v63 = vld [vmem:[#allocation26_spill] sm:$0xff] }
 0x5d1   : > { %9619 = vmatmul.msk.f32.gmra.mxu3 %vm3491_vm5, %v13810_v10  ;;  %v5788_v24 = vpop.f32.mrf.mxu0 }
 0x5d3   : > { %v5941_v48 = vpop.f32.mrf.mxu1  ;;  %v5470_v18 = vpop.f32.mrf.mxu2 }
 0x5d4   : > { %v5632_v46 = vpop.f32.mrf.mxu3  ;;  %9652 = vmatmul.msk.f32.gmra.mxu0 %vm3491_vm5, %v13763_v9  ;;  %9685 = vmatmul.msk.f32.gmra.mxu1 %vm3491_vm5, %v17451_v49  ;;  %v14250_v56 = vadd.f32 %v5941_v48, %v5879_v55  ;;  %v5562_v52 = vadd.f32 %v5470_v18, %v17453_v19  ;;  %v17455_v9 = vld [vmem:[#allocation107_spill] sm:$0xff]  ;;  %v17456_v49 = vld [vmem:[#allocation113_spill] sm:$0xff] }
 0x5d5   : > { %v17458_v18 = vld [vmem:[#allocation155_spill] sm:$0xff] }
 0x5d6   : > { %17452 = vst [vmem:[#allocation147_spill] sm:$0xff] %v14250_v56  ;;  %v5721_v33 = vadd.f32 %v5629_v54, %v5562_v52 }
 0x5d8   : > { %v5880_v12 = vadd.f32 %v5788_v24, %v5721_v33  ;;  %9585 = vmatmul.msk.f32.gmra.mxu2 %vm3491_vm5, %v17454_v63  ;;  %v17459_v33 = vld [vmem:[#allocation132_spill] sm:$0xff] }
 0x5d9   : > { %9620 = vmatmul.msk.f32.gmra.mxu3 %vm3491_vm5, %v13829_v1  ;;  %v5791_v2 = vpop.f32.mrf.mxu0 }
 0x5db   : > { %v5944_v60 = vpop.f32.mrf.mxu1  ;;  %v5473_v55 = vpop.f32.mrf.mxu2 }
 0x5dc   : > { %v5635_v10 = vpop.f32.mrf.mxu3  ;;  %9653 = vmatmul.msk.f32.gmra.mxu0 %vm3491_vm5, %v17455_v9  ;;  %9686 = vmatmul.msk.f32.gmra.mxu1 %vm3491_vm5, %v17456_v49  ;;  %v14261_v48 = vadd.f32 %v5944_v60, %v5880_v12  ;;  %v5563_v19 = vadd.f32 %v5473_v55, %v17458_v18  ;;  %v17460_v9 = vld [vmem:[#allocation156_spill] sm:$0xff]  ;;  %v17461_v49 = vld [vmem:[#allocation106_spill] sm:$0xff] }
 0x5dd   : > { %v17462_v55 = vld [vmem:[#allocation158_spill] sm:$0xff] }
 0x5de   : > { %17457 = vst [vmem:[#allocation65_spill] sm:$0xff] %v14261_v48  ;;  %v5722_v24 = vadd.f32 %v5632_v46, %v5563_v19 }
 0x5e0   : > { %v5881_v52 = vadd.f32 %v5791_v2, %v5722_v24  ;;  %9586 = vmatmul.msk.f32.gmra.mxu2 %vm3491_vm5, %v17459_v33  ;;  %v17463_v24 = vld [vmem:[#allocation40_spill] sm:$0xff] }
 0x5e1   : > { %9621 = vmatmul.msk.f32.gmra.mxu3 %vm3491_vm5, %v13852_v44  ;;  %v5794_v54 = vpop.f32.mrf.mxu0 }
 0x5e3   : > { %v5947_v56 = vpop.f32.mrf.mxu1  ;;  %v5476_v12 = vpop.f32.mrf.mxu2 }
 0x5e4   : > { %v5638_v1 = vpop.f32.mrf.mxu3  ;;  %9654 = vmatmul.msk.f32.gmra.mxu0 %vm3491_vm5, %v17460_v9  ;;  %9687 = vmatmul.msk.f32.gmra.mxu1 %vm3491_vm5, %v17461_v49  ;;  %v14272_v60 = vadd.f32 %v5947_v56, %v5881_v52  ;;  %v5564_v18 = vadd.f32 %v5476_v12, %v17462_v55  ;;  %v17464_v9 = vld [vmem:[#allocation159_spill] sm:$0xff]  ;;  %v17466_v55 = vld [vmem:[#allocation44_spill] sm:$0xff] }
 0x5e6   : > { %v5723_v2 = vadd.f32 %v5635_v10, %v5564_v18 }
 0x5e8   : > { %v5882_v19 = vadd.f32 %v5794_v54, %v5723_v2  ;;  %9587 = vmatmul.msk.f32.gmra.mxu2 %vm3491_vm5, %v17463_v24 }
 0x5e9   : > { %9622 = vmatmul.msk.f32.gmra.mxu3 %vm3491_vm5, %v13871_v3  ;;  %v5797_v46 = vpop.f32.mrf.mxu0 }
 0x5eb   : > { %v5950_v48 = vpop.f32.mrf.mxu1  ;;  %v5479_v52 = vpop.f32.mrf.mxu2 }
 0x5ec   : > { %v5641_v44 = vpop.f32.mrf.mxu3  ;;  %9655 = vmatmul.msk.f32.gmra.mxu0 %vm3491_vm5, %v17464_v9  ;;  %9688 = vmatmul.msk.f32.gmra.mxu1 %vm3491_vm5, %v13833_v39  ;;  %v14283_v56 = vadd.f32 %v5950_v48, %v5882_v19  ;;  %v5565_v49 = vadd.f32 %v5479_v52, %v13843_v20  ;;  %v17467_v39 = vld [vmem:[#allocation161_spill] sm:$0xff]  ;;  %v17468_v19 = vld [vmem:[#allocation164_spill] sm:$0xff] }
 0x5ee   : > { %17465 = vst [vmem:[#allocation70_spill] sm:$0xff] %v14283_v56  ;;  %v5724_v54 = vadd.f32 %v5638_v1, %v5565_v49 }
 0x5f0   : > { %v5883_v12 = vadd.f32 %v5797_v46, %v5724_v54  ;;  %9588 = vmatmul.msk.f32.gmra.mxu2 %vm3491_vm5, %v17466_v55  ;;  %v17469_v54 = vld [vmem:[#allocation133_spill] sm:$0xff] }
 0x5f1   : > { %9623 = vmatmul.msk.f32.gmra.mxu3 %vm3491_vm5, %v13894_v50  ;;  %v5800_v10 = vpop.f32.mrf.mxu0 }
 0x5f3   : > { %v5953_v2 = vpop.f32.mrf.mxu1  ;;  %v5482_v20 = vpop.f32.mrf.mxu2 }
 0x5f4   : > { %v5644_v18 = vpop.f32.mrf.mxu3  ;;  %9656 = vmatmul.msk.f32.gmra.mxu0 %vm3491_vm5, %v13847_v47  ;;  %9689 = vmatmul.msk.f32.gmra.mxu1 %vm3491_vm5, %v17467_v39  ;;  %v14294_v48 = vadd.f32 %v5953_v2, %v5883_v12  ;;  %v5566_v52 = vadd.f32 %v5482_v20, %v17468_v19  ;;  %v17470_v47 = vld [vmem:[#allocation165_spill] sm:$0xff]  ;;  %v17472_v39 = vld [vmem:[#allocation168_spill] sm:$0xff] }
 0x5f6   : > { %v5725_v46 = vadd.f32 %v5641_v44, %v5566_v52  ;;  %v17473_v52 = vld [vmem:[#allocation25_spill] sm:$0xff] }
 0x5f8   : > { %v5884_v49 = vadd.f32 %v5800_v10, %v5725_v46  ;;  %9589 = vmatmul.msk.f32.gmra.mxu2 %vm3491_vm5, %v17469_v54 }
 0x5f9   : > { %9624 = vmatmul.msk.f32.gmra.mxu3 %vm3491_vm5, %v13913_v53  ;;  %v5803_v1 = vpop.f32.mrf.mxu0 }
 0x5fb   : > { %v5956_v56 = vpop.f32.mrf.mxu1  ;;  %v5485_v2 = vpop.f32.mrf.mxu2 }
 0x5fc   : > { %v5647_v50 = vpop.f32.mrf.mxu3  ;;  %9657 = vmatmul.msk.f32.gmra.mxu0 %vm3491_vm5, %v17470_v47  ;;  %9690 = vmatmul.msk.f32.gmra.mxu1 %vm3491_vm5, %v13878_v17  ;;  %v14305_v12 = vadd.f32 %v5956_v56, %v5884_v49  ;;  %v5567_v20 = vadd.f32 %v5485_v2, %v17472_v39  ;;  %v17474_v47 = vld [vmem:[#allocation169_spill] sm:$0xff]  ;;  %v17475_v17 = vld [vmem:[#allocation167_spill] sm:$0xff] }
 0x5fd   : > { %v17477_v2 = vld [vmem:[#allocation171_spill] sm:$0xff] }
 0x5fe   : > { %17471 = vst [vmem:[#allocation149_spill] sm:$0xff] %v14305_v12  ;;  %v5726_v10 = vadd.f32 %v5644_v18, %v5567_v20 }
 0x600   : > { %v5885_v19 = vadd.f32 %v5803_v1, %v5726_v10  ;;  %9590 = vmatmul.msk.f32.gmra.mxu2 %vm3491_vm5, %v17473_v52  ;;  %v17478_v10 = vld [vmem:[#allocation64_spill] sm:$0xff] }
 0x601   : > { %9625 = vmatmul.msk.f32.gmra.mxu3 %vm3491_vm5, %v13936_v15  ;;  %v5806_v44 = vpop.f32.mrf.mxu0 }
 0x603   : > { %v5959_v53 = vpop.f32.mrf.mxu1  ;;  %v5488_v49 = vpop.f32.mrf.mxu2 }
 0x604   : > { %v5650_v46 = vpop.f32.mrf.mxu3  ;;  %9658 = vmatmul.msk.f32.gmra.mxu0 %vm3491_vm5, %v17474_v47  ;;  %9691 = vmatmul.msk.f32.gmra.mxu1 %vm3491_vm5, %v17475_v17  ;;  %v14316_v56 = vadd.f32 %v5959_v53, %v5885_v19  ;;  %v5568_v39 = vadd.f32 %v5488_v49, %v17477_v2  ;;  %v17479_v47 = vld [vmem:[#allocation172_spill] sm:$0xff]  ;;  %v17480_v17 = vld [vmem:[#allocation175_spill] sm:$0xff] }
 0x605   : > { %v17482_v49 = vld [vmem:[#allocation176_spill] sm:$0xff] }
 0x606   : > { %17476 = vst [vmem:[#allocation73_spill] sm:$0xff] %v14316_v56  ;;  %v5727_v1 = vadd.f32 %v5647_v50, %v5568_v39 }
 0x608   : > { %v5886_v20 = vadd.f32 %v5806_v44, %v5727_v1  ;;  %9591 = vmatmul.msk.f32.gmra.mxu2 %vm3491_vm5, %v17478_v10  ;;  %v17483_v1 = vld [vmem:[#allocation35_spill] sm:$0xff] }
 0x609   : > { %9626 = vmatmul.msk.f32.gmra.mxu3 %vm3491_vm5, %v13955_v22  ;;  %v5809_v18 = vpop.f32.mrf.mxu0 }
 0x60b   : > { %v5962_v12 = vpop.f32.mrf.mxu1  ;;  %v5491_v19 = vpop.f32.mrf.mxu2 }
 0x60c   : > { %v5653_v15 = vpop.f32.mrf.mxu3  ;;  %9659 = vmatmul.msk.f32.gmra.mxu0 %vm3491_vm5, %v17479_v47  ;;  %9692 = vmatmul.msk.f32.gmra.mxu1 %vm3491_vm5, %v17480_v17  ;;  %v14327_v53 = vadd.f32 %v5962_v12, %v5886_v20  ;;  %v5569_v2 = vadd.f32 %v5491_v19, %v17482_v49  ;;  %v17484_v47 = vld [vmem:[#allocation177_spill] sm:$0xff]  ;;  %v17485_v17 = vld [vmem:[#allocation174_spill] sm:$0xff]  ;;  %v17486_v19 = vld [vmem:[#allocation179_spill] sm:$0xff] }
 0x60e   : > { %17481 = vst [vmem:[#allocation59_spill] sm:$0xff] %v14327_v53  ;;  %v5728_v44 = vadd.f32 %v5650_v46, %v5569_v2 }
 0x610   : > { %v5887_v39 = vadd.f32 %v5809_v18, %v5728_v44  ;;  %9592 = vmatmul.msk.f32.gmra.mxu2 %vm3491_vm5, %v17483_v1  ;;  %v17487_v44 = vld [vmem:[#allocation31_spill] sm:$0xff] }
 0x611   : > { %9627 = vmatmul.msk.f32.gmra.mxu3 %vm3491_vm5, %v13994_v0  ;;  %v5812_v50 = vpop.f32.mrf.mxu0 }
 0x613   : > { %v5965_v56 = vpop.f32.mrf.mxu1  ;;  %v5494_v20 = vpop.f32.mrf.mxu2 }
 0x614   : > { %v5656_v22 = vpop.f32.mrf.mxu3  ;;  %9660 = vmatmul.msk.f32.gmra.mxu0 %vm3491_vm5, %v17484_v47  ;;  %9693 = vmatmul.msk.f32.gmra.mxu1 %vm3491_vm5, %v17485_v17  ;;  %v14338_v12 = vadd.f32 %v5965_v56, %v5887_v39  ;;  %v5570_v49 = vadd.f32 %v5494_v20, %v17486_v19  ;;  %v17488_v47 = vld [vmem:[#allocation180_spill] sm:$0xff]  ;;  %v5593_v20 = vrot.slane %v14021_v51, 3 }
 0x616   : > { %v5729_v18 = vadd.f32 %v5653_v15, %v5570_v49  ;;  %v17490_v49 = vld [vmem:[#allocation33_spill] sm:$0xff] }
 0x618   : > { %v5888_v2 = vadd.f32 %v5812_v50, %v5729_v18  ;;  %9593 = vmatmul.msk.f32.gmra.mxu2 %vm3491_vm5, %v17487_v44 }
 0x619   : > { %9628 = vmatmul.msk.f32.gmra.mxu3 %vm3491_vm5, %v14013_v59  ;;  %v5815_v46 = vpop.f32.mrf.mxu0 }
 0x61b   : > { %v5968_v53 = vpop.f32.mrf.mxu1  ;;  %v5497_v39 = vpop.f32.mrf.mxu2 }
 0x61c   : > { %v5659_v0 = vpop.f32.mrf.mxu3  ;;  %9661 = vmatmul.msk.f32.gmra.mxu0 %vm3491_vm5, %v17488_v47  ;;  %9694 = vmatmul.msk.f32.gmra.mxu1 %vm3491_vm5, %v13957_v34  ;;  %v14349_v56 = vadd.f32 %v5968_v53, %v5888_v2  ;;  %v5571_v17 = vadd.f32 %v5497_v39, %v13979_v62  ;;  %v17491_v47 = vld [vmem:[#allocation183_spill] sm:$0xff]  ;;  %v9836_v62 = vld [vmem:[%s16458_s7 + $0x1e] sm:$0x3]  ;;  %v9768_v53 = vld [vmem:[%s16458_s7 + $0x1a] sm:$0x3]  ;;  %v5592_v2 = vrot.slane %v14015_v26, 3 }
 0x61d   : > { %9837 = vmatpush.msk.msra.mxu2 %vm3937_vm7, %v9836_v62  ;;  %9769 = vmatpush.msk.msra.mxu0 %vm3937_vm7, %v9768_v53  ;;  %v17496_v53 = vld [vmem:[#allocation46_spill] sm:$0xff] }
 0x61e   : > { %17489 = vst [vmem:[#allocation63_spill] sm:$0xff] %v14349_v56  ;;  %v5730_v50 = vadd.f32 %v5656_v22, %v5571_v17  ;;  %v9870_v22 = vld [vmem:[%s16458_s7 + $0x20] sm:$0x3]  ;;  %v5751_v56 = vrot.slane %v14015_v26, 4 }
 0x61f   : > { %9871 = vmatpush.msk.msra.mxu3 %vm3937_vm7, %v9870_v22 }
 0x620   : > { %v5889_v19 = vadd.f32 %v5815_v46, %v5730_v50  ;;  %9594 = vmatmul.msk.f32.gmra.mxu2 %vm3491_vm5, %v17490_v49  ;;  %v17492_v46 = vld [vmem:[#allocation182_spill] sm:$0xff]  ;;  %v17494_v50 = vld [vmem:[#allocation185_spill] sm:$0xff] }
 0x621   : > { %9629 = vmatmul.msk.f32.gmra.mxu3 %vm3491_vm5, %v14033_v31  ;;  %v5818_v15 = vpop.f32.mrf.mxu0  ;;  %v14378_v31 = vsel %vm4528_vm8, %v5592_v2, %v5593_v20  ;;  %v17497_v2 = vld [vmem:[#allocation186_spill] sm:$0xff] }
 0x622   : > { %17495 = vst [vmem:[#allocation154_spill] sm:$0xff] %v14378_v31 }
 0x623   : > { %v5971_v34 = vpop.f32.mrf.mxu1  ;;  %v5500_v17 = vpop.f32.mrf.mxu2 }
 0x624   : > { %v5662_v18 = vpop.f32.mrf.mxu3  ;;  %9662 = vmatmul.msk.f32.gmra.mxu0 %vm3491_vm5, %v17491_v47  ;;  %9695 = vmatmul.msk.f32.gmra.mxu1 %vm3491_vm5, %v17492_v46  ;;  %v14372_v39 = vadd.f32 %v5971_v34, %v5889_v19  ;;  %v5572_v47 = vadd.f32 %v5500_v17, %v17494_v50  ;;  %v9802_v46 = vld [vmem:[%s16458_s7 + $0x1c] sm:$0x3]  ;;  %v5595_v17 = vrot.slane %v14044_v30, 3 }
 0x625   : > { %9803 = vmatpush.msk.msra.mxu1 %vm3937_vm7, %v9802_v46  ;;  %v5434_v46 = vrot.slane %v14021_v51, 2 }
 0x626   : > { %17493 = vst [vmem:[#allocation69_spill] sm:$0xff] %v14372_v39  ;;  %v5731_v19 = vadd.f32 %v5659_v0, %v5572_v47  ;;  %v5752_v47 = vrot.slane %v14021_v51, 4 }
 0x628   : > { %v5890_v34 = vadd.f32 %v5818_v15, %v5731_v19  ;;  %9595 = vmatmul.msk.f32.gmra.mxu2 %vm3491_vm5, %v17496_v53  ;;  %v14399_v15 = vsel %vm4528_vm8, %v5593_v20, %v5595_v17  ;;  %v5433_v19 = vrot.slane %v14015_v26, 2 }
 0x629   : > { %9630 = vmatmul.msk.f32.gmra.mxu3 %vm3491_vm5, %v14378_v31  ;;  %v5821_v62 = vpop.f32.mrf.mxu0  ;;  %17499 = vst [vmem:[#allocation92_spill] sm:$0xff] %v14399_v15 }
 0x62b   : > { %v5974_v50 = vpop.f32.mrf.mxu1  ;;  %v5503_v31 = vpop.f32.mrf.mxu2 }
 0x62c   : > { %v5665_v22 = vpop.f32.mrf.mxu3  ;;  %9663 = vmatmul.msk.f32.gmra.mxu0 %vm3491_vm5, %v17497_v2  ;;  %9696 = vmatmul.msk.f32.gmra.mxu1 %vm3491_vm5, %v14015_v26  ;;  %v14393_v39 = vadd.f32 %v5974_v50, %v5890_v34  ;;  %v5573_v0 = vadd.f32 %v5503_v31, %v14025_v6  ;;  %v14406_v50 = vsel %vm806_vm2, %v5433_v19, %v5434_v46 }
 0x62d   : > { %17500 = vst [vmem:[#allocation99_spill] sm:$0xff] %v14406_v50 }
 0x62e   : > { %17498 = vst [vmem:[#allocation77_spill] sm:$0xff] %v14393_v39  ;;  %v5732_v34 = vadd.f32 %v5662_v18, %v5573_v0  ;;  %v14409_v39 = vsel %vm585_vm0, %v5751_v56, %v5752_v47  ;;  %v5436_v18 = vrot.slane %v14044_v30, 2  ;;  %v5754_v56 = vrot.slane %v14044_v30, 4 }
 0x62f   : > { %17501 = vst [vmem:[#allocation113_spill] sm:$0xff] %v14409_v39 }
 0x630   : > { %v5891_v59 = vadd.f32 %v5821_v62, %v5732_v34  ;;  %9596 = vmatmul.msk.f32.gmra.mxu2 %vm3491_vm5, %v14406_v50  ;;  %v14425_v19 = vsel %vm806_vm2, %v5434_v46, %v5436_v18  ;;  %v14428_v34 = vsel %vm585_vm0, %v5752_v47, %v5754_v56  ;;  %v17504_v18 = vld [vmem:[#allocation80_spill] sm:$0xff] }
 0x631   : > { %9631 = vmatmul.msk.f32.gmra.mxu3 %vm3491_vm5, %v14399_v15  ;;  %v5824_v2 = vpop.f32.mrf.mxu0  ;;  %17502 = vst [vmem:[#allocation155_spill] sm:$0xff] %v14425_v19 }
 0x632   : > { %17503 = vst [vmem:[#allocation106_spill] sm:$0xff] %v14428_v34 }
 0x633   : > { %v5977_v6 = vpop.f32.mrf.mxu1  ;;  %v5506_v20 = vpop.f32.mrf.mxu2 }
 0x634   : > { %v5668_v31 = vpop.f32.mrf.mxu3  ;;  %9664 = vmatmul.msk.f32.gmra.mxu0 %vm3491_vm5, %v14409_v39  ;;  %9697 = vmatmul.msk.f32.gmra.mxu1 %vm3491_vm5, %v14021_v51  ;;  %v14417_v26 = vadd.f32 %v5977_v6, %v5891_v59  ;;  %v5574_v62 = vadd.f32 %v5506_v20, %v14046_v23  ;;  %v14434_v23 = vld [vmem:[#allocation3 + $0x198] sm:$0xff] }
 0x636   : > { %v5733_v0 = vadd.f32 %v5665_v22, %v5574_v62  ;;  %v14447_v62 = vld [vmem:[#allocation3 + $0x1a0] sm:$0xff] }
 0x638   : > { %v5892_v59 = vadd.f32 %v5824_v2, %v5733_v0  ;;  %9597 = vmatmul.msk.f32.gmra.mxu2 %vm3491_vm5, %v14425_v19 }
 0x639   : > { %9736 = vmatmul.msk.f32.vlgmr.msrb.gmra.mxu3 %vm3491_vm5, %v17383_v57  ;;  %v5827_v17 = vpop.f32.mrf.mxu0 }
 0x63b   : > { %v5980_v30 = vpop.f32.mrf.mxu1  ;;  %v5509_v22 = vpop.f32.mrf.mxu2 }
 0x63c   : > { %v5671_v51 = vpop.f32.mrf.mxu3  ;;  %9665 = vmatmul.msk.f32.gmra.mxu0 %vm3491_vm5, %v14428_v34  ;;  %9698 = vmatmul.msk.f32.gmra.mxu1 %vm3491_vm5, %v14434_v23  ;;  %v14438_v57 = vadd.f32 %v5980_v30, %v5892_v59  ;;  %v5575_v46 = vadd.f32 %v5509_v22, %v14061_v14  ;;  %v17505_v22 = vld [vmem:[#allocation82_spill] sm:$0xff] }
 0x63e   : > { %v5734_v47 = vadd.f32 %v5668_v31, %v5575_v46 }
 0x640   : > { %v5893_v6 = vadd.f32 %v5827_v17, %v5734_v47  ;;  %9702 = vmatmul.msk.f32.vlgmr.msrb.gmra.mxu2 %vm3491_vm5, %v17504_v18  ;;  %v17507_v47 = vld [vmem:[#allocation84_spill] sm:$0xff] }
 0x641   : > { %9737 = vmatmul.msk.f32.gmra.mxu3 %vm3491_vm5, %v17387_v42  ;;  %v5830_v2 = vpop.f32.mrf.mxu0  ;;  %v17508_v18 = vld [vmem:[#allocation100_spill] sm:$0xff] }
 0x643   : > { %v5983_v56 = vpop.f32.mrf.mxu1  ;;  %v5512_v0 = vpop.f32.mrf.mxu2 }
 0x644   : > { %v5674_v20 = vpop.f32.mrf.mxu3  ;;  %9770 = vmatmul.msk.f32.vlgmr.msra.gmra.mxu0 %vm3491_vm5, %v13456_v40  ;;  %9699 = vmatmul.msk.f32.gmra.mxu1 %vm3491_vm5, %v14447_v62  ;;  %v14451_v14 = vadd.f32 %v5983_v56, %v5893_v6  ;;  %v5576_v42 = vadd.f32 %v5512_v0, %v14071_v45 }
 0x646   : > { %v5735_v17 = vadd.f32 %v5671_v51, %v5576_v42  ;;  %v17509_v42 = vld [vmem:[#allocation86_spill] sm:$0xff] }
 0x648   : > { %v5894_v59 = vadd.f32 %v5830_v2, %v5735_v17  ;;  %9703 = vmatmul.msk.f32.gmra.mxu2 %vm3491_vm5, %v17505_v22 }
 0x649   : > { %9738 = vmatmul.msk.f32.gmra.mxu3 %vm3491_vm5, %v17391_v35  ;;  %v5833_v31 = vpop.f32.mrf.mxu0 }
 0x64b   : > { %v5986_v40 = vpop.f32.mrf.mxu1  ;;  %v5515_v45 = vpop.f32.mrf.mxu2 }
 0x64c   : > { %v5677_v30 = vpop.f32.mrf.mxu3  ;;  %9771 = vmatmul.msk.f32.gmra.mxu0 %vm3491_vm5, %v13474_v11  ;;  %9804 = vmatmul.msk.f32.vlgmr.msra.gmra.mxu1 %vm3491_vm5, %v13432_v36  ;;  %v14462_v46 = vadd.f32 %v5986_v40, %v5894_v59  ;;  %v5577_v6 = vadd.f32 %v5515_v45, %v17507_v47  ;;  %v17510_v11 = vld [vmem:[#allocation134_spill] sm:$0xff]  ;;  %v17513_v40 = vld [vmem:[#allocation88_spill] sm:$0xff] }
 0x64d   : > { %v17511_v36 = vld [vmem:[#allocation30_spill] sm:$0xff] }
 0x64e   : > { %17506 = vst [vmem:[#allocation158_spill] sm:$0xff] %v14462_v46  ;;  %v5736_v2 = vadd.f32 %v5674_v20, %v5577_v6  ;;  %v17514_v47 = vld [vmem:[#allocation98_spill] sm:$0xff] }
 0x650   : > { %v5895_v56 = vadd.f32 %v5833_v31, %v5736_v2  ;;  %9704 = vmatmul.msk.f32.gmra.mxu2 %vm3491_vm5, %v17509_v42 }
 0x651   : > { %9739 = vmatmul.msk.f32.gmra.mxu3 %vm3491_vm5, %v17508_v18  ;;  %v5836_v51 = vpop.f32.mrf.mxu0  ;;  %v17515_v18 = vld [vmem:[#allocation94_spill] sm:$0xff] }
 0x653   : > { %v5989_v17 = vpop.f32.mrf.mxu1  ;;  %v5518_v22 = vpop.f32.mrf.mxu2 }
 0x654   : > { %v5680_v0 = vpop.f32.mrf.mxu3  ;;  %9772 = vmatmul.msk.f32.gmra.mxu0 %vm3491_vm5, %v17510_v11  ;;  %9805 = vmatmul.msk.f32.gmra.mxu1 %vm3491_vm5, %v17511_v36  ;;  %v14473_v59 = vadd.f32 %v5989_v17, %v5895_v56  ;;  %v5578_v45 = vadd.f32 %v5518_v22, %v17513_v40  ;;  %v17516_v11 = vld [vmem:[#allocation54_spill] sm:$0xff]  ;;  %v17517_v36 = vld [vmem:[#allocation37_spill] sm:$0xff]  ;;  %v17519_v22 = vld [vmem:[#allocation136_spill] sm:$0xff] }
 0x656   : > { %17512 = vst [vmem:[#allocation161_spill] sm:$0xff] %v14473_v59  ;;  %v5737_v31 = vadd.f32 %v5677_v30, %v5578_v45 }
 0x658   : > { %v5896_v6 = vadd.f32 %v5836_v51, %v5737_v31  ;;  %9705 = vmatmul.msk.f32.gmra.mxu2 %vm3491_vm5, %v17515_v18 }
 0x659   : > { %9740 = vmatmul.msk.f32.gmra.mxu3 %vm3491_vm5, %v17514_v47  ;;  %v5839_v20 = vpop.f32.mrf.mxu0  ;;  %v17520_v47 = vld [vmem:[#allocation93_spill] sm:$0xff] }
 0x65b   : > { %v5992_v46 = vpop.f32.mrf.mxu1  ;;  %v5521_v17 = vpop.f32.mrf.mxu2 }
 0x65c   : > { %v5683_v2 = vpop.f32.mrf.mxu3  ;;  %9773 = vmatmul.msk.f32.gmra.mxu0 %vm3491_vm5, %v17516_v11  ;;  %9806 = vmatmul.msk.f32.gmra.mxu1 %vm3491_vm5, %v17517_v36  ;;  %v14484_v56 = vadd.f32 %v5992_v46, %v5896_v6  ;;  %v5579_v40 = vadd.f32 %v5521_v17, %v17519_v22  ;;  %v17521_v11 = vld [vmem:[#allocation39_spill] sm:$0xff]  ;;  %v17524_v17 = vld [vmem:[#allocation90_spill] sm:$0xff] }
 0x65d   : > { %v17522_v36 = vld [vmem:[#allocation139_spill] sm:$0xff] }
 0x65e   : > { %17518 = vst [vmem:[#allocation164_spill] sm:$0xff] %v14484_v56  ;;  %v5738_v51 = vadd.f32 %v5680_v0, %v5579_v40 }
 0x660   : > { %v5897_v45 = vadd.f32 %v5839_v20, %v5738_v51  ;;  %9706 = vmatmul.msk.f32.gmra.mxu2 %vm3491_vm5, %v17520_v47 }
 0x661   : > { %9741 = vmatmul.msk.f32.gmra.mxu3 %vm3491_vm5, %v17406_v13  ;;  %v5842_v30 = vpop.f32.mrf.mxu0  ;;  %v17525_v13 = vld [vmem:[#allocation96_spill] sm:$0xff] }
 0x663   : > { %v5995_v59 = vpop.f32.mrf.mxu1  ;;  %v5524_v6 = vpop.f32.mrf.mxu2 }
 0x664   : > { %v5686_v31 = vpop.f32.mrf.mxu3  ;;  %9774 = vmatmul.msk.f32.gmra.mxu0 %vm3491_vm5, %v17521_v11  ;;  %9807 = vmatmul.msk.f32.gmra.mxu1 %vm3491_vm5, %v17522_v36  ;;  %v14495_v46 = vadd.f32 %v5995_v59, %v5897_v45  ;;  %v5580_v22 = vadd.f32 %v5524_v6, %v17524_v17  ;;  %v17526_v11 = vld [vmem:[#allocation144_spill] sm:$0xff]  ;;  %v17527_v36 = vld [vmem:[#allocation135_spill] sm:$0xff] }
 0x665   : > { %v17529_v6 = vld [vmem:[#allocation68_spill] sm:$0xff] }
 0x666   : > { %17523 = vst [vmem:[#allocation168_spill] sm:$0xff] %v14495_v46  ;;  %v5739_v20 = vadd.f32 %v5683_v2, %v5580_v22 }
 0x668   : > { %v5898_v40 = vadd.f32 %v5842_v30, %v5739_v20  ;;  %9707 = vmatmul.msk.f32.gmra.mxu2 %vm3491_vm5, %v17525_v13 }
 0x669   : > { %9742 = vmatmul.msk.f32.gmra.mxu3 %vm3491_vm5, %v17410_v61  ;;  %v5845_v0 = vpop.f32.mrf.mxu0  ;;  %v17530_v61 = vld [vmem:[#allocation102_spill] sm:$0xff] }
 0x66b   : > { %v5998_v56 = vpop.f32.mrf.mxu1  ;;  %v5527_v45 = vpop.f32.mrf.mxu2 }
 0x66c   : > { %v5689_v51 = vpop.f32.mrf.mxu3  ;;  %9775 = vmatmul.msk.f32.gmra.mxu0 %vm3491_vm5, %v17526_v11  ;;  %9808 = vmatmul.msk.f32.gmra.mxu1 %vm3491_vm5, %v17527_v36  ;;  %v14506_v59 = vadd.f32 %v5998_v56, %v5898_v40  ;;  %v5581_v17 = vadd.f32 %v5527_v45, %v17529_v6  ;;  %v17531_v11 = vld [vmem:[#allocation140_spill] sm:$0xff]  ;;  %v17532_v36 = vld [vmem:[#allocation137_spill] sm:$0xff] }
 0x66d   : > { %v17533_v45 = vld [vmem:[#allocation97_spill] sm:$0xff] }
 0x66e   : > { %17528 = vst [vmem:[#allocation167_spill] sm:$0xff] %v14506_v59  ;;  %v5740_v30 = vadd.f32 %v5686_v31, %v5581_v17 }
 0x670   : > { %v5899_v22 = vadd.f32 %v5845_v0, %v5740_v30  ;;  %9708 = vmatmul.msk.f32.gmra.mxu2 %vm3491_vm5, %v17530_v61 }
 0x671   : > { %9743 = vmatmul.msk.f32.gmra.mxu3 %vm3491_vm5, %v17413_v27  ;;  %v5848_v2 = vpop.f32.mrf.mxu0  ;;  %v17534_v27 = vld [vmem:[#allocation105_spill] sm:$0xff] }
 0x673   : > { %v6001_v46 = vpop.f32.mrf.mxu1  ;;  %v5530_v40 = vpop.f32.mrf.mxu2 }
 0x674   : > { %v5692_v20 = vpop.f32.mrf.mxu3  ;;  %9776 = vmatmul.msk.f32.gmra.mxu0 %vm3491_vm5, %v17531_v11  ;;  %9809 = vmatmul.msk.f32.gmra.mxu1 %vm3491_vm5, %v17532_v36  ;;  %v14517_v56 = vadd.f32 %v6001_v46, %v5899_v22  ;;  %v5582_v6 = vadd.f32 %v5530_v40, %v17533_v45  ;;  %v17535_v11 = vld [vmem:[#allocation146_spill] sm:$0xff]  ;;  %v17536_v36 = vld [vmem:[#allocation57_spill] sm:$0xff] }
 0x676   : > { %v5741_v0 = vadd.f32 %v5689_v51, %v5582_v6 }
 0x678   : > { %v5900_v17 = vadd.f32 %v5848_v2, %v5741_v0  ;;  %9709 = vmatmul.msk.f32.gmra.mxu2 %vm3491_vm5, %v17534_v27  ;;  %v17538_v0 = vld [vmem:[#allocation114_spill] sm:$0xff] }
 0x679   : > { %9744 = vmatmul.msk.f32.gmra.mxu3 %vm3491_vm5, %v17416_v58  ;;  %v5851_v31 = vpop.f32.mrf.mxu0 }
 0x67b   : > { %v6004_v59 = vpop.f32.mrf.mxu1  ;;  %v5533_v22 = vpop.f32.mrf.mxu2 }
 0x67c   : > { %v5695_v30 = vpop.f32.mrf.mxu3  ;;  %9777 = vmatmul.msk.f32.gmra.mxu0 %vm3491_vm5, %v17535_v11  ;;  %9810 = vmatmul.msk.f32.gmra.mxu1 %vm3491_vm5, %v17536_v36  ;;  %v14528_v46 = vadd.f32 %v6004_v59, %v5900_v17  ;;  %v5583_v40 = vadd.f32 %v5533_v22, %v14141_v5  ;;  %v17539_v36 = vld [vmem:[#allocation43_spill] sm:$0xff]  ;;  %v17541_v17 = vld [vmem:[#allocation49_spill] sm:$0xff] }
 0x67e   : > { %17537 = vst [vmem:[#allocation171_spill] sm:$0xff] %v14528_v46  ;;  %v5742_v2 = vadd.f32 %v5692_v20, %v5583_v40 }
 0x680   : > { %v5901_v45 = vadd.f32 %v5851_v31, %v5742_v2  ;;  %9710 = vmatmul.msk.f32.gmra.mxu2 %vm3491_vm5, %v17538_v0 }
 0x681   : > { %9745 = vmatmul.msk.f32.gmra.mxu3 %vm3491_vm5, %v17420_v43  ;;  %v5854_v51 = vpop.f32.mrf.mxu0  ;;  %v17542_v43 = vld [vmem:[#allocation104_spill] sm:$0xff] }
 0x683   : > { %v6007_v11 = vpop.f32.mrf.mxu1  ;;  %v5536_v5 = vpop.f32.mrf.mxu2 }
 0x684   : > { %v5698_v6 = vpop.f32.mrf.mxu3  ;;  %9778 = vmatmul.msk.f32.gmra.mxu0 %vm3491_vm5, %v13610_v16  ;;  %9811 = vmatmul.msk.f32.gmra.mxu1 %vm3491_vm5, %v17539_v36  ;;  %v14539_v59 = vadd.f32 %v6007_v11, %v5901_v45  ;;  %v5584_v22 = vadd.f32 %v5536_v5, %v17541_v17  ;;  %v17543_v16 = vld [vmem:[#allocation145_spill] sm:$0xff] }
 0x685   : > { %v17544_v36 = vld [vmem:[#allocation61_spill] sm:$0xff] }
 0x686   : > { %17540 = vst [vmem:[#allocation175_spill] sm:$0xff] %v14539_v59  ;;  %v5743_v31 = vadd.f32 %v5695_v30, %v5584_v22  ;;  %v17546_v5 = vld [vmem:[#allocation29_spill] sm:$0xff] }
 0x688   : > { %v5902_v40 = vadd.f32 %v5854_v51, %v5743_v31  ;;  %9711 = vmatmul.msk.f32.gmra.mxu2 %vm3491_vm5, %v17542_v43 }
 0x689   : > { %9746 = vmatmul.msk.f32.gmra.mxu3 %vm3491_vm5, %v17425_v38  ;;  %v5857_v20 = vpop.f32.mrf.mxu0  ;;  %v17547_v38 = vld [vmem:[#allocation112_spill] sm:$0xff] }
 0x68b   : > { %v6010_v46 = vpop.f32.mrf.mxu1  ;;  %v5539_v45 = vpop.f32.mrf.mxu2 }
 0x68c   : > { %v5701_v2 = vpop.f32.mrf.mxu3  ;;  %9779 = vmatmul.msk.f32.gmra.mxu0 %vm3491_vm5, %v17543_v16  ;;  %9812 = vmatmul.msk.f32.gmra.mxu1 %vm3491_vm5, %v17544_v36  ;;  %v14550_v11 = vadd.f32 %v6010_v46, %v5902_v40  ;;  %v5585_v17 = vadd.f32 %v5539_v45, %v17546_v5  ;;  %v17548_v16 = vld [vmem:[#allocation150_spill] sm:$0xff]  ;;  %v17549_v36 = vld [vmem:[#allocation45_spill] sm:$0xff] }
 0x68d   : > { %v17551_v45 = vld [vmem:[#allocation141_spill] sm:$0xff] }
 0x68e   : > { %17545 = vst [vmem:[#allocation176_spill] sm:$0xff] %v14550_v11  ;;  %v5744_v51 = vadd.f32 %v5698_v6, %v5585_v17 }
 0x690   : > { %v5903_v22 = vadd.f32 %v5857_v20, %v5744_v51  ;;  %9712 = vmatmul.msk.f32.gmra.mxu2 %vm3491_vm5, %v17547_v38 }
 0x691   : > { %9747 = vmatmul.msk.f32.gmra.mxu3 %vm3491_vm5, %v17430_v8  ;;  %v5860_v30 = vpop.f32.mrf.mxu0  ;;  %v17552_v8 = vld [vmem:[#allocation128_spill] sm:$0xff] }
 0x693   : > { %v6013_v59 = vpop.f32.mrf.mxu1  ;;  %v5542_v40 = vpop.f32.mrf.mxu2 }
 0x694   : > { %v5704_v31 = vpop.f32.mrf.mxu3  ;;  %9780 = vmatmul.msk.f32.gmra.mxu0 %vm3491_vm5, %v17548_v16  ;;  %9813 = vmatmul.msk.f32.gmra.mxu1 %vm3491_vm5, %v17549_v36  ;;  %v14561_v46 = vadd.f32 %v6013_v59, %v5903_v22  ;;  %v5586_v5 = vadd.f32 %v5542_v40, %v17551_v45  ;;  %v17553_v16 = vld [vmem:[#allocation153_spill] sm:$0xff]  ;;  %v17554_v36 = vld [vmem:[#allocation51_spill] sm:$0xff]  ;;  %v17556_v40 = vld [vmem:[#allocation138_spill] sm:$0xff] }
 0x696   : > { %17550 = vst [vmem:[#allocation174_spill] sm:$0xff] %v14561_v46  ;;  %v5745_v20 = vadd.f32 %v5701_v2, %v5586_v5 }
 0x698   : > { %v5904_v17 = vadd.f32 %v5860_v30, %v5745_v20  ;;  %9713 = vmatmul.msk.f32.gmra.mxu2 %vm3491_vm5, %v17552_v8 }
 0x699   : > { %9748 = vmatmul.msk.f32.gmra.mxu3 %vm3491_vm5, %v17435_v32  ;;  %v5863_v6 = vpop.f32.mrf.mxu0  ;;  %v17557_v32 = vld [vmem:[#allocation116_spill] sm:$0xff] }
 0x69b   : > { %v6016_v11 = vpop.f32.mrf.mxu1  ;;  %v5545_v22 = vpop.f32.mrf.mxu2 }
 0x69c   : > { %v5707_v51 = vpop.f32.mrf.mxu3  ;;  %9781 = vmatmul.msk.f32.gmra.mxu0 %vm3491_vm5, %v17553_v16  ;;  %9814 = vmatmul.msk.f32.gmra.mxu1 %vm3491_vm5, %v17554_v36  ;;  %v14572_v59 = vadd.f32 %v6016_v11, %v5904_v17  ;;  %v5587_v45 = vadd.f32 %v5545_v22, %v17556_v40  ;;  %v17558_v16 = vld [vmem:[#allocation78_spill] sm:$0xff]  ;;  %v17559_v36 = vld [vmem:[#allocation151_spill] sm:$0xff] }
 0x69d   : > { %v17560_v22 = vld [vmem:[#allocation142_spill] sm:$0xff] }
 0x69e   : > { %17555 = vst [vmem:[#allocation179_spill] sm:$0xff] %v14572_v59  ;;  %v5746_v30 = vadd.f32 %v5704_v31, %v5587_v45 }
 0x6a0   : > { %v5905_v5 = vadd.f32 %v5863_v6, %v5746_v30  ;;  %9714 = vmatmul.msk.f32.gmra.mxu2 %vm3491_vm5, %v17557_v32 }
 0x6a1   : > { %9749 = vmatmul.msk.f32.gmra.mxu3 %vm3491_vm5, %v17439_v25  ;;  %v5866_v2 = vpop.f32.mrf.mxu0  ;;  %v17561_v25 = vld [vmem:[#allocation117_spill] sm:$0xff] }
 0x6a3   : > { %v6019_v46 = vpop.f32.mrf.mxu1  ;;  %v5548_v17 = vpop.f32.mrf.mxu2 }
 0x6a4   : > { %v5710_v20 = vpop.f32.mrf.mxu3  ;;  %9782 = vmatmul.msk.f32.gmra.mxu0 %vm3491_vm5, %v17558_v16  ;;  %9815 = vmatmul.msk.f32.gmra.mxu1 %vm3491_vm5, %v17559_v36  ;;  %v14583_v11 = vadd.f32 %v6019_v46, %v5905_v5  ;;  %v5588_v40 = vadd.f32 %v5548_v17, %v17560_v22  ;;  %v17562_v16 = vld [vmem:[#allocation87_spill] sm:$0xff]  ;;  %v17563_v36 = vld [vmem:[#allocation152_spill] sm:$0xff] }
 0x6a6   : > { %v5747_v6 = vadd.f32 %v5707_v51, %v5588_v40 }
 0x6a8   : > { %v5906_v45 = vadd.f32 %v5866_v2, %v5747_v6  ;;  %9715 = vmatmul.msk.f32.gmra.mxu2 %vm3491_vm5, %v17561_v25  ;;  %v17565_v6 = vld [vmem:[#allocation119_spill] sm:$0xff] }
 0x6a9   : > { %9750 = vmatmul.msk.f32.gmra.mxu3 %vm3491_vm5, %v17442_v29  ;;  %v5869_v31 = vpop.f32.mrf.mxu0 }
 0x6ab   : > { %v6022_v59 = vpop.f32.mrf.mxu1  ;;  %v5551_v5 = vpop.f32.mrf.mxu2 }
 0x6ac   : > { %v5713_v30 = vpop.f32.mrf.mxu3  ;;  %9783 = vmatmul.msk.f32.gmra.mxu0 %vm3491_vm5, %v17562_v16  ;;  %9816 = vmatmul.msk.f32.gmra.mxu1 %vm3491_vm5, %v17563_v36  ;;  %v14594_v46 = vadd.f32 %v6022_v59, %v5906_v45  ;;  %v5589_v17 = vadd.f32 %v5551_v5, %v14206_v21  ;;  %v17566_v36 = vld [vmem:[#allocation67_spill] sm:$0xff]  ;;  %v17567_v45 = vld [vmem:[#allocation53_spill] sm:$0xff] }
 0x6ae   : > { %17564 = vst [vmem:[#allocation182_spill] sm:$0xff] %v14594_v46  ;;  %v5748_v2 = vadd.f32 %v5710_v20, %v5589_v17 }
 0x6b0   : > { %v5907_v22 = vadd.f32 %v5869_v31, %v5748_v2  ;;  %9716 = vmatmul.msk.f32.gmra.mxu2 %vm3491_vm5, %v17565_v6  ;;  %v17568_v2 = vld [vmem:[#allocation120_spill] sm:$0xff] }
 0x6b1   : > { %9751 = vmatmul.msk.f32.gmra.mxu3 %vm3491_vm5, %v17446_v7  ;;  %v5872_v51 = vpop.f32.mrf.mxu0 }
 0x6b3   : > { %v6025_v16 = vpop.f32.mrf.mxu1  ;;  %v5554_v21 = vpop.f32.mrf.mxu2 }
 0x6b4   : > { %v5716_v40 = vpop.f32.mrf.mxu3  ;;  %9784 = vmatmul.msk.f32.gmra.mxu0 %vm3491_vm5, %v13745_v4  ;;  %9817 = vmatmul.msk.f32.gmra.mxu1 %vm3491_vm5, %v17566_v36  ;;  %v14605_v59 = vadd.f32 %v6025_v16, %v5907_v22  ;;  %v5590_v5 = vadd.f32 %v5554_v21, %v17567_v45  ;;  %v17569_v4 = vld [vmem:[#allocation95_spill] sm:$0xff] }
 0x6b5   : > { %v17570_v36 = vld [vmem:[#allocation75_spill] sm:$0xff] }
 0x6b6   : > { %v5749_v31 = vadd.f32 %v5713_v30, %v5590_v5  ;;  %v17572_v5 = vld [vmem:[#allocation123_spill] sm:$0xff] }
 0x6b8   : > { %v5908_v17 = vadd.f32 %v5872_v51, %v5749_v31  ;;  %9717 = vmatmul.msk.f32.gmra.mxu2 %vm3491_vm5, %v17568_v2 }
 0x6b9   : > { %9752 = vmatmul.msk.f32.gmra.mxu3 %vm3491_vm5, %v17450_v28  ;;  %v5875_v20 = vpop.f32.mrf.mxu0 }
 0x6bb   : > { %v6028_v46 = vpop.f32.mrf.mxu1  ;;  %v5557_v22 = vpop.f32.mrf.mxu2 }
 0x6bc   : > { %v6257_v7 = vpop.f32.mrf.mxu3  ;;  %9785 = vmatmul.msk.f32.gmra.mxu0 %vm3491_vm5, %v17569_v4  ;;  %9818 = vmatmul.msk.f32.gmra.mxu1 %vm3491_vm5, %v17570_v36  ;;  %v14616_v16 = vadd.f32 %v6028_v46, %v5908_v17  ;;  %v5591_v21 = vadd.f32 %v5557_v22, %v14228_v37  ;;  %v17573_v36 = vld [vmem:[#allocation89_spill] sm:$0xff]  ;;  %v17575_v17 = vld [vmem:[#allocation148_spill] sm:$0xff] }
 0x6be   : > { %17571 = vst [vmem:[#allocation185_spill] sm:$0xff] %v14616_v16  ;;  %v5750_v51 = vadd.f32 %v5716_v40, %v5591_v21 }
 0x6c0   : > { %v5909_v45 = vadd.f32 %v5875_v20, %v5750_v51  ;;  %9718 = vmatmul.msk.f32.gmra.mxu2 %vm3491_vm5, %v17572_v5  ;;  %v17576_v51 = vld [vmem:[#allocation124_spill] sm:$0xff] }
 0x6c1   : > { %9753 = vmatmul.msk.f32.gmra.mxu3 %vm3491_vm5, %v17454_v63  ;;  %v6416_v30 = vpop.f32.mrf.mxu0 }
 0x6c3   : > { %v6031_v4 = vpop.f32.mrf.mxu1  ;;  %v6098_v37 = vpop.f32.mrf.mxu2 }
 0x6c4   : > { %v6260_v31 = vpop.f32.mrf.mxu3  ;;  %9786 = vmatmul.msk.f32.gmra.mxu0 %vm3491_vm5, %v13787_v41  ;;  %9819 = vmatmul.msk.f32.gmra.mxu1 %vm3491_vm5, %v17573_v36  ;;  %v14627_v46 = vadd.f32 %v6031_v4, %v5909_v45  ;;  %v6194_v22 = vadd.f32 %v6098_v37, %v17575_v17  ;;  %v17577_v41 = vld [vmem:[#allocation157_spill] sm:$0xff]  ;;  %v17578_v36 = vld [vmem:[#allocation91_spill] sm:$0xff] }
 0x6c5   : > { %v17580_v37 = vld [vmem:[#allocation147_spill] sm:$0xff] }
 0x6c6   : > { %17574 = vst [vmem:[#allocation80_spill] sm:$0xff] %v14627_v46  ;;  %v6353_v20 = vadd.f32 %v6257_v7, %v6194_v22 }
 0x6c8   : > { %v6512_v21 = vadd.f32 %v6416_v30, %v6353_v20  ;;  %9719 = vmatmul.msk.f32.gmra.mxu2 %vm3491_vm5, %v17576_v51  ;;  %v17581_v20 = vld [vmem:[#allocation122_spill] sm:$0xff] }
 0x6c9   : > { %9754 = vmatmul.msk.f32.gmra.mxu3 %vm3491_vm5, %v17459_v33  ;;  %v6419_v40 = vpop.f32.mrf.mxu0 }
 0x6cb   : > { %v6575_v16 = vpop.f32.mrf.mxu1  ;;  %v6101_v45 = vpop.f32.mrf.mxu2 }
 0x6cc   : > { %v6263_v63 = vpop.f32.mrf.mxu3  ;;  %9787 = vmatmul.msk.f32.gmra.mxu0 %vm3491_vm5, %v17577_v41  ;;  %9820 = vmatmul.msk.f32.gmra.mxu1 %vm3491_vm5, %v17578_v36  ;;  %v14638_v4 = vadd.f32 %v6575_v16, %v6512_v21  ;;  %v6195_v17 = vadd.f32 %v6101_v45, %v17580_v37  ;;  %v17582_v41 = vld [vmem:[#allocation160_spill] sm:$0xff]  ;;  %v17583_v36 = vld [vmem:[#allocation107_spill] sm:$0xff]  ;;  %v17584_v45 = vld [vmem:[#allocation65_spill] sm:$0xff] }
 0x6ce   : > { %17579 = vst [vmem:[#allocation82_spill] sm:$0xff] %v14638_v4  ;;  %v6354_v30 = vadd.f32 %v6260_v31, %v6195_v17 }
 0x6d0   : > { %v6513_v22 = vadd.f32 %v6419_v40, %v6354_v30  ;;  %9720 = vmatmul.msk.f32.gmra.mxu2 %vm3491_vm5, %v17581_v20  ;;  %v17585_v30 = vld [vmem:[#allocation36_spill] sm:$0xff] }
 0x6d1   : > { %9755 = vmatmul.msk.f32.gmra.mxu3 %vm3491_vm5, %v17463_v24  ;;  %v6422_v7 = vpop.f32.mrf.mxu0 }
 0x6d3   : > { %v6578_v46 = vpop.f32.mrf.mxu1  ;;  %v6104_v21 = vpop.f32.mrf.mxu2 }
 0x6d4   : > { %v6266_v33 = vpop.f32.mrf.mxu3  ;;  %9788 = vmatmul.msk.f32.gmra.mxu0 %vm3491_vm5, %v17582_v41  ;;  %9821 = vmatmul.msk.f32.gmra.mxu1 %vm3491_vm5, %v17583_v36  ;;  %v14649_v16 = vadd.f32 %v6578_v46, %v6513_v22  ;;  %v6196_v37 = vadd.f32 %v6104_v21, %v17584_v45  ;;  %v17586_v41 = vld [vmem:[#allocation163_spill] sm:$0xff]  ;;  %v17587_v36 = vld [vmem:[#allocation156_spill] sm:$0xff] }
 0x6d6   : > { %v6355_v40 = vadd.f32 %v6263_v63, %v6196_v37  ;;  %v17588_v37 = vld [vmem:[#allocation126_spill] sm:$0xff] }
 0x6d8   : > { %v6514_v17 = vadd.f32 %v6422_v7, %v6355_v40  ;;  %9721 = vmatmul.msk.f32.gmra.mxu2 %vm3491_vm5, %v17585_v30 }
 0x6d9   : > { %9756 = vmatmul.msk.f32.gmra.mxu3 %vm3491_vm5, %v17466_v55  ;;  %v6425_v31 = vpop.f32.mrf.mxu0 }
 0x6db   : > { %v6581_v4 = vpop.f32.mrf.mxu1  ;;  %v6107_v22 = vpop.f32.mrf.mxu2 }
 0x6dc   : > { %v6269_v24 = vpop.f32.mrf.mxu3  ;;  %9789 = vmatmul.msk.f32.gmra.mxu0 %vm3491_vm5, %v17586_v41  ;;  %9822 = vmatmul.msk.f32.gmra.mxu1 %vm3491_vm5, %v17587_v36  ;;  %v14660_v46 = vadd.f32 %v6581_v4, %v6514_v17  ;;  %v6197_v21 = vadd.f32 %v6107_v22, %v14272_v60  ;;  %v17589_v17 = vld [vmem:[#allocation70_spill] sm:$0xff] }
 0x6de   : > { %v6356_v7 = vadd.f32 %v6266_v33, %v6197_v21 }
 0x6e0   : > { %v6515_v45 = vadd.f32 %v6425_v31, %v6356_v7  ;;  %9722 = vmatmul.msk.f32.gmra.mxu2 %vm3491_vm5, %v17588_v37  ;;  %v17590_v7 = vld [vmem:[#allocation48_spill] sm:$0xff] }
 0x6e1   : > { %9757 = vmatmul.msk.f32.gmra.mxu3 %vm3491_vm5, %v17469_v54  ;;  %v6428_v63 = vpop.f32.mrf.mxu0 }
 0x6e3   : > { %v6584_v41 = vpop.f32.mrf.mxu1  ;;  %v6110_v60 = vpop.f32.mrf.mxu2 }
 0x6e4   : > { %v6272_v40 = vpop.f32.mrf.mxu3  ;;  %9790 = vmatmul.msk.f32.gmra.mxu0 %vm3491_vm5, %v13871_v3  ;;  %9823 = vmatmul.msk.f32.gmra.mxu1 %vm3491_vm5, %v17464_v9  ;;  %v14671_v4 = vadd.f32 %v6584_v41, %v6515_v45  ;;  %v6198_v22 = vadd.f32 %v6110_v60, %v17589_v17  ;;  %v17591_v3 = vld [vmem:[#allocation170_spill] sm:$0xff] }
 0x6e5   : > { %v17592_v9 = vld [vmem:[#allocation162_spill] sm:$0xff] }
 0x6e6   : > { %v6357_v31 = vadd.f32 %v6269_v24, %v6198_v22  ;;  %v17594_v22 = vld [vmem:[#allocation131_spill] sm:$0xff] }
 0x6e8   : > { %v6516_v21 = vadd.f32 %v6428_v63, %v6357_v31  ;;  %9723 = vmatmul.msk.f32.gmra.mxu2 %vm3491_vm5, %v17590_v7 }
 0x6e9   : > { %9758 = vmatmul.msk.f32.gmra.mxu3 %vm3491_vm5, %v17473_v52  ;;  %v6431_v33 = vpop.f32.mrf.mxu0 }
 0x6eb   : > { %v6587_v54 = vpop.f32.mrf.mxu1  ;;  %v6113_v45 = vpop.f32.mrf.mxu2 }
 0x6ec   : > { %v6275_v36 = vpop.f32.mrf.mxu3  ;;  %9791 = vmatmul.msk.f32.gmra.mxu0 %vm3491_vm5, %v17591_v3  ;;  %9824 = vmatmul.msk.f32.gmra.mxu1 %vm3491_vm5, %v17592_v9  ;;  %v14682_v41 = vadd.f32 %v6587_v54, %v6516_v21  ;;  %v6199_v60 = vadd.f32 %v6113_v45, %v14294_v48  ;;  %v17595_v3 = vld [vmem:[#allocation173_spill] sm:$0xff] }
 0x6ed   : > { %v17596_v9 = vld [vmem:[#allocation165_spill] sm:$0xff] }
 0x6ee   : > { %17593 = vst [vmem:[#allocation84_spill] sm:$0xff] %v14682_v41  ;;  %v6358_v63 = vadd.f32 %v6272_v40, %v6199_v60  ;;  %v17598_v21 = vld [vmem:[#allocation149_spill] sm:$0xff] }
 0x6f0   : > { %v6517_v17 = vadd.f32 %v6431_v33, %v6358_v63  ;;  %9724 = vmatmul.msk.f32.gmra.mxu2 %vm3491_vm5, %v17594_v22  ;;  %v17599_v63 = vld [vmem:[#allocation52_spill] sm:$0xff] }
 0x6f1   : > { %9759 = vmatmul.msk.f32.gmra.mxu3 %vm3491_vm5, %v17478_v10  ;;  %v6434_v24 = vpop.f32.mrf.mxu0 }
 0x6f3   : > { %v6590_v52 = vpop.f32.mrf.mxu1  ;;  %v6116_v48 = vpop.f32.mrf.mxu2 }
 0x6f4   : > { %v6278_v31 = vpop.f32.mrf.mxu3  ;;  %9792 = vmatmul.msk.f32.gmra.mxu0 %vm3491_vm5, %v17595_v3  ;;  %9825 = vmatmul.msk.f32.gmra.mxu1 %vm3491_vm5, %v17596_v9  ;;  %v14693_v54 = vadd.f32 %v6590_v52, %v6517_v17  ;;  %v6200_v45 = vadd.f32 %v6116_v48, %v17598_v21  ;;  %v17600_v3 = vld [vmem:[#allocation178_spill] sm:$0xff]  ;;  %v17601_v9 = vld [vmem:[#allocation169_spill] sm:$0xff] }
 0x6f5   : > { %v17603_v48 = vld [vmem:[#allocation73_spill] sm:$0xff] }
 0x6f6   : > { %17597 = vst [vmem:[#allocation86_spill] sm:$0xff] %v14693_v54  ;;  %v6359_v33 = vadd.f32 %v6275_v36, %v6200_v45 }
 0x6f8   : > { %v6518_v60 = vadd.f32 %v6434_v24, %v6359_v33  ;;  %9725 = vmatmul.msk.f32.gmra.mxu2 %vm3491_vm5, %v17599_v63  ;;  %v17604_v33 = vld [vmem:[#allocation56_spill] sm:$0xff] }
 0x6f9   : > { %9760 = vmatmul.msk.f32.gmra.mxu3 %vm3491_vm5, %v17483_v1  ;;  %v6437_v40 = vpop.f32.mrf.mxu0 }
 0x6fb   : > { %v6593_v41 = vpop.f32.mrf.mxu1  ;;  %v6119_v17 = vpop.f32.mrf.mxu2 }
 0x6fc   : > { %v6281_v10 = vpop.f32.mrf.mxu3  ;;  %9793 = vmatmul.msk.f32.gmra.mxu0 %vm3491_vm5, %v17600_v3  ;;  %9826 = vmatmul.msk.f32.gmra.mxu1 %vm3491_vm5, %v17601_v9  ;;  %v14704_v52 = vadd.f32 %v6593_v41, %v6518_v60  ;;  %v6201_v21 = vadd.f32 %v6119_v17, %v17603_v48  ;;  %v17605_v3 = vld [vmem:[#allocation181_spill] sm:$0xff]  ;;  %v17606_v9 = vld [vmem:[#allocation172_spill] sm:$0xff]  ;;  %v17607_v17 = vld [vmem:[#allocation59_spill] sm:$0xff] }
 0x6fe   : > { %17602 = vst [vmem:[#allocation30_spill] sm:$0xff] %v14704_v52  ;;  %v6360_v24 = vadd.f32 %v6278_v31, %v6201_v21 }
 0x700   : > { %v6519_v45 = vadd.f32 %v6437_v40, %v6360_v24  ;;  %9726 = vmatmul.msk.f32.gmra.mxu2 %vm3491_vm5, %v17604_v33  ;;  %v17608_v24 = vld [vmem:[#allocation27_spill] sm:$0xff] }
 0x701   : > { %9761 = vmatmul.msk.f32.gmra.mxu3 %vm3491_vm5, %v17487_v44  ;;  %v6440_v36 = vpop.f32.mrf.mxu0 }
 0x703   : > { %v6596_v54 = vpop.f32.mrf.mxu1  ;;  %v6122_v60 = vpop.f32.mrf.mxu2 }
 0x704   : > { %v6284_v1 = vpop.f32.mrf.mxu3  ;;  %9794 = vmatmul.msk.f32.gmra.mxu0 %vm3491_vm5, %v17605_v3  ;;  %9827 = vmatmul.msk.f32.gmra.mxu1 %vm3491_vm5, %v17606_v9  ;;  %v14715_v41 = vadd.f32 %v6596_v54, %v6519_v45  ;;  %v6202_v48 = vadd.f32 %v6122_v60, %v17607_v17  ;;  %v17609_v3 = vld [vmem:[#allocation184_spill] sm:$0xff]  ;;  %v17610_v9 = vld [vmem:[#allocation177_spill] sm:$0xff] }
 0x706   : > { %v6361_v40 = vadd.f32 %v6281_v10, %v6202_v48  ;;  %v17612_v48 = vld [vmem:[#allocation41_spill] sm:$0xff] }
 0x708   : > { %v6520_v21 = vadd.f32 %v6440_v36, %v6361_v40  ;;  %9727 = vmatmul.msk.f32.gmra.mxu2 %vm3491_vm5, %v17608_v24 }
 0x709   : > { %9762 = vmatmul.msk.f32.gmra.mxu3 %vm3491_vm5, %v17490_v49  ;;  %v6443_v31 = vpop.f32.mrf.mxu0 }
 0x70b   : > { %v6599_v52 = vpop.f32.mrf.mxu1  ;;  %v6125_v45 = vpop.f32.mrf.mxu2 }
 0x70c   : > { %v6287_v44 = vpop.f32.mrf.mxu3  ;;  %9795 = vmatmul.msk.f32.gmra.mxu0 %vm3491_vm5, %v17609_v3  ;;  %9828 = vmatmul.msk.f32.gmra.mxu1 %vm3491_vm5, %v17610_v9  ;;  %v14726_v54 = vadd.f32 %v6599_v52, %v6520_v21  ;;  %v6203_v60 = vadd.f32 %v6125_v45, %v14338_v12  ;;  %v17613_v3 = vld [vmem:[#allocation187_spill] sm:$0xff]  ;;  %v17614_v9 = vld [vmem:[#allocation180_spill] sm:$0xff] }
 0x70d   : > { %v17616_v21 = vld [vmem:[#allocation63_spill] sm:$0xff] }
 0x70e   : > { %17611 = vst [vmem:[#allocation88_spill] sm:$0xff] %v14726_v54  ;;  %v6362_v36 = vadd.f32 %v6284_v1, %v6203_v60 }
 0x710   : > { %v6521_v17 = vadd.f32 %v6443_v31, %v6362_v36  ;;  %9728 = vmatmul.msk.f32.gmra.mxu2 %vm3491_vm5, %v17612_v48  ;;  %v17617_v36 = vld [vmem:[#allocation60_spill] sm:$0xff] }
 0x711   : > { %9763 = vmatmul.msk.f32.gmra.mxu3 %vm3491_vm5, %v17496_v53  ;;  %v6446_v10 = vpop.f32.mrf.mxu0 }
 0x713   : > { %v6602_v49 = vpop.f32.mrf.mxu1  ;;  %v6128_v12 = vpop.f32.mrf.mxu2 }
 0x714   : > { %v6290_v40 = vpop.f32.mrf.mxu3  ;;  %9796 = vmatmul.msk.f32.gmra.mxu0 %vm3491_vm5, %v17613_v3  ;;  %9829 = vmatmul.msk.f32.gmra.mxu1 %vm3491_vm5, %v17614_v9  ;;  %v14737_v52 = vadd.f32 %v6602_v49, %v6521_v17  ;;  %v6204_v45 = vadd.f32 %v6128_v12, %v17616_v21  ;;  %v17618_v3 = vld [vmem:[#allocation188_spill] sm:$0xff]  ;;  %v17619_v9 = vld [vmem:[#allocation183_spill] sm:$0xff]  ;;  %v17621_v12 = vld [vmem:[#allocation69_spill] sm:$0xff] }
 0x716   : > { %17615 = vst [vmem:[#allocation94_spill] sm:$0xff] %v14737_v52  ;;  %v6363_v31 = vadd.f32 %v6287_v44, %v6204_v45  ;;  %v6226_v45 = vrot.slane %v14434_v23, 2 }
 0x718   : > { %v6522_v60 = vadd.f32 %v6446_v10, %v6363_v31  ;;  %9729 = vmatmul.msk.f32.gmra.mxu2 %vm3491_vm5, %v17617_v36  ;;  %v6227_v31 = vrot.slane %v14447_v62, 2 }
 0x719   : > { %9764 = vmatmul.msk.f32.gmra.mxu3 %vm3491_vm5, %v14406_v50  ;;  %v6449_v1 = vpop.f32.mrf.mxu0 }
 0x71b   : > { %v6605_v54 = vpop.f32.mrf.mxu1  ;;  %v6131_v17 = vpop.f32.mrf.mxu2 }
 0x71c   : > { %v6293_v53 = vpop.f32.mrf.mxu3  ;;  %9797 = vmatmul.msk.f32.gmra.mxu0 %vm3491_vm5, %v17618_v3  ;;  %9830 = vmatmul.msk.f32.gmra.mxu1 %vm3491_vm5, %v17619_v9  ;;  %v14748_v49 = vadd.f32 %v6605_v54, %v6522_v60  ;;  %v6205_v21 = vadd.f32 %v6131_v17, %v17621_v12  ;;  %v17622_v3 = vld [vmem:[#allocation189_spill] sm:$0xff]  ;;  %v17623_v9 = vld [vmem:[#allocation154_spill] sm:$0xff] }
 0x71d   : > { %v9972_v60 = vld [vmem:[%s16458_s7 + $0x26] sm:$0x3]  ;;  %v17624_v17 = vld [vmem:[#allocation186_spill] sm:$0xff] }
 0x71e   : > { %17620 = vst [vmem:[#allocation136_spill] sm:$0xff] %v14748_v49  ;;  %v6364_v10 = vadd.f32 %v6290_v40, %v6205_v21  ;;  %v9904_v40 = vld [vmem:[%s16458_s7 + $0x22] sm:$0x3]  ;;  %9973 = vmatpush.msk.msrb.mxu2 %vm3937_vm7, %v9972_v60  ;;  %v9938_v49 = vld [vmem:[%s16458_s7 + $0x24] sm:$0x3] }
 0x71f   : > { %9905 = vmatpush.msk.msrb.mxu0 %vm3937_vm7, %v9904_v40  ;;  %v14784_v60 = vld [vmem:[#allocation3 + $0x1a8] sm:$0xf]  ;;  %9939 = vmatpush.msk.msrb.mxu1 %vm3937_vm7, %v9938_v49  ;;  %v6067_v49 = vrot.slane %v14434_v23, 1 }
 0x720   : > { %v6523_v50 = vadd.f32 %v6449_v1, %v6364_v10  ;;  %9730 = vmatmul.msk.f32.gmra.mxu2 %vm3491_vm5, %v17622_v3  ;;  %v10006_v1 = vld [vmem:[%s16458_s7 + $0x28] sm:$0x3]  ;;  %v17626_v10 = vld [vmem:[#allocation77_spill] sm:$0xff] }
 0x721   : > { %9765 = vmatmul.msk.f32.gmra.mxu3 %vm3491_vm5, %v14425_v19  ;;  %v6452_v44 = vpop.f32.mrf.mxu0  ;;  %v14777_v19 = vsel %vm806_vm2, %v6226_v45, %v6227_v31  ;;  %v6229_v45 = vrot.slane %v14784_v60, 2 }
 0x722   : > { %10007 = vmatpush.msk.msrb.mxu3 %vm3937_vm7, %v10006_v1  ;;  %17627 = vst [vmem:[#allocation90_spill] sm:$0xff] %v14777_v19  ;;  %v17628_v1 = vld [vmem:[#allocation72_spill] sm:$0xff] }
 0x723   : > { %v6608_v54 = vpop.f32.mrf.mxu1  ;;  %v6134_v21 = vpop.f32.mrf.mxu2 }
 0x724   : > { %v6296_v52 = vpop.f32.mrf.mxu3  ;;  %9798 = vmatmul.msk.f32.gmra.mxu0 %vm3491_vm5, %v17623_v9  ;;  %9831 = vmatmul.msk.f32.gmra.mxu1 %vm3491_vm5, %v17624_v17  ;;  %v14771_v12 = vadd.f32 %v6608_v54, %v6523_v50  ;;  %v6206_v9 = vadd.f32 %v6134_v21, %v17626_v10 }
 0x726   : > { %17625 = vst [vmem:[#allocation93_spill] sm:$0xff] %v14771_v12  ;;  %v6365_v54 = vadd.f32 %v6293_v53, %v6206_v9  ;;  %v6068_v9 = vrot.slane %v14447_v62, 1  ;;  %v6385_v53 = vrot.slane %v14434_v23, 3  ;;  %v14802_v12 = vsel %vm806_vm2, %v6227_v31, %v6229_v45 }
 0x727   : > { %17630 = vst [vmem:[#allocation68_spill] sm:$0xff] %v14802_v12  ;;  %v6070_v31 = vrot.slane %v14784_v60, 1  ;;  %v6388_v45 = vrot.slane %v14784_v60, 3 }
 0x728   : > { %v6524_v40 = vadd.f32 %v6452_v44, %v6365_v54  ;;  %9731 = vmatmul.msk.f32.gmra.mxu2 %vm3491_vm5, %v17628_v1  ;;  %v6386_v44 = vrot.slane %v14447_v62, 3 }
 0x729   : > { %9766 = vmatmul.msk.f32.gmra.mxu3 %vm3491_vm5, %v14777_v19  ;;  %v6455_v50 = vpop.f32.mrf.mxu0 }
 0x72b   : > { %v6611_v10 = vpop.f32.mrf.mxu1  ;;  %v6137_v19 = vpop.f32.mrf.mxu2 }
 0x72c   : > { %v6299_v21 = vpop.f32.mrf.mxu3  ;;  %9799 = vmatmul.msk.f32.gmra.mxu0 %vm3491_vm5, %v14399_v15  ;;  %9832 = vmatmul.msk.f32.gmra.mxu1 %vm3491_vm5, %v14409_v39  ;;  %v14794_v17 = vadd.f32 %v6611_v10, %v6524_v40  ;;  %v6207_v54 = vadd.f32 %v6137_v19, %v14417_v26  ;;  %v14807_v10 = vsel %vm434_vm1, %v6067_v49, %v6068_v9  ;;  %v6544_v49 = vrot.slane %v14434_v23, 4 }
 0x72d   : > { %17631 = vst [vmem:[#allocation97_spill] sm:$0xff] %v14807_v10 }
 0x72e   : > { %17629 = vst [vmem:[#allocation96_spill] sm:$0xff] %v14794_v17  ;;  %v6366_v40 = vadd.f32 %v6296_v52, %v6207_v54  ;;  %v14810_v17 = vsel %vm4528_vm8, %v6385_v53, %v6386_v44  ;;  %v6545_v53 = vrot.slane %v14447_v62, 4 }
 0x72f   : > { %17632 = vst [vmem:[#allocation49_spill] sm:$0xff] %v14810_v17 }
 0x730   : > { %v6525_v15 = vadd.f32 %v6455_v50, %v6366_v40  ;;  %9732 = vmatmul.msk.f32.gmra.mxu2 %vm3491_vm5, %v14807_v10  ;;  %v14838_v62 = vsel %vm585_vm0, %v6544_v49, %v6545_v53 }
 0x731   : > { %9767 = vmatmul.msk.f32.gmra.mxu3 %vm3491_vm5, %v14802_v12  ;;  %v6458_v39 = vpop.f32.mrf.mxu0  ;;  %17635 = vst [vmem:[#allocation138_spill] sm:$0xff] %v14838_v62 }
 0x733   : > { %v6614_v26 = vpop.f32.mrf.mxu1  ;;  %v6140_v52 = vpop.f32.mrf.mxu2 }
 0x734   : > { %v6302_v1 = vpop.f32.mrf.mxu3  ;;  %9800 = vmatmul.msk.f32.gmra.mxu0 %vm3491_vm5, %v14810_v17  ;;  %9833 = vmatmul.msk.f32.gmra.mxu1 %vm3491_vm5, %v14428_v34  ;;  %v14818_v19 = vadd.f32 %v6614_v26, %v6525_v15  ;;  %v6208_v50 = vadd.f32 %v6140_v52, %v14438_v57  ;;  %v14828_v34 = vsel %vm434_vm1, %v6068_v9, %v6070_v31 }
 0x735   : > { %17633 = vst [vmem:[#allocation29_spill] sm:$0xff] %v14828_v34  ;;  %v14831_v15 = vsel %vm4528_vm8, %v6386_v44, %v6388_v45 }
 0x736   : > { %v6367_v40 = vadd.f32 %v6299_v21, %v6208_v50  ;;  %17634 = vst [vmem:[#allocation141_spill] sm:$0xff] %v14831_v15  ;;  %v10321_v50 = vld [vmem:[#allocation3 + $0x48] sm:$0xff] }
 0x738   : > { %v6526_v26 = vadd.f32 %v6458_v39, %v6367_v40  ;;  %9733 = vmatmul.msk.f32.gmra.mxu2 %vm3491_vm5, %v14828_v34  ;;  %v6547_v39 = vrot.slane %v14784_v60, 4  ;;  %v17637_v60 = vld [vmem:[#allocation158_spill] sm:$0xff] }
 0x739   : > { %9872 = vmatmul.msk.f32.vlgmr.msra.gmra.mxu3 %vm3491_vm5, %v17509_v42  ;;  %v6461_v54 = vpop.f32.mrf.mxu0 }
 0x73a   : > { %v14852_v40 = vsel %vm585_vm0, %v6545_v53, %v6547_v39  ;;  %v17638_v53 = vld [vmem:[#allocation100_spill] sm:$0xff]  ;;  %v17639_v39 = vld [vmem:[#allocation134_spill] sm:$0xff] }
 0x73b   : > { %v6617_v23 = vpop.f32.mrf.mxu1  ;;  %v6143_v21 = vpop.f32.mrf.mxu2  ;;  %17636 = vst [vmem:[#allocation142_spill] sm:$0xff] %v14852_v40 }
 0x73c   : > { %v6305_v57 = vpop.f32.mrf.mxu3  ;;  %9801 = vmatmul.msk.f32.gmra.mxu0 %vm3491_vm5, %v14831_v15  ;;  %9834 = vmatmul.msk.f32.gmra.mxu1 %vm3491_vm5, %v14838_v62  ;;  %v14842_v42 = vadd.f32 %v6617_v23, %v6526_v26  ;;  %v6209_v9 = vadd.f32 %v6143_v21, %v14451_v14 }
 0x73e   : > { %v6368_v52 = vadd.f32 %v6302_v1, %v6209_v9 }
 0x740   : > { %v6527_v31 = vadd.f32 %v6461_v54, %v6368_v52  ;;  %9838 = vmatmul.msk.f32.vlgmr.msra.gmra.mxu2 %vm3491_vm5, %v10321_v50  ;;  %v17640_v50 = vld [vmem:[#allocation161_spill] sm:$0xff] }
 0x741   : > { %9873 = vmatmul.msk.f32.gmra.mxu3 %vm3491_vm5, %v17515_v18  ;;  %v6464_v44 = vpop.f32.mrf.mxu0 }
 0x743   : > { %v6620_v49 = vpop.f32.mrf.mxu1  ;;  %v6146_v18 = vpop.f32.mrf.mxu2 }
 0x744   : > { %v6308_v45 = vpop.f32.mrf.mxu3  ;;  %9906 = vmatmul.msk.f32.vlgmr.msrb.gmra.mxu0 %vm3491_vm5, %v17391_v35  ;;  %9835 = vmatmul.msk.f32.gmra.mxu1 %vm3491_vm5, %v14852_v40  ;;  %v14856_v14 = vadd.f32 %v6620_v49, %v6527_v31  ;;  %v6210_v1 = vadd.f32 %v6146_v18, %v17637_v60  ;;  %v10322_v35 = vld [vmem:[#allocation3 + $0x50] sm:$0xff] }
 0x745   : > { %v17644_v40 = vld [vmem:[#allocation101_spill] sm:$0xff] }
 0x746   : > { %v6369_v26 = vadd.f32 %v6305_v57, %v6210_v1  ;;  %v14871_v1 = vld [vmem:[#allocation3 + $0x60] sm:$0xff] }
 0x748   : > { %v6528_v23 = vadd.f32 %v6464_v44, %v6369_v26  ;;  %9839 = vmatmul.msk.f32.gmra.mxu2 %vm3491_vm5, %v10322_v35  ;;  %v17641_v26 = vld [vmem:[#allocation98_spill] sm:$0xff] }
 0x749   : > { %9874 = vmatmul.msk.f32.gmra.mxu3 %vm3491_vm5, %v17520_v47  ;;  %v6467_v54 = vpop.f32.mrf.mxu0  ;;  %v17642_v35 = vld [vmem:[#allocation54_spill] sm:$0xff] }
 0x74b   : > { %v6623_v9 = vpop.f32.mrf.mxu1  ;;  %v6149_v31 = vpop.f32.mrf.mxu2 }
 0x74c   : > { %v6311_v21 = vpop.f32.mrf.mxu3  ;;  %9907 = vmatmul.msk.f32.gmra.mxu0 %vm3491_vm5, %v17638_v53  ;;  %9940 = vmatmul.msk.f32.vlgmr.msrb.gmra.mxu1 %vm3491_vm5, %v17639_v39  ;;  %v14866_v52 = vadd.f32 %v6623_v9, %v6528_v23  ;;  %v6211_v49 = vadd.f32 %v6149_v31, %v17640_v50  ;;  %v17643_v39 = vld [vmem:[#allocation164_spill] sm:$0xff] }
 0x74e   : > { %v6370_v44 = vadd.f32 %v6308_v45, %v6211_v49 }
 0x750   : > { %v6529_v18 = vadd.f32 %v6467_v54, %v6370_v44  ;;  %9840 = vmatmul.msk.f32.gmra.mxu2 %vm3491_vm5, %v14871_v1  ;;  %v14884_v44 = vld [vmem:[#allocation3 + $0x68] sm:$0xff] }
 0x751   : > { %9875 = vmatmul.msk.f32.gmra.mxu3 %vm3491_vm5, %v17525_v13  ;;  %v6470_v57 = vpop.f32.mrf.mxu0 }
 0x753   : > { %v6626_v23 = vpop.f32.mrf.mxu1  ;;  %v6152_v9 = vpop.f32.mrf.mxu2 }
 0x754   : > { %v6314_v60 = vpop.f32.mrf.mxu3  ;;  %9908 = vmatmul.msk.f32.gmra.mxu0 %vm3491_vm5, %v17641_v26  ;;  %9941 = vmatmul.msk.f32.gmra.mxu1 %vm3491_vm5, %v17642_v35  ;;  %v14879_v53 = vadd.f32 %v6626_v23, %v6529_v18  ;;  %v6212_v31 = vadd.f32 %v6152_v9, %v17643_v39  ;;  %v17645_v23 = vld [vmem:[#allocation39_spill] sm:$0xff]  ;;  %v17647_v39 = vld [vmem:[#allocation168_spill] sm:$0xff] }
 0x756   : > { %v6371_v54 = vadd.f32 %v6311_v21, %v6212_v31 }
 0x758   : > { %v6530_v50 = vadd.f32 %v6470_v57, %v6371_v54  ;;  %9841 = vmatmul.msk.f32.gmra.mxu2 %vm3491_vm5, %v14884_v44 }
 0x759   : > { %9876 = vmatmul.msk.f32.gmra.mxu3 %vm3491_vm5, %v17530_v61  ;;  %v6473_v45 = vpop.f32.mrf.mxu0  ;;  %v14897_v61 = vld [vmem:[#allocation3 + $0x78] sm:$0xff] }
 0x75b   : > { %v6629_v18 = vpop.f32.mrf.mxu1  ;;  %v6155_v9 = vpop.f32.mrf.mxu2 }
 0x75c   : > { %v6317_v49 = vpop.f32.mrf.mxu3  ;;  %9909 = vmatmul.msk.f32.gmra.mxu0 %vm3491_vm5, %v17644_v40  ;;  %9942 = vmatmul.msk.f32.gmra.mxu1 %vm3491_vm5, %v17645_v23  ;;  %v14892_v35 = vadd.f32 %v6629_v18, %v6530_v50  ;;  %v6213_v62 = vadd.f32 %v6155_v9, %v17647_v39  ;;  %v17648_v40 = vld [vmem:[#allocation109_spill] sm:$0xff]  ;;  %v17649_v18 = vld [vmem:[#allocation144_spill] sm:$0xff]  ;;  %v17650_v23 = vld [vmem:[#allocation167_spill] sm:$0xff] }
 0x75e   : > { %17646 = vst [vmem:[#allocation53_spill] sm:$0xff] %v14892_v35  ;;  %v6372_v57 = vadd.f32 %v6314_v60, %v6213_v62  ;;  %v14910_v35 = vld [vmem:[#allocation3 + $0x80] sm:$0xff] }
 0x760   : > { %v6531_v31 = vadd.f32 %v6473_v45, %v6372_v57  ;;  %9842 = vmatmul.msk.f32.gmra.mxu2 %vm3491_vm5, %v14897_v61 }
 0x761   : > { %9877 = vmatmul.msk.f32.gmra.mxu3 %vm3491_vm5, %v17534_v27  ;;  %v6476_v21 = vpop.f32.mrf.mxu0 }
 0x763   : > { %v6632_v50 = vpop.f32.mrf.mxu1  ;;  %v6158_v39 = vpop.f32.mrf.mxu2 }
 0x764   : > { %v6320_v54 = vpop.f32.mrf.mxu3  ;;  %9910 = vmatmul.msk.f32.gmra.mxu0 %vm3491_vm5, %v17648_v40  ;;  %9943 = vmatmul.msk.f32.gmra.mxu1 %vm3491_vm5, %v17649_v18  ;;  %v14905_v9 = vadd.f32 %v6632_v50, %v6531_v31  ;;  %v6214_v27 = vadd.f32 %v6158_v39, %v17650_v23  ;;  %v17651_v40 = vld [vmem:[#allocation110_spill] sm:$0xff]  ;;  %v17652_v50 = vld [vmem:[#allocation140_spill] sm:$0xff] }
 0x766   : > { %v6373_v60 = vadd.f32 %v6317_v49, %v6214_v27 }
 0x768   : > { %v6532_v45 = vadd.f32 %v6476_v21, %v6373_v60  ;;  %9843 = vmatmul.msk.f32.gmra.mxu2 %vm3491_vm5, %v14910_v35 }
 0x769   : > { %9878 = vmatmul.msk.f32.gmra.mxu3 %vm3491_vm5, %v17538_v0  ;;  %v6479_v62 = vpop.f32.mrf.mxu0  ;;  %v14923_v0 = vld [vmem:[#allocation3 + $0x90] sm:$0xff] }
 0x76b   : > { %v6635_v31 = vpop.f32.mrf.mxu1  ;;  %v6161_v39 = vpop.f32.mrf.mxu2 }
 0x76c   : > { %v6323_v57 = vpop.f32.mrf.mxu3  ;;  %9911 = vmatmul.msk.f32.gmra.mxu0 %vm3491_vm5, %v17651_v40  ;;  %9944 = vmatmul.msk.f32.gmra.mxu1 %vm3491_vm5, %v17652_v50  ;;  %v14918_v23 = vadd.f32 %v6635_v31, %v6532_v45  ;;  %v6215_v18 = vadd.f32 %v6161_v39, %v14517_v56  ;;  %v17654_v31 = vld [vmem:[#allocation146_spill] sm:$0xff]  ;;  %v17656_v50 = vld [vmem:[#allocation171_spill] sm:$0xff] }
 0x76e   : > { %17653 = vst [vmem:[#allocation148_spill] sm:$0xff] %v14918_v23  ;;  %v6374_v49 = vadd.f32 %v6320_v54, %v6215_v18  ;;  %v14936_v23 = vld [vmem:[#allocation3 + $0x98] sm:$0xff] }
 0x770   : > { %v6533_v21 = vadd.f32 %v6479_v62, %v6374_v49  ;;  %9844 = vmatmul.msk.f32.gmra.mxu2 %vm3491_vm5, %v14923_v0 }
 0x771   : > { %9879 = vmatmul.msk.f32.gmra.mxu3 %vm3491_vm5, %v17542_v43  ;;  %v6482_v27 = vpop.f32.mrf.mxu0 }
 0x773   : > { %v6638_v45 = vpop.f32.mrf.mxu1  ;;  %v6164_v39 = vpop.f32.mrf.mxu2 }
 0x774   : > { %v6326_v60 = vpop.f32.mrf.mxu3  ;;  %9912 = vmatmul.msk.f32.gmra.mxu0 %vm3491_vm5, %v17416_v58  ;;  %9945 = vmatmul.msk.f32.gmra.mxu1 %vm3491_vm5, %v17654_v31  ;;  %v14931_v56 = vadd.f32 %v6638_v45, %v6533_v21  ;;  %v6216_v43 = vadd.f32 %v6164_v39, %v17656_v50  ;;  %v17657_v58 = vld [vmem:[#allocation121_spill] sm:$0xff]  ;;  %v17658_v45 = vld [vmem:[#allocation143_spill] sm:$0xff] }
 0x775   : > { %v17660_v31 = vld [vmem:[#allocation175_spill] sm:$0xff] }
 0x776   : > { %17655 = vst [vmem:[#allocation147_spill] sm:$0xff] %v14931_v56  ;;  %v6375_v18 = vadd.f32 %v6323_v57, %v6216_v43  ;;  %v14949_v56 = vld [vmem:[#allocation3 + $0xa8] sm:$0xff] }
 0x778   : > { %v6534_v62 = vadd.f32 %v6482_v27, %v6375_v18  ;;  %9845 = vmatmul.msk.f32.gmra.mxu2 %vm3491_vm5, %v14936_v23 }
 0x779   : > { %9880 = vmatmul.msk.f32.gmra.mxu3 %vm3491_vm5, %v17547_v38  ;;  %v6485_v54 = vpop.f32.mrf.mxu0 }
 0x77b   : > { %v6641_v21 = vpop.f32.mrf.mxu1  ;;  %v6167_v39 = vpop.f32.mrf.mxu2 }
 0x77c   : > { %v6329_v49 = vpop.f32.mrf.mxu3  ;;  %9913 = vmatmul.msk.f32.gmra.mxu0 %vm3491_vm5, %v17657_v58  ;;  %9946 = vmatmul.msk.f32.gmra.mxu1 %vm3491_vm5, %v17658_v45  ;;  %v14944_v50 = vadd.f32 %v6641_v21, %v6534_v62  ;;  %v6217_v38 = vadd.f32 %v6167_v39, %v17660_v31  ;;  %v17661_v58 = vld [vmem:[#allocation111_spill] sm:$0xff]  ;;  %v17662_v21 = vld [vmem:[#allocation145_spill] sm:$0xff]  ;;  %v17664_v45 = vld [vmem:[#allocation176_spill] sm:$0xff] }
 0x77e   : > { %17659 = vst [vmem:[#allocation65_spill] sm:$0xff] %v14944_v50  ;;  %v6376_v57 = vadd.f32 %v6326_v60, %v6217_v38  ;;  %v14962_v50 = vld [vmem:[#allocation3 + $0xb0] sm:$0xff] }
 0x780   : > { %v6535_v27 = vadd.f32 %v6485_v54, %v6376_v57  ;;  %9846 = vmatmul.msk.f32.gmra.mxu2 %vm3491_vm5, %v14949_v56 }
 0x781   : > { %9881 = vmatmul.msk.f32.gmra.mxu3 %vm3491_vm5, %v17552_v8  ;;  %v6488_v43 = vpop.f32.mrf.mxu0 }
 0x783   : > { %v6644_v62 = vpop.f32.mrf.mxu1  ;;  %v6170_v39 = vpop.f32.mrf.mxu2 }
 0x784   : > { %v6332_v18 = vpop.f32.mrf.mxu3  ;;  %9914 = vmatmul.msk.f32.gmra.mxu0 %vm3491_vm5, %v17661_v58  ;;  %9947 = vmatmul.msk.f32.gmra.mxu1 %vm3491_vm5, %v17662_v21  ;;  %v14957_v31 = vadd.f32 %v6644_v62, %v6535_v27  ;;  %v6218_v8 = vadd.f32 %v6170_v39, %v17664_v45  ;;  %v17665_v58 = vld [vmem:[#allocation125_spill] sm:$0xff]  ;;  %v17666_v62 = vld [vmem:[#allocation150_spill] sm:$0xff] }
 0x785   : > { %v17668_v21 = vld [vmem:[#allocation174_spill] sm:$0xff] }
 0x786   : > { %17663 = vst [vmem:[#allocation126_spill] sm:$0xff] %v14957_v31  ;;  %v6377_v60 = vadd.f32 %v6329_v49, %v6218_v8  ;;  %v14975_v31 = vld [vmem:[#allocation3 + $0xc0] sm:$0xff] }
 0x788   : > { %v6536_v54 = vadd.f32 %v6488_v43, %v6377_v60  ;;  %9847 = vmatmul.msk.f32.gmra.mxu2 %vm3491_vm5, %v14962_v50 }
 0x789   : > { %9882 = vmatmul.msk.f32.gmra.mxu3 %vm3491_vm5, %v17557_v32  ;;  %v6491_v38 = vpop.f32.mrf.mxu0 }
 0x78b   : > { %v6647_v27 = vpop.f32.mrf.mxu1  ;;  %v6173_v39 = vpop.f32.mrf.mxu2 }
 0x78c   : > { %v6335_v57 = vpop.f32.mrf.mxu3  ;;  %9915 = vmatmul.msk.f32.gmra.mxu0 %vm3491_vm5, %v17665_v58  ;;  %9948 = vmatmul.msk.f32.gmra.mxu1 %vm3491_vm5, %v17666_v62  ;;  %v14970_v45 = vadd.f32 %v6647_v27, %v6536_v54  ;;  %v6219_v32 = vadd.f32 %v6173_v39, %v17668_v21  ;;  %v17669_v58 = vld [vmem:[#allocation115_spill] sm:$0xff]  ;;  %v17670_v27 = vld [vmem:[#allocation153_spill] sm:$0xff] }
 0x78d   : > { %v17671_v62 = vld [vmem:[#allocation179_spill] sm:$0xff] }
 0x78e   : > { %17667 = vst [vmem:[#allocation70_spill] sm:$0xff] %v14970_v45  ;;  %v6378_v49 = vadd.f32 %v6332_v18, %v6219_v32  ;;  %v14988_v45 = vld [vmem:[#allocation3 + $0xc8] sm:$0xff] }
 0x790   : > { %v6537_v43 = vadd.f32 %v6491_v38, %v6378_v49  ;;  %9848 = vmatmul.msk.f32.gmra.mxu2 %vm3491_vm5, %v14975_v31 }
 0x791   : > { %9883 = vmatmul.msk.f32.gmra.mxu3 %vm3491_vm5, %v17561_v25  ;;  %v6494_v8 = vpop.f32.mrf.mxu0 }
 0x793   : > { %v6650_v54 = vpop.f32.mrf.mxu1  ;;  %v6176_v39 = vpop.f32.mrf.mxu2 }
 0x794   : > { %v6338_v60 = vpop.f32.mrf.mxu3  ;;  %9916 = vmatmul.msk.f32.gmra.mxu0 %vm3491_vm5, %v17669_v58  ;;  %9949 = vmatmul.msk.f32.gmra.mxu1 %vm3491_vm5, %v17670_v27  ;;  %v14983_v21 = vadd.f32 %v6650_v54, %v6537_v43  ;;  %v6220_v25 = vadd.f32 %v6176_v39, %v17671_v62  ;;  %v17672_v58 = vld [vmem:[#allocation130_spill] sm:$0xff] }
 0x795   : > { %v17673_v54 = vld [vmem:[#allocation78_spill] sm:$0xff] }
 0x796   : > { %v6379_v18 = vadd.f32 %v6335_v57, %v6220_v25 }
 0x798   : > { %v6538_v38 = vadd.f32 %v6494_v8, %v6379_v18  ;;  %9849 = vmatmul.msk.f32.gmra.mxu2 %vm3491_vm5, %v14988_v45 }
 0x799   : > { %9884 = vmatmul.msk.f32.gmra.mxu3 %vm3491_vm5, %v17565_v6  ;;  %v6497_v32 = vpop.f32.mrf.mxu0  ;;  %v15001_v6 = vld [vmem:[#allocation3 + $0xd8] sm:$0xff] }
 0x79b   : > { %v6653_v43 = vpop.f32.mrf.mxu1  ;;  %v6179_v39 = vpop.f32.mrf.mxu2 }
 0x79c   : > { %v6341_v49 = vpop.f32.mrf.mxu3  ;;  %9917 = vmatmul.msk.f32.gmra.mxu0 %vm3491_vm5, %v17672_v58  ;;  %9950 = vmatmul.msk.f32.gmra.mxu1 %vm3491_vm5, %v17673_v54  ;;  %v14996_v62 = vadd.f32 %v6653_v43, %v6538_v38  ;;  %v6221_v27 = vadd.f32 %v6179_v39, %v14583_v11  ;;  %v17675_v43 = vld [vmem:[#allocation87_spill] sm:$0xff]  ;;  %v17676_v54 = vld [vmem:[#allocation182_spill] sm:$0xff] }
 0x79e   : > { %17674 = vst [vmem:[#allocation149_spill] sm:$0xff] %v14996_v62  ;;  %v6380_v57 = vadd.f32 %v6338_v60, %v6221_v27  ;;  %v15014_v62 = vld [vmem:[#allocation3 + $0xe0] sm:$0xff] }
 0x7a0   : > { %v6539_v8 = vadd.f32 %v6497_v32, %v6380_v57  ;;  %9850 = vmatmul.msk.f32.gmra.mxu2 %vm3491_vm5, %v15001_v6 }
 0x7a1   : > { %9885 = vmatmul.msk.f32.gmra.mxu3 %vm3491_vm5, %v17568_v2  ;;  %v6500_v25 = vpop.f32.mrf.mxu0 }
 0x7a3   : > { %v6656_v38 = vpop.f32.mrf.mxu1  ;;  %v6182_v39 = vpop.f32.mrf.mxu2 }
 0x7a4   : > { %v6344_v18 = vpop.f32.mrf.mxu3  ;;  %9918 = vmatmul.msk.f32.gmra.mxu0 %vm3491_vm5, %v17442_v29  ;;  %9951 = vmatmul.msk.f32.gmra.mxu1 %vm3491_vm5, %v17675_v43  ;;  %v15009_v11 = vadd.f32 %v6656_v38, %v6539_v8  ;;  %v6222_v2 = vadd.f32 %v6182_v39, %v17676_v54  ;;  %v17677_v29 = vld [vmem:[#allocation127_spill] sm:$0xff] }
 0x7a5   : > { %v17678_v38 = vld [vmem:[#allocation83_spill] sm:$0xff] }
 0x7a6   : > { %v6381_v27 = vadd.f32 %v6341_v49, %v6222_v2 }
 0x7a8   : > { %v6540_v32 = vadd.f32 %v6500_v25, %v6381_v27  ;;  %9851 = vmatmul.msk.f32.gmra.mxu2 %vm3491_vm5, %v15014_v62 }
 0x7a9   : > { %9886 = vmatmul.msk.f32.gmra.mxu3 %vm3491_vm5, %v17572_v5  ;;  %v6503_v60 = vpop.f32.mrf.mxu0  ;;  %v15027_v5 = vld [vmem:[#allocation3 + $0xf0] sm:$0xff] }
 0x7ab   : > { %v6659_v8 = vpop.f32.mrf.mxu1  ;;  %v6185_v39 = vpop.f32.mrf.mxu2 }
 0x7ac   : > { %v6347_v57 = vpop.f32.mrf.mxu3  ;;  %9919 = vmatmul.msk.f32.gmra.mxu0 %vm3491_vm5, %v17677_v29  ;;  %9952 = vmatmul.msk.f32.gmra.mxu1 %vm3491_vm5, %v17678_v38  ;;  %v15022_v54 = vadd.f32 %v6659_v8, %v6540_v32  ;;  %v6223_v43 = vadd.f32 %v6185_v39, %v14605_v59  ;;  %v17680_v8 = vld [vmem:[#allocation95_spill] sm:$0xff]  ;;  %v17682_v38 = vld [vmem:[#allocation185_spill] sm:$0xff] }
 0x7ae   : > { %17679 = vst [vmem:[#allocation73_spill] sm:$0xff] %v15022_v54  ;;  %v6382_v49 = vadd.f32 %v6344_v18, %v6223_v43  ;;  %v17683_v54 = vld [vmem:[#allocation26_spill] sm:$0xff] }
 0x7b0   : > { %v6541_v25 = vadd.f32 %v6503_v60, %v6382_v49  ;;  %9852 = vmatmul.msk.f32.gmra.mxu2 %vm3491_vm5, %v15027_v5  ;;  %v15040_v49 = vld [vmem:[#allocation3 + $0xf8] sm:$0xff] }
 0x7b1   : > { %9887 = vmatmul.msk.f32.gmra.mxu3 %vm3491_vm5, %v17576_v51  ;;  %v6506_v2 = vpop.f32.mrf.mxu0 }
 0x7b3   : > { %v6662_v32 = vpop.f32.mrf.mxu1  ;;  %v6188_v39 = vpop.f32.mrf.mxu2 }
 0x7b4   : > { %v6350_v27 = vpop.f32.mrf.mxu3  ;;  %9920 = vmatmul.msk.f32.gmra.mxu0 %vm3491_vm5, %v17450_v28  ;;  %9953 = vmatmul.msk.f32.gmra.mxu1 %vm3491_vm5, %v17680_v8  ;;  %v15035_v59 = vadd.f32 %v6662_v32, %v6541_v25  ;;  %v6224_v51 = vadd.f32 %v6188_v39, %v17682_v38  ;;  %v17684_v32 = vld [vmem:[#allocation103_spill] sm:$0xff]  ;;  %v17686_v8 = vld [vmem:[#allocation80_spill] sm:$0xff] }
 0x7b6   : > { %17681 = vst [vmem:[#allocation59_spill] sm:$0xff] %v15035_v59  ;;  %v6383_v43 = vadd.f32 %v6347_v57, %v6224_v51  ;;  %v17687_v59 = vld [vmem:[#allocation132_spill] sm:$0xff] }
 0x7b8   : > { %v6542_v60 = vadd.f32 %v6506_v2, %v6383_v43  ;;  %9853 = vmatmul.msk.f32.gmra.mxu2 %vm3491_vm5, %v15040_v49  ;;  %v15053_v43 = vld [vmem:[#allocation3 + $0x108] sm:$0xff] }
 0x7b9   : > { %9888 = vmatmul.msk.f32.gmra.mxu3 %vm3491_vm5, %v17581_v20  ;;  %v6509_v18 = vpop.f32.mrf.mxu0 }
 0x7bb   : > { %v6665_v25 = vpop.f32.mrf.mxu1  ;;  %v6191_v39 = vpop.f32.mrf.mxu2 }
 0x7bc   : > { %v6891_v28 = vpop.f32.mrf.mxu3  ;;  %9921 = vmatmul.msk.f32.gmra.mxu0 %vm3491_vm5, %v17683_v54  ;;  %9954 = vmatmul.msk.f32.gmra.mxu1 %vm3491_vm5, %v17684_v32  ;;  %v15048_v38 = vadd.f32 %v6665_v25, %v6542_v60  ;;  %v6225_v20 = vadd.f32 %v6191_v39, %v17686_v8  ;;  %v17688_v25 = vld [vmem:[#allocation157_spill] sm:$0xff]  ;;  %v17689_v32 = vld [vmem:[#allocation82_spill] sm:$0xff] }
 0x7be   : > { %17685 = vst [vmem:[#allocation63_spill] sm:$0xff] %v15048_v38  ;;  %v6384_v57 = vadd.f32 %v6350_v27, %v6225_v20  ;;  %v17690_v38 = vld [vmem:[#allocation40_spill] sm:$0xff] }
 0x7c0   : > { %v6543_v2 = vadd.f32 %v6509_v18, %v6384_v57  ;;  %9854 = vmatmul.msk.f32.gmra.mxu2 %vm3491_vm5, %v15053_v43  ;;  %v15066_v57 = vld [vmem:[#allocation3 + $0x110] sm:$0xff] }
 0x7c1   : > { %9889 = vmatmul.msk.f32.gmra.mxu3 %vm3491_vm5, %v17585_v30  ;;  %v7050_v51 = vpop.f32.mrf.mxu0 }
 0x7c3   : > { %v6668_v60 = vpop.f32.mrf.mxu1  ;;  %v6731_v39 = vpop.f32.mrf.mxu2 }
 0x7c4   : > { %v6894_v54 = vpop.f32.mrf.mxu3  ;;  %9922 = vmatmul.msk.f32.gmra.mxu0 %vm3491_vm5, %v17687_v59  ;;  %9955 = vmatmul.msk.f32.gmra.mxu1 %vm3491_vm5, %v17688_v25  ;;  %v15061_v8 = vadd.f32 %v6668_v60, %v6543_v2  ;;  %v6827_v30 = vadd.f32 %v6731_v39, %v17689_v32  ;;  %v17691_v60 = vld [vmem:[#allocation160_spill] sm:$0xff] }
 0x7c6   : > { %v6987_v27 = vadd.f32 %v6891_v28, %v6827_v30 }
 0x7c8   : > { %v7146_v18 = vadd.f32 %v7050_v51, %v6987_v27  ;;  %9855 = vmatmul.msk.f32.gmra.mxu2 %vm3491_vm5, %v15066_v57  ;;  %v15079_v27 = vld [vmem:[#allocation3 + $0x120] sm:$0xff] }
 0x7c9   : > { %9890 = vmatmul.msk.f32.gmra.mxu3 %vm3491_vm5, %v17588_v37  ;;  %v7053_v20 = vpop.f32.mrf.mxu0 }
 0x7cb   : > { %v7209_v2 = vpop.f32.mrf.mxu1  ;;  %v6734_v39 = vpop.f32.mrf.mxu2 }
 0x7cc   : > { %v6897_v59 = vpop.f32.mrf.mxu3  ;;  %9923 = vmatmul.msk.f32.gmra.mxu0 %vm3491_vm5, %v17690_v38  ;;  %9956 = vmatmul.msk.f32.gmra.mxu1 %vm3491_vm5, %v17691_v60  ;;  %v15074_v32 = vadd.f32 %v7209_v2, %v7146_v18  ;;  %v6828_v25 = vadd.f32 %v6734_v39, %v14649_v16  ;;  %v17692_v2 = vld [vmem:[#allocation163_spill] sm:$0xff] }
 0x7ce   : > { %v6988_v30 = vadd.f32 %v6894_v54, %v6828_v25 }
 0x7d0   : > { %v7147_v51 = vadd.f32 %v7053_v20, %v6988_v30  ;;  %9856 = vmatmul.msk.f32.gmra.mxu2 %vm3491_vm5, %v15079_v27  ;;  %v15092_v30 = vld [vmem:[#allocation3 + $0x128] sm:$0xff] }
 0x7d1   : > { %9891 = vmatmul.msk.f32.gmra.mxu3 %vm3491_vm5, %v17590_v7  ;;  %v7056_v28 = vpop.f32.mrf.mxu0  ;;  %v17693_v7 = vld [vmem:[#allocation133_spill] sm:$0xff] }
 0x7d3   : > { %v7212_v18 = vpop.f32.mrf.mxu1  ;;  %v6737_v39 = vpop.f32.mrf.mxu2 }
 0x7d4   : > { %v6900_v38 = vpop.f32.mrf.mxu3  ;;  %9924 = vmatmul.msk.f32.gmra.mxu0 %vm3491_vm5, %v17466_v55  ;;  %9957 = vmatmul.msk.f32.gmra.mxu1 %vm3491_vm5, %v17692_v2  ;;  %v15087_v16 = vadd.f32 %v7212_v18, %v7147_v51  ;;  %v6829_v60 = vadd.f32 %v6737_v39, %v14660_v46  ;;  %v17694_v18 = vld [vmem:[#allocation166_spill] sm:$0xff] }
 0x7d6   : > { %v6989_v25 = vadd.f32 %v6897_v59, %v6829_v60 }
 0x7d8   : > { %v7148_v20 = vadd.f32 %v7056_v28, %v6989_v25  ;;  %9857 = vmatmul.msk.f32.gmra.mxu2 %vm3491_vm5, %v15092_v30  ;;  %v15105_v25 = vld [vmem:[#allocation3 + $0x138] sm:$0xff] }
 0x7d9   : > { %9892 = vmatmul.msk.f32.gmra.mxu3 %vm3491_vm5, %v17594_v22  ;;  %v7059_v54 = vpop.f32.mrf.mxu0  ;;  %v17696_v22 = vld [vmem:[#allocation25_spill] sm:$0xff] }
 0x7db   : > { %v7215_v51 = vpop.f32.mrf.mxu1  ;;  %v6740_v39 = vpop.f32.mrf.mxu2 }
 0x7dc   : > { %v6903_v55 = vpop.f32.mrf.mxu3  ;;  %9925 = vmatmul.msk.f32.gmra.mxu0 %vm3491_vm5, %v17693_v7  ;;  %9958 = vmatmul.msk.f32.gmra.mxu1 %vm3491_vm5, %v17694_v18  ;;  %v15100_v46 = vadd.f32 %v7215_v51, %v7148_v20  ;;  %v6830_v2 = vadd.f32 %v6740_v39, %v14671_v4  ;;  %v17697_v51 = vld [vmem:[#allocation170_spill] sm:$0xff]  ;;  %v17699_v18 = vld [vmem:[#allocation84_spill] sm:$0xff] }
 0x7de   : > { %17695 = vst [vmem:[#allocation69_spill] sm:$0xff] %v15100_v46  ;;  %v6990_v60 = vadd.f32 %v6900_v38, %v6830_v2  ;;  %v17700_v46 = vld [vmem:[#allocation64_spill] sm:$0xff] }
 0x7e0   : > { %v7149_v28 = vadd.f32 %v7059_v54, %v6990_v60  ;;  %9858 = vmatmul.msk.f32.gmra.mxu2 %vm3491_vm5, %v15105_v25  ;;  %v15118_v60 = vld [vmem:[#allocation3 + $0x140] sm:$0xff] }
 0x7e1   : > { %9893 = vmatmul.msk.f32.gmra.mxu3 %vm3491_vm5, %v17599_v63  ;;  %v7062_v59 = vpop.f32.mrf.mxu0 }
 0x7e3   : > { %v7218_v20 = vpop.f32.mrf.mxu1  ;;  %v6743_v39 = vpop.f32.mrf.mxu2 }
 0x7e4   : > { %v6906_v7 = vpop.f32.mrf.mxu3  ;;  %9926 = vmatmul.msk.f32.gmra.mxu0 %vm3491_vm5, %v17696_v22  ;;  %9959 = vmatmul.msk.f32.gmra.mxu1 %vm3491_vm5, %v17697_v51  ;;  %v15113_v4 = vadd.f32 %v7218_v20, %v7149_v28  ;;  %v6831_v63 = vadd.f32 %v6743_v39, %v17699_v18  ;;  %v17701_v20 = vld [vmem:[#allocation173_spill] sm:$0xff]  ;;  %v17703_v51 = vld [vmem:[#allocation86_spill] sm:$0xff] }
 0x7e6   : > { %17698 = vst [vmem:[#allocation77_spill] sm:$0xff] %v15113_v4  ;;  %v6991_v2 = vadd.f32 %v6903_v55, %v6831_v63  ;;  %v17704_v4 = vld [vmem:[#allocation35_spill] sm:$0xff] }
 0x7e8   : > { %v7150_v54 = vadd.f32 %v7062_v59, %v6991_v2  ;;  %9859 = vmatmul.msk.f32.gmra.mxu2 %vm3491_vm5, %v15118_v60  ;;  %v15131_v2 = vld [vmem:[#allocation3 + $0x150] sm:$0xff] }
 0x7e9   : > { %9894 = vmatmul.msk.f32.gmra.mxu3 %vm3491_vm5, %v17604_v33  ;;  %v7065_v38 = vpop.f32.mrf.mxu0 }
 0x7eb   : > { %v7221_v28 = vpop.f32.mrf.mxu1  ;;  %v6746_v39 = vpop.f32.mrf.mxu2 }
 0x7ec   : > { %v6909_v22 = vpop.f32.mrf.mxu3  ;;  %9927 = vmatmul.msk.f32.gmra.mxu0 %vm3491_vm5, %v17700_v46  ;;  %9960 = vmatmul.msk.f32.gmra.mxu1 %vm3491_vm5, %v17701_v20  ;;  %v15126_v18 = vadd.f32 %v7221_v28, %v7150_v54  ;;  %v6832_v33 = vadd.f32 %v6746_v39, %v17703_v51  ;;  %v17705_v28 = vld [vmem:[#allocation178_spill] sm:$0xff] }
 0x7ed   : > { %v17706_v20 = vld [vmem:[#allocation30_spill] sm:$0xff] }
 0x7ee   : > { %17702 = vst [vmem:[#allocation158_spill] sm:$0xff] %v15126_v18  ;;  %v6992_v63 = vadd.f32 %v6906_v7, %v6832_v33  ;;  %v17707_v18 = vld [vmem:[#allocation31_spill] sm:$0xff] }
 0x7f0   : > { %v7151_v59 = vadd.f32 %v7065_v38, %v6992_v63  ;;  %9860 = vmatmul.msk.f32.gmra.mxu2 %vm3491_vm5, %v15131_v2  ;;  %v15144_v63 = vld [vmem:[#allocation3 + $0x158] sm:$0xff] }
 0x7f1   : > { %9895 = vmatmul.msk.f32.gmra.mxu3 %vm3491_vm5, %v17608_v24  ;;  %v7068_v55 = vpop.f32.mrf.mxu0 }
 0x7f3   : > { %v7224_v54 = vpop.f32.mrf.mxu1  ;;  %v6749_v39 = vpop.f32.mrf.mxu2 }
 0x7f4   : > { %v6912_v46 = vpop.f32.mrf.mxu3  ;;  %9928 = vmatmul.msk.f32.gmra.mxu0 %vm3491_vm5, %v17704_v4  ;;  %9961 = vmatmul.msk.f32.gmra.mxu1 %vm3491_vm5, %v17705_v28  ;;  %v15139_v51 = vadd.f32 %v7224_v54, %v7151_v59  ;;  %v6833_v24 = vadd.f32 %v6749_v39, %v17706_v20  ;;  %v17708_v54 = vld [vmem:[#allocation181_spill] sm:$0xff] }
 0x7f6   : > { %v6993_v33 = vadd.f32 %v6909_v22, %v6833_v24 }
 0x7f8   : > { %v7152_v38 = vadd.f32 %v7068_v55, %v6993_v33  ;;  %9861 = vmatmul.msk.f32.gmra.mxu2 %vm3491_vm5, %v15144_v63  ;;  %v15157_v33 = vld [vmem:[#allocation3 + $0x168] sm:$0xff] }
 0x7f9   : > { %9896 = vmatmul.msk.f32.gmra.mxu3 %vm3491_vm5, %v17612_v48  ;;  %v7071_v7 = vpop.f32.mrf.mxu0  ;;  %v17710_v48 = vld [vmem:[#allocation33_spill] sm:$0xff] }
 0x7fb   : > { %v7227_v59 = vpop.f32.mrf.mxu1  ;;  %v6752_v39 = vpop.f32.mrf.mxu2 }
 0x7fc   : > { %v6915_v4 = vpop.f32.mrf.mxu3  ;;  %9929 = vmatmul.msk.f32.gmra.mxu0 %vm3491_vm5, %v17707_v18  ;;  %9962 = vmatmul.msk.f32.gmra.mxu1 %vm3491_vm5, %v17708_v54  ;;  %v15152_v20 = vadd.f32 %v7227_v59, %v7152_v38  ;;  %v6834_v28 = vadd.f32 %v6752_v39, %v14715_v41  ;;  %v17711_v59 = vld [vmem:[#allocation184_spill] sm:$0xff] }
 0x7fd   : > { %v17713_v54 = vld [vmem:[#allocation88_spill] sm:$0xff] }
 0x7fe   : > { %17709 = vst [vmem:[#allocation100_spill] sm:$0xff] %v15152_v20  ;;  %v6994_v24 = vadd.f32 %v6912_v46, %v6834_v28  ;;  %v17715_v20 = vld [vmem:[#allocation46_spill] sm:$0xff] }
 0x800   : > { %v7153_v55 = vadd.f32 %v7071_v7, %v6994_v24  ;;  %9862 = vmatmul.msk.f32.gmra.mxu2 %vm3491_vm5, %v15157_v33  ;;  %v15170_v24 = vld [vmem:[#allocation3 + $0x170] sm:$0xff] }
 0x801   : > { %9897 = vmatmul.msk.f32.gmra.mxu3 %vm3491_vm5, %v17617_v36  ;;  %v7074_v22 = vpop.f32.mrf.mxu0  ;;  %17714 = vst [vmem:[#allocation161_spill] sm:$0xff] %v15170_v24 }
 0x803   : > { %v7230_v38 = vpop.f32.mrf.mxu1  ;;  %v6755_v39 = vpop.f32.mrf.mxu2 }
 0x804   : > { %v6918_v18 = vpop.f32.mrf.mxu3  ;;  %9930 = vmatmul.msk.f32.gmra.mxu0 %vm3491_vm5, %v17710_v48  ;;  %9963 = vmatmul.msk.f32.gmra.mxu1 %vm3491_vm5, %v17711_v59  ;;  %v15165_v41 = vadd.f32 %v7230_v38, %v7153_v55  ;;  %v6835_v36 = vadd.f32 %v6755_v39, %v17713_v54  ;;  %v17716_v38 = vld [vmem:[#allocation187_spill] sm:$0xff]  ;;  %v17718_v59 = vld [vmem:[#allocation94_spill] sm:$0xff] }
 0x806   : > { %17712 = vst [vmem:[#allocation134_spill] sm:$0xff] %v15165_v41  ;;  %v6995_v28 = vadd.f32 %v6915_v4, %v6835_v36  ;;  %v17719_v36 = vld [vmem:[#allocation72_spill] sm:$0xff]  ;;  %v15183_v41 = vld [vmem:[#allocation3 + $0x180] sm:$0xff] }
 0x807   : > { %17720 = vst [vmem:[#allocation54_spill] sm:$0xff] %v15183_v41 }
 0x808   : > { %v7154_v7 = vadd.f32 %v7074_v22, %v6995_v28  ;;  %9863 = vmatmul.msk.f32.gmra.mxu2 %vm3491_vm5, %v15170_v24  ;;  %v17721_v24 = vld [vmem:[#allocation99_spill] sm:$0xff] }
 0x809   : > { %9898 = vmatmul.msk.f32.gmra.mxu3 %vm3491_vm5, %v17622_v3  ;;  %v7077_v46 = vpop.f32.mrf.mxu0 }
 0x80b   : > { %v7233_v55 = vpop.f32.mrf.mxu1  ;;  %v6758_v39 = vpop.f32.mrf.mxu2 }
 0x80c   : > { %v6921_v48 = vpop.f32.mrf.mxu3  ;;  %9931 = vmatmul.msk.f32.gmra.mxu0 %vm3491_vm5, %v17715_v20  ;;  %9964 = vmatmul.msk.f32.gmra.mxu1 %vm3491_vm5, %v17716_v38  ;;  %v15178_v54 = vadd.f32 %v7233_v55, %v7154_v7  ;;  %v6836_v3 = vadd.f32 %v6758_v39, %v17718_v59  ;;  %v17722_v55 = vld [vmem:[#allocation188_spill] sm:$0xff] }
 0x80d   : > { %v17724_v38 = vld [vmem:[#allocation136_spill] sm:$0xff] }
 0x80e   : > { %17717 = vst [vmem:[#allocation98_spill] sm:$0xff] %v15178_v54  ;;  %v6996_v22 = vadd.f32 %v6918_v18, %v6836_v3  ;;  %v17726_v54 = vld [vmem:[#allocation155_spill] sm:$0xff] }
 0x810   : > { %v7155_v28 = vadd.f32 %v7077_v46, %v6996_v22  ;;  %9864 = vmatmul.msk.f32.gmra.mxu2 %vm3491_vm5, %v15183_v41  ;;  %v15196_v22 = vld [vmem:[#allocation3 + $0x188] sm:$0xff] }
 0x811   : > { %9899 = vmatmul.msk.f32.gmra.mxu3 %vm3491_vm5, %v17719_v36  ;;  %v7080_v4 = vpop.f32.mrf.mxu0  ;;  %17725 = vst [vmem:[#allocation168_spill] sm:$0xff] %v15196_v22 }
 0x813   : > { %v7236_v7 = vpop.f32.mrf.mxu1  ;;  %v6761_v39 = vpop.f32.mrf.mxu2 }
 0x814   : > { %v6924_v20 = vpop.f32.mrf.mxu3  ;;  %9932 = vmatmul.msk.f32.gmra.mxu0 %vm3491_vm5, %v17721_v24  ;;  %9965 = vmatmul.msk.f32.gmra.mxu1 %vm3491_vm5, %v17722_v55  ;;  %v15191_v59 = vadd.f32 %v7236_v7, %v7155_v28  ;;  %v6837_v36 = vadd.f32 %v6761_v39, %v17724_v38  ;;  %v17727_v7 = vld [vmem:[#allocation154_spill] sm:$0xff]  ;;  %v15206_v55 = vld [vmem:[#allocation3 + $0x1b0] sm:$0xff] }
 0x816   : > { %17723 = vst [vmem:[#allocation164_spill] sm:$0xff] %v15191_v59  ;;  %v6997_v18 = vadd.f32 %v6921_v48, %v6837_v36  ;;  %v15208_v48 = vld [vmem:[#allocation3 + $0x1b8] sm:$0xff]  ;;  %v17729_v36 = vld [vmem:[#allocation93_spill] sm:$0xff] }
 0x817   : > { %v6861_v59 = vrot.slane %v15208_v48, 1 }
 0x818   : > { %v7156_v46 = vadd.f32 %v7080_v4, %v6997_v18  ;;  %9865 = vmatmul.msk.f32.gmra.mxu2 %vm3491_vm5, %v15196_v22 }
 0x819   : > { %9900 = vmatmul.msk.f32.gmra.mxu3 %vm3491_vm5, %v14807_v10  ;;  %v7083_v3 = vpop.f32.mrf.mxu0 }
 0x81b   : > { %v7239_v28 = vpop.f32.mrf.mxu1  ;;  %v6764_v39 = vpop.f32.mrf.mxu2 }
 0x81c   : > { %v6927_v24 = vpop.f32.mrf.mxu3  ;;  %9933 = vmatmul.msk.f32.gmra.mxu0 %vm3491_vm5, %v17726_v54  ;;  %9966 = vmatmul.msk.f32.gmra.mxu1 %vm3491_vm5, %v17727_v7  ;;  %v15204_v38 = vadd.f32 %v7239_v28, %v7156_v46  ;;  %v6838_v4 = vadd.f32 %v6764_v39, %v17729_v36  ;;  %v6860_v54 = vrot.slane %v15206_v55, 1  ;;  %v15215_v7 = vld [vmem:[#allocation3 + $0x198] sm:$0xff] }
 0x81d   : > { %17730 = vst [vmem:[#allocation110_spill] sm:$0xff] %v15215_v7  ;;  %v17731_v28 = vld [vmem:[#allocation90_spill] sm:$0xff] }
 0x81e   : > { %17728 = vst [vmem:[#allocation167_spill] sm:$0xff] %v15204_v38  ;;  %v6998_v10 = vadd.f32 %v6924_v20, %v6838_v4  ;;  %v10108_v36 = vld [vmem:[%s16458_s7 + $0x2e] sm:$0x3]  ;;  %v10040_v20 = vld [vmem:[%s16458_s7 + $0x2a] sm:$0x3]  ;;  %v17732_v4 = vld [vmem:[#allocation92_spill] sm:$0xff] }
 0x81f   : > { %10109 = vmatpush.msk.msra.mxu2 %vm3937_vm7, %v10108_v36  ;;  %10041 = vmatpush.msk.msra.mxu0 %vm3937_vm7, %v10040_v20  ;;  %v15240_v38 = vld [vmem:[#allocation3 + $0x1c0] sm:$0xf]  ;;  %v10074_v36 = vld [vmem:[%s16458_s7 + $0x2c] sm:$0x3] }
 0x820   : > { %v7157_v22 = vadd.f32 %v7083_v3, %v6998_v10  ;;  %9866 = vmatmul.msk.f32.gmra.mxu2 %vm3491_vm5, %v15215_v7  ;;  %v10142_v10 = vld [vmem:[%s16458_s7 + $0x30] sm:$0x3]  ;;  %v15234_v3 = vsel %vm434_vm1, %v6860_v54, %v6861_v59  ;;  %v17735_v7 = vld [vmem:[#allocation96_spill] sm:$0xff]  ;;  %10075 = vmatpush.msk.msra.mxu1 %vm3937_vm7, %v10074_v36 }
 0x821   : > { %9901 = vmatmul.msk.f32.gmra.mxu3 %vm3491_vm5, %v14828_v34  ;;  %v7086_v18 = vpop.f32.mrf.mxu0  ;;  %17733 = vst [vmem:[#allocation171_spill] sm:$0xff] %v15234_v3 }
 0x822   : > { %10143 = vmatpush.msk.msra.mxu3 %vm3937_vm7, %v10142_v10  ;;  %v15250_v10 = vld [vmem:[#allocation3 + $0x1a0] sm:$0xff] }
 0x823   : > { %v7242_v39 = vpop.f32.mrf.mxu1  ;;  %v6767_v34 = vpop.f32.mrf.mxu2  ;;  %17736 = vst [vmem:[#allocation176_spill] sm:$0xff] %v15250_v10 }
 0x824   : > { %v6930_v46 = vpop.f32.mrf.mxu3  ;;  %9934 = vmatmul.msk.f32.gmra.mxu0 %vm3491_vm5, %v17731_v28  ;;  %9967 = vmatmul.msk.f32.gmra.mxu1 %vm3491_vm5, %v17732_v4  ;;  %v15236_v28 = vadd.f32 %v7242_v39, %v7157_v22  ;;  %v6839_v4 = vadd.f32 %v6767_v34, %v17735_v7  ;;  %v6863_v39 = vrot.slane %v15240_v38, 1 }
 0x826   : > { %17734 = vst [vmem:[#allocation175_spill] sm:$0xff] %v15236_v28  ;;  %v6999_v22 = vadd.f32 %v6927_v24, %v6839_v4  ;;  %v7019_v28 = vrot.slane %v15206_v55, 2  ;;  %v15261_v24 = vsel %vm434_vm1, %v6861_v59, %v6863_v39  ;;  %v7022_v39 = vrot.slane %v15240_v38, 2 }
 0x828   : > { %v7158_v20 = vadd.f32 %v7086_v18, %v6999_v22  ;;  %9867 = vmatmul.msk.f32.gmra.mxu2 %vm3491_vm5, %v15250_v10 }
 0x829   : > { %9902 = vmatmul.msk.f32.gmra.mxu3 %vm3491_vm5, %v15234_v3  ;;  %v7089_v54 = vpop.f32.mrf.mxu0  ;;  %v7020_v3 = vrot.slane %v15208_v48, 2 }
 0x82b   : > { %v7245_v7 = vpop.f32.mrf.mxu1  ;;  %v6770_v4 = vpop.f32.mrf.mxu2 }
 0x82c   : > { %v6933_v34 = vpop.f32.mrf.mxu3  ;;  %9935 = vmatmul.msk.f32.gmra.mxu0 %vm3491_vm5, %v14802_v12  ;;  %9968 = vmatmul.msk.f32.gmra.mxu1 %vm3491_vm5, %v14810_v17  ;;  %v15263_v18 = vadd.f32 %v7245_v7, %v7158_v20  ;;  %v6840_v36 = vadd.f32 %v6770_v4, %v14818_v19  ;;  %v15269_v12 = vsel %vm806_vm2, %v7019_v28, %v7020_v3  ;;  %v7178_v28 = vrot.slane %v15206_v55, 3 }
 0x82d   : > { %v15286_v7 = vsel %vm806_vm2, %v7020_v3, %v7022_v39  ;;  %v7181_v3 = vrot.slane %v15240_v38, 3 }
 0x82e   : > { %v7000_v10 = vadd.f32 %v6930_v46, %v6840_v36  ;;  %v7179_v46 = vrot.slane %v15208_v48, 3 }
 0x830   : > { %v7159_v41 = vadd.f32 %v7089_v54, %v7000_v10  ;;  %9868 = vmatmul.msk.f32.gmra.mxu2 %vm3491_vm5, %v15206_v55  ;;  %v15289_v36 = vsel %vm4528_vm8, %v7178_v28, %v7179_v46 }
 0x831   : > { %9903 = vmatmul.msk.f32.gmra.mxu3 %vm3491_vm5, %v15261_v24  ;;  %v7092_v22 = vpop.f32.mrf.mxu0  ;;  %17737 = vst [vmem:[#allocation174_spill] sm:$0xff] %v15289_v36 }
 0x833   : > { %v7248_v59 = vpop.f32.mrf.mxu1  ;;  %v6773_v54 = vpop.f32.mrf.mxu2 }
 0x834   : > { %v6936_v17 = vpop.f32.mrf.mxu3  ;;  %9936 = vmatmul.msk.f32.gmra.mxu0 %vm3491_vm5, %v15269_v12  ;;  %9969 = vmatmul.msk.f32.gmra.mxu1 %vm3491_vm5, %v14831_v15  ;;  %v15278_v19 = vadd.f32 %v7248_v59, %v7159_v41  ;;  %v6841_v20 = vadd.f32 %v6773_v54, %v14842_v42  ;;  %v15304_v54 = vsel %vm4528_vm8, %v7179_v46, %v7181_v3  ;;  %v17739_v15 = vld [vmem:[#allocation37_spill] sm:$0xff] }
 0x835   : > { %17738 = vst [vmem:[#allocation179_spill] sm:$0xff] %v15304_v54 }
 0x836   : > { %v7001_v4 = vadd.f32 %v6933_v34, %v6841_v20 }
 0x838   : > { %v7160_v41 = vadd.f32 %v7092_v22, %v7001_v4  ;;  %9869 = vmatmul.msk.f32.gmra.mxu2 %vm3491_vm5, %v15208_v48 }
 0x839   : > { %10008 = vmatmul.msk.f32.vlgmr.msrb.gmra.mxu3 %vm3491_vm5, %v14871_v1  ;;  %v7095_v10 = vpop.f32.mrf.mxu0 }
 0x83b   : > { %v7251_v42 = vpop.f32.mrf.mxu1  ;;  %v6776_v34 = vpop.f32.mrf.mxu2 }
 0x83c   : > { %v6939_v59 = vpop.f32.mrf.mxu3  ;;  %9937 = vmatmul.msk.f32.gmra.mxu0 %vm3491_vm5, %v15286_v7  ;;  %9970 = vmatmul.msk.f32.gmra.mxu1 %vm3491_vm5, %v15289_v36  ;;  %v15297_v1 = vadd.f32 %v7251_v42, %v7160_v41  ;;  %v6842_v39 = vadd.f32 %v6776_v34, %v14856_v14 }
 0x83e   : > { %v7002_v28 = vadd.f32 %v6936_v17, %v6842_v39 }
 0x840   : > { %v7161_v20 = vadd.f32 %v7095_v10, %v7002_v28  ;;  %9974 = vmatmul.msk.f32.vlgmr.msrb.gmra.mxu2 %vm3491_vm5, %v17739_v15  ;;  %v17740_v15 = vld [vmem:[#allocation139_spill] sm:$0xff] }
 0x841   : > { %10009 = vmatmul.msk.f32.gmra.mxu3 %vm3491_vm5, %v14884_v44  ;;  %v7098_v22 = vpop.f32.mrf.mxu0 }
 0x843   : > { %v7254_v41 = vpop.f32.mrf.mxu1  ;;  %v6779_v44 = vpop.f32.mrf.mxu2 }
 0x844   : > { %v6942_v4 = vpop.f32.mrf.mxu3  ;;  %10042 = vmatmul.msk.f32.vlgmr.msra.gmra.mxu0 %vm3491_vm5, %v17520_v47  ;;  %9971 = vmatmul.msk.f32.gmra.mxu1 %vm3491_vm5, %v15304_v54  ;;  %v15312_v14 = vadd.f32 %v7254_v41, %v7161_v20  ;;  %v6843_v17 = vadd.f32 %v6779_v44, %v14866_v52  ;;  %v17741_v20 = vld [vmem:[#allocation135_spill] sm:$0xff] }
 0x846   : > { %v7003_v10 = vadd.f32 %v6939_v59, %v6843_v17  ;;  %v17744_v17 = vld [vmem:[#allocation53_spill] sm:$0xff] }
 0x848   : > { %v7162_v42 = vadd.f32 %v7098_v22, %v7003_v10  ;;  %9975 = vmatmul.msk.f32.gmra.mxu2 %vm3491_vm5, %v17740_v15  ;;  %v17745_v15 = vld [vmem:[#allocation137_spill] sm:$0xff] }
 0x849   : > { %10010 = vmatmul.msk.f32.gmra.mxu3 %vm3491_vm5, %v14897_v61  ;;  %v7101_v46 = vpop.f32.mrf.mxu0 }
 0x84b   : > { %v7257_v47 = vpop.f32.mrf.mxu1  ;;  %v6782_v52 = vpop.f32.mrf.mxu2 }
 0x84c   : > { %v6945_v3 = vpop.f32.mrf.mxu3  ;;  %10043 = vmatmul.msk.f32.gmra.mxu0 %vm3491_vm5, %v17525_v13  ;;  %10076 = vmatmul.msk.f32.vlgmr.msra.gmra.mxu1 %vm3491_vm5, %v17641_v26  ;;  %v15323_v34 = vadd.f32 %v7257_v47, %v7162_v42  ;;  %v6844_v39 = vadd.f32 %v6782_v52, %v14879_v53  ;;  %v17742_v13 = vld [vmem:[#allocation102_spill] sm:$0xff]  ;;  %v17743_v26 = vld [vmem:[#allocation101_spill] sm:$0xff] }
 0x84d   : > { %v17746_v47 = vld [vmem:[#allocation105_spill] sm:$0xff] }
 0x84e   : > { %v7004_v59 = vadd.f32 %v6942_v4, %v6844_v39  ;;  %v17747_v39 = vld [vmem:[#allocation109_spill] sm:$0xff] }
 0x850   : > { %v7163_v22 = vadd.f32 %v7101_v46, %v7004_v59  ;;  %9976 = vmatmul.msk.f32.gmra.mxu2 %vm3491_vm5, %v17741_v20 }
 0x851   : > { %10011 = vmatmul.msk.f32.gmra.mxu3 %vm3491_vm5, %v14910_v35  ;;  %v7104_v61 = vpop.f32.mrf.mxu0 }
 0x853   : > { %v7260_v41 = vpop.f32.mrf.mxu1  ;;  %v6785_v53 = vpop.f32.mrf.mxu2 }
 0x854   : > { %v6948_v28 = vpop.f32.mrf.mxu3  ;;  %10044 = vmatmul.msk.f32.gmra.mxu0 %vm3491_vm5, %v17742_v13  ;;  %10077 = vmatmul.msk.f32.gmra.mxu1 %vm3491_vm5, %v17743_v26  ;;  %v15334_v44 = vadd.f32 %v7260_v41, %v7163_v22  ;;  %v6845_v10 = vadd.f32 %v6785_v53, %v17744_v17  ;;  %v17748_v26 = vld [vmem:[#allocation57_spill] sm:$0xff]  ;;  %v17749_v53 = vld [vmem:[#allocation114_spill] sm:$0xff] }
 0x856   : > { %v7005_v4 = vadd.f32 %v6945_v3, %v6845_v10 }
 0x858   : > { %v7164_v46 = vadd.f32 %v7104_v61, %v7005_v4  ;;  %9977 = vmatmul.msk.f32.gmra.mxu2 %vm3491_vm5, %v17745_v15  ;;  %v17750_v4 = vld [vmem:[#allocation148_spill] sm:$0xff] }
 0x859   : > { %10012 = vmatmul.msk.f32.gmra.mxu3 %vm3491_vm5, %v14923_v0  ;;  %v7107_v35 = vpop.f32.mrf.mxu0 }
 0x85b   : > { %v7263_v52 = vpop.f32.mrf.mxu1  ;;  %v6788_v22 = vpop.f32.mrf.mxu2 }
 0x85c   : > { %v6951_v42 = vpop.f32.mrf.mxu3  ;;  %10045 = vmatmul.msk.f32.gmra.mxu0 %vm3491_vm5, %v17746_v47  ;;  %10078 = vmatmul.msk.f32.gmra.mxu1 %vm3491_vm5, %v17747_v39  ;;  %v15345_v59 = vadd.f32 %v7263_v52, %v7164_v46  ;;  %v6846_v13 = vadd.f32 %v6788_v22, %v14905_v9  ;;  %v17751_v52 = vld [vmem:[#allocation43_spill] sm:$0xff]  ;;  %v17752_v39 = vld [vmem:[#allocation104_spill] sm:$0xff] }
 0x85e   : > { %v7006_v3 = vadd.f32 %v6948_v28, %v6846_v13 }
 0x860   : > { %v7165_v61 = vadd.f32 %v7107_v35, %v7006_v3  ;;  %9978 = vmatmul.msk.f32.gmra.mxu2 %vm3491_vm5, %v17748_v26 }
 0x861   : > { %10013 = vmatmul.msk.f32.gmra.mxu3 %vm3491_vm5, %v14936_v23  ;;  %v7110_v0 = vpop.f32.mrf.mxu0 }
 0x863   : > { %v7266_v17 = vpop.f32.mrf.mxu1  ;;  %v6791_v9 = vpop.f32.mrf.mxu2 }
 0x864   : > { %v6954_v41 = vpop.f32.mrf.mxu3  ;;  %10046 = vmatmul.msk.f32.gmra.mxu0 %vm3491_vm5, %v17749_v53  ;;  %10079 = vmatmul.msk.f32.gmra.mxu1 %vm3491_vm5, %v17651_v40  ;;  %v15356_v10 = vadd.f32 %v7266_v17, %v7165_v61  ;;  %v6847_v46 = vadd.f32 %v6791_v9, %v17750_v4  ;;  %v17753_v40 = vld [vmem:[#allocation108_spill] sm:$0xff]  ;;  %v17754_v61 = vld [vmem:[#allocation147_spill] sm:$0xff]  ;;  %v17755_v9 = vld [vmem:[#allocation61_spill] sm:$0xff] }
 0x865   : > { %v17756_v4 = vld [vmem:[#allocation112_spill] sm:$0xff] }
 0x866   : > { %v7007_v28 = vadd.f32 %v6951_v42, %v6847_v46 }
 0x868   : > { %v7166_v35 = vadd.f32 %v7110_v0, %v7007_v28  ;;  %9979 = vmatmul.msk.f32.gmra.mxu2 %vm3491_vm5, %v17751_v52  ;;  %v17757_v28 = vld [vmem:[#allocation121_spill] sm:$0xff] }
 0x869   : > { %10014 = vmatmul.msk.f32.gmra.mxu3 %vm3491_vm5, %v14949_v56  ;;  %v7113_v23 = vpop.f32.mrf.mxu0 }
 0x86b   : > { %v7269_v22 = vpop.f32.mrf.mxu1  ;;  %v6794_v3 = vpop.f32.mrf.mxu2 }
 0x86c   : > { %v6957_v47 = vpop.f32.mrf.mxu3  ;;  %10047 = vmatmul.msk.f32.gmra.mxu0 %vm3491_vm5, %v17752_v39  ;;  %10080 = vmatmul.msk.f32.gmra.mxu1 %vm3491_vm5, %v17753_v40  ;;  %v15367_v13 = vadd.f32 %v7269_v22, %v7166_v35  ;;  %v6848_v53 = vadd.f32 %v6794_v3, %v17754_v61  ;;  %v17758_v22 = vld [vmem:[#allocation65_spill] sm:$0xff] }
 0x86d   : > { %v17759_v61 = vld [vmem:[#allocation45_spill] sm:$0xff] }
 0x86e   : > { %v7008_v42 = vadd.f32 %v6954_v41, %v6848_v53  ;;  %v17760_v53 = vld [vmem:[#allocation128_spill] sm:$0xff] }
 0x870   : > { %v7167_v0 = vadd.f32 %v7113_v23, %v7008_v42  ;;  %9980 = vmatmul.msk.f32.gmra.mxu2 %vm3491_vm5, %v17755_v9 }
 0x871   : > { %10015 = vmatmul.msk.f32.gmra.mxu3 %vm3491_vm5, %v14962_v50  ;;  %v7116_v56 = vpop.f32.mrf.mxu0 }
 0x873   : > { %v7272_v46 = vpop.f32.mrf.mxu1  ;;  %v6797_v39 = vpop.f32.mrf.mxu2 }
 0x874   : > { %v6960_v17 = vpop.f32.mrf.mxu3  ;;  %10048 = vmatmul.msk.f32.gmra.mxu0 %vm3491_vm5, %v17756_v4  ;;  %10081 = vmatmul.msk.f32.gmra.mxu1 %vm3491_vm5, %v17757_v28  ;;  %v15378_v35 = vadd.f32 %v7272_v46, %v7167_v0  ;;  %v6849_v40 = vadd.f32 %v6797_v39, %v17758_v22  ;;  %v17761_v4 = vld [vmem:[#allocation111_spill] sm:$0xff]  ;;  %v17762_v28 = vld [vmem:[#allocation126_spill] sm:$0xff] }
 0x876   : > { %v7009_v41 = vadd.f32 %v6957_v47, %v6849_v40  ;;  %v17763_v40 = vld [vmem:[#allocation51_spill] sm:$0xff] }
 0x878   : > { %v7168_v23 = vadd.f32 %v7116_v56, %v7009_v41  ;;  %9981 = vmatmul.msk.f32.gmra.mxu2 %vm3491_vm5, %v17759_v61  ;;  %v17764_v41 = vld [vmem:[#allocation116_spill] sm:$0xff] }
 0x879   : > { %10016 = vmatmul.msk.f32.gmra.mxu3 %vm3491_vm5, %v14975_v31  ;;  %v7119_v50 = vpop.f32.mrf.mxu0 }
 0x87b   : > { %v7275_v42 = vpop.f32.mrf.mxu1  ;;  %v6800_v46 = vpop.f32.mrf.mxu2 }
 0x87c   : > { %v6963_v3 = vpop.f32.mrf.mxu3  ;;  %10049 = vmatmul.msk.f32.gmra.mxu0 %vm3491_vm5, %v17760_v53  ;;  %10082 = vmatmul.msk.f32.gmra.mxu1 %vm3491_vm5, %v17761_v4  ;;  %v15389_v0 = vadd.f32 %v7275_v42, %v7168_v23  ;;  %v6850_v39 = vadd.f32 %v6800_v46, %v17762_v28  ;;  %v17765_v4 = vld [vmem:[#allocation125_spill] sm:$0xff]  ;;  %v17766_v46 = vld [vmem:[#allocation70_spill] sm:$0xff] }
 0x87e   : > { %v7010_v47 = vadd.f32 %v6960_v17, %v6850_v39 }
 0x880   : > { %v7169_v56 = vadd.f32 %v7119_v50, %v7010_v47  ;;  %9982 = vmatmul.msk.f32.gmra.mxu2 %vm3491_vm5, %v17763_v40  ;;  %v17767_v47 = vld [vmem:[#allocation151_spill] sm:$0xff] }
 0x881   : > { %10017 = vmatmul.msk.f32.gmra.mxu3 %vm3491_vm5, %v14988_v45  ;;  %v7122_v31 = vpop.f32.mrf.mxu0 }
 0x883   : > { %v7278_v53 = vpop.f32.mrf.mxu1  ;;  %v6803_v42 = vpop.f32.mrf.mxu2 }
 0x884   : > { %v6966_v22 = vpop.f32.mrf.mxu3  ;;  %10050 = vmatmul.msk.f32.gmra.mxu0 %vm3491_vm5, %v17764_v41  ;;  %10083 = vmatmul.msk.f32.gmra.mxu1 %vm3491_vm5, %v17765_v4  ;;  %v15400_v23 = vadd.f32 %v7278_v53, %v7169_v56  ;;  %v6851_v28 = vadd.f32 %v6803_v42, %v17766_v46  ;;  %v17768_v41 = vld [vmem:[#allocation117_spill] sm:$0xff]  ;;  %v17769_v4 = vld [vmem:[#allocation115_spill] sm:$0xff] }
 0x886   : > { %v7011_v17 = vadd.f32 %v6963_v3, %v6851_v28  ;;  %v17770_v28 = vld [vmem:[#allocation152_spill] sm:$0xff] }
 0x888   : > { %v7170_v50 = vadd.f32 %v7122_v31, %v7011_v17  ;;  %9983 = vmatmul.msk.f32.gmra.mxu2 %vm3491_vm5, %v17767_v47  ;;  %v17771_v17 = vld [vmem:[#allocation119_spill] sm:$0xff] }
 0x889   : > { %10018 = vmatmul.msk.f32.gmra.mxu3 %vm3491_vm5, %v15001_v6  ;;  %v7125_v45 = vpop.f32.mrf.mxu0 }
 0x88b   : > { %v7281_v54 = vpop.f32.mrf.mxu1  ;;  %v6806_v53 = vpop.f32.mrf.mxu2 }
 0x88c   : > { %v6969_v39 = vpop.f32.mrf.mxu3  ;;  %10051 = vmatmul.msk.f32.gmra.mxu0 %vm3491_vm5, %v17768_v41  ;;  %10084 = vmatmul.msk.f32.gmra.mxu1 %vm3491_vm5, %v17769_v4  ;;  %v15411_v56 = vadd.f32 %v7281_v54, %v7170_v50  ;;  %v6852_v42 = vadd.f32 %v6806_v53, %v14983_v21  ;;  %v17772_v50 = vld [vmem:[#allocation149_spill] sm:$0xff] }
 0x88e   : > { %v7012_v3 = vadd.f32 %v6966_v22, %v6852_v42  ;;  %v17773_v42 = vld [vmem:[#allocation67_spill] sm:$0xff] }
 0x890   : > { %v7171_v31 = vadd.f32 %v7125_v45, %v7012_v3  ;;  %9984 = vmatmul.msk.f32.gmra.mxu2 %vm3491_vm5, %v17770_v28  ;;  %v17774_v3 = vld [vmem:[#allocation120_spill] sm:$0xff] }
 0x891   : > { %10019 = vmatmul.msk.f32.gmra.mxu3 %vm3491_vm5, %v15014_v62  ;;  %v7128_v6 = vpop.f32.mrf.mxu0 }
 0x893   : > { %v7284_v41 = vpop.f32.mrf.mxu1  ;;  %v6809_v21 = vpop.f32.mrf.mxu2 }
 0x894   : > { %v6972_v46 = vpop.f32.mrf.mxu3  ;;  %10052 = vmatmul.msk.f32.gmra.mxu0 %vm3491_vm5, %v17771_v17  ;;  %10085 = vmatmul.msk.f32.gmra.mxu1 %vm3491_vm5, %v17672_v58  ;;  %v15422_v54 = vadd.f32 %v7284_v41, %v7171_v31  ;;  %v6853_v4 = vadd.f32 %v6809_v21, %v17772_v50  ;;  %v17775_v58 = vld [vmem:[#allocation118_spill] sm:$0xff] }
 0x896   : > { %v7013_v22 = vadd.f32 %v6969_v39, %v6853_v4  ;;  %v17776_v4 = vld [vmem:[#allocation75_spill] sm:$0xff] }
 0x898   : > { %v7172_v45 = vadd.f32 %v7128_v6, %v7013_v22  ;;  %9985 = vmatmul.msk.f32.gmra.mxu2 %vm3491_vm5, %v17773_v42  ;;  %v17777_v22 = vld [vmem:[#allocation123_spill] sm:$0xff] }
 0x899   : > { %10020 = vmatmul.msk.f32.gmra.mxu3 %vm3491_vm5, %v15027_v5  ;;  %v7131_v62 = vpop.f32.mrf.mxu0 }
 0x89b   : > { %v7287_v17 = vpop.f32.mrf.mxu1  ;;  %v6812_v41 = vpop.f32.mrf.mxu2 }
 0x89c   : > { %v6975_v53 = vpop.f32.mrf.mxu3  ;;  %10053 = vmatmul.msk.f32.gmra.mxu0 %vm3491_vm5, %v17774_v3  ;;  %10086 = vmatmul.msk.f32.gmra.mxu1 %vm3491_vm5, %v17775_v58  ;;  %v15433_v31 = vadd.f32 %v7287_v17, %v7172_v45  ;;  %v6854_v21 = vadd.f32 %v6812_v41, %v15009_v11  ;;  %v17778_v17 = vld [vmem:[#allocation73_spill] sm:$0xff] }
 0x89e   : > { %v7014_v39 = vadd.f32 %v6972_v46, %v6854_v21  ;;  %v17779_v21 = vld [vmem:[#allocation89_spill] sm:$0xff] }
 0x8a0   : > { %v7173_v6 = vadd.f32 %v7131_v62, %v7014_v39  ;;  %9986 = vmatmul.msk.f32.gmra.mxu2 %vm3491_vm5, %v17776_v4  ;;  %v17780_v39 = vld [vmem:[#allocation124_spill] sm:$0xff] }
 0x8a1   : > { %10021 = vmatmul.msk.f32.gmra.mxu3 %vm3491_vm5, %v15040_v49  ;;  %v7134_v5 = vpop.f32.mrf.mxu0 }
 0x8a3   : > { %v7290_v3 = vpop.f32.mrf.mxu1  ;;  %v6815_v11 = vpop.f32.mrf.mxu2 }
 0x8a4   : > { %v6978_v50 = vpop.f32.mrf.mxu3  ;;  %10054 = vmatmul.msk.f32.gmra.mxu0 %vm3491_vm5, %v17777_v22  ;;  %10087 = vmatmul.msk.f32.gmra.mxu1 %vm3491_vm5, %v17677_v29  ;;  %v15444_v45 = vadd.f32 %v7290_v3, %v7173_v6  ;;  %v6855_v58 = vadd.f32 %v6815_v11, %v17778_v17  ;;  %v17781_v29 = vld [vmem:[#allocation129_spill] sm:$0xff]  ;;  %v17783_v11 = vld [vmem:[#allocation59_spill] sm:$0xff] }
 0x8a6   : > { %v7015_v46 = vadd.f32 %v6975_v53, %v6855_v58 }
 0x8a8   : > { %v7174_v62 = vadd.f32 %v7134_v5, %v7015_v46  ;;  %9987 = vmatmul.msk.f32.gmra.mxu2 %vm3491_vm5, %v17779_v21  ;;  %v17784_v46 = vld [vmem:[#allocation91_spill] sm:$0xff] }
 0x8a9   : > { %10022 = vmatmul.msk.f32.gmra.mxu3 %vm3491_vm5, %v15053_v43  ;;  %v7137_v49 = vpop.f32.mrf.mxu0 }
 0x8ab   : > { %v7293_v22 = vpop.f32.mrf.mxu1  ;;  %v6818_v3 = vpop.f32.mrf.mxu2 }
 0x8ac   : > { %v6981_v41 = vpop.f32.mrf.mxu3  ;;  %10055 = vmatmul.msk.f32.gmra.mxu0 %vm3491_vm5, %v17780_v39  ;;  %10088 = vmatmul.msk.f32.gmra.mxu1 %vm3491_vm5, %v17781_v29  ;;  %v15455_v6 = vadd.f32 %v7293_v22, %v7174_v62  ;;  %v6856_v17 = vadd.f32 %v6818_v3, %v17783_v11  ;;  %v17785_v39 = vld [vmem:[#allocation122_spill] sm:$0xff]  ;;  %v17787_v3 = vld [vmem:[#allocation63_spill] sm:$0xff] }
 0x8ad   : > { %v17786_v29 = vld [vmem:[#allocation26_spill] sm:$0xff] }
 0x8ae   : > { %17782 = vst [vmem:[#allocation130_spill] sm:$0xff] %v15455_v6  ;;  %v7016_v53 = vadd.f32 %v6978_v50, %v6856_v17  ;;  %v17788_v17 = vld [vmem:[#allocation107_spill] sm:$0xff] }
 0x8b0   : > { %v7175_v5 = vadd.f32 %v7137_v49, %v7016_v53  ;;  %9988 = vmatmul.msk.f32.gmra.mxu2 %vm3491_vm5, %v17784_v46 }
 0x8b1   : > { %10023 = vmatmul.msk.f32.gmra.mxu3 %vm3491_vm5, %v15066_v57  ;;  %v7140_v43 = vpop.f32.mrf.mxu0 }
 0x8b3   : > { %v7296_v36 = vpop.f32.mrf.mxu1  ;;  %v6821_v22 = vpop.f32.mrf.mxu2 }
 0x8b4   : > { %v6984_v58 = vpop.f32.mrf.mxu3  ;;  %10056 = vmatmul.msk.f32.gmra.mxu0 %vm3491_vm5, %v17785_v39  ;;  %10089 = vmatmul.msk.f32.gmra.mxu1 %vm3491_vm5, %v17786_v29  ;;  %v15466_v62 = vadd.f32 %v7296_v36, %v7175_v5  ;;  %v6857_v11 = vadd.f32 %v6821_v22, %v17787_v3  ;;  %v17789_v39 = vld [vmem:[#allocation36_spill] sm:$0xff] }
 0x8b5   : > { %v17790_v29 = vld [vmem:[#allocation132_spill] sm:$0xff] }
 0x8b6   : > { %v7017_v50 = vadd.f32 %v6981_v41, %v6857_v11  ;;  %v17791_v3 = vld [vmem:[#allocation156_spill] sm:$0xff] }
 0x8b8   : > { %v7176_v49 = vadd.f32 %v7140_v43, %v7017_v50  ;;  %9989 = vmatmul.msk.f32.gmra.mxu2 %vm3491_vm5, %v17788_v17 }
 0x8b9   : > { %10024 = vmatmul.msk.f32.gmra.mxu3 %vm3491_vm5, %v15079_v27  ;;  %v7143_v57 = vpop.f32.mrf.mxu0 }
 0x8bb   : > { %v7299_v6 = vpop.f32.mrf.mxu1  ;;  %v6824_v5 = vpop.f32.mrf.mxu2 }
 0x8bc   : > { %v7524_v53 = vpop.f32.mrf.mxu3  ;;  %10057 = vmatmul.msk.f32.gmra.mxu0 %vm3491_vm5, %v17789_v39  ;;  %10090 = vmatmul.msk.f32.gmra.mxu1 %vm3491_vm5, %v17790_v29  ;;  %v15477_v36 = vadd.f32 %v7299_v6, %v7176_v49  ;;  %v6858_v22 = vadd.f32 %v6824_v5, %v15061_v8  ;;  %v17792_v39 = vld [vmem:[#allocation40_spill] sm:$0xff]  ;;  %v17793_v29 = vld [vmem:[#allocation159_spill] sm:$0xff] }
 0x8be   : > { %v7018_v41 = vadd.f32 %v6984_v58, %v6858_v22 }
 0x8c0   : > { %v7177_v43 = vadd.f32 %v7143_v57, %v7018_v41  ;;  %9990 = vmatmul.msk.f32.gmra.mxu2 %vm3491_vm5, %v17791_v3  ;;  %v17795_v41 = vld [vmem:[#allocation44_spill] sm:$0xff] }
 0x8c1   : > { %10025 = vmatmul.msk.f32.gmra.mxu3 %vm3491_vm5, %v15092_v30  ;;  %v7684_v27 = vpop.f32.mrf.mxu0 }
 0x8c3   : > { %v7302_v50 = vpop.f32.mrf.mxu1  ;;  %v7368_v8 = vpop.f32.mrf.mxu2 }
 0x8c4   : > { %v7527_v11 = vpop.f32.mrf.mxu3  ;;  %10058 = vmatmul.msk.f32.gmra.mxu0 %vm3491_vm5, %v17588_v37  ;;  %10091 = vmatmul.msk.f32.gmra.mxu1 %vm3491_vm5, %v17792_v39  ;;  %v15488_v6 = vadd.f32 %v7302_v50, %v7177_v43  ;;  %v7464_v49 = vadd.f32 %v7368_v8, %v15074_v32  ;;  %v17794_v37 = vld [vmem:[#allocation48_spill] sm:$0xff]  ;;  %v17796_v39 = vld [vmem:[#allocation162_spill] sm:$0xff] }
 0x8c6   : > { %v7620_v58 = vadd.f32 %v7524_v53, %v7464_v49  ;;  %v17797_v49 = vld [vmem:[#allocation131_spill] sm:$0xff] }
 0x8c8   : > { %v7780_v57 = vadd.f32 %v7684_v27, %v7620_v58  ;;  %9991 = vmatmul.msk.f32.gmra.mxu2 %vm3491_vm5, %v17793_v29 }
 0x8c9   : > { %10026 = vmatmul.msk.f32.gmra.mxu3 %vm3491_vm5, %v15105_v25  ;;  %v7687_v30 = vpop.f32.mrf.mxu0 }
 0x8cb   : > { %v7843_v22 = vpop.f32.mrf.mxu1  ;;  %v7371_v32 = vpop.f32.mrf.mxu2 }
 0x8cc   : > { %v7530_v5 = vpop.f32.mrf.mxu3  ;;  %10059 = vmatmul.msk.f32.gmra.mxu0 %vm3491_vm5, %v17794_v37  ;;  %10092 = vmatmul.msk.f32.gmra.mxu1 %vm3491_vm5, %v17795_v41  ;;  %v15499_v43 = vadd.f32 %v7843_v22, %v7780_v57  ;;  %v7465_v50 = vadd.f32 %v7371_v32, %v15087_v16  ;;  %v17798_v37 = vld [vmem:[#allocation133_spill] sm:$0xff] }
 0x8cd   : > { %v17800_v22 = vld [vmem:[#allocation69_spill] sm:$0xff] }
 0x8ce   : > { %v7621_v53 = vadd.f32 %v7527_v11, %v7465_v50  ;;  %v17801_v32 = vld [vmem:[#allocation165_spill] sm:$0xff] }
 0x8d0   : > { %v7781_v27 = vadd.f32 %v7687_v30, %v7621_v53  ;;  %9992 = vmatmul.msk.f32.gmra.mxu2 %vm3491_vm5, %v17796_v39  ;;  %v17802_v53 = vld [vmem:[#allocation52_spill] sm:$0xff] }
 0x8d1   : > { %10027 = vmatmul.msk.f32.gmra.mxu3 %vm3491_vm5, %v15118_v60  ;;  %v7690_v25 = vpop.f32.mrf.mxu0 }
 0x8d3   : > { %v7846_v58 = vpop.f32.mrf.mxu1  ;;  %v7374_v16 = vpop.f32.mrf.mxu2 }
 0x8d4   : > { %v7533_v8 = vpop.f32.mrf.mxu3  ;;  %10060 = vmatmul.msk.f32.gmra.mxu0 %vm3491_vm5, %v17797_v49  ;;  %10093 = vmatmul.msk.f32.gmra.mxu1 %vm3491_vm5, %v17798_v37  ;;  %v15510_v57 = vadd.f32 %v7846_v58, %v7781_v27  ;;  %v7466_v41 = vadd.f32 %v7374_v16, %v17800_v22  ;;  %v17803_v37 = vld [vmem:[#allocation25_spill] sm:$0xff] }
 0x8d5   : > { %v17805_v16 = vld [vmem:[#allocation77_spill] sm:$0xff] }
 0x8d6   : > { %17799 = vst [vmem:[#allocation182_spill] sm:$0xff] %v15510_v57  ;;  %v7622_v60 = vadd.f32 %v7530_v5, %v7466_v41 }
 0x8d8   : > { %v7782_v30 = vadd.f32 %v7690_v25, %v7622_v60  ;;  %9993 = vmatmul.msk.f32.gmra.mxu2 %vm3491_vm5, %v17801_v32  ;;  %v17806_v25 = vld [vmem:[#allocation169_spill] sm:$0xff]  ;;  %v17807_v60 = vld [vmem:[#allocation56_spill] sm:$0xff] }
 0x8d9   : > { %10028 = vmatmul.msk.f32.gmra.mxu3 %vm3491_vm5, %v15131_v2  ;;  %v7693_v11 = vpop.f32.mrf.mxu0 }
 0x8db   : > { %v7849_v49 = vpop.f32.mrf.mxu1  ;;  %v7377_v58 = vpop.f32.mrf.mxu2 }
 0x8dc   : > { %v7536_v50 = vpop.f32.mrf.mxu3  ;;  %10061 = vmatmul.msk.f32.gmra.mxu0 %vm3491_vm5, %v17802_v53  ;;  %10094 = vmatmul.msk.f32.gmra.mxu1 %vm3491_vm5, %v17803_v37  ;;  %v15521_v27 = vadd.f32 %v7849_v49, %v7782_v30  ;;  %v7467_v22 = vadd.f32 %v7377_v58, %v17805_v16  ;;  %v17808_v37 = vld [vmem:[#allocation64_spill] sm:$0xff]  ;;  %v17810_v58 = vld [vmem:[#allocation158_spill] sm:$0xff] }
 0x8de   : > { %17804 = vst [vmem:[#allocation127_spill] sm:$0xff] %v15521_v27  ;;  %v7623_v2 = vadd.f32 %v7533_v8, %v7467_v22  ;;  %v17813_v27 = vld [vmem:[#allocation35_spill] sm:$0xff] }
 0x8e0   : > { %v7783_v5 = vadd.f32 %v7693_v11, %v7623_v2  ;;  %9994 = vmatmul.msk.f32.gmra.mxu2 %vm3491_vm5, %v17806_v25  ;;  %v17811_v11 = vld [vmem:[#allocation172_spill] sm:$0xff]  ;;  %v17812_v2 = vld [vmem:[#allocation27_spill] sm:$0xff] }
 0x8e1   : > { %10029 = vmatmul.msk.f32.gmra.mxu3 %vm3491_vm5, %v15144_v63  ;;  %v7696_v57 = vpop.f32.mrf.mxu0 }
 0x8e3   : > { %v7852_v53 = vpop.f32.mrf.mxu1  ;;  %v7380_v49 = vpop.f32.mrf.mxu2 }
 0x8e4   : > { %v7539_v41 = vpop.f32.mrf.mxu3  ;;  %10062 = vmatmul.msk.f32.gmra.mxu0 %vm3491_vm5, %v17807_v60  ;;  %10095 = vmatmul.msk.f32.gmra.mxu1 %vm3491_vm5, %v17808_v37  ;;  %v15532_v30 = vadd.f32 %v7852_v53, %v7783_v5  ;;  %v7468_v16 = vadd.f32 %v7380_v49, %v17810_v58  ;;  %v17816_v58 = vld [vmem:[#allocation177_spill] sm:$0xff] }
 0x8e6   : > { %17809 = vst [vmem:[#allocation185_spill] sm:$0xff] %v15532_v30  ;;  %v7624_v63 = vadd.f32 %v7536_v50, %v7468_v16 }
 0x8e8   : > { %v7784_v8 = vadd.f32 %v7696_v57, %v7624_v63  ;;  %9995 = vmatmul.msk.f32.gmra.mxu2 %vm3491_vm5, %v17811_v11  ;;  %v17817_v63 = vld [vmem:[#allocation41_spill] sm:$0xff] }
 0x8e9   : > { %10030 = vmatmul.msk.f32.gmra.mxu3 %vm3491_vm5, %v15157_v33  ;;  %v7699_v37 = vpop.f32.mrf.mxu0  ;;  %v17815_v33 = vld [vmem:[#allocation161_spill] sm:$0xff] }
 0x8eb   : > { %v7855_v60 = vpop.f32.mrf.mxu1  ;;  %v7383_v53 = vpop.f32.mrf.mxu2 }
 0x8ec   : > { %v7542_v22 = vpop.f32.mrf.mxu3  ;;  %10063 = vmatmul.msk.f32.gmra.mxu0 %vm3491_vm5, %v17812_v2  ;;  %10096 = vmatmul.msk.f32.gmra.mxu1 %vm3491_vm5, %v17813_v27  ;;  %v15543_v5 = vadd.f32 %v7855_v60, %v7784_v8  ;;  %v7469_v49 = vadd.f32 %v7383_v53, %v15139_v51  ;;  %v17818_v27 = vld [vmem:[#allocation31_spill] sm:$0xff]  ;;  %v17820_v51 = vld [vmem:[#allocation100_spill] sm:$0xff] }
 0x8ee   : > { %17814 = vst [vmem:[#allocation80_spill] sm:$0xff] %v15543_v5  ;;  %v7625_v57 = vadd.f32 %v7539_v41, %v7469_v49  ;;  %v17821_v5 = vld [vmem:[#allocation54_spill] sm:$0xff] }
 0x8f0   : > { %v7785_v50 = vadd.f32 %v7699_v37, %v7625_v57  ;;  %9996 = vmatmul.msk.f32.gmra.mxu2 %vm3491_vm5, %v17816_v58 }
 0x8f1   : > { %10031 = vmatmul.msk.f32.gmra.mxu3 %vm3491_vm5, %v17815_v33  ;;  %v7702_v41 = vpop.f32.mrf.mxu0  ;;  %v17822_v33 = vld [vmem:[#allocation180_spill] sm:$0xff] }
 0x8f3   : > { %v7858_v2 = vpop.f32.mrf.mxu1  ;;  %v7386_v60 = vpop.f32.mrf.mxu2 }
 0x8f4   : > { %v7545_v16 = vpop.f32.mrf.mxu3  ;;  %10064 = vmatmul.msk.f32.gmra.mxu0 %vm3491_vm5, %v17817_v63  ;;  %10097 = vmatmul.msk.f32.gmra.mxu1 %vm3491_vm5, %v17818_v27  ;;  %v15554_v8 = vadd.f32 %v7858_v2, %v7785_v50  ;;  %v7470_v53 = vadd.f32 %v7386_v60, %v17820_v51  ;;  %v17823_v63 = vld [vmem:[#allocation60_spill] sm:$0xff]  ;;  %v17824_v27 = vld [vmem:[#allocation33_spill] sm:$0xff]  ;;  %v17825_v60 = vld [vmem:[#allocation134_spill] sm:$0xff] }
 0x8f6   : > { %17819 = vst [vmem:[#allocation82_spill] sm:$0xff] %v15554_v8  ;;  %v7626_v37 = vadd.f32 %v7542_v22, %v7470_v53 }
 0x8f8   : > { %v7786_v49 = vadd.f32 %v7702_v41, %v7626_v37  ;;  %9997 = vmatmul.msk.f32.gmra.mxu2 %vm3491_vm5, %v17822_v33  ;;  %v17827_v37 = vld [vmem:[#allocation183_spill] sm:$0xff] }
 0x8f9   : > { %10032 = vmatmul.msk.f32.gmra.mxu3 %vm3491_vm5, %v17821_v5  ;;  %v17826_v5 = vld [vmem:[#allocation168_spill] sm:$0xff]  ;;  %v7705_v53 = vpop.f32.mrf.mxu0 }
 0x8fb   : > { %v7861_v30 = vpop.f32.mrf.mxu1  ;;  %v7389_v2 = vpop.f32.mrf.mxu2 }
 0x8fc   : > { %v7548_v57 = vpop.f32.mrf.mxu3  ;;  %10065 = vmatmul.msk.f32.gmra.mxu0 %vm3491_vm5, %v17823_v63  ;;  %10098 = vmatmul.msk.f32.gmra.mxu1 %vm3491_vm5, %v17824_v27  ;;  %v15565_v50 = vadd.f32 %v7861_v30, %v7786_v49  ;;  %v7471_v51 = vadd.f32 %v7389_v2, %v17825_v60  ;;  %v17828_v63 = vld [vmem:[#allocation189_spill] sm:$0xff]  ;;  %v17829_v27 = vld [vmem:[#allocation46_spill] sm:$0xff] }
 0x8fd   : > { %v17831_v2 = vld [vmem:[#allocation98_spill] sm:$0xff] }
 0x8fe   : > { %v7627_v22 = vadd.f32 %v7545_v16, %v7471_v51  ;;  %v17834_v51 = vld [vmem:[#allocation186_spill] sm:$0xff] }
 0x900   : > { %v7787_v41 = vadd.f32 %v7705_v53, %v7627_v22  ;;  %9998 = vmatmul.msk.f32.gmra.mxu2 %vm3491_vm5, %v17827_v37  ;;  %v17835_v53 = vld [vmem:[#allocation72_spill] sm:$0xff] }
 0x901   : > { %10033 = vmatmul.msk.f32.gmra.mxu3 %vm3491_vm5, %v17826_v5  ;;  %v17832_v5 = vld [vmem:[#allocation110_spill] sm:$0xff] }
 0x903   : > { %v7864_v33 = vpop.f32.mrf.mxu1  ;;  %v7392_v49 = vpop.f32.mrf.mxu2 }
 0x904   : > { %v7551_v8 = vpop.f32.mrf.mxu3  ;;  %10066 = vmatmul.msk.f32.gmra.mxu0 %vm3491_vm5, %v17828_v63  ;;  %10099 = vmatmul.msk.f32.gmra.mxu1 %vm3491_vm5, %v17829_v27  ;;  %v15576_v30 = vadd.f32 %v7864_v33, %v7787_v41  ;;  %v7472_v60 = vadd.f32 %v7392_v49, %v17831_v2  ;;  %v17836_v63 = vld [vmem:[#allocation99_spill] sm:$0xff]  ;;  %v17837_v41 = vld [vmem:[#allocation164_spill] sm:$0xff] }
 0x906   : > { %17830 = vst [vmem:[#allocation84_spill] sm:$0xff] %v15576_v30  ;;  %v15581_v16 = vadd.f32 %v7548_v57, %v7472_v60  ;;  %v17838_v30 = vld [vmem:[#allocation176_spill] sm:$0xff]  ;;  %v17840_v57 = vld [vmem:[#allocation113_spill] sm:$0xff] }
 0x907   : > { %v17841_v60 = vld [vmem:[#allocation97_spill] sm:$0xff] }
 0x908   : > { %17833 = vst [vmem:[#allocation86_spill] sm:$0xff] %v15581_v16  ;;  %9999 = vmatmul.msk.f32.gmra.mxu2 %vm3491_vm5, %v17834_v51 }
 0x909   : > { %10034 = vmatmul.msk.f32.gmra.mxu3 %vm3491_vm5, %v17832_v5  ;;  %v17842_v5 = vld [vmem:[#allocation155_spill] sm:$0xff] }
 0x90b   : > { %v7395_v33 = vpop.f32.mrf.mxu2 }
 0x90c   : > { %v7554_v22 = vpop.f32.mrf.mxu3  ;;  %10067 = vmatmul.msk.f32.gmra.mxu0 %vm3491_vm5, %v17835_v53  ;;  %10100 = vmatmul.msk.f32.gmra.mxu1 %vm3491_vm5, %v17836_v63  ;;  %v7473_v27 = vadd.f32 %v7395_v33, %v17837_v41  ;;  %v17843_v63 = vld [vmem:[#allocation167_spill] sm:$0xff]  ;;  %v17846_v41 = vld [vmem:[#allocation29_spill] sm:$0xff] }
 0x90e   : > { %v15592_v49 = vadd.f32 %v7551_v8, %v7473_v27  ;;  %v17845_v8 = vld [vmem:[#allocation106_spill] sm:$0xff] }
 0x90f   : > { %v17847_v27 = vld [vmem:[#allocation90_spill] sm:$0xff] }
 0x910   : > { %17839 = vst [vmem:[#allocation30_spill] sm:$0xff] %v15592_v49  ;;  %10000 = vmatmul.msk.f32.gmra.mxu2 %vm3491_vm5, %v17840_v57 }
 0x911   : > { %10035 = vmatmul.msk.f32.gmra.mxu3 %vm3491_vm5, %v17838_v30 }
 0x913   : > { %v7398_v53 = vpop.f32.mrf.mxu2 }
 0x914   : > { %v7557_v2 = vpop.f32.mrf.mxu3  ;;  %10068 = vmatmul.msk.f32.gmra.mxu0 %vm3491_vm5, %v17841_v60  ;;  %10101 = vmatmul.msk.f32.gmra.mxu1 %vm3491_vm5, %v17842_v5  ;;  %v7474_v16 = vadd.f32 %v7398_v53, %v17843_v63  ;;  %v17848_v5 = vld [vmem:[#allocation175_spill] sm:$0xff] }
 0x915   : > { %v17851_v63 = vld [vmem:[#allocation171_spill] sm:$0xff] }
 0x916   : > { %v15603_v33 = vadd.f32 %v7554_v22, %v7474_v16  ;;  %v17850_v16 = vld [vmem:[#allocation138_spill] sm:$0xff] }
 0x918   : > { %17844 = vst [vmem:[#allocation88_spill] sm:$0xff] %v15603_v33  ;;  %10001 = vmatmul.msk.f32.gmra.mxu2 %vm3491_vm5, %v17845_v8  ;;  %v17852_v33 = vld [vmem:[#allocation68_spill] sm:$0xff] }
 0x919   : > { %10036 = vmatmul.msk.f32.gmra.mxu3 %vm3491_vm5, %v15206_v55 }
 0x91b   : > { %v7401_v60 = vpop.f32.mrf.mxu2 }
 0x91c   : > { %v7560_v30 = vpop.f32.mrf.mxu3  ;;  %10069 = vmatmul.msk.f32.gmra.mxu0 %vm3491_vm5, %v17846_v41  ;;  %10102 = vmatmul.msk.f32.gmra.mxu1 %vm3491_vm5, %v17847_v27  ;;  %v7475_v49 = vadd.f32 %v7401_v60, %v17848_v5  ;;  %v15622_v41 = vld [vmem:[#allocation3 + $0x1c8] sm:$0xff] }
 0x91d   : > { %17853 = vst [vmem:[#allocation136_spill] sm:$0xff] %v15622_v41 }
 0x91e   : > { %v15614_v53 = vadd.f32 %v7557_v2, %v7475_v49  ;;  %v17855_v2 = vld [vmem:[#allocation142_spill] sm:$0xff] }
 0x920   : > { %17849 = vst [vmem:[#allocation94_spill] sm:$0xff] %v15614_v53  ;;  %10002 = vmatmul.msk.f32.gmra.mxu2 %vm3491_vm5, %v17850_v16  ;;  %v15631_v53 = vld [vmem:[#allocation3 + $0x1d0] sm:$0xff] }
 0x921   : > { %10037 = vmatmul.msk.f32.gmra.mxu3 %vm3491_vm5, %v15208_v48 }
 0x923   : > { %v7404_v27 = vpop.f32.mrf.mxu2 }
 0x924   : > { %v7563_v22 = vpop.f32.mrf.mxu3  ;;  %10070 = vmatmul.msk.f32.gmra.mxu0 %vm3491_vm5, %v17851_v63  ;;  %10103 = vmatmul.msk.f32.gmra.mxu1 %vm3491_vm5, %v17852_v33  ;;  %v7476_v60 = vadd.f32 %v7404_v27, %v15263_v18  ;;  %v7337_v33 = vrot.slane %v15206_v55, 4  ;;  %v7338_v63 = vrot.slane %v15208_v48, 4  ;;  %v7653_v18 = vrot.slane %v15622_v41, 1  ;;  %v15650_v48 = vld [vmem:[#allocation3 + $0x1d8] sm:$0xf] }
 0x926   : > { %v15627_v49 = vadd.f32 %v7560_v30, %v7476_v60  ;;  %v7654_v30 = vrot.slane %v15631_v53, 1 }
 0x928   : > { %17854 = vst [vmem:[#allocation93_spill] sm:$0xff] %v15627_v49  ;;  %10003 = vmatmul.msk.f32.gmra.mxu2 %vm3491_vm5, %v17855_v2  ;;  %v15645_v49 = vsel %vm585_vm0, %v7337_v33, %v7338_v63  ;;  %v7655_v55 = vsel %vm434_vm1, %v7653_v18, %v7654_v30  ;;  %v7656_v33 = vrot.slane %v15650_v48, 1 }
 0x929   : > { %10038 = vmatmul.msk.f32.gmra.mxu3 %vm3491_vm5, %v15622_v41 }
 0x92b   : > { %v7407_v27 = vpop.f32.mrf.mxu2 }
 0x92c   : > { %v7566_v5 = vpop.f32.mrf.mxu3  ;;  %10071 = vmatmul.msk.f32.gmra.mxu0 %vm3491_vm5, %v15261_v24  ;;  %10104 = vmatmul.msk.f32.gmra.mxu1 %vm3491_vm5, %v15269_v12  ;;  %v7477_v60 = vadd.f32 %v7407_v27, %v15278_v19  ;;  %v7340_v19 = vrot.slane %v15240_v38, 4  ;;  %v7812_v27 = vrot.slane %v15622_v41, 2  ;;  %v7657_v38 = vsel %vm434_vm1, %v7654_v30, %v7656_v33  ;;  %v17857_v33 = vld [vmem:[#allocation39_spill] sm:$0xff] }
 0x92e   : > { %v15648_v24 = vadd.f32 %v7563_v22, %v7477_v60  ;;  %v7813_v22 = vrot.slane %v15631_v53, 2 }
 0x930   : > { %17856 = vst [vmem:[#allocation96_spill] sm:$0xff] %v15648_v24  ;;  %10004 = vmatmul.msk.f32.gmra.mxu2 %vm3491_vm5, %v15645_v49  ;;  %v15665_v24 = vsel %vm585_vm0, %v7338_v63, %v7340_v19 }
 0x931   : > { %10039 = vmatmul.msk.f32.gmra.mxu3 %vm3491_vm5, %v15631_v53 }
 0x933   : > { %v7410_v18 = vpop.f32.mrf.mxu2 }
 0x934   : > { %v7569_v12 = vpop.f32.mrf.mxu3  ;;  %10072 = vmatmul.msk.f32.gmra.mxu0 %vm3491_vm5, %v7655_v55  ;;  %10105 = vmatmul.msk.f32.gmra.mxu1 %vm3491_vm5, %v15286_v7  ;;  %v7478_v60 = vadd.f32 %v7410_v18, %v15297_v1  ;;  %v7814_v7 = vsel %vm806_vm2, %v7812_v27, %v7813_v22  ;;  %v7815_v1 = vrot.slane %v15650_v48, 2 }
 0x936   : > { %v15668_v55 = vadd.f32 %v7566_v5, %v7478_v60  ;;  %v7816_v30 = vsel %vm806_vm2, %v7813_v22, %v7815_v1  ;;  %v17859_v1 = vld [vmem:[#allocation140_spill] sm:$0xff] }
 0x938   : > { %10005 = vmatmul.msk.f32.gmra.mxu2 %vm3491_vm5, %v15665_v24 }
 0x939   : > { %10144 = vmatmul.msk.f32.vlgmr.msra.gmra.mxu3 %vm3491_vm5, %v17741_v20 }
 0x93b   : > { %v7413_v20 = vpop.f32.mrf.mxu2 }
 0x93c   : > { %v7572_v41 = vpop.f32.mrf.mxu3  ;;  %10073 = vmatmul.msk.f32.gmra.mxu0 %vm3491_vm5, %v7657_v38  ;;  %10106 = vmatmul.msk.f32.gmra.mxu1 %vm3491_vm5, %v7814_v7  ;;  %v7479_v63 = vadd.f32 %v7413_v20, %v15312_v14 }
 0x93e   : > { %v15679_v5 = vadd.f32 %v7569_v12, %v7479_v63  ;;  %v17860_v63 = vld [vmem:[#allocation146_spill] sm:$0xff] }
 0x940   : > { %10110 = vmatmul.msk.f32.vlgmr.msra.gmra.mxu2 %vm3491_vm5, %v17857_v33  ;;  %v17861_v33 = vld [vmem:[#allocation143_spill] sm:$0xff] }
 0x941   : > { %10145 = vmatmul.msk.f32.gmra.mxu3 %vm3491_vm5, %v17745_v15  ;;  %v17858_v15 = vld [vmem:[#allocation144_spill] sm:$0xff] }
 0x943   : > { %v7416_v27 = vpop.f32.mrf.mxu2 }
 0x944   : > { %v7575_v19 = vpop.f32.mrf.mxu3  ;;  %10107 = vmatmul.msk.f32.gmra.mxu1 %vm3491_vm5, %v7816_v30  ;;  %v7480_v18 = vadd.f32 %v7416_v27, %v15323_v34 }
 0x946   : > { %v15688_v14 = vadd.f32 %v7572_v41, %v7480_v18 }
 0x948   : > { %10111 = vmatmul.msk.f32.gmra.mxu2 %vm3491_vm5, %v17858_v15 }
 0x949   : > { %10146 = vmatmul.msk.f32.gmra.mxu3 %vm3491_vm5, %v17748_v26 }
 0x94b   : > { %v7419_v12 = vpop.f32.mrf.mxu2 }
 0x94c   : > { %v7578_v60 = vpop.f32.mrf.mxu3  ;;  %v7481_v22 = vadd.f32 %v7419_v12, %v15334_v44 }
 0x94e   : > { %v15695_v38 = vadd.f32 %v7575_v19, %v7481_v22  ;;  %v17863_v22 = vld [vmem:[#allocation150_spill] sm:$0xff] }
 0x950   : > { %10112 = vmatmul.msk.f32.gmra.mxu2 %vm3491_vm5, %v17859_v1 }
 0x951   : > { %10147 = vmatmul.msk.f32.gmra.mxu3 %vm3491_vm5, %v17751_v52 }
 0x953   : > { %v7422_v34 = vpop.f32.mrf.mxu2 }
 0x954   : > { %v7581_v7 = vpop.f32.mrf.mxu3  ;;  %v7482_v26 = vadd.f32 %v7422_v34, %v15345_v59  ;;  %v17864_v34 = vld [vmem:[#allocation153_spill] sm:$0xff] }
 0x956   : > { %v15702_v41 = vadd.f32 %v7578_v60, %v7482_v26  ;;  %v17862_v60 = vld [vmem:[#allocation145_spill] sm:$0xff] }
 0x958   : > { %10113 = vmatmul.msk.f32.gmra.mxu2 %vm3491_vm5, %v17860_v63  ;;  %v17865_v63 = vld [vmem:[#allocation78_spill] sm:$0xff] }
 0x959   : > { %10148 = vmatmul.msk.f32.gmra.mxu3 %vm3491_vm5, %v17755_v9 }
 0x95b   : > { %v7425_v44 = vpop.f32.mrf.mxu2 }
 0x95c   : > { %v7584_v20 = vpop.f32.mrf.mxu3  ;;  %v7483_v52 = vadd.f32 %v7425_v44, %v15356_v10  ;;  %v15744_v44 = vpop.permute.xlu2 %8645 }
 0x95e   : > { %v15709_v30 = vadd.f32 %v7581_v7, %v7483_v52 }
 0x960   : > { %10114 = vmatmul.msk.f32.gmra.mxu2 %vm3491_vm5, %v17861_v33 }
 0x961   : > { %10149 = vmatmul.msk.f32.gmra.mxu3 %vm3491_vm5, %v17759_v61 }
 0x963   : > { %v7428_v59 = vpop.f32.mrf.mxu2 }
 0x964   : > { %v7587_v19 = vpop.f32.mrf.mxu3  ;;  %v7484_v9 = vadd.f32 %v7428_v59, %v15367_v13 }
 0x966   : > { %v15716_v27 = vadd.f32 %v7584_v20, %v7484_v9 }
 0x968   : > { %10115 = vmatmul.msk.f32.gmra.mxu2 %vm3491_vm5, %v17862_v60 }
 0x969   : > { %10150 = vmatmul.msk.f32.gmra.mxu3 %vm3491_vm5, %v17763_v40 }
 0x96b   : > { %v7431_v10 = vpop.f32.mrf.mxu2 }
 0x96c   : > { %v7590_v18 = vpop.f32.mrf.mxu3  ;;  %v7485_v61 = vadd.f32 %v7431_v10, %v15378_v35  ;;  %v15760_v10 = vpop.permute.xlu0 %8647 }
 0x96e   : > { %v15723_v15 = vadd.f32 %v7587_v19, %v7485_v61  ;;  %v17866_v19 = vld [vmem:[#allocation87_spill] sm:$0xff] }
 0x970   : > { %10116 = vmatmul.msk.f32.gmra.mxu2 %vm3491_vm5, %v17863_v22 }
 0x971   : > { %10151 = vmatmul.msk.f32.gmra.mxu3 %vm3491_vm5, %v17767_v47 }
 0x973   : > { %v7434_v13 = vpop.f32.mrf.mxu2 }
 0x974   : > { %v7593_v12 = vpop.f32.mrf.mxu3  ;;  %v7486_v40 = vadd.f32 %v7434_v13, %v15389_v0  ;;  %v15770_v13 = vpop.permute.xlu1 %8649 }
 0x976   : > { %v15730_v7 = vadd.f32 %v7590_v18, %v7486_v40 }
 0x978   : > { %10117 = vmatmul.msk.f32.gmra.mxu2 %vm3491_vm5, %v17864_v34  ;;  %v17872_v34 = vld [vmem:[#allocation103_spill] sm:$0xff] }
 0x979   : > { %10152 = vmatmul.msk.f32.gmra.mxu3 %vm3491_vm5, %v17770_v28 }
 0x97b   : > { %v7437_v35 = vpop.f32.mrf.mxu2 }
 0x97c   : > { %v7596_v1 = vpop.f32.mrf.mxu3  ;;  %v7487_v47 = vadd.f32 %v7437_v35, %v15400_v23 }
 0x97e   : > { %v15737_v26 = vadd.f32 %v7593_v12, %v7487_v47 }
 0x980   : > { %10118 = vmatmul.msk.f32.gmra.mxu2 %vm3491_vm5, %v17865_v63 }
 0x981   : > { %10153 = vmatmul.msk.f32.gmra.mxu3 %vm3491_vm5, %v17773_v42 }
 0x983   : > { %v7440_v0 = vpop.f32.mrf.mxu2 }
 0x984   : > { %v7599_v20 = vpop.f32.mrf.mxu3  ;;  %v7488_v28 = vadd.f32 %v7440_v0, %v15411_v56  ;;  %v15755_v56 = vpop.permute.xlu2 %8651 }
 0x986   : > { %v15746_v52 = vadd.f32 %v7596_v1, %v7488_v28  ;;  %v15777_v1 = vpop.permute.xlu0 %8653  ;;  %v17876_v28 = vld [vmem:[#allocation157_spill] sm:$0xff] }
 0x988   : > { %10119 = vmatmul.msk.f32.gmra.mxu2 %vm3491_vm5, %v17866_v19 }
 0x989   : > { %10154 = vmatmul.msk.f32.gmra.mxu3 %vm3491_vm5, %v17776_v4  ;;  %v17868_v4 = vld [vmem:[#allocation83_spill] sm:$0xff] }
 0x98b   : > { %v7443_v42 = vpop.f32.mrf.mxu2 }
 0x98c   : > { %v7602_v23 = vpop.f32.mrf.mxu3  ;;  %v7489_v33 = vadd.f32 %v7443_v42, %v15422_v54  ;;  %v15768_v12 = vpop.permute.xlu2 %8657 }
 0x98e   : > { %v15753_v59 = vadd.f32 %v7599_v20, %v7489_v33  ;;  %v17874_v20 = vld [vmem:[#allocation130_spill] sm:$0xff] }
 0x990   : > { %17867 = vst [vmem:[#allocation37_spill] sm:$0xff] %v15753_v59  ;;  %10120 = vmatmul.msk.f32.gmra.mxu2 %vm3491_vm5, %v17868_v4 }
 0x991   : > { %10155 = vmatmul.msk.f32.gmra.mxu3 %vm3491_vm5, %v17779_v21  ;;  %v17870_v21 = vld [vmem:[#allocation95_spill] sm:$0xff] }
 0x993   : > { %v7446_v18 = vpop.f32.mrf.mxu2 }
 0x994   : > { %v7605_v9 = vpop.f32.mrf.mxu3  ;;  %v7490_v60 = vadd.f32 %v7446_v18, %v15433_v31  ;;  %v15781_v47 = vpop.permute.xlu2 %8663  ;;  %v17879_v18 = vld [vmem:[#allocation160_spill] sm:$0xff] }
 0x995   : > { %17873 = vst [vmem:[#allocation102_spill] sm:$0xff] %v15781_v47 }
 0x996   : > { %v15764_v54 = vadd.f32 %v7602_v23, %v7490_v60  ;;  %v15792_v23 = vpop.permute.xlu0 %8659 }
 0x998   : > { %17869 = vst [vmem:[#allocation139_spill] sm:$0xff] %v15764_v54  ;;  %10121 = vmatmul.msk.f32.gmra.mxu2 %vm3491_vm5, %v17870_v21 }
 0x999   : > { %10156 = vmatmul.msk.f32.gmra.mxu3 %vm3491_vm5, %v17784_v46 }
 0x99b   : > { %v7449_v22 = vpop.f32.mrf.mxu2 }
 0x99c   : > { %v7608_v61 = vpop.f32.mrf.mxu3  ;;  %v7491_v40 = vadd.f32 %v7449_v22, %v15444_v45  ;;  %v15786_v45 = vpop.permute.xlu1 %8655  ;;  %v17883_v22 = vld [vmem:[#allocation163_spill] sm:$0xff] }
 0x99d   : > { %v15797_v33 = vpop.permute.xlu2 %8669 }
 0x99e   : > { %v15775_v31 = vadd.f32 %v7605_v9, %v7491_v40  ;;  %17877 = vst [vmem:[#allocation53_spill] sm:$0xff] %v15797_v33  ;;  %v15805_v60 = vpop.permute.xlu0 %8665  ;;  %v17914_v33 = vld [vmem:[#allocation188_spill] sm:$0xff] }
 0x99f   : > { %17880 = vst [vmem:[#allocation105_spill] sm:$0xff] %v15805_v60  ;;  %v17918_v60 = vld [vmem:[#allocation154_spill] sm:$0xff] }
 0x9a0   : > { %17871 = vst [vmem:[#allocation135_spill] sm:$0xff] %v15775_v31  ;;  %10122 = vmatmul.msk.f32.gmra.mxu2 %vm3491_vm5, %v17872_v34 }
 0x9a1   : > { %10157 = vmatmul.msk.f32.gmra.mxu3 %vm3491_vm5, %v17788_v17 }
 0x9a3   : > { %v7452_v35 = vpop.f32.mrf.mxu2 }
 0x9a4   : > { %v7611_v46 = vpop.f32.mrf.mxu3  ;;  %v7492_v63 = vadd.f32 %v7452_v35, %v17874_v20 }
 0x9a6   : > { %v15788_v0 = vadd.f32 %v7608_v61, %v7492_v63  ;;  %v15819_v20 = vpop.permute.xlu0 %8671  ;;  %v17887_v63 = vld [vmem:[#allocation166_spill] sm:$0xff] }
 0x9a7   : > { %17884 = vst [vmem:[#allocation114_spill] sm:$0xff] %v15819_v20 }
 0x9a8   : > { %17875 = vst [vmem:[#allocation101_spill] sm:$0xff] %v15788_v0  ;;  %10123 = vmatmul.msk.f32.gmra.mxu2 %vm3491_vm5, %v17876_v28 }
 0x9a9   : > { %10158 = vmatmul.msk.f32.gmra.mxu3 %vm3491_vm5, %v17791_v3  ;;  %v15801_v3 = vpop.permute.xlu1 %8661 }
 0x9ab   : > { %v7455_v19 = vpop.f32.mrf.mxu2 }
 0x9ac   : > { %v7614_v17 = vpop.f32.mrf.mxu3  ;;  %v7493_v42 = vadd.f32 %v7455_v19, %v15466_v62  ;;  %v15810_v62 = vpop.permute.xlu2 %8675 }
 0x9ad   : > { %17881 = vst [vmem:[#allocation109_spill] sm:$0xff] %v15810_v62 }
 0x9ae   : > { %v15799_v9 = vadd.f32 %v7611_v46, %v7493_v42 }
 0x9b0   : > { %17878 = vst [vmem:[#allocation137_spill] sm:$0xff] %v15799_v9  ;;  %10124 = vmatmul.msk.f32.gmra.mxu2 %vm3491_vm5, %v17879_v18  ;;  %v15837_v18 = vpop.permute.xlu0 %8677 }
 0x9b1   : > { %10159 = vmatmul.msk.f32.gmra.mxu3 %vm3491_vm5, %v17793_v29  ;;  %v15816_v46 = vpop.permute.xlu1 %8667  ;;  %17889 = vst [vmem:[#allocation108_spill] sm:$0xff] %v15837_v18 }
 0x9b3   : > { %v7458_v61 = vpop.f32.mrf.mxu2 }
 0x9b4   : > { %v7617_v4 = vpop.f32.mrf.mxu3  ;;  %v7494_v21 = vadd.f32 %v7458_v61, %v15477_v36  ;;  %v15823_v36 = vpop.permute.xlu2 %8681  ;;  %v17891_v61 = vld [vmem:[#allocation170_spill] sm:$0xff] }
 0x9b5   : > { %17885 = vst [vmem:[#allocation148_spill] sm:$0xff] %v15823_v36 }
 0x9b6   : > { %v15812_v29 = vadd.f32 %v7614_v17, %v7494_v21 }
 0x9b8   : > { %17882 = vst [vmem:[#allocation57_spill] sm:$0xff] %v15812_v29  ;;  %10125 = vmatmul.msk.f32.gmra.mxu2 %vm3491_vm5, %v17883_v22  ;;  %v15850_v36 = vpop.permute.xlu0 %8683 }
 0x9b9   : > { %10160 = vmatmul.msk.f32.gmra.mxu3 %vm3491_vm5, %v17796_v39  ;;  %v15829_v19 = vpop.permute.xlu1 %8673  ;;  %17894 = vst [vmem:[#allocation112_spill] sm:$0xff] %v15850_v36  ;;  %v17898_v36 = vld [vmem:[#allocation127_spill] sm:$0xff] }
 0x9ba   : > { %17888 = vst [vmem:[#allocation104_spill] sm:$0xff] %v15829_v19  ;;  %v17915_v19 = vld [vmem:[#allocation84_spill] sm:$0xff] }
 0x9bb   : > { %v7461_v34 = vpop.f32.mrf.mxu2 }
 0x9bc   : > { %v8161_v40 = vpop.f32.mrf.mxu3  ;;  %v7495_v35 = vadd.f32 %v7461_v34, %v15488_v6  ;;  %v15835_v6 = vld [vmem:[%s16459_s8] ss:$0 sm:$0xff] }
 0x9be   : > { %v15825_v39 = vadd.f32 %v7617_v4, %v7495_v35 }
 0x9c0   : > { %17886 = vst [vmem:[#allocation43_spill] sm:$0xff] %v15825_v39  ;;  %10126 = vmatmul.msk.f32.gmra.mxu2 %vm3491_vm5, %v17887_v63  ;;  %v17893_v63 = vld [vmem:[#allocation182_spill] sm:$0xff] }
 0x9c1   : > { %10161 = vmatmul.msk.f32.gmra.mxu3 %vm3491_vm5, %v17801_v32  ;;  %v15841_v32 = vpop.permute.xlu2 %8687  ;;  %v15846_v35 = vpop.permute.xlu1 %8679 }
 0x9c2   : > { %17890 = vst [vmem:[#allocation147_spill] sm:$0xff] %v15841_v32 }
 0x9c3   : > { %v8002_v28 = vpop.f32.mrf.mxu2  ;;  %17892 = vst [vmem:[#allocation61_spill] sm:$0xff] %v15846_v35 }
 0x9c4   : > { %v8164_v17 = vpop.f32.mrf.mxu3  ;;  %v8098_v42 = vadd.f32 %v8002_v28, %v15499_v43 }
 0x9c6   : > { %v8257_v4 = vadd.f32 %v8161_v40, %v8098_v42  ;;  %v15856_v42 = vpop.f32.mrf.mxu0 }
 0x9c8   : > { %10127 = vmatmul.msk.f32.gmra.mxu2 %vm3491_vm5, %v17891_v61  ;;  %v8293_v22 = vadd.f32 %v15835_v6, %v8257_v4  ;;  %v17896_v4 = vld [vmem:[#allocation173_spill] sm:$0xff] }
 0x9c9   : > { %10162 = vmatmul.msk.f32.gmra.mxu3 %vm3491_vm5, %v17806_v25  ;;  %v15854_v25 = vpop.permute.xlu2 %8693  ;;  %v15863_v32 = vpop.permute.xlu1 %8685 }
 0x9ca   : > { %v8325_v43 = vmax.f32 %v8293_v22, 0.0  ;;  %17895 = vst [vmem:[#allocation121_spill] sm:$0xff] %v15854_v25 }
 0x9cb   : > { %v8005_v34 = vpop.f32.mrf.mxu2  ;;  %17897 = vst [vmem:[#allocation65_spill] sm:$0xff] %v15863_v32 }
 0x9cc   : > { %v8167_v21 = vpop.f32.mrf.mxu3  ;;  %v8099_v28 = vadd.f32 %v8005_v34, %v17893_v63  ;;  %8517 = vrot.lane.b32.xlu0 %v8325_v43, %s10421_s24  ;;  %v15861_v34 = vpop.f32.mrf.mxu1 }
 0x9ce   : > { %v8258_v40 = vadd.f32 %v8164_v17, %v8099_v28  ;;  %v15876_v25 = vpop.f32.mrf.mxu0 }
 0x9d0   : > { %10128 = vmatmul.msk.f32.gmra.mxu2 %vm3491_vm5, %v17896_v4  ;;  %v8294_v22 = vadd.f32 %v15835_v6, %v8258_v40  ;;  %v17901_v4 = vld [vmem:[#allocation178_spill] sm:$0xff] }
 0x9d1   : > { %10163 = vmatmul.msk.f32.gmra.mxu3 %vm3491_vm5, %v17811_v11  ;;  %v15867_v11 = vpop.permute.xlu0 %8689  ;;  %v15871_v17 = vpop.permute.xlu2 %8699 }
 0x9d2   : > { %v8326_v63 = vmax.f32 %v8294_v22, 0.0  ;;  %17899 = vst [vmem:[#allocation45_spill] sm:$0xff] %v15867_v11  ;;  %v17903_v11 = vld [vmem:[#allocation185_spill] sm:$0xff] }
 0x9d3   : > { %v8008_v43 = vpop.f32.mrf.mxu2  ;;  %17900 = vst [vmem:[#allocation128_spill] sm:$0xff] %v15871_v17 }
 0x9d4   : > { %v8170_v61 = vpop.f32.mrf.mxu3  ;;  %v8100_v18 = vadd.f32 %v8008_v43, %v17898_v36  ;;  %8519 = vrot.lane.b32.xlu1 %v8326_v63, %s10421_s24  ;;  %v15878_v36 = vpop.f32.mrf.mxu1 }
 0x9d5   : > { %v15880_v43 = vpop.permute.xlu1 %8691 }
 0x9d6   : > { %v8259_v28 = vadd.f32 %v8167_v21, %v8100_v18  ;;  %17902 = vst [vmem:[#allocation111_spill] sm:$0xff] %v15880_v43  ;;  %v17905_v18 = vld [vmem:[#allocation180_spill] sm:$0xff] }
 0x9d8   : > { %10129 = vmatmul.msk.f32.gmra.mxu2 %vm3491_vm5, %v17901_v4  ;;  %v8295_v22 = vadd.f32 %v15835_v6, %v8259_v28  ;;  %v17906_v4 = vld [vmem:[#allocation181_spill] sm:$0xff] }
 0x9d9   : > { %10164 = vmatmul.msk.f32.gmra.mxu3 %vm3491_vm5, %v17816_v58  ;;  %v15884_v58 = vpop.permute.xlu0 %8695  ;;  %v15888_v21 = vpop.permute.xlu2 %8391 }
 0x9da   : > { %v8327_v32 = vmax.f32 %v8295_v22, 0.0  ;;  %17904 = vst [vmem:[#allocation126_spill] sm:$0xff] %v15884_v58 }
 0x9db   : > { %v8011_v63 = vpop.f32.mrf.mxu2 }
 0x9dc   : > { %v8173_v40 = vpop.f32.mrf.mxu3  ;;  %v8101_v62 = vadd.f32 %v8011_v63, %v17903_v11  ;;  %8521 = vrot.lane.b32.xlu2 %v8327_v32, %s10421_s24  ;;  %v15895_v11 = vpop.f32.mrf.mxu0  ;;  %v17908_v32 = vld [vmem:[#allocation80_spill] sm:$0xff] }
 0x9dd   : > { %v15893_v35 = vpop.permute.xlu1 %8697  ;;  %v15901_v58 = vpop.f32.mrf.mxu1 }
 0x9de   : > { %v8260_v28 = vadd.f32 %v8170_v61, %v8101_v62  ;;  %17907 = vst [vmem:[#allocation51_spill] sm:$0xff] %v15893_v35 }
 0x9e0   : > { %10130 = vmatmul.msk.f32.gmra.mxu2 %vm3491_vm5, %v17906_v4  ;;  %v8296_v17 = vadd.f32 %v15835_v6, %v8260_v28 }
 0x9e1   : > { %10165 = vmatmul.msk.f32.gmra.mxu3 %vm3491_vm5, %v17905_v18  ;;  %v15899_v18 = vpop.permute.xlu0 %8701  ;;  %v15905_v62 = vpop.permute.xlu2 %8397 }
 0x9e2   : > { %v8328_v39 = vmax.f32 %v8296_v17, 0.0  ;;  %17909 = vst [vmem:[#allocation116_spill] sm:$0xff] %v15899_v18  ;;  %v17910_v17 = vld [vmem:[#allocation184_spill] sm:$0xff] }
 0x9e3   : > { %v8014_v43 = vpop.f32.mrf.mxu2 }
 0x9e4   : > { %v8176_v22 = vpop.f32.mrf.mxu3  ;;  %v8102_v63 = vadd.f32 %v8014_v43, %v17908_v32  ;;  %8523 = vrot.lane.b32.xlu0 %v8328_v39, %s10421_s24  ;;  %v17911_v39 = vld [vmem:[#allocation82_spill] sm:$0xff] }
 0x9e5   : > { %v15910_v32 = vpop.permute.xlu1 %8389 }
 0x9e6   : > { %v8261_v61 = vadd.f32 %v8173_v40, %v8102_v63  ;;  %v15920_v40 = vpop.f32.mrf.mxu0 }
 0x9e8   : > { %10131 = vmatmul.msk.f32.gmra.mxu2 %vm3491_vm5, %v17910_v17  ;;  %v8297_v4 = vadd.f32 %v15835_v6, %v8261_v61  ;;  %v15922_v17 = vpop.f32.mrf.mxu1  ;;  %v17912_v61 = vld [vmem:[#allocation187_spill] sm:$0xff] }
 0x9e9   : > { %10166 = vmatmul.msk.f32.gmra.mxu3 %vm3491_vm5, %v17827_v37  ;;  %v15914_v29 = vpop.permute.xlu0 %8393  ;;  %v15918_v37 = vpop.permute.xlu2 %8403 }
 0x9ea   : > { %v8329_v35 = vmax.f32 %v8297_v4, 0.0 }
 0x9eb   : > { %v8017_v43 = vpop.f32.mrf.mxu2 }
 0x9ec   : > { %v8179_v28 = vpop.f32.mrf.mxu3  ;;  %v8103_v18 = vadd.f32 %v8017_v43, %v17911_v39  ;;  %8525 = vrot.lane.b32.xlu1 %v8329_v35, %s10421_s24 }
 0x9ed   : > { %v15927_v20 = vpop.permute.xlu1 %8395 }
 0x9ee   : > { %v8262_v63 = vadd.f32 %v8176_v22, %v8103_v18 }
 0x9f0   : > { %10132 = vmatmul.msk.f32.gmra.mxu2 %vm3491_vm5, %v17912_v61  ;;  %v8298_v43 = vadd.f32 %v15835_v6, %v8262_v63  ;;  %v15937_v61 = vpop.f32.mrf.mxu0  ;;  %v15942_v0 = vpop.f32.mrf.mxu1 }
 0x9f1   : > { %10167 = vmatmul.msk.f32.gmra.mxu3 %vm3491_vm5, %v17834_v51  ;;  %v15931_v51 = vpop.permute.xlu0 %8399  ;;  %v15935_v22 = vpop.permute.xlu2 %8409 }
 0x9f2   : > { %v8330_v39 = vmax.f32 %v8298_v43, 0.0  ;;  %17913 = vst [vmem:[#allocation125_spill] sm:$0xff] %v15935_v22 }
 0x9f3   : > { %v8020_v35 = vpop.f32.mrf.mxu2 }
 0x9f4   : > { %v8182_v4 = vpop.f32.mrf.mxu3  ;;  %v8104_v9 = vadd.f32 %v8020_v35, %v15565_v50  ;;  %8527 = vrot.lane.b32.xlu2 %v8330_v39, %s10421_s24 }
 0x9f5   : > { %v15944_v35 = vpop.permute.xlu1 %8401 }
 0x9f6   : > { %v8263_v18 = vadd.f32 %v8179_v28, %v8104_v9  ;;  %v17917_v28 = vld [vmem:[#allocation86_spill] sm:$0xff] }
 0x9f8   : > { %10133 = vmatmul.msk.f32.gmra.mxu2 %vm3491_vm5, %v17914_v33  ;;  %v8299_v43 = vadd.f32 %v15835_v6, %v8263_v18  ;;  %v7788_v18 = vadd.f32 %v15856_v42, %v17917_v28  ;;  %v15962_v22 = vpop.f32.mrf.mxu1 }
 0x9f9   : > { %10168 = vmatmul.msk.f32.gmra.mxu3 %vm3491_vm5, %v17840_v57  ;;  %v15948_v57 = vpop.permute.xlu0 %8405  ;;  %v15952_v9 = vpop.permute.xlu2 %8415 }
 0x9fa   : > { %v8331_v50 = vmax.f32 %v8299_v43, 0.0  ;;  %17916 = vst [vmem:[#allocation70_spill] sm:$0xff] %v15952_v9 }
 0x9fb   : > { %v8023_v39 = vpop.f32.mrf.mxu2 }
 0x9fc   : > { %v8185_v63 = vpop.f32.mrf.mxu3  ;;  %v8105_v31 = vadd.f32 %v8023_v39, %v17915_v19  ;;  %8529 = vrot.lane.b32.xlu0 %v8331_v50, %s10421_s24  ;;  %v7947_v19 = vadd.f32 %v15861_v34, %v7788_v18  ;;  %v15960_v50 = vpop.f32.mrf.mxu0  ;;  %v17920_v34 = vld [vmem:[#allocation30_spill] sm:$0xff] }
 0x9fd   : > { %v15964_v47 = vpop.permute.xlu1 %8407 }
 0x9fe   : > { %v8264_v33 = vadd.f32 %v8182_v4, %v8105_v31 }
 0xa00   : > { %10134 = vmatmul.msk.f32.gmra.mxu2 %vm3491_vm5, %v17918_v60  ;;  %v8300_v54 = vadd.f32 %v15835_v6, %v8264_v33  ;;  %v7789_v33 = vadd.f32 %v15876_v25, %v17920_v34  ;;  %v15986_v25 = vpop.f32.mrf.mxu1 }
 0xa01   : > { %10169 = vmatmul.msk.f32.gmra.mxu3 %vm3491_vm5, %v17845_v8  ;;  %v15967_v42 = vpop.permute.xlu0 %8411  ;;  %v15971_v60 = vpop.permute.xlu2 %8421 }
 0xa02   : > { %v8332_v39 = vmax.f32 %v8300_v54, 0.0  ;;  %17919 = vst [vmem:[#allocation151_spill] sm:$0xff] %v15971_v60  ;;  %v17921_v54 = vld [vmem:[#allocation92_spill] sm:$0xff] }
 0xa03   : > { %v8026_v8 = vpop.f32.mrf.mxu2 }
 0xa04   : > { %v8188_v43 = vpop.f32.mrf.mxu3  ;;  %v8106_v31 = vadd.f32 %v8026_v8, %v7947_v19  ;;  %8531 = vrot.lane.b32.xlu1 %v8332_v39, %s10421_s24  ;;  %v7948_v19 = vadd.f32 %v15878_v36, %v7789_v33  ;;  %v15981_v59 = vpop.f32.mrf.mxu0  ;;  %v17923_v36 = vld [vmem:[#allocation88_spill] sm:$0xff]  ;;  %v17924_v33 = vld [vmem:[#allocation49_spill] sm:$0xff] }
 0xa05   : > { %v15979_v9 = vpop.permute.xlu1 %8413  ;;  %v7790_v34 = vadd.f32 %v15895_v11, %v17923_v36 }
 0xa06   : > { %v8265_v4 = vadd.f32 %v8185_v63, %v8106_v31 }
 0xa08   : > { %10135 = vmatmul.msk.f32.gmra.mxu2 %vm3491_vm5, %v17921_v54  ;;  %v8301_v18 = vadd.f32 %v15835_v6, %v8265_v4 }
 0xa09   : > { %10170 = vmatmul.msk.f32.gmra.mxu3 %vm3491_vm5, %v17850_v16  ;;  %v15984_v63 = vpop.permute.xlu0 %8417  ;;  %v15990_v31 = vpop.permute.xlu2 %8427 }
 0xa0a   : > { %v8333_v39 = vmax.f32 %v8301_v18, 0.0  ;;  %17922 = vst [vmem:[#allocation117_spill] sm:$0xff] %v15990_v31 }
 0xa0b   : > { %v8029_v8 = vpop.f32.mrf.mxu2 }
 0xa0c   : > { %v8191_v28 = vpop.f32.mrf.mxu3  ;;  %v8107_v16 = vadd.f32 %v8029_v8, %v7948_v19  ;;  %8533 = vrot.lane.b32.xlu2 %v8333_v39, %s10421_s24  ;;  %v7949_v19 = vadd.f32 %v15901_v58, %v7790_v34  ;;  %v17928_v58 = vld [vmem:[#allocation94_spill] sm:$0xff]  ;;  %v17929_v34 = vld [vmem:[#allocation141_spill] sm:$0xff] }
 0xa0d   : > { %v7791_v36 = vadd.f32 %v15920_v40, %v17928_v58  ;;  %v17933_v58 = vld [vmem:[#allocation136_spill] sm:$0xff] }
 0xa0e   : > { %v8266_v4 = vadd.f32 %v8188_v43, %v8107_v16  ;;  %v16007_v43 = vpop.f32.mrf.mxu0 }
 0xa10   : > { %10136 = vmatmul.msk.f32.gmra.mxu2 %vm3491_vm5, %v17924_v33  ;;  %v8302_v18 = vadd.f32 %v15835_v6, %v8266_v4  ;;  %v16009_v4 = vpop.f32.mrf.mxu1 }
 0xa11   : > { %10171 = vmatmul.msk.f32.gmra.mxu3 %vm3491_vm5, %v17855_v2  ;;  %v15999_v2 = vpop.permute.xlu1 %8419  ;;  %v16001_v31 = vpop.permute.xlu0 %8423 }
 0xa12   : > { %v8334_v39 = vmax.f32 %v8302_v18, 0.0  ;;  %17925 = vst [vmem:[#allocation115_spill] sm:$0xff] %v15999_v2  ;;  %v16005_v11 = vpop.permute.xlu2 %8433  ;;  %v8133_v2 = vrot.slane %v15650_v48, 4 }
 0xa13   : > { %v8032_v8 = vpop.f32.mrf.mxu2  ;;  %17926 = vst [vmem:[#allocation152_spill] sm:$0xff] %v16001_v31  ;;  %v17937_v31 = vld [vmem:[#allocation96_spill] sm:$0xff] }
 0xa14   : > { %v8194_v54 = vpop.f32.mrf.mxu3  ;;  %v8108_v60 = vadd.f32 %v8032_v8, %v7949_v19  ;;  %8535 = vrot.lane.b32.xlu0 %v8334_v39, %s10421_s24  ;;  %17927 = vst [vmem:[#allocation119_spill] sm:$0xff] %v16005_v11  ;;  %v7950_v19 = vadd.f32 %v15922_v17, %v7791_v36  ;;  %v17934_v17 = vld [vmem:[#allocation93_spill] sm:$0xff] }
 0xa15   : > { %v7792_v36 = vadd.f32 %v15937_v61, %v17934_v17 }
 0xa16   : > { %v8267_v16 = vadd.f32 %v8191_v28, %v8108_v60 }
 0xa18   : > { %10137 = vmatmul.msk.f32.gmra.mxu2 %vm3491_vm5, %v17929_v34  ;;  %v8303_v18 = vadd.f32 %v15835_v6, %v8267_v16  ;;  %v8130_v34 = vrot.slane %v17933_v58, 4  ;;  %v8131_v16 = vrot.slane %v15631_v53, 4 }
 0xa19   : > { %10172 = vmatmul.msk.f32.gmra.mxu3 %vm3491_vm5, %v15645_v49  ;;  %v16018_v11 = vpop.permute.xlu1 %8425  ;;  %v16022_v60 = vpop.permute.xlu0 %8429 }
 0xa1a   : > { %v8335_v39 = vmax.f32 %v8303_v18, 0.0  ;;  %17930 = vst [vmem:[#allocation149_spill] sm:$0xff] %v16018_v11  ;;  %v16024_v40 = vpop.permute.xlu2 %8439  ;;  %v16030_v18 = vpop.f32.mrf.mxu0 }
 0xa1b   : > { %v8035_v49 = vpop.f32.mrf.mxu2  ;;  %17931 = vst [vmem:[#allocation67_spill] sm:$0xff] %v16022_v60 }
 0xa1c   : > { %v8197_v33 = vpop.f32.mrf.mxu3  ;;  %v8109_v8 = vadd.f32 %v8035_v49, %v7950_v19  ;;  %8537 = vrot.lane.b32.xlu1 %v8335_v39, %s10421_s24  ;;  %17932 = vst [vmem:[#allocation120_spill] sm:$0xff] %v16024_v40  ;;  %v17935_v19 = vld [vmem:[#allocation174_spill] sm:$0xff]  ;;  %v16035_v49 = vpop.f32.mrf.mxu1  ;;  %v7951_v40 = vadd.f32 %v15942_v0, %v7792_v36  ;;  %v7793_v0 = vadd.f32 %v15960_v50, %v17937_v31  ;;  %v17938_v36 = vld [vmem:[#allocation179_spill] sm:$0xff] }
 0xa1e   : > { %v8268_v28 = vadd.f32 %v8194_v54, %v8109_v8  ;;  %v8132_v8 = vsel %vm585_vm0, %v8130_v34, %v8131_v16  ;;  %v7971_v34 = vrot.slane %v17933_v58, 3 }
 0xa20   : > { %10138 = vmatmul.msk.f32.gmra.mxu2 %vm3491_vm5, %v17935_v19 }
 0xa21   : > { %10173 = vmatmul.msk.f32.gmra.mxu3 %vm3491_vm5, %v15665_v24  ;;  %v8304_v24 = vadd.f32 %v15835_v6, %v8268_v28  ;;  %v16040_v61 = vpop.permute.xlu1 %8431  ;;  %v16043_v17 = vpop.permute.xlu0 %8435 }
 0xa22   : > { %v16045_v19 = vpop.permute.xlu2 %8445 }
 0xa23   : > { %v8336_v54 = vmax.f32 %v8304_v24, 0.0  ;;  %v8038_v11 = vpop.f32.mrf.mxu2  ;;  %17936 = vst [vmem:[#allocation118_spill] sm:$0xff] %v16045_v19  ;;  %v7972_v24 = vrot.slane %v15631_v53, 3 }
 0xa24   : > { %v8200_v39 = vpop.f32.mrf.mxu3  ;;  %v8110_v60 = vadd.f32 %v8038_v11, %v7951_v40  ;;  %v16059_v19 = vpop.f32.mrf.mxu1 }
 0xa25   : > { %8539 = vrot.lane.b32.xlu2 %v8336_v54, %s10421_s24  ;;  %v7952_v54 = vadd.f32 %v15962_v22, %v7793_v0  ;;  %v7973_v58 = vsel %vm4528_vm8, %v7971_v34, %v7972_v24 }
 0xa26   : > { %v8269_v28 = vadd.f32 %v8197_v33, %v8110_v60  ;;  %v8134_v60 = vsel %vm585_vm0, %v8131_v16, %v8133_v2  ;;  %v7794_v2 = vadd.f32 %v15981_v59, %v15668_v55 }
 0xa28   : > { %10139 = vmatmul.msk.f32.gmra.mxu2 %vm3491_vm5, %v17938_v36  ;;  %v8305_v40 = vadd.f32 %v15835_v6, %v8269_v28  ;;  %v7953_v34 = vadd.f32 %v15986_v25, %v7794_v2 }
 0xa29   : > { %10174 = vmatmul.msk.f32.gmra.mxu3 %vm3491_vm5, %v8132_v8  ;;  %v16056_v8 = vpop.f32.mrf.mxu0  ;;  %v16062_v28 = vpop.permute.xlu1 %8437 }
 0xa2a   : > { %v8337_v33 = vmax.f32 %v8305_v40, 0.0  ;;  %v16066_v53 = vpop.permute.xlu0 %8441  ;;  %v16068_v22 = vpop.permute.xlu2 %8451  ;;  %v7974_v40 = vrot.slane %v15650_v48, 3  ;;  %v17939_v48 = vld [vmem:[#allocation9_spill] sm:$0xff] }
 0xa2b   : > { %v8041_v50 = vpop.f32.mrf.mxu2  ;;  %v8743_v25 = vsel %vm520_vm3, %v17939_v48, %v15914_v29 }
 0xa2c   : > { %v8203_v11 = vpop.f32.mrf.mxu3  ;;  %v8111_v31 = vadd.f32 %v8041_v50, %v7952_v54  ;;  %8541 = vrot.lane.b32.xlu0 %v8337_v33, %s10421_s24  ;;  %v16084_v59 = vpop.f32.mrf.mxu1  ;;  %v7975_v50 = vsel %vm4528_vm8, %v7972_v24, %v7974_v40 }
 0xa2e   : > { %v8270_v0 = vadd.f32 %v8200_v39, %v8111_v31 }
 0xa30   : > { %10140 = vmatmul.msk.f32.gmra.mxu2 %vm3491_vm5, %v7973_v58  ;;  %v8306_v36 = vadd.f32 %v15835_v6, %v8270_v0 }
 0xa31   : > { %10175 = vmatmul.msk.f32.gmra.mxu3 %vm3491_vm5, %v8134_v60  ;;  %v16079_v60 = vpop.f32.mrf.mxu0  ;;  %v16082_v55 = vpop.permute.xlu1 %8443 }
 0xa32   : > { %v8338_v54 = vmax.f32 %v8306_v36, 0.0  ;;  %v16090_v31 = vpop.permute.xlu0 %8447  ;;  %v7795_v36 = vadd.f32 %v16007_v43, %v15679_v5 }
 0xa33   : > { %v8044_v33 = vpop.f32.mrf.mxu2 }
 0xa34   : > { %v8206_v16 = vpop.f32.mrf.mxu3  ;;  %v8112_v39 = vadd.f32 %v8044_v33, %v7953_v34  ;;  %8543 = vrot.lane.b32.xlu1 %v8338_v54, %s10421_s24  ;;  %v7954_v29 = vadd.f32 %v16009_v4, %v7795_v36  ;;  %v7796_v4 = vadd.f32 %v16030_v18, %v15688_v14 }
 0xa36   : > { %v8271_v58 = vadd.f32 %v8203_v11, %v8112_v39  ;;  %v8522_v0 = vpop.permute.xlu2 %8521 }
 0xa37   : > { %v8776_v2 = vsel %vm8773_vm9, %v8743_v25, %v8522_v0  ;;  %v7900_v25 = vpop.f32.mrf.mxu1 }
 0xa38   : > { %v8809_v34 = vsel %vm8806_vm10, %v8776_v2, %v15770_v13  ;;  %10141 = vmatmul.msk.f32.gmra.mxu2 %vm3491_vm5, %v7975_v50  ;;  %v8307_v40 = vadd.f32 %v15835_v6, %v8271_v58  ;;  %v17940_v13 = vld [vmem:[#allocation7_spill] sm:$0xff] }
 0xa39   : > { %8842 = vst.msk [vmem:[%s16099_s27 + $0x10] sm:$0xff] %vm8839_vm11, %v8809_v34  ;;  %v16105_v5 = vpop.permute.xlu1 %8449  ;;  %v8741_v43 = vsel %vm520_vm3, %v17940_v13, %v15910_v32  ;;  %v7741_v39 = vpop.f32.mrf.mxu0  ;;  %v7955_v32 = vadd.f32 %v16035_v49, %v7796_v4 }
 0xa3a   : > { %v8339_v11 = vmax.f32 %v8307_v40, 0.0 }
 0xa3b   : > { %v8047_v54 = vpop.f32.mrf.mxu2 }
 0xa3c   : > { %v8209_v24 = vpop.f32.mrf.mxu3  ;;  %v8113_v33 = vadd.f32 %v8047_v54, %v7954_v29  ;;  %8545 = vrot.lane.b32.xlu2 %v8339_v11, %s10421_s24  ;;  %v17941_v29 = vld [vmem:[#allocation8_spill] sm:$0xff]  ;;  %v7797_v54 = vadd.f32 %v16056_v8, %v15695_v38 }
 0xa3d   : > { %v8742_v14 = vsel %vm520_vm3, %v17941_v29, %v15888_v21  ;;  %v17942_v38 = vld [vmem:[#allocation12_spill] sm:$0xff] }
 0xa3e   : > { %v8272_v50 = vadd.f32 %v8206_v16, %v8113_v33  ;;  %v8518_v48 = vpop.permute.xlu0 %8517  ;;  %v7956_v21 = vadd.f32 %v16059_v19, %v7797_v54  ;;  %v8746_v8 = vsel %vm520_vm3, %v17942_v38, %v15931_v51 }
 0xa3f   : > { %v8774_v58 = vsel %vm8773_vm9, %v8741_v43, %v8518_v48 }
 0xa40   : > { %v8807_v0 = vsel %vm8806_vm10, %v8774_v58, %v15744_v44  ;;  %v8308_v36 = vadd.f32 %v15835_v6, %v8272_v50  ;;  %v7903_v50 = vpop.f32.mrf.mxu1 }
 0xa41   : > { %8840 = vst.msk [vmem:[%s16099_s27] sm:$0xff] %vm8839_vm11, %v8807_v0  ;;  %v7744_v33 = vpop.f32.mrf.mxu0 }
 0xa42   : > { %v8340_v34 = vmax.f32 %v8308_v36, 0.0  ;;  %v7798_v36 = vadd.f32 %v16079_v60, %v15702_v41  ;;  %v17943_v41 = vld [vmem:[#allocation10_spill] sm:$0xff] }
 0xa43   : > { %v8050_v16 = vpop.f32.mrf.mxu2  ;;  %v8744_v60 = vsel %vm520_vm3, %v17943_v41, %v15927_v20 }
 0xa44   : > { %v8212_v2 = vpop.f32.mrf.mxu3  ;;  %v8114_v40 = vadd.f32 %v8050_v16, %v7955_v32  ;;  %8547 = vrot.lane.b32.xlu0 %v8340_v34, %s10421_s24  ;;  %v7957_v16 = vadd.f32 %v16084_v59, %v7798_v36 }
 0xa46   : > { %v8273_v18 = vadd.f32 %v8209_v24, %v8114_v40  ;;  %v8520_v11 = vpop.permute.xlu1 %8519 }
 0xa47   : > { %v8775_v44 = vsel %vm8773_vm9, %v8742_v14, %v8520_v11 }
 0xa48   : > { %v8808_v49 = vsel %vm8806_vm10, %v8775_v44, %v15760_v10  ;;  %v8309_v43 = vadd.f32 %v15835_v6, %v8273_v18  ;;  %v7799_v44 = vadd.f32 %v7741_v39, %v15709_v30 }
 0xa49   : > { %8841 = vst.msk [vmem:[%s16099_s27 + $0x8] sm:$0xff] %vm8839_vm11, %v8808_v49  ;;  %v7747_v40 = vpop.f32.mrf.mxu0 }
 0xa4a   : > { %v8341_v24 = vmax.f32 %v8309_v43, 0.0  ;;  %v7958_v43 = vadd.f32 %v7900_v25, %v7799_v44 }
 0xa4b   : > { %v8053_v48 = vpop.f32.mrf.mxu2 }
 0xa4c   : > { %v8215_v13 = vpop.f32.mrf.mxu3  ;;  %v8115_v58 = vadd.f32 %v8053_v48, %v7956_v21  ;;  %8549 = vrot.lane.b32.xlu1 %v8341_v24, %s10421_s24 }
 0xa4e   : > { %v8274_v4 = vadd.f32 %v8212_v2, %v8115_v58  ;;  %v8528_v10 = vpop.permute.xlu2 %8527  ;;  %v7906_v2 = vpop.f32.mrf.mxu1  ;;  %v17944_v58 = vld [vmem:[#allocation11_spill] sm:$0xff] }
 0xa4f   : > { %v8779_v0 = vsel %vm8773_vm9, %v8746_v8, %v8528_v10  ;;  %v8745_v30 = vsel %vm520_vm3, %v17944_v58, %v15905_v62  ;;  %v7800_v8 = vadd.f32 %v7744_v33, %v15716_v27  ;;  %v17945_v62 = vld [vmem:[#allocation15_spill] sm:$0xff] }
 0xa50   : > { %v8812_v32 = vsel %vm8806_vm10, %v8779_v0, %v15786_v45  ;;  %v8310_v34 = vadd.f32 %v15835_v6, %v8274_v4 }
 0xa51   : > { %8845 = vst.msk [vmem:[%s16099_s27 + $0x28] sm:$0xff] %vm8839_vm11, %v8812_v32  ;;  %v7750_v48 = vpop.f32.mrf.mxu0  ;;  %v7959_v0 = vadd.f32 %v7903_v50, %v7800_v8 }
 0xa52   : > { %v8342_v51 = vmax.f32 %v8310_v34, 0.0 }
 0xa53   : > { %v8056_v29 = vpop.f32.mrf.mxu2 }
 0xa54   : > { %v8218_v19 = vpop.f32.mrf.mxu3  ;;  %v8116_v14 = vadd.f32 %v8056_v29, %v7957_v16  ;;  %8551 = vrot.lane.b32.xlu2 %v8342_v51, %s10421_s24  ;;  %v7801_v29 = vadd.f32 %v7747_v40, %v15723_v15 }
 0xa56   : > { %v8275_v45 = vadd.f32 %v8215_v13, %v8116_v14  ;;  %v8524_v18 = vpop.permute.xlu0 %8523  ;;  %v7909_v13 = vpop.f32.mrf.mxu1 }
 0xa57   : > { %v8777_v11 = vsel %vm8773_vm9, %v8744_v60, %v8524_v18  ;;  %v7960_v60 = vadd.f32 %v7906_v2, %v7801_v29 }
 0xa58   : > { %v8810_v59 = vsel %vm8806_vm10, %v8777_v11, %v15755_v56  ;;  %v8311_v49 = vadd.f32 %v15835_v6, %v8275_v45  ;;  %v17946_v11 = vld [vmem:[#allocation13_spill] sm:$0xff] }
 0xa59   : > { %8843 = vst.msk [vmem:[%s16099_s27 + $0x18] sm:$0xff] %vm8839_vm11, %v8810_v59  ;;  %v7753_v27 = vpop.f32.mrf.mxu0  ;;  %v8747_v44 = vsel %vm520_vm3, %v17946_v11, %v15944_v35  ;;  %v7802_v59 = vadd.f32 %v7750_v48, %v15730_v7 }
 0xa5a   : > { %v8343_v21 = vmax.f32 %v8311_v49, 0.0 }
 0xa5b   : > { %v8059_v24 = vpop.f32.mrf.mxu2 }
 0xa5c   : > { %v8221_v54 = vpop.f32.mrf.mxu3  ;;  %v8117_v20 = vadd.f32 %v8059_v24, %v7958_v43  ;;  %8553 = vrot.lane.b32.xlu0 %v8343_v21, %s10421_s24  ;;  %v7961_v24 = vadd.f32 %v7909_v13, %v7802_v59 }
 0xa5e   : > { %v8276_v39 = vadd.f32 %v8218_v19, %v8117_v20  ;;  %v8526_v56 = vpop.permute.xlu1 %8525  ;;  %v8749_v19 = vsel %vm520_vm3, %v17945_v62, %v15948_v57 }
 0xa5f   : > { %v8778_v38 = vsel %vm8773_vm9, %v8745_v30, %v8526_v56  ;;  %v17947_v30 = vld [vmem:[#allocation14_spill] sm:$0xff] }
 0xa60   : > { %v8811_v25 = vsel %vm8806_vm10, %v8778_v38, %v15777_v1  ;;  %v8312_v10 = vadd.f32 %v15835_v6, %v8276_v39  ;;  %v7912_v1 = vpop.f32.mrf.mxu1  ;;  %v8748_v7 = vsel %vm520_vm3, %v17947_v30, %v15918_v37  ;;  %v17954_v30 = vld [vmem:[#allocation139_spill] sm:$0xff] }
 0xa61   : > { %8844 = vst.msk [vmem:[%s16099_s27 + $0x20] sm:$0xff] %vm8839_vm11, %v8811_v25 }
 0xa62   : > { %v8344_v36 = vmax.f32 %v8312_v10, 0.0 }
 0xa63   : > { %v8062_v32 = vpop.f32.mrf.mxu2 }
 0xa64   : > { %v8224_v4 = vpop.f32.mrf.mxu3  ;;  %v8118_v34 = vadd.f32 %v8062_v32, %v7959_v0  ;;  %8555 = vrot.lane.b32.xlu1 %v8344_v36, %s10421_s24  ;;  %v17948_v32 = vld [vmem:[#allocation18_spill] sm:$0xff] }
 0xa66   : > { %v8277_v33 = vadd.f32 %v8221_v54, %v8118_v34  ;;  %v8534_v16 = vpop.permute.xlu2 %8533  ;;  %v7756_v54 = vpop.f32.mrf.mxu0 }
 0xa67   : > { %v8782_v51 = vsel %vm8773_vm9, %v8749_v19, %v8534_v16  ;;  %v7804_v19 = vadd.f32 %v7756_v54, %v15746_v52 }
 0xa68   : > { %v8815_v50 = vsel %vm8806_vm10, %v8782_v51, %v15801_v3  ;;  %v8313_v41 = vadd.f32 %v15835_v6, %v8277_v33  ;;  %v7915_v21 = vpop.f32.mrf.mxu1 }
 0xa69   : > { %8848 = vst.msk [vmem:[%s16099_s27 + $0x40] sm:$0xff] %vm8839_vm11, %v8815_v50 }
 0xa6a   : > { %v8345_v45 = vmax.f32 %v8313_v41, 0.0  ;;  %v17949_v41 = vld [vmem:[#allocation16_spill] sm:$0xff] }
 0xa6b   : > { %v8065_v57 = vpop.f32.mrf.mxu2  ;;  %v8750_v52 = vsel %vm520_vm3, %v17949_v41, %v15964_v47  ;;  %v17952_v47 = vld [vmem:[#allocation125_spill] sm:$0xff] }
 0xa6c   : > { %v8227_v14 = vpop.f32.mrf.mxu3  ;;  %v8119_v18 = vadd.f32 %v8065_v57, %v7960_v60  ;;  %8557 = vrot.lane.b32.xlu2 %v8345_v45, %s10421_s24  ;;  %v17950_v57 = vld [vmem:[#allocation37_spill] sm:$0xff] }
 0xa6e   : > { %v8278_v15 = vadd.f32 %v8224_v4, %v8119_v18  ;;  %v8530_v40 = vpop.permute.xlu0 %8529  ;;  %v7759_v25 = vpop.f32.mrf.mxu0 }
 0xa6f   : > { %v8780_v3 = vsel %vm8773_vm9, %v8747_v44, %v8530_v40  ;;  %v7805_v18 = vadd.f32 %v7759_v25, %v17950_v57  ;;  %v17951_v44 = vld [vmem:[#allocation102_spill] sm:$0xff] }
 0xa70   : > { %v8314_v49 = vadd.f32 %v15835_v6, %v8278_v15  ;;  %v8813_v2 = vsel %vm8806_vm10, %v8780_v3, %v15768_v12  ;;  %v7803_v12 = vadd.f32 %v7753_v27, %v15737_v26  ;;  %v7918_v0 = vpop.f32.mrf.mxu1  ;;  %v8752_v26 = vsel %vm520_vm3, %v17948_v32, %v15967_v42 }
 0xa71   : > { %8846 = vst.msk [vmem:[%s16099_s27 + $0x30] sm:$0xff] %vm8839_vm11, %v8813_v2  ;;  %v7964_v40 = vadd.f32 %v7918_v0, %v7805_v18  ;;  %v17953_v2 = vld [vmem:[#allocation17_spill] sm:$0xff] }
 0xa72   : > { %v8346_v20 = vmax.f32 %v8314_v49, 0.0  ;;  %v7962_v4 = vadd.f32 %v7912_v1, %v7803_v12  ;;  %v7963_v1 = vadd.f32 %v7915_v21, %v7804_v19 }
 0xa73   : > { %v8068_v35 = vpop.f32.mrf.mxu2 }
 0xa74   : > { %v8230_v43 = vpop.f32.mrf.mxu3  ;;  %v8120_v58 = vadd.f32 %v8068_v35, %v7961_v24  ;;  %8559 = vrot.lane.b32.xlu0 %v8346_v20, %s10421_s24 }
 0xa76   : > { %v8279_v48 = vadd.f32 %v8227_v14, %v8120_v58  ;;  %v8532_v39 = vpop.permute.xlu1 %8531  ;;  %v7762_v42 = vpop.f32.mrf.mxu0 }
 0xa77   : > { %v8781_v56 = vsel %vm8773_vm9, %v8748_v7, %v8532_v39  ;;  %v7806_v7 = vadd.f32 %v7762_v42, %v17954_v30  ;;  %v17955_v39 = vld [vmem:[#allocation105_spill] sm:$0xff] }
 0xa78   : > { %v8814_v38 = vsel %vm8806_vm10, %v8781_v56, %v15792_v23  ;;  %v8315_v13 = vadd.f32 %v15835_v6, %v8279_v48  ;;  %v7921_v14 = vpop.f32.mrf.mxu1 }
 0xa79   : > { %8847 = vst.msk [vmem:[%s16099_s27 + $0x38] sm:$0xff] %vm8839_vm11, %v8814_v38  ;;  %v7965_v12 = vadd.f32 %v7921_v14, %v7806_v7 }
 0xa7a   : > { %v8347_v10 = vmax.f32 %v8315_v13, 0.0 }
 0xa7b   : > { %v8071_v37 = vpop.f32.mrf.mxu2 }
 0xa7c   : > { %v8233_v8 = vpop.f32.mrf.mxu3  ;;  %v8121_v36 = vadd.f32 %v8071_v37, %v7962_v4  ;;  %8561 = vrot.lane.b32.xlu1 %v8347_v10, %s10421_s24  ;;  %v17956_v4 = vld [vmem:[#allocation21_spill] sm:$0xff] }
 0xa7d   : > { %v8755_v10 = vsel %vm520_vm3, %v17956_v4, %v15984_v63 }
 0xa7e   : > { %v8280_v34 = vadd.f32 %v8230_v43, %v8121_v36  ;;  %v8751_v43 = vsel %vm520_vm3, %v17953_v2, %v17952_v47  ;;  %v7765_v20 = vpop.f32.mrf.mxu0 }
 0xa7f   : > { %v8540_v23 = vpop.permute.xlu2 %8539 }
 0xa80   : > { %v8785_v62 = vsel %vm8773_vm9, %v8752_v26, %v8540_v23  ;;  %v8316_v27 = vadd.f32 %v15835_v6, %v8280_v34  ;;  %v7924_v35 = vpop.f32.mrf.mxu1  ;;  %v17957_v26 = vld [vmem:[#allocation135_spill] sm:$0xff] }
 0xa81   : > { %v8818_v33 = vsel %vm8806_vm10, %v8785_v62, %v15816_v46  ;;  %v7807_v34 = vadd.f32 %v7765_v20, %v17957_v26  ;;  %v17958_v62 = vld [vmem:[#allocation104_spill] sm:$0xff] }
 0xa82   : > { %8851 = vst.msk [vmem:[%s16099_s27 + $0x58] sm:$0xff] %vm8839_vm11, %v8818_v33  ;;  %v8348_v51 = vmax.f32 %v8316_v27, 0.0 }
 0xa83   : > { %v8074_v29 = vpop.f32.mrf.mxu2  ;;  %v7966_v33 = vadd.f32 %v7924_v35, %v7807_v34  ;;  %v17965_v35 = vld [vmem:[#allocation114_spill] sm:$0xff] }
 0xa84   : > { %v8236_v16 = vpop.f32.mrf.mxu3  ;;  %v8122_v50 = vadd.f32 %v8074_v29, %v7963_v1  ;;  %8563 = vrot.lane.b32.xlu2 %v8348_v51, %s10421_s24  ;;  %v17959_v29 = vld [vmem:[#allocation19_spill] sm:$0xff] }
 0xa86   : > { %v8281_v60 = vadd.f32 %v8233_v8, %v8122_v50  ;;  %v8536_v45 = vpop.permute.xlu0 %8535  ;;  %v7768_v36 = vpop.f32.mrf.mxu0  ;;  %v8753_v50 = vsel %vm520_vm3, %v17959_v29, %v15979_v9  ;;  %v17972_v29 = vld [vmem:[#allocation22_spill] sm:$0xff] }
 0xa87   : > { %v8783_v46 = vsel %vm8773_vm9, %v8750_v52, %v8536_v45  ;;  %v17960_v52 = vld [vmem:[#allocation101_spill] sm:$0xff] }
 0xa88   : > { %v8317_v11 = vadd.f32 %v15835_v6, %v8281_v60  ;;  %v8816_v15 = vsel %vm8806_vm10, %v8783_v46, %v17951_v44  ;;  %v7927_v27 = vpop.f32.mrf.mxu1  ;;  %v7808_v60 = vadd.f32 %v7768_v36, %v17960_v52  ;;  %v17961_v46 = vld [vmem:[#allocation53_spill] sm:$0xff] }
 0xa89   : > { %8849 = vst.msk [vmem:[%s16099_s27 + $0x48] sm:$0xff] %vm8839_vm11, %v8816_v15 }
 0xa8a   : > { %v8349_v3 = vmax.f32 %v8317_v11, 0.0  ;;  %v7967_v11 = vadd.f32 %v7927_v27, %v7808_v60  ;;  %v17973_v60 = vld [vmem:[#allocation43_spill] sm:$0xff] }
 0xa8b   : > { %v8077_v54 = vpop.f32.mrf.mxu2 }
 0xa8c   : > { %v8239_v59 = vpop.f32.mrf.mxu3  ;;  %v8123_v49 = vadd.f32 %v8077_v54, %v7964_v40  ;;  %8565 = vrot.lane.b32.xlu0 %v8349_v3, %s10421_s24  ;;  %v17962_v3 = vld [vmem:[#allocation70_spill] sm:$0xff] }
 0xa8e   : > { %v8282_v21 = vadd.f32 %v8236_v16, %v8123_v49  ;;  %v8538_v24 = vpop.permute.xlu1 %8537  ;;  %v7771_v18 = vpop.f32.mrf.mxu0 }
 0xa8f   : > { %v8784_v58 = vsel %vm8773_vm9, %v8751_v43, %v8538_v24 }
 0xa90   : > { %v8318_v48 = vadd.f32 %v15835_v6, %v8282_v21  ;;  %v8817_v56 = vsel %vm8806_vm10, %v8784_v58, %v17955_v39  ;;  %v7930_v15 = vpop.f32.mrf.mxu1  ;;  %v17964_v21 = vld [vmem:[#allocation137_spill] sm:$0xff] }
 0xa91   : > { %8850 = vst.msk [vmem:[%s16099_s27 + $0x50] sm:$0xff] %vm8839_vm11, %v8817_v56  ;;  %v7809_v24 = vadd.f32 %v7771_v18, %v17964_v21 }
 0xa92   : > { %v8350_v38 = vmax.f32 %v8318_v48, 0.0 }
 0xa93   : > { %v8080_v8 = vpop.f32.mrf.mxu2  ;;  %v7968_v30 = vadd.f32 %v7930_v15, %v7809_v24 }
 0xa94   : > { %v8124_v13 = vadd.f32 %v8080_v8, %v7965_v12  ;;  %8567 = vrot.lane.b32.xlu1 %v8350_v38, %s10421_s24  ;;  %v8242_v25 = vpop.f32.mrf.mxu3  ;;  %v17966_v38 = vld [vmem:[#allocation152_spill] sm:$0xff] }
 0xa95   : > { %v17967_v8 = vld [vmem:[#allocation24_spill] sm:$0xff] }
 0xa96   : > { %v8283_v0 = vadd.f32 %v8239_v59, %v8124_v13  ;;  %v8546_v37 = vpop.permute.xlu2 %8545  ;;  %v17963_v59 = vld [vmem:[#allocation20_spill] sm:$0xff]  ;;  %v7774_v48 = vpop.f32.mrf.mxu0  ;;  %v8758_v13 = vsel %vm520_vm3, %v17967_v8, %v17966_v38 }
 0xa97   : > { %v8788_v32 = vsel %vm8773_vm9, %v8755_v10, %v8546_v37  ;;  %v8754_v54 = vsel %vm520_vm3, %v17963_v59, %v17962_v3  ;;  %v17975_v59 = vld [vmem:[#allocation85_spill] sm:$0xff] }
 0xa98   : > { %v8319_v23 = vadd.f32 %v15835_v6, %v8283_v0  ;;  %v8821_v19 = vsel %vm8806_vm10, %v8788_v32, %v17958_v62  ;;  %v7933_v12 = vpop.f32.mrf.mxu1  ;;  %v17968_v0 = vld [vmem:[#allocation57_spill] sm:$0xff] }
 0xa99   : > { %8854 = vst.msk [vmem:[%s16099_s27 + $0x70] sm:$0xff] %vm8839_vm11, %v8821_v19  ;;  %v7810_v37 = vadd.f32 %v7774_v48, %v17968_v0  ;;  %v17969_v32 = vld [vmem:[#allocation61_spill] sm:$0xff]  ;;  %v17979_v48 = vld [vmem:[#allocation76_spill] sm:$0xff] }
 0xa9a   : > { %v8351_v16 = vmax.f32 %v8319_v23, 0.0  ;;  %v17984_v0 = vld [vmem:[#allocation28_spill] sm:$0xff] }
 0xa9b   : > { %v8083_v1 = vpop.f32.mrf.mxu2  ;;  %v7969_v23 = vadd.f32 %v7933_v12, %v7810_v37  ;;  %v17981_v12 = vld [vmem:[#allocation34_spill] sm:$0xff] }
 0xa9c   : > { %v8125_v63 = vadd.f32 %v8083_v1, %v7966_v33  ;;  %8569 = vrot.lane.b32.xlu2 %v8351_v16, %s10421_s24  ;;  %v8245_v51 = vpop.f32.mrf.mxu3  ;;  %v10351_v16 = vld [vmem:[%s16455_s4] ss:$0 sm:$0xff] }
 0xa9d   : > { %v17970_v1 = vld [vmem:[#allocation81_spill] sm:$0xff] }
 0xa9e   : > { %v8284_v42 = vadd.f32 %v8242_v25, %v8125_v63  ;;  %v8542_v14 = vpop.permute.xlu0 %8541  ;;  %v7777_v33 = vpop.f32.mrf.mxu0  ;;  %v1381_v63 = vadd.f32 %v10351_v16, %v17970_v1 }
 0xa9f   : > { %v8786_v41 = vsel %vm8773_vm9, %v8753_v50, %v8542_v14 }
 0xaa0   : > { %v8320_v45 = vadd.f32 %v15835_v6, %v8284_v42  ;;  %v8819_v57 = vsel %vm8806_vm10, %v8786_v41, %v17961_v46  ;;  %v7936_v41 = vpop.f32.mrf.mxu1 }
 0xaa1   : > { %8852 = vst.msk [vmem:[%s16099_s27 + $0x60] sm:$0xff] %vm8839_vm11, %v8819_v57  ;;  %v17974_v57 = vld [vmem:[#allocation109_spill] sm:$0xff] }
 0xaa2   : > { %v8352_v44 = vmax.f32 %v8320_v45, 0.0  ;;  %v7811_v45 = vadd.f32 %v7777_v33, %v17973_v60 }
 0xaa3   : > { %v8086_v40 = vpop.f32.mrf.mxu2 }
 0xaa4   : > { %v8126_v9 = vadd.f32 %v8086_v40, %v7967_v11  ;;  %8571 = vrot.lane.b32.xlu0 %v8352_v44, %s10421_s24  ;;  %v8248_v43 = vpop.f32.mrf.mxu3  ;;  %v1416_v11 = vmax.f32 %v1381_v63, 0.0  ;;  %v7970_v44 = vadd.f32 %v7936_v41, %v7811_v45  ;;  %v17989_v63 = vld [vmem:[#allocation47_spill] sm:$0xff]  ;;  %v17991_v41 = vld [vmem:[#allocation38_spill] sm:$0xff] }
 0xaa6   : > { %v8285_v49 = vadd.f32 %v8245_v51, %v8126_v9  ;;  %v8544_v47 = vpop.permute.xlu1 %8543  ;;  %v17971_v51 = vld [vmem:[#allocation115_spill] sm:$0xff] }
 0xaa7   : > { %v8787_v2 = vsel %vm8773_vm9, %v8754_v54, %v8544_v47  ;;  %v8756_v50 = vsel %vm520_vm3, %v17972_v29, %v17971_v51  ;;  %v1384_v54 = vadd.f32 %v10351_v16, %v17975_v59  ;;  %v17977_v47 = vld [vmem:[#allocation23_spill] sm:$0xff]  ;;  %v8764_v51 = vsel %vm520_vm3, %v17989_v63, %v16043_v17 }
 0xaa8   : > { %v8321_v20 = vadd.f32 %v15835_v6, %v8285_v49  ;;  %v8820_v58 = vsel %vm8806_vm10, %v8787_v2, %v17965_v35  ;;  %v17976_v49 = vld [vmem:[#allocation151_spill] sm:$0xff]  ;;  %v17978_v35 = vld [vmem:[#allocation108_spill] sm:$0xff] }
 0xaa9   : > { %8853 = vst.msk [vmem:[%s16099_s27 + $0x68] sm:$0xff] %vm8839_vm11, %v8820_v58  ;;  %v8757_v2 = vsel %vm520_vm3, %v17977_v47, %v17976_v49  ;;  %v17993_v17 = vld [vmem:[#allocation119_spill] sm:$0xff] }
 0xaaa   : > { %v8353_v7 = vmax.f32 %v8321_v20, 0.0  ;;  %v17997_v49 = vld [vmem:[#allocation51_spill] sm:$0xff] }
 0xaab   : > { %v8089_v39 = vpop.f32.mrf.mxu2 }
 0xaac   : > { %v8127_v56 = vadd.f32 %v8089_v39, %v7968_v30  ;;  %8573 = vrot.lane.b32.xlu1 %v8353_v7, %s10421_s24  ;;  %v8251_v34 = vpop.f32.mrf.mxu3  ;;  %v1417_v30 = vmax.f32 %v1384_v54, 0.0  ;;  %v1378_v39 = vadd.f32 %v10351_v16, %v17979_v48  ;;  %v17988_v16 = vld [vmem:[#allocation112_spill] sm:$0xff] }
 0xaae   : > { %v8286_v25 = vadd.f32 %v8248_v43, %v8127_v56  ;;  %v8552_v4 = vpop.permute.xlu2 %8551  ;;  %v17980_v56 = vld [vmem:[#allocation67_spill] sm:$0xff] }
 0xaaf   : > { %v8791_v10 = vsel %vm8773_vm9, %v8758_v13, %v8552_v4  ;;  %v8761_v38 = vsel %vm520_vm3, %v17981_v12, %v17980_v56  ;;  %v17982_v13 = vld [vmem:[#allocation65_spill] sm:$0xff]  ;;  %v1415_v4 = vmax.f32 %v1378_v39, 0.0  ;;  %v18002_v39 = vld [vmem:[#allocation126_spill] sm:$0xff] }
 0xab0   : > { %v8322_v36 = vadd.f32 %v15835_v6, %v8286_v25  ;;  %v8824_v26 = vsel %vm8806_vm10, %v8791_v10, %v17969_v32  ;;  %v17983_v10 = vld [vmem:[#allocation149_spill] sm:$0xff] }
 0xab1   : > { %8857 = vst.msk [vmem:[%s16099_s27 + $0x88] sm:$0xff] %vm8839_vm11, %v8824_v26  ;;  %v8759_v37 = vsel %vm520_vm3, %v17984_v0, %v17983_v10  ;;  %v17985_v26 = vld [vmem:[#allocation148_spill] sm:$0xff] }
 0xab2   : > { %v8354_v62 = vmax.f32 %v8322_v36, 0.0 }
 0xab3   : > { %v8092_v19 = vpop.f32.mrf.mxu2 }
 0xab4   : > { %v8128_v27 = vadd.f32 %v8092_v19, %v7969_v23  ;;  %8575 = vrot.lane.b32.xlu2 %v8354_v62, %s10421_s24  ;;  %v8254_v9 = vpop.f32.mrf.mxu3  ;;  %v17986_v23 = vld [vmem:[#allocation117_spill] sm:$0xff]  ;;  %v17987_v62 = vld [vmem:[#allocation32_spill] sm:$0xff] }
 0xab5   : > { %v8760_v19 = vsel %vm520_vm3, %v17987_v62, %v17986_v23 }
 0xab6   : > { %v8287_v42 = vadd.f32 %v8251_v34, %v8128_v27  ;;  %v8548_v14 = vpop.permute.xlu0 %8547 }
 0xab7   : > { %v8789_v52 = vsel %vm8773_vm9, %v8756_v50, %v8548_v14 }
 0xab8   : > { %v8323_v46 = vadd.f32 %v15835_v6, %v8287_v42  ;;  %v8822_v18 = vsel %vm8806_vm10, %v8789_v52, %v17974_v57  ;;  %v17990_v42 = vld [vmem:[#allocation111_spill] sm:$0xff]  ;;  %v8762_v52 = vsel %vm520_vm3, %v17991_v41, %v16040_v61  ;;  %v17996_v61 = vld [vmem:[#allocation58_spill] sm:$0xff] }
 0xab9   : > { %8855 = vst.msk [vmem:[%s16099_s27 + $0x78] sm:$0xff] %vm8839_vm11, %v8822_v18  ;;  %v17994_v18 = vld [vmem:[#allocation42_spill] sm:$0xff] }
 0xaba   : > { %v8355_v15 = vmax.f32 %v8323_v46, 0.0  ;;  %v17992_v46 = vld [vmem:[#allocation147_spill] sm:$0xff] }
 0xabb   : > { %v8095_v40 = vpop.f32.mrf.mxu2 }
 0xabc   : > { %v8129_v3 = vadd.f32 %v8095_v40, %v7970_v44  ;;  %8577 = vrot.lane.b32.xlu0 %v8355_v15, %s10421_s24  ;;  %8705 = vrot.lane.b32.xlu2 %v1416_v11, %s10419_s26  ;;  %v8763_v11 = vsel %vm520_vm3, %v17994_v18, %v17993_v17  ;;  %v17995_v40 = vld [vmem:[#allocation45_spill] sm:$0xff] }
 0xabe   : > { %v8288_v43 = vadd.f32 %v8254_v9, %v8129_v3  ;;  %v8550_v21 = vpop.permute.xlu1 %8549  ;;  %v8767_v3 = vsel %vm520_vm3, %v17996_v61, %v16066_v53  ;;  %v18000_v53 = vld [vmem:[#allocation120_spill] sm:$0xff] }
 0xabf   : > { %v8790_v24 = vsel %vm8773_vm9, %v8757_v2, %v8550_v21  ;;  %v17998_v2 = vld [vmem:[#allocation50_spill] sm:$0xff] }
 0xac0   : > { %v8324_v20 = vadd.f32 %v15835_v6, %v8288_v43  ;;  %v8823_v58 = vsel %vm8806_vm10, %v8790_v24, %v17978_v35  ;;  %v8765_v43 = vsel %vm520_vm3, %v17998_v2, %v16062_v28  ;;  %v18003_v28 = vld [vmem:[#allocation62_spill] sm:$0xff] }
 0xac1   : > { %8856 = vst.msk [vmem:[%s16099_s27 + $0x80] sm:$0xff] %vm8839_vm11, %v8823_v58  ;;  %v18001_v58 = vld [vmem:[#allocation55_spill] sm:$0xff]  ;;  %v8768_v12 = vsel %vm520_vm3, %v18003_v28, %v16082_v55 }
 0xac2   : > { %v8356_v7 = vmax.f32 %v8324_v20, 0.0  ;;  %v17999_v20 = vld [vmem:[#allocation121_spill] sm:$0xff] }
 0xac4   : > { %8579 = vrot.lane.b32.xlu1 %v8356_v7, %s10421_s24  ;;  %8707 = vrot.lane.b32.xlu0 %v1417_v30, %s10419_s26  ;;  %v8766_v30 = vsel %vm520_vm3, %v18001_v58, %v18000_v53 }
 0xac6   : > { %v8558_v6 = vpop.permute.xlu2 %8557 }
 0xac7   : > { %v8794_v8 = vsel %vm8773_vm9, %v8761_v38, %v8558_v6 }
 0xac8   : > { %v8827_v25 = vsel %vm8806_vm10, %v8794_v8, %v17982_v13  ;;  %v18004_v8 = vld [vmem:[#allocation128_spill] sm:$0xff] }
 0xac9   : > { %8860 = vst.msk [vmem:[%s16099_s27 + $0xa0] sm:$0xff] %vm8839_vm11, %v8827_v25  ;;  %v18005_v25 = vld [vmem:[#allocation118_spill] sm:$0xff] }
 0xacc   : > { %8703 = vrot.lane.b32.xlu1 %v1415_v4, %s10419_s26  ;;  %v18006_v4 = vld [vmem:[#allocation66_spill] sm:$0xff]  ;;  %s10181_s26 = sshll.u32 %s10495_s13, 8  ;;  %s8885_s13 = sshll.u32 %s16099_s27, 4  ;;  %s8886_s13 = int_to_ptr.vmem [resolvable:$true] %s8885_s13 }
 0xacd   : > { %v8769_v10 = vsel %vm520_vm3, %v18006_v4, %v18005_v25  ;;  %s8884_s22 = scalar_lea.hbm %s16460_s9, %s10181_s26  ;;  %s10372_s26 = scalar_lea.hbm %s16460_s9, 512 }
 0xace   : > { %v8554_v36 = vpop.permute.xlu0 %8553  ;;  %s8887_s29 = sshll.u32 %s8884_s22, 4  ;;  %s8888_s29 = int_to_ptr.hbm [resolvable:$true] %s8887_s29 }
 0xacf   : > { %v8792_v32 = vsel %vm8773_vm9, %v8759_v37, %v8554_v36  ;;  %v18007_v36 = vld [vmem:[#allocation116_spill] sm:$0xff]  ;;  %s10366_s24 = sshra.s32 %s8888_s29, 4  ;;  %s10367_s24 = int_to_ptr.hbm [resolvable:$true] %s10366_s24 }
 0xad0   : > { %v8825_v34 = vsel %vm8806_vm10, %v8792_v32, %v17985_v26  ;;  %v18008_v26 = vld [vmem:[#allocation74_spill] sm:$0xff]  ;;  %s10368_s25 = scalar_lea.hbm %s10367_s24, 256  ;;  %p10373_p0 = scmp.lt.s32.totalorder %s10367_s24, %s16460_s9 }
 0xad1   : > { %8858 = vst.msk [vmem:[%s16099_s27 + $0x90] sm:$0xff] %vm8839_vm11, %v8825_v34  ;;  %v8771_v34 = vsel %vm520_vm3, %v18008_v26, %v16105_v5  ;;  %p10369_p11 = scmp.ne.s32.totalorder %s10367_s24, %s10368_s25  ;;  %p10374_p1 = scmp.lt.s32.totalorder %s10372_s26, %s10368_s25 }
 0xad3   : > { %p10370_p12 = pnand %p10369_p11, %p10512_p5  ;;  %p10375_p2 = por %p10374_p1, %p10373_p0 }
 0xad5   : > { %p10371_p13 = pneg %p10370_p12 }
 0xad6   : > { %v8556_v27 = vpop.permute.xlu1 %8555 }
 0xad7   : > { %v8793_v33 = vsel %vm8773_vm9, %v8760_v19, %v8556_v27  ;;  %p10376_p3 = pnand %p10375_p2, %p10371_p13 }
 0xad8   : > { %v8826_v1 = vsel %vm8806_vm10, %v8793_v33, %v17988_v16  ;;  %v18009_v33 = vld [vmem:[#allocation79_spill] sm:$0xff] }
 0xad9   : > { %8859 = vst.msk [vmem:[%s16099_s27 + $0x98] sm:$0xff] %vm8839_vm11, %v8826_v1  ;;  %v8772_v16 = vsel %vm520_vm3, %v18009_v33, %v16068_v22 }
 0xade   : > { %v8564_v29 = vpop.permute.xlu2 %8563 }
 0xadf   : > { %v8797_v50 = vsel %vm8773_vm9, %v8764_v51, %v8564_v29  ;;  %v18010_v29 = vld [vmem:[#allocation71_spill] sm:$0xff] }
 0xae0   : > { %v8830_v14 = vsel %vm8806_vm10, %v8797_v50, %v17990_v42  ;;  %v8770_v22 = vsel %vm520_vm3, %v18010_v29, %v16090_v31 }
 0xae1   : > { %8863 = vst.msk [vmem:[%s16099_s27 + $0xb8] sm:$0xff] %vm8839_vm11, %v8830_v14 }
 0xae6   : > { %v8560_v60 = vpop.permute.xlu0 %8559 }
 0xae7   : > { %v8795_v45 = vsel %vm8773_vm9, %v8762_v52, %v8560_v60 }
 0xae8   : > { %v8828_v57 = vsel %vm8806_vm10, %v8795_v45, %v17992_v46 }
 0xae9   : > { %8861 = vst.msk [vmem:[%s16099_s27 + $0xa8] sm:$0xff] %vm8839_vm11, %v8828_v57 }
 0xaee   : > { %v8562_v44 = vpop.permute.xlu1 %8561 }
 0xaef   : > { %v8796_v15 = vsel %vm8773_vm9, %v8763_v11, %v8562_v44 }
 0xaf0   : > { %v8829_v9 = vsel %vm8806_vm10, %v8796_v15, %v17995_v40 }
 0xaf1   : > { %8862 = vst.msk [vmem:[%s16099_s27 + $0xb0] sm:$0xff] %vm8839_vm11, %v8829_v9 }
 0xaf6   : > { %v8570_v59 = vpop.permute.xlu2 %8569 }
 0xaf7   : > { %v8800_v54 = vsel %vm8773_vm9, %v8767_v3, %v8570_v59 }
 0xaf8   : > { %v8833_v47 = vsel %vm8806_vm10, %v8800_v54, %v17997_v49 }
 0xaf9   : > { %8866 = vst.msk [vmem:[%s16099_s27 + $0xd0] sm:$0xff] %vm8839_vm11, %v8833_v47 }
 0xafe   : > { %v8566_v21 = vpop.permute.xlu0 %8565 }
 0xaff   : > { %v8798_v24 = vsel %vm8773_vm9, %v8765_v43, %v8566_v21 }
 0xb00   : > { %v8831_v35 = vsel %vm8806_vm10, %v8798_v24, %v17999_v20 }
 0xb01   : > { %8864 = vst.msk [vmem:[%s16099_s27 + $0xc0] sm:$0xff] %vm8839_vm11, %v8831_v35 }
 0xb06   : > { %v8568_v7 = vpop.permute.xlu1 %8567 }
 0xb07   : > { %v8799_v48 = vsel %vm8773_vm9, %v8766_v30, %v8568_v7 }
 0xb08   : > { %v8832_v56 = vsel %vm8806_vm10, %v8799_v48, %v18002_v39 }
 0xb09   : > { %8865 = vst.msk [vmem:[%s16099_s27 + $0xc8] sm:$0xff] %vm8839_vm11, %v8832_v56 }
 0xb0e   : > { %v8576_v32 = vpop.permute.xlu2 %8575 }
 0xb0f   : > { %v8803_v50 = vsel %vm8773_vm9, %v8770_v22, %v8576_v32 }
 0xb16   : > { %v8572_v38 = vpop.permute.xlu0 %8571  ;;  %v8706_v62 = vpop.permute.xlu2 %8705 }
 0xb17   : > { %v8801_v6 = vsel %vm8773_vm9, %v8768_v12, %v8572_v38 }
 0xb18   : > { %v8834_v13 = vsel %vm8806_vm10, %v8801_v6, %v18004_v8 }
 0xb19   : > { %8867 = vst.msk [vmem:[%s16099_s27 + $0xd8] sm:$0xff] %vm8839_vm11, %v8834_v13 }
 0xb1e   : > { %v8574_v0 = vpop.permute.xlu1 %8573 }
 0xb1f   : > { %v8802_v37 = vsel %vm8773_vm9, %v8769_v10, %v8574_v0 }
 0xb20   : > { %v8835_v55 = vsel %vm8806_vm10, %v8802_v37, %v18007_v36 }
 0xb21   : > { %8868 = vst.msk [vmem:[%s16099_s27 + $0xe0] sm:$0xff] %vm8839_vm11, %v8835_v55 }
 0xb2e   : > { %v8578_v23 = vpop.permute.xlu0 %8577 }
 0xb2f   : > { %v8804_v19 = vsel %vm8773_vm9, %v8771_v34, %v8578_v23 }
 0xb30   : > { %v8837_v27 = vsel %vm8806_vm10, %v8804_v19, %v8706_v62 }
 0xb31   : > { %8870 = vst.msk [vmem:[%s16099_s27 + $0xf0] sm:$0xff] %vm8839_vm11, %v8837_v27 }
 0xb36   : > { %v8580_v1 = vpop.permute.xlu1 %8579  ;;  %v8708_v63 = vpop.permute.xlu0 %8707 }
 0xb37   : > { %v8805_v51 = vsel %vm8773_vm9, %v8772_v16, %v8580_v1 }
 0xb38   : > { %v8838_v5 = vsel %vm8806_vm10, %v8805_v51, %v8708_v63 }
 0xb39   : > { %8871 = vst.msk [vmem:[%s16099_s27 + $0xf8] sm:$0xff] %vm8839_vm11, %v8838_v5 }
 0xb3e   : > { %v8704_v42 = vpop.permute.xlu1 %8703 }
 0xb3f   : > { %v8836_v14 = vsel %vm8806_vm10, %v8803_v50, %v8704_v42 }
 0xb40   : > { %8869 = vst.msk [vmem:[%s16099_s27 + $0xe8] sm:$0xff] %vm8839_vm11, %v8836_v14 }
 0xb41   : > { %10379 = shalt.err (!%p10376_p3)
}
 0xb42   : > { %s10422_s17 = smov 128   ;;  %s10423_s27 = smov 8  }
 0xb43   : > { %10183 = dma.vmem_to_hbm [thread:$0]  (%p10512_p5), %s8886_s13, 4096, %s8888_s29, %s8873_s23, %s10422_s17, %s10422_s17, %s10423_s27  }
 0xb44 PF: > { %p10189_p4 = scmp.ge.s32.totalorder %s10414_s12, 2  ;;  %s8902_s22 = sand.u32 1, %s10402_s30  }
 0xb45   : > { %s8903_s28 = scalar_lea.sflag [#allocation5], %s8902_s22 }
 0xb46   : > { %p10186_p7 = pnand %p10189_p4, %p10516_p6 }
 0xb48   : > { %p10187_p8 = pneg %p10186_p7 }
 0xb4a   : > { %10397 = dma.done.wait (%p10187_p8), %s8903_s28, 4096  }
 0xb4b   : > { %10399 = vsyncadd (%p10187_p8), %s8903_s28, 4294963200  ;;  %p19_p9 = scmp.ge.s32.totalorder %s10499_s15, 4   ;;  %s18011_s30 = smov %s10406_s10 }
 0xb4c   : > { %s18012_s10 = smov %s10410_s11  ;;  %s18013_s11 = smov %s10510_s18 }
 0xb4d   : > { %s18014_s12 = smov %s10499_s15  ;;  %21 = sbr.rel (!%p19_p9) target bundleno = 3 (0x3), region = 125 }
 0xb52   :  { %8909 = vsyncpa [#allocation5], 1 }
 0xb53   :  { %8911 = vsyncpa [#allocation5 + $0x1], 1 }

</bundles_post_ra>
